<compile_context>
chip_gen: v7x
topology: tpu7x:2x2x1
jax: 0.10.0
libtpu: 0.0.40
codegen_flags: <defaults>
</compile_context>

<pallas_src>
import functools

import jax
import jax.numpy as jnp
from jax import lax
from jax.experimental import pallas as pl
from jax.experimental.pallas import tpu as pltpu

MAX_CHAR_LEN = 15
CNN_K = 5  # char-CNN kernel height (padding=2)


# ---------------------------------------------------------------------------
# Fused forward kernel
# ---------------------------------------------------------------------------

def _fused_forward_kernel(
    # activations / ids (time-major (T*B, ...) slabs)
    word_ref,       # (TB, E)          f32
    charpad_ref,    # (TB, Lc+4, Cc)   f32  zero-padded char embeddings
    keyvalid_ref,   # (1, TB)          i32  key-padding mask row
    # char CNN (per-tap weights)
    cnnw_ref,       # (5, Cc, Cc)      bf16
    cnnb_ref,       # (1, Cc)          f32
    # BiLSTM (interleaved gate layout [i_f|i_b|f_f|f_b|g_f|g_b|o_f|o_b])
    wih_ref,        # (Din, 8H)        bf16 fused fwd/bwd input projection
    b_ref,          # (1, 8H)          f32
    whhbd_ref,      # (2H, 8H)         bf16 block-diagonal recurrent weight
    # self-attention
    wqkv_ref,       # (D, 3D)          bf16
    # S4-like SSM (convolutional form)
    kf_ref,         # (T, D)           f32
    kb_ref,         # (T, D)           f32
    d_ref,          # (1, D)           f32
    wout_ref,       # (D, 2D)          bf16
    bout_ref,       # (1, 2D)          f32
    # second LSTM
    lwih_ref,       # (D, 4D)          bf16
    lwhh_ref,       # (D, 4D)          bf16
    lb_ref,         # (1, 4D)          f32
    # classifier (lane-padded to a multiple of 128)
    fcw_ref,        # (D, Lpad)        bf16
    fcb_ref,        # (1, Lpad)        f32 (-1e30 on padded labels)
    # output
    pred_ref,       # (TB, 1)          i32
    # scratch
    xproj_ref,      # (TB, 8H)         f32
    hf_ref,         # (TB, H)          f32
    hb_ref,         # (TB, H)          f32
    xproj2_ref,     # (TB, 4D)         f32
    hseq_ref,       # (TB, D)          f32
    *, B, T,
):
    TB = word_ref.shape[0]
    _, Lp, Cc = charpad_ref.shape
    L = Lp - (CNN_K - 1)
    H = whhbd_ref.shape[0] // 2
    D = 2 * H
    unroll = min(T, 8)

    # ---- 1) char CNN: tap-wise accumulated matmuls + max-pool + bias --------
    xp = charpad_ref[...]
    acc = jnp.zeros((TB * L, Cc), jnp.float32)
    for kh in range(CNN_K):                       # 5 static taps
        tap = xp[:, kh:kh + L, :].reshape(TB * L, Cc).astype(jnp.bfloat16)
        acc = acc + jnp.dot(tap, cnnw_ref[kh], preferred_element_type=jnp.float32)
    # conv bias is constant over the pooled axis -> add it after the max
    char_feat = jnp.max(acc.reshape(TB, L, Cc), axis=1) + cnnb_ref[...]
    emb = jnp.concatenate([word_ref[...], char_feat], axis=-1)        # (TB, Din)

    # ---- 2) BiLSTM: hoisted fused input projection + fused fwd/bwd step -----
    xproj_ref[...] = (jnp.dot(emb.astype(jnp.bfloat16), wih_ref[...],
                              preferred_element_type=jnp.float32) + b_ref[...])
    whh_bd = whhbd_ref[...]                       # loaded once, outside the loop
    col = lax.broadcasted_iota(jnp.int32, (B, 8 * H), 1)
    fwd_cols = (col % (2 * H)) < H                # hoisted direction column mask

    def bilstm_body(s, carry):
        h_cat, c_cat = carry                      # (B, 2H): [fwd | bwd]
        tb = T - 1 - s
        gx = jnp.where(fwd_cols,
                       xproj_ref[pl.ds(s * B, B), :],
                       xproj_ref[pl.ds(tb * B, B), :])
        gsum = gx + jnp.dot(h_cat.astype(jnp.bfloat16), whh_bd,
                            preferred_element_type=jnp.float32)       # (B, 8H)
        sig = jax.nn.sigmoid(gsum)                # one wide EUP pass (i, f, o)
        th = jnp.tanh(gsum)                       # one wide EUP pass (g)
        i = sig[:, 0:2 * H]
        f = sig[:, 2 * H:4 * H]
        g = th[:, 4 * H:6 * H]
        o = sig[:, 6 * H:8 * H]
        c_cat = f * c_cat + i * g
        h_cat = o * jnp.tanh(c_cat)
        hf_ref[pl.ds(s * B, B), :] = h_cat[:, 0:H]
        hb_ref[pl.ds(tb * B, B), :] = h_cat[:, H:2 * H]
        return h_cat, c_cat

    z2 = jnp.zeros((B, 2 * H), jnp.float32)
    lax.fori_loop(0, T, bilstm_body, (z2, z2), unroll=unroll)
    bilstm_out = jnp.concatenate([hf_ref[...], hb_ref[...]], axis=-1)  # (TB, D)

    # ---- 3) self-attention (mask rebuilt in-kernel, finite -1e30 masking) ---
    xb = bilstm_out.astype(jnp.bfloat16)
    qkv = jnp.dot(xb, wqkv_ref[...], preferred_element_type=jnp.float32)
    q = qkv[:, 0:D].astype(jnp.bfloat16)
    k = qkv[:, D:2 * D].astype(jnp.bfloat16)
    v = qkv[:, 2 * D:3 * D].astype(jnp.bfloat16)
    scores = jnp.einsum('td,sd->ts', q, k,
                        preferred_element_type=jnp.float32) * (1.0 / D ** 0.5)
    rows = lax.broadcasted_iota(jnp.int32, (TB, TB), 0)
    cols2 = lax.broadcasted_iota(jnp.int32, (TB, TB), 1)
    # time-major flatten: row r <-> (t=r//B, b=r%B); same-batch AND key-not-pad
    mask = ((rows % B) == (cols2 % B)) & (keyvalid_ref[...] != 0)
    scores = jnp.where(mask, scores, jnp.float32(-1e30))
    m = jnp.max(scores, axis=-1, keepdims=True)
    e = jnp.exp(scores - m)
    attn = e * pl.reciprocal(jnp.sum(e, axis=-1, keepdims=True), approx=True)
    ctx = jnp.dot(attn.astype(jnp.bfloat16), v,
                  preferred_element_type=jnp.float32)                  # (TB, D)
    # TODO(synk): at production sizes use per-batch (B, T, T) attention tiles
    #   instead of the flattened (TB, TB) form.

    # ---- 4) S4-style bidirectional SSM, parallel convolutional form ---------
    # TODO(synk): real S4Block uses the NPLR kernel; approximated by a diagonal
    #   SSM whose conv kernels K[j] = sum_n C_n A_n^j B_n come in precomputed.
    # TODO(synk): at production T replace this O(T^2) shift-sum with an
    #   associative scan / FFT convolution.
    kf = kf_ref[...]
    kb = kb_ref[...]
    y_ssm = (kf[0:1, :] + kb[0:1, :]) * ctx
    for j in range(1, T):                         # static, fully parallel terms
        r = j * B
        zpad = jnp.zeros((r, D), jnp.float32)
        x_dn = jnp.concatenate([zpad, ctx[:TB - r, :]], axis=0)        # x[t-j]
        x_up = jnp.concatenate([ctx[r:, :], zpad], axis=0)             # x[t+j]
        y_ssm = y_ssm + kf[j:j + 1, :] * x_dn + kb[j:j + 1, :] * x_up
    y = y_ssm + ctx * d_ref[...]
    y = jax.nn.gelu(y, approximate=True)
    zlin = (jnp.dot(y.astype(jnp.bfloat16), wout_ref[...],
                    preferred_element_type=jnp.float32) + bout_ref[...])
    glu = zlin[:, 0:D] * jax.nn.sigmoid(zlin[:, D:2 * D])              # (TB, D)

    # ---- 5) second LSTM: hoisted input projection + recurrence --------------
    xproj2_ref[...] = (jnp.dot(glu.astype(jnp.bfloat16), lwih_ref[...],
                               preferred_element_type=jnp.float32) + lb_ref[...])
    lwhh = lwhh_ref[...]

    def lstm_body(s, carry):
        h, c = carry                              # (B, D) f32
        gsum = xproj2_ref[pl.ds(s * B, B), :] + jnp.dot(
            h.astype(jnp.bfloat16), lwhh, preferred_element_type=jnp.float32)
        sig = jax.nn.sigmoid(gsum)
        th = jnp.tanh(gsum)
        i = sig[:, 0:D]
        f = sig[:, D:2 * D]
        g = th[:, 2 * D:3 * D]
        o = sig[:, 3 * D:4 * D]
        c = f * c + i * g
        h = o * jnp.tanh(c)
        hseq_ref[pl.ds(s * B, B), :] = h
        return h, c

    zD = jnp.zeros((B, D), jnp.float32)
    lax.fori_loop(0, T, lstm_body, (zD, zD), unroll=unroll)

    # ---- 6) lane-padded classifier + argmax epilogue -------------------------
    Lpad = fcw_ref.shape[1]
    logits = (jnp.dot(hseq_ref[...].astype(jnp.bfloat16), fcw_ref[...],
                      preferred_element_type=jnp.float32) + fcb_ref[...])
    maxv = jnp.max(logits, axis=-1, keepdims=True)
    lane = lax.broadcasted_iota(jnp.int32, logits.shape, 1)
    pred = jnp.min(jnp.where(logits == maxv, lane, jnp.int32(Lpad)),
                   axis=-1, keepdims=True)
    pred_ref[...] = pred.astype(jnp.int32)


# ---------------------------------------------------------------------------
# Parameters (deterministic synthetic init, PyTorch shape conventions)
# ---------------------------------------------------------------------------

def init_params(key, emb_size, hidden_size, word_num, label_num,
                char_vocab_size, char_emb_dim, n_state=4):
    ks = jax.random.split(key, 32)

    def nrm(k, shape, scale=0.1):
        return (scale * jax.random.normal(k, shape)).astype(jnp.float32)

    H = hidden_size
    D = 2 * H
    din = emb_size + char_emb_dim
    p = {}
    p['word_emb'] = nrm(ks[0], (word_num, emb_size))
    p['char_emb'] = nrm(ks[1], (char_vocab_size, char_emb_dim))
    p['cnn_w'] = nrm(ks[2], (char_emb_dim, 1, CNN_K, char_emb_dim))
    p['cnn_b'] = nrm(ks[3], (char_emb_dim,))
    # BiLSTM (PyTorch: weight_ih (4H, din), weight_hh (4H, H), gate order ifgo)
    p['bilstm_wih_f'] = nrm(ks[4], (4 * H, din))
    p['bilstm_whh_f'] = nrm(ks[5], (4 * H, H))
    p['bilstm_b_f'] = nrm(ks[6], (4 * H,))
    p['bilstm_wih_b'] = nrm(ks[7], (4 * H, din))
    p['bilstm_whh_b'] = nrm(ks[8], (4 * H, H))
    p['bilstm_b_b'] = nrm(ks[9], (4 * H,))
    # Self-attention (bias-free Linears, torch weight shape (out, in))
    p['att_wq'] = nrm(ks[10], (D, D))
    p['att_wk'] = nrm(ks[11], (D, D))
    p['att_wv'] = nrm(ks[12], (D, D))
    # S4-like bidirectional diagonal SSM
    p['s4_A_f'] = (0.5 + 0.45 * jax.nn.sigmoid(jax.random.normal(ks[13], (n_state, D)))).astype(jnp.float32)
    p['s4_B_f'] = nrm(ks[14], (n_state, D), 0.5)
    p['s4_C_f'] = nrm(ks[15], (n_state, D), 0.5)
    p['s4_A_b'] = (0.5 + 0.45 * jax.nn.sigmoid(jax.random.normal(ks[16], (n_state, D)))).astype(jnp.float32)
    p['s4_B_b'] = nrm(ks[17], (n_state, D), 0.5)
    p['s4_C_b'] = nrm(ks[18], (n_state, D), 0.5)
    p['s4_D'] = nrm(ks[19], (D,), 1.0)
    p['s4_wout'] = nrm(ks[20], (2 * D, D))
    p['s4_bout'] = nrm(ks[21], (2 * D,))
    # Second LSTM (D -> D)
    p['lstm_wih'] = nrm(ks[22], (4 * D, D))
    p['lstm_whh'] = nrm(ks[23], (4 * D, D))
    p['lstm_b'] = nrm(ks[24], (4 * D,))
    # Final classifier
    p['fc_w'] = nrm(ks[25], (label_num, D))
    p['fc_b'] = nrm(ks[26], (label_num,))
    return p


def prepare_params(p):
    """One-time conversion to kernel-ready layouts: pre-transposed, per-tap,
    direction-fused (interleaved gates + block-diag whh), lane-padded, bf16
    matmul weights; f32 biases reshaped to (1, n)."""
    H = p['bilstm_whh_f'].shape[1]
    D = 2 * H
    Cc = p['char_emb'].shape[1]
    label_num = p['fc_w'].shape[0]
    Lpad = max(128, ((label_num + 127) // 128) * 128)
    bf16 = jnp.bfloat16

    def interleave_cols(wf_t, wb_t):
        # (X, 4H) fwd & bwd -> (X, 8H) columns [i_f|i_b|f_f|f_b|g_f|g_b|o_f|o_b]
        X = wf_t.shape[0]
        return jnp.concatenate(
            [wf_t.reshape(X, 4, 1, H), wb_t.reshape(X, 4, 1, H)], axis=2
        ).reshape(X, 8 * H)

    whh_f_t = p['bilstm_whh_f'].T                 # (H, 4H)
    whh_b_t = p['bilstm_whh_b'].T
    zeros_h = jnp.zeros_like(whh_f_t)
    whh_bd = jnp.concatenate(
        [interleave_cols(whh_f_t, zeros_h),       # h_f rows drive fwd gate cols
         interleave_cols(zeros_h, whh_b_t)],      # h_b rows drive bwd gate cols
        axis=0)                                   # (2H, 8H)

    # TODO(synk): when porting real torch weights pass b_ih + b_hh here
    #   (PyTorch LSTMs carry two bias vectors per direction).
    b_cat = interleave_cols(p['bilstm_b_f'].reshape(1, 4 * H),
                            p['bilstm_b_b'].reshape(1, 4 * H))

    fc_w = jnp.zeros((D, Lpad), jnp.float32).at[:, :label_num].set(p['fc_w'].T)
    fc_b = jnp.full((1, Lpad), -1e30, jnp.float32).at[0, :label_num].set(p['fc_b'])

    return {
        'word_emb': p['word_emb'],
        'char_emb': p['char_emb'],
        'cnn_w': jnp.transpose(p['cnn_w'][:, 0], (1, 2, 0)).astype(bf16),  # (5, Cc, Cc)
        'cnn_b': p['cnn_b'].reshape(1, Cc),
        'bilstm_wih': interleave_cols(p['bilstm_wih_f'].T,
                                      p['bilstm_wih_b'].T).astype(bf16),   # (Din, 8H)
        'bilstm_b': b_cat,                                                 # (1, 8H)
        'bilstm_whh_bd': whh_bd.astype(bf16),                              # (2H, 8H)
        'att_wqkv': jnp.concatenate([p['att_wq'].T, p['att_wk'].T,
                                     p['att_wv'].T], axis=1).astype(bf16), # (D, 3D)
        's4_A_f': p['s4_A_f'], 's4_B_f': p['s4_B_f'], 's4_C_f': p['s4_C_f'],
        's4_A_b': p['s4_A_b'], 's4_B_b': p['s4_B_b'], 's4_C_b': p['s4_C_b'],
        's4_D': p['s4_D'].reshape(1, D),
        's4_wout': p['s4_wout'].T.astype(bf16),
        's4_bout': p['s4_bout'].reshape(1, 2 * D),
        'lstm_wih': p['lstm_wih'].T.astype(bf16),
        'lstm_whh': p['lstm_whh'].T.astype(bf16),
        'lstm_b': p['lstm_b'].reshape(1, 4 * D),
        'fc_w': fc_w.astype(bf16),
        'fc_b': fc_b,
    }


# ---------------------------------------------------------------------------
# Forward pass: tiny gathers / index math in JAX, everything else in ONE kernel
# ---------------------------------------------------------------------------

@jax.jit
def forward(prep, input_ids, char_input_ids):
    B, T = input_ids.shape
    TB = T * B
    H = prep['bilstm_whh_bd'].shape[0] // 2
    D = 2 * H

    # Embedding gathers directly in time-major flattened order (tables are tiny).
    ids_tb = input_ids.T.reshape(TB)                                   # (TB,)
    word_slab = jnp.take(prep['word_emb'], ids_tb, axis=0)             # (TB, E)
    char_ids = jnp.transpose(char_input_ids, (1, 0, 2)).reshape(TB, MAX_CHAR_LEN)
    char_embs = jnp.take(prep['char_emb'], char_ids, axis=0)           # (TB, Lc, Cc)
    charpad = jnp.pad(char_embs, ((0, 0), (2, 2), (0, 0)))             # (TB, Lc+4, Cc)
    key_valid = (ids_tb != 0).astype(jnp.int32).reshape(1, TB)

    # S4 conv kernels K[j] = sum_n C_n A_n^j B_n (parameter-only, tiny).
    jpow = jnp.arange(T, dtype=jnp.float32)[:, None, None]
    k_f = jnp.sum(prep['s4_C_f'] * prep['s4_B_f'] *
                  prep['s4_A_f'][None] ** jpow, axis=1)                # (T, D)
    k_b = jnp.sum(prep['s4_C_b'] * prep['s4_B_b'] *
                  prep['s4_A_b'][None] ** jpow, axis=1)                # (T, D)

    kernel = functools.partial(_fused_forward_kernel, B=B, T=T)
    args = (word_slab, charpad, key_valid,
            prep['cnn_w'], prep['cnn_b'],
            prep['bilstm_wih'], prep['bilstm_b'], prep['bilstm_whh_bd'],
            prep['att_wqkv'], k_f, k_b, prep['s4_D'],
            prep['s4_wout'], prep['s4_bout'],
            prep['lstm_wih'], prep['lstm_whh'], prep['lstm_b'],
            prep['fc_w'], prep['fc_b'])
    vspec = pl.BlockSpec(memory_space=pltpu.MemorySpace.VMEM)

    preds = pl.pallas_call(
        kernel,
        out_shape=jax.ShapeDtypeStruct((TB, 1), jnp.int32),
        in_specs=[vspec] * len(args),
        out_specs=vspec,
        scratch_shapes=[
            pltpu.VMEM((TB, 8 * H), jnp.float32),   # BiLSTM input projection
            pltpu.VMEM((TB, H), jnp.float32),       # forward hidden sequence
            pltpu.VMEM((TB, H), jnp.float32),       # backward hidden sequence
            pltpu.VMEM((TB, 4 * D), jnp.float32),   # LSTM input projection
            pltpu.VMEM((TB, D), jnp.float32),       # LSTM hidden sequence
        ],
        compiler_params=pltpu.CompilerParams(vmem_limit_bytes=64 * 1024 * 1024),
    )(*args)
    # TODO(synk): for production batch sizes add a batch grid with
    #   dimension_semantics=("parallel",) so both v7x TensorCores are used.
    return preds.reshape(T, B).T                                       # (B, T) int32


# ---------------------------------------------------------------------------
# Main
# ---------------------------------------------------------------------------

if __name__ == "__main__":
    B, T = 2, 8
    emb_size, hidden_size = 16, 16
    word_num, label_num = 100, 10
    char_vocab_size, char_emb_dim = 30, 8

    root = jax.random.PRNGKey(0)
    k_param, k_ids, k_chars = jax.random.split(root, 3)

    params = init_params(k_param, emb_size, hidden_size, word_num, label_num,
                         char_vocab_size, char_emb_dim)
    prep = prepare_params(params)

    input_ids = jax.random.randint(k_ids, (B, T), 1, word_num)
    input_ids = input_ids.at[:, -1].set(0)            # exercise the padding mask
    char_input_ids = jax.random.randint(k_chars, (B, T, MAX_CHAR_LEN),
                                        0, char_vocab_size)

    preds = forward(prep, input_ids, char_input_ids)
    preds = jax.block_until_ready(preds)

    assert preds.shape == (B, T)
    assert preds.dtype == jnp.int32
    print("KERNEL_OK")
</pallas_src>

<mosaic_0001>
module attributes {stable_mosaic.version = 11 : i64} {
  func.func @_fused_forward_kernel(%arg0: memref<16x16xf32, #tpu.memory_space<vmem>>, %arg1: memref<16x19x8xf32, #tpu.memory_space<vmem>>, %arg2: memref<1x16xi32, #tpu.memory_space<vmem>>, %arg3: memref<5x8x8xbf16, #tpu.memory_space<vmem>>, %arg4: memref<1x8xf32, #tpu.memory_space<vmem>>, %arg5: memref<24x128xbf16, #tpu.memory_space<vmem>>, %arg6: memref<1x128xf32, #tpu.memory_space<vmem>>, %arg7: memref<32x128xbf16, #tpu.memory_space<vmem>>, %arg8: memref<32x96xbf16, #tpu.memory_space<vmem>>, %arg9: memref<8x32xf32, #tpu.memory_space<vmem>>, %arg10: memref<8x32xf32, #tpu.memory_space<vmem>>, %arg11: memref<1x32xf32, #tpu.memory_space<vmem>>, %arg12: memref<32x64xbf16, #tpu.memory_space<vmem>>, %arg13: memref<1x64xf32, #tpu.memory_space<vmem>>, %arg14: memref<32x128xbf16, #tpu.memory_space<vmem>>, %arg15: memref<32x128xbf16, #tpu.memory_space<vmem>>, %arg16: memref<1x128xf32, #tpu.memory_space<vmem>>, %arg17: memref<32x128xbf16, #tpu.memory_space<vmem>>, %arg18: memref<1x128xf32, #tpu.memory_space<vmem>>, %arg19: memref<16x1xi32, #tpu.memory_space<vmem>>, %arg20: memref<16x128xf32, #tpu.memory_space<vmem>>, %arg21: memref<16x16xf32, #tpu.memory_space<vmem>>, %arg22: memref<16x16xf32, #tpu.memory_space<vmem>>, %arg23: memref<16x128xf32, #tpu.memory_space<vmem>>, %arg24: memref<16x32xf32, #tpu.memory_space<vmem>>) attributes {dimension_semantics = [], scalar_prefetch = 0 : i64, scratch_operands = 5 : i64, tpu.core_type = #tpu.core_type<tc>} {
    %c0 = arith.constant 0 : index
    %c0_0 = arith.constant 0 : index
    %c0_1 = arith.constant 0 : index
    %0 = vector.load %arg1[%c0, %c0_0, %c0_1] : memref<16x19x8xf32, #tpu.memory_space<vmem>>, vector<16x19x8xf32>
    %cst = arith.constant 0.000000e+00 : f32
    %1 = vector.broadcast %cst : f32 to vector<240x8xf32>
    %2 = vector.extract_strided_slice %0 {offsets = [0, 0, 0], sizes = [16, 15, 8], strides = [1, 1, 1]} : vector<16x19x8xf32> to vector<16x15x8xf32>
    %3 = vector.shape_cast %2 : vector<16x15x8xf32> to vector<240x8xf32>
    %4 = arith.truncf %3 : vector<240x8xf32> to vector<240x8xbf16>
    %c0_2 = arith.constant 0 : index
    %c0_3 = arith.constant 0 : index
    %c0_4 = arith.constant 0 : index
    %5 = vector.load %arg3[%c0_2, %c0_3, %c0_4] : memref<5x8x8xbf16, #tpu.memory_space<vmem>>, vector<1x8x8xbf16>
    %6 = vector.shape_cast %5 : vector<1x8x8xbf16> to vector<8x8xbf16>
    %cst_5 = arith.constant dense<0.000000e+00> : vector<240x8xf32>
    %7 = tpu.matmul %4, %6, %cst_5 {dimension_numbers = #tpu.dot_dimension_numbers<[1], [0], [0], [1], [0, 0, 1, 1], [], []>} : vector<240x8xbf16>, vector<8x8xbf16>, vector<240x8xf32> -> vector<240x8xf32>
    %8 = arith.addf %1, %7 : vector<240x8xf32>
    %9 = vector.extract_strided_slice %0 {offsets = [0, 1, 0], sizes = [16, 15, 8], strides = [1, 1, 1]} : vector<16x19x8xf32> to vector<16x15x8xf32>
    %10 = vector.shape_cast %9 : vector<16x15x8xf32> to vector<240x8xf32>
    %11 = arith.truncf %10 : vector<240x8xf32> to vector<240x8xbf16>
    %c1 = arith.constant 1 : index
    %c0_6 = arith.constant 0 : index
    %c0_7 = arith.constant 0 : index
    %12 = vector.load %arg3[%c1, %c0_6, %c0_7] : memref<5x8x8xbf16, #tpu.memory_space<vmem>>, vector<1x8x8xbf16>
    %13 = vector.shape_cast %12 : vector<1x8x8xbf16> to vector<8x8xbf16>
    %cst_8 = arith.constant dense<0.000000e+00> : vector<240x8xf32>
    %14 = tpu.matmul %11, %13, %cst_8 {dimension_numbers = #tpu.dot_dimension_numbers<[1], [0], [0], [1], [0, 0, 1, 1], [], []>} : vector<240x8xbf16>, vector<8x8xbf16>, vector<240x8xf32> -> vector<240x8xf32>
    %15 = arith.addf %8, %14 : vector<240x8xf32>
    %16 = vector.extract_strided_slice %0 {offsets = [0, 2, 0], sizes = [16, 15, 8], strides = [1, 1, 1]} : vector<16x19x8xf32> to vector<16x15x8xf32>
    %17 = vector.shape_cast %16 : vector<16x15x8xf32> to vector<240x8xf32>
    %18 = arith.truncf %17 : vector<240x8xf32> to vector<240x8xbf16>
    %c2 = arith.constant 2 : index
    %c0_9 = arith.constant 0 : index
    %c0_10 = arith.constant 0 : index
    %19 = vector.load %arg3[%c2, %c0_9, %c0_10] : memref<5x8x8xbf16, #tpu.memory_space<vmem>>, vector<1x8x8xbf16>
    %20 = vector.shape_cast %19 : vector<1x8x8xbf16> to vector<8x8xbf16>
    %cst_11 = arith.constant dense<0.000000e+00> : vector<240x8xf32>
    %21 = tpu.matmul %18, %20, %cst_11 {dimension_numbers = #tpu.dot_dimension_numbers<[1], [0], [0], [1], [0, 0, 1, 1], [], []>} : vector<240x8xbf16>, vector<8x8xbf16>, vector<240x8xf32> -> vector<240x8xf32>
    %22 = arith.addf %15, %21 : vector<240x8xf32>
    %23 = vector.extract_strided_slice %0 {offsets = [0, 3, 0], sizes = [16, 15, 8], strides = [1, 1, 1]} : vector<16x19x8xf32> to vector<16x15x8xf32>
    %24 = vector.shape_cast %23 : vector<16x15x8xf32> to vector<240x8xf32>
    %25 = arith.truncf %24 : vector<240x8xf32> to vector<240x8xbf16>
    %c3 = arith.constant 3 : index
    %c0_12 = arith.constant 0 : index
    %c0_13 = arith.constant 0 : index
    %26 = vector.load %arg3[%c3, %c0_12, %c0_13] : memref<5x8x8xbf16, #tpu.memory_space<vmem>>, vector<1x8x8xbf16>
    %27 = vector.shape_cast %26 : vector<1x8x8xbf16> to vector<8x8xbf16>
    %cst_14 = arith.constant dense<0.000000e+00> : vector<240x8xf32>
    %28 = tpu.matmul %25, %27, %cst_14 {dimension_numbers = #tpu.dot_dimension_numbers<[1], [0], [0], [1], [0, 0, 1, 1], [], []>} : vector<240x8xbf16>, vector<8x8xbf16>, vector<240x8xf32> -> vector<240x8xf32>
    %29 = arith.addf %22, %28 : vector<240x8xf32>
    %30 = vector.extract_strided_slice %0 {offsets = [0, 4, 0], sizes = [16, 15, 8], strides = [1, 1, 1]} : vector<16x19x8xf32> to vector<16x15x8xf32>
    %31 = vector.shape_cast %30 : vector<16x15x8xf32> to vector<240x8xf32>
    %32 = arith.truncf %31 : vector<240x8xf32> to vector<240x8xbf16>
    %c4 = arith.constant 4 : index
    %c0_15 = arith.constant 0 : index
    %c0_16 = arith.constant 0 : index
    %33 = vector.load %arg3[%c4, %c0_15, %c0_16] : memref<5x8x8xbf16, #tpu.memory_space<vmem>>, vector<1x8x8xbf16>
    %34 = vector.shape_cast %33 : vector<1x8x8xbf16> to vector<8x8xbf16>
    %cst_17 = arith.constant dense<0.000000e+00> : vector<240x8xf32>
    %35 = tpu.matmul %32, %34, %cst_17 {dimension_numbers = #tpu.dot_dimension_numbers<[1], [0], [0], [1], [0, 0, 1, 1], [], []>} : vector<240x8xbf16>, vector<8x8xbf16>, vector<240x8xf32> -> vector<240x8xf32>
    %36 = arith.addf %29, %35 : vector<240x8xf32>
    %37 = vector.shape_cast %36 : vector<240x8xf32> to vector<16x15x8xf32>
    %cst_18 = arith.constant dense<0xFF800000> : vector<16x8xf32>
    %38 = vector.multi_reduction <maximumf>, %37, %cst_18 [1] : vector<16x15x8xf32> to vector<16x8xf32>
    %c0_19 = arith.constant 0 : index
    %c0_20 = arith.constant 0 : index
    %39 = vector.load %arg4[%c0_19, %c0_20] : memref<1x8xf32, #tpu.memory_space<vmem>>, vector<1x8xf32>
    %40 = vector.broadcast %39 : vector<1x8xf32> to vector<16x8xf32>
    %41 = arith.addf %38, %40 : vector<16x8xf32>
    %c0_21 = arith.constant 0 : index
    %c0_22 = arith.constant 0 : index
    %42 = vector.load %arg0[%c0_21, %c0_22] : memref<16x16xf32, #tpu.memory_space<vmem>>, vector<16x16xf32>
    %43 = tpu.concatenate %42, %41 in 1 : vector<16x16xf32>, vector<16x8xf32> -> vector<16x24xf32>
    %44 = arith.truncf %43 : vector<16x24xf32> to vector<16x24xbf16>
    %c0_23 = arith.constant 0 : index
    %c0_24 = arith.constant 0 : index
    %45 = vector.load %arg5[%c0_23, %c0_24] : memref<24x128xbf16, #tpu.memory_space<vmem>>, vector<24x128xbf16>
    %cst_25 = arith.constant dense<0.000000e+00> : vector<16x128xf32>
    %46 = tpu.matmul %44, %45, %cst_25 {dimension_numbers = #tpu.dot_dimension_numbers<[1], [0], [0], [1], [0, 0, 1, 1], [], []>} : vector<16x24xbf16>, vector<24x128xbf16>, vector<16x128xf32> -> vector<16x128xf32>
    %c0_26 = arith.constant 0 : index
    %c0_27 = arith.constant 0 : index
    %47 = vector.load %arg6[%c0_26, %c0_27] : memref<1x128xf32, #tpu.memory_space<vmem>>, vector<1x128xf32>
    %48 = vector.broadcast %47 : vector<1x128xf32> to vector<16x128xf32>
    %49 = arith.addf %46, %48 : vector<16x128xf32>
    %c0_28 = arith.constant 0 : index
    %c0_29 = arith.constant 0 : index
    %50 = vector.load %arg20[%c0_28, %c0_29] : memref<16x128xf32, #tpu.memory_space<vmem>>, vector<16x128xf32>
    tpu.vector_store %arg20[%c0_28, %c0_29], %49 {strides = array<i32>} : memref<16x128xf32, #tpu.memory_space<vmem>>, vector<16x128xf32>,
    %c0_30 = arith.constant 0 : index
    %c0_31 = arith.constant 0 : index
    %51 = vector.load %arg7[%c0_30, %c0_31] : memref<32x128xbf16, #tpu.memory_space<vmem>>, vector<32x128xbf16>
    %52 = tpu.iota {dimensions = array<i32: 1>} : vector<2x128xi32>
    %c32_i32 = arith.constant 32 : i32
    %c0_i32 = arith.constant 0 : i32
    %53 = arith.cmpi eq, %c32_i32, %c0_i32 : i32
    %c1_i32 = arith.constant 1 : i32
    %54 = arith.select %53, %c1_i32, %c32_i32 : i32
    %55 = vector.broadcast %54 : i32 to vector<2x128xi32>
    %56 = arith.remsi %52, %55 : vector<2x128xi32>
    %c0_i32_32 = arith.constant 0 : i32
    %57 = vector.broadcast %c0_i32_32 : i32 to vector<2x128xi32>
    %58 = arith.cmpi ne, %56, %57 : vector<2x128xi32>
    %c0_i32_33 = arith.constant 0 : i32
    %59 = vector.broadcast %c0_i32_33 : i32 to vector<2x128xi32>
    %60 = arith.cmpi slt, %56, %59 : vector<2x128xi32>
    %c0_i32_34 = arith.constant 0 : i32
    %61 = arith.cmpi slt, %54, %c0_i32_34 : i32
    %62 = vector.broadcast %61 : i1 to vector<2x128xi1>
    %63 = vector.broadcast %62 : vector<2x128xi1> to vector<2x128xi1>
    %64 = arith.xori %60, %63 : vector<2x128xi1>
    %65 = arith.andi %64, %58 : vector<2x128xi1>
    %66 = vector.broadcast %54 : i32 to vector<2x128xi32>
    %67 = arith.addi %56, %66 : vector<2x128xi32>
    %68 = arith.select %65, %67, %56 : vector<2x128xi1>, vector<2x128xi32>
    %c16_i32 = arith.constant 16 : i32
    %69 = vector.broadcast %c16_i32 : i32 to vector<2x128xi32>
    %70 = arith.cmpi slt, %68, %69 : vector<2x128xi32>
    %cst_35 = arith.constant 0.000000e+00 : f32
    %71 = vector.broadcast %cst_35 : f32 to vector<2x32xf32>
    %c0_i32_36 = arith.constant 0 : i32
    %c7_i32 = arith.constant 7 : i32
    %72 = arith.subi %c7_i32, %c0_i32_36 : i32
    %c2_i32 = arith.constant 2 : i32
    %73 = arith.muli %c0_i32_36, %c2_i32 : i32
    %74 = arith.index_cast %73 : i32 to index
    %c0_37 = arith.constant 0 : index
    %75 = vector.load %arg20[%74, %c0_37] : memref<16x128xf32, #tpu.memory_space<vmem>>, vector<2x128xf32>
    %c2_i32_38 = arith.constant 2 : i32
    %76 = arith.muli %72, %c2_i32_38 : i32
    %77 = arith.index_cast %76 : i32 to index
    %c0_39 = arith.constant 0 : index
    %78 = vector.load %arg20[%77, %c0_39] : memref<16x128xf32, #tpu.memory_space<vmem>>, vector<2x128xf32>
    %79 = arith.select %70, %75, %78 : vector<2x128xi1>, vector<2x128xf32>
    %80 = arith.truncf %71 : vector<2x32xf32> to vector<2x32xbf16>
    %cst_40 = arith.constant dense<0.000000e+00> : vector<2x128xf32>
    %81 = tpu.matmul %80, %51, %cst_40 {dimension_numbers = #tpu.dot_dimension_numbers<[1], [0], [0], [1], [0, 0, 1, 1], [], []>} : vector<2x32xbf16>, vector<32x128xbf16>, vector<2x128xf32> -> vector<2x128xf32>
    %82 = arith.addf %79, %81 : vector<2x128xf32>
    %83 = arith.negf %82 : vector<2x128xf32>
    %84 = math.exp %83 : vector<2x128xf32>
    %cst_41 = arith.constant 1.000000e+00 : f32
    %85 = vector.broadcast %cst_41 : f32 to vector<2x128xf32>
    %86 = arith.addf %85, %84 : vector<2x128xf32>
    %87 = arith.divf %85, %86 : vector<2x128xf32>
    %88 = math.tanh %82 : vector<2x128xf32>
    %89 = vector.extract_strided_slice %87 {offsets = [0, 0], sizes = [2, 32], strides = [1, 1]} : vector<2x128xf32> to vector<2x32xf32>
    %90 = vector.extract_strided_slice %87 {offsets = [0, 32], sizes = [2, 32], strides = [1, 1]} : vector<2x128xf32> to vector<2x32xf32>
    %91 = vector.extract_strided_slice %88 {offsets = [0, 64], sizes = [2, 32], strides = [1, 1]} : vector<2x128xf32> to vector<2x32xf32>
    %92 = vector.extract_strided_slice %87 {offsets = [0, 96], sizes = [2, 32], strides = [1, 1]} : vector<2x128xf32> to vector<2x32xf32>
    %93 = arith.mulf %90, %71 : vector<2x32xf32>
    %94 = arith.mulf %89, %91 : vector<2x32xf32>
    %95 = arith.addf %93, %94 : vector<2x32xf32>
    %96 = math.tanh %95 : vector<2x32xf32>
    %97 = arith.mulf %92, %96 : vector<2x32xf32>
    %98 = vector.extract_strided_slice %97 {offsets = [0, 0], sizes = [2, 16], strides = [1, 1]} : vector<2x32xf32> to vector<2x16xf32>
    %c2_i32_42 = arith.constant 2 : i32
    %99 = arith.muli %c0_i32_36, %c2_i32_42 : i32
    %100 = arith.index_cast %99 : i32 to index
    %c0_43 = arith.constant 0 : index
    %101 = vector.load %arg21[%100, %c0_43] : memref<16x16xf32, #tpu.memory_space<vmem>>, vector<2x16xf32>
    tpu.vector_store %arg21[%100, %c0_43], %98 {strides = array<i32>} : memref<16x16xf32, #tpu.memory_space<vmem>>, vector<2x16xf32>,
    %102 = vector.extract_strided_slice %97 {offsets = [0, 16], sizes = [2, 16], strides = [1, 1]} : vector<2x32xf32> to vector<2x16xf32>
    %c2_i32_44 = arith.constant 2 : i32
    %103 = arith.muli %72, %c2_i32_44 : i32
    %104 = arith.index_cast %103 : i32 to index
    %c0_45 = arith.constant 0 : index
    %105 = vector.load %arg22[%104, %c0_45] : memref<16x16xf32, #tpu.memory_space<vmem>>, vector<2x16xf32>
    tpu.vector_store %arg22[%104, %c0_45], %102 {strides = array<i32>} : memref<16x16xf32, #tpu.memory_space<vmem>>, vector<2x16xf32>,
    %c1_i32_46 = arith.constant 1 : i32
    %c7_i32_47 = arith.constant 7 : i32
    %106 = arith.subi %c7_i32_47, %c1_i32_46 : i32
    %c2_i32_48 = arith.constant 2 : i32
    %107 = arith.muli %c1_i32_46, %c2_i32_48 : i32
    %108 = arith.index_cast %107 : i32 to index
    %c0_49 = arith.constant 0 : index
    %109 = vector.load %arg20[%108, %c0_49] : memref<16x128xf32, #tpu.memory_space<vmem>>, vector<2x128xf32>
    %c2_i32_50 = arith.constant 2 : i32
    %110 = arith.muli %106, %c2_i32_50 : i32
    %111 = arith.index_cast %110 : i32 to index
    %c0_51 = arith.constant 0 : index
    %112 = vector.load %arg20[%111, %c0_51] : memref<16x128xf32, #tpu.memory_space<vmem>>, vector<2x128xf32>
    %113 = arith.select %70, %109, %112 : vector<2x128xi1>, vector<2x128xf32>
    %114 = arith.truncf %97 : vector<2x32xf32> to vector<2x32xbf16>
    %cst_52 = arith.constant dense<0.000000e+00> : vector<2x128xf32>
    %115 = tpu.matmul %114, %51, %cst_52 {dimension_numbers = #tpu.dot_dimension_numbers<[1], [0], [0], [1], [0, 0, 1, 1], [], []>} : vector<2x32xbf16>, vector<32x128xbf16>, vector<2x128xf32> -> vector<2x128xf32>
    %116 = arith.addf %113, %115 : vector<2x128xf32>
    %117 = arith.negf %116 : vector<2x128xf32>
    %118 = math.exp %117 : vector<2x128xf32>
    %cst_53 = arith.constant 1.000000e+00 : f32
    %119 = vector.broadcast %cst_53 : f32 to vector<2x128xf32>
    %120 = arith.addf %119, %118 : vector<2x128xf32>
    %121 = arith.divf %119, %120 : vector<2x128xf32>
    %122 = math.tanh %116 : vector<2x128xf32>
    %123 = vector.extract_strided_slice %121 {offsets = [0, 0], sizes = [2, 32], strides = [1, 1]} : vector<2x128xf32> to vector<2x32xf32>
    %124 = vector.extract_strided_slice %121 {offsets = [0, 32], sizes = [2, 32], strides = [1, 1]} : vector<2x128xf32> to vector<2x32xf32>
    %125 = vector.extract_strided_slice %122 {offsets = [0, 64], sizes = [2, 32], strides = [1, 1]} : vector<2x128xf32> to vector<2x32xf32>
    %126 = vector.extract_strided_slice %121 {offsets = [0, 96], sizes = [2, 32], strides = [1, 1]} : vector<2x128xf32> to vector<2x32xf32>
    %127 = arith.mulf %124, %95 : vector<2x32xf32>
    %128 = arith.mulf %123, %125 : vector<2x32xf32>
    %129 = arith.addf %127, %128 : vector<2x32xf32>
    %130 = math.tanh %129 : vector<2x32xf32>
    %131 = arith.mulf %126, %130 : vector<2x32xf32>
    %132 = vector.extract_strided_slice %131 {offsets = [0, 0], sizes = [2, 16], strides = [1, 1]} : vector<2x32xf32> to vector<2x16xf32>
    %c2_i32_54 = arith.constant 2 : i32
    %133 = arith.muli %c1_i32_46, %c2_i32_54 : i32
    %134 = arith.index_cast %133 : i32 to index
    %c0_55 = arith.constant 0 : index
    %135 = vector.load %arg21[%134, %c0_55] : memref<16x16xf32, #tpu.memory_space<vmem>>, vector<2x16xf32>
    tpu.vector_store %arg21[%134, %c0_55], %132 {strides = array<i32>} : memref<16x16xf32, #tpu.memory_space<vmem>>, vector<2x16xf32>,
    %136 = vector.extract_strided_slice %131 {offsets = [0, 16], sizes = [2, 16], strides = [1, 1]} : vector<2x32xf32> to vector<2x16xf32>
    %c2_i32_56 = arith.constant 2 : i32
    %137 = arith.muli %106, %c2_i32_56 : i32
    %138 = arith.index_cast %137 : i32 to index
    %c0_57 = arith.constant 0 : index
    %139 = vector.load %arg22[%138, %c0_57] : memref<16x16xf32, #tpu.memory_space<vmem>>, vector<2x16xf32>
    tpu.vector_store %arg22[%138, %c0_57], %136 {strides = array<i32>} : memref<16x16xf32, #tpu.memory_space<vmem>>, vector<2x16xf32>,
    %c2_i32_58 = arith.constant 2 : i32
    %c7_i32_59 = arith.constant 7 : i32
    %140 = arith.subi %c7_i32_59, %c2_i32_58 : i32
    %c2_i32_60 = arith.constant 2 : i32
    %141 = arith.muli %c2_i32_58, %c2_i32_60 : i32
    %142 = arith.index_cast %141 : i32 to index
    %c0_61 = arith.constant 0 : index
    %143 = vector.load %arg20[%142, %c0_61] : memref<16x128xf32, #tpu.memory_space<vmem>>, vector<2x128xf32>
    %c2_i32_62 = arith.constant 2 : i32
    %144 = arith.muli %140, %c2_i32_62 : i32
    %145 = arith.index_cast %144 : i32 to index
    %c0_63 = arith.constant 0 : index
    %146 = vector.load %arg20[%145, %c0_63] : memref<16x128xf32, #tpu.memory_space<vmem>>, vector<2x128xf32>
    %147 = arith.select %70, %143, %146 : vector<2x128xi1>, vector<2x128xf32>
    %148 = arith.truncf %131 : vector<2x32xf32> to vector<2x32xbf16>
    %cst_64 = arith.constant dense<0.000000e+00> : vector<2x128xf32>
    %149 = tpu.matmul %148, %51, %cst_64 {dimension_numbers = #tpu.dot_dimension_numbers<[1], [0], [0], [1], [0, 0, 1, 1], [], []>} : vector<2x32xbf16>, vector<32x128xbf16>, vector<2x128xf32> -> vector<2x128xf32>
    %150 = arith.addf %147, %149 : vector<2x128xf32>
    %151 = arith.negf %150 : vector<2x128xf32>
    %152 = math.exp %151 : vector<2x128xf32>
    %cst_65 = arith.constant 1.000000e+00 : f32
    %153 = vector.broadcast %cst_65 : f32 to vector<2x128xf32>
    %154 = arith.addf %153, %152 : vector<2x128xf32>
    %155 = arith.divf %153, %154 : vector<2x128xf32>
    %156 = math.tanh %150 : vector<2x128xf32>
    %157 = vector.extract_strided_slice %155 {offsets = [0, 0], sizes = [2, 32], strides = [1, 1]} : vector<2x128xf32> to vector<2x32xf32>
    %158 = vector.extract_strided_slice %155 {offsets = [0, 32], sizes = [2, 32], strides = [1, 1]} : vector<2x128xf32> to vector<2x32xf32>
    %159 = vector.extract_strided_slice %156 {offsets = [0, 64], sizes = [2, 32], strides = [1, 1]} : vector<2x128xf32> to vector<2x32xf32>
    %160 = vector.extract_strided_slice %155 {offsets = [0, 96], sizes = [2, 32], strides = [1, 1]} : vector<2x128xf32> to vector<2x32xf32>
    %161 = arith.mulf %158, %129 : vector<2x32xf32>
    %162 = arith.mulf %157, %159 : vector<2x32xf32>
    %163 = arith.addf %161, %162 : vector<2x32xf32>
    %164 = math.tanh %163 : vector<2x32xf32>
    %165 = arith.mulf %160, %164 : vector<2x32xf32>
    %166 = vector.extract_strided_slice %165 {offsets = [0, 0], sizes = [2, 16], strides = [1, 1]} : vector<2x32xf32> to vector<2x16xf32>
    %c2_i32_66 = arith.constant 2 : i32
    %167 = arith.muli %c2_i32_58, %c2_i32_66 : i32
    %168 = arith.index_cast %167 : i32 to index
    %c0_67 = arith.constant 0 : index
    %169 = vector.load %arg21[%168, %c0_67] : memref<16x16xf32, #tpu.memory_space<vmem>>, vector<2x16xf32>
    tpu.vector_store %arg21[%168, %c0_67], %166 {strides = array<i32>} : memref<16x16xf32, #tpu.memory_space<vmem>>, vector<2x16xf32>,
    %170 = vector.extract_strided_slice %165 {offsets = [0, 16], sizes = [2, 16], strides = [1, 1]} : vector<2x32xf32> to vector<2x16xf32>
    %c2_i32_68 = arith.constant 2 : i32
    %171 = arith.muli %140, %c2_i32_68 : i32
    %172 = arith.index_cast %171 : i32 to index
    %c0_69 = arith.constant 0 : index
    %173 = vector.load %arg22[%172, %c0_69] : memref<16x16xf32, #tpu.memory_space<vmem>>, vector<2x16xf32>
    tpu.vector_store %arg22[%172, %c0_69], %170 {strides = array<i32>} : memref<16x16xf32, #tpu.memory_space<vmem>>, vector<2x16xf32>,
    %c3_i32 = arith.constant 3 : i32
    %c7_i32_70 = arith.constant 7 : i32
    %174 = arith.subi %c7_i32_70, %c3_i32 : i32
    %c2_i32_71 = arith.constant 2 : i32
    %175 = arith.muli %c3_i32, %c2_i32_71 : i32
    %176 = arith.index_cast %175 : i32 to index
    %c0_72 = arith.constant 0 : index
    %177 = vector.load %arg20[%176, %c0_72] : memref<16x128xf32, #tpu.memory_space<vmem>>, vector<2x128xf32>
    %c2_i32_73 = arith.constant 2 : i32
    %178 = arith.muli %174, %c2_i32_73 : i32
    %179 = arith.index_cast %178 : i32 to index
    %c0_74 = arith.constant 0 : index
    %180 = vector.load %arg20[%179, %c0_74] : memref<16x128xf32, #tpu.memory_space<vmem>>, vector<2x128xf32>
    %181 = arith.select %70, %177, %180 : vector<2x128xi1>, vector<2x128xf32>
    %182 = arith.truncf %165 : vector<2x32xf32> to vector<2x32xbf16>
    %cst_75 = arith.constant dense<0.000000e+00> : vector<2x128xf32>
    %183 = tpu.matmul %182, %51, %cst_75 {dimension_numbers = #tpu.dot_dimension_numbers<[1], [0], [0], [1], [0, 0, 1, 1], [], []>} : vector<2x32xbf16>, vector<32x128xbf16>, vector<2x128xf32> -> vector<2x128xf32>
    %184 = arith.addf %181, %183 : vector<2x128xf32>
    %185 = arith.negf %184 : vector<2x128xf32>
    %186 = math.exp %185 : vector<2x128xf32>
    %cst_76 = arith.constant 1.000000e+00 : f32
    %187 = vector.broadcast %cst_76 : f32 to vector<2x128xf32>
    %188 = arith.addf %187, %186 : vector<2x128xf32>
    %189 = arith.divf %187, %188 : vector<2x128xf32>
    %190 = math.tanh %184 : vector<2x128xf32>
    %191 = vector.extract_strided_slice %189 {offsets = [0, 0], sizes = [2, 32], strides = [1, 1]} : vector<2x128xf32> to vector<2x32xf32>
    %192 = vector.extract_strided_slice %189 {offsets = [0, 32], sizes = [2, 32], strides = [1, 1]} : vector<2x128xf32> to vector<2x32xf32>
    %193 = vector.extract_strided_slice %190 {offsets = [0, 64], sizes = [2, 32], strides = [1, 1]} : vector<2x128xf32> to vector<2x32xf32>
    %194 = vector.extract_strided_slice %189 {offsets = [0, 96], sizes = [2, 32], strides = [1, 1]} : vector<2x128xf32> to vector<2x32xf32>
    %195 = arith.mulf %192, %163 : vector<2x32xf32>
    %196 = arith.mulf %191, %193 : vector<2x32xf32>
    %197 = arith.addf %195, %196 : vector<2x32xf32>
    %198 = math.tanh %197 : vector<2x32xf32>
    %199 = arith.mulf %194, %198 : vector<2x32xf32>
    %200 = vector.extract_strided_slice %199 {offsets = [0, 0], sizes = [2, 16], strides = [1, 1]} : vector<2x32xf32> to vector<2x16xf32>
    %c2_i32_77 = arith.constant 2 : i32
    %201 = arith.muli %c3_i32, %c2_i32_77 : i32
    %202 = arith.index_cast %201 : i32 to index
    %c0_78 = arith.constant 0 : index
    %203 = vector.load %arg21[%202, %c0_78] : memref<16x16xf32, #tpu.memory_space<vmem>>, vector<2x16xf32>
    tpu.vector_store %arg21[%202, %c0_78], %200 {strides = array<i32>} : memref<16x16xf32, #tpu.memory_space<vmem>>, vector<2x16xf32>,
    %204 = vector.extract_strided_slice %199 {offsets = [0, 16], sizes = [2, 16], strides = [1, 1]} : vector<2x32xf32> to vector<2x16xf32>
    %c2_i32_79 = arith.constant 2 : i32
    %205 = arith.muli %174, %c2_i32_79 : i32
    %206 = arith.index_cast %205 : i32 to index
    %c0_80 = arith.constant 0 : index
    %207 = vector.load %arg22[%206, %c0_80] : memref<16x16xf32, #tpu.memory_space<vmem>>, vector<2x16xf32>
    tpu.vector_store %arg22[%206, %c0_80], %204 {strides = array<i32>} : memref<16x16xf32, #tpu.memory_space<vmem>>, vector<2x16xf32>,
    %c4_i32 = arith.constant 4 : i32
    %c7_i32_81 = arith.constant 7 : i32
    %208 = arith.subi %c7_i32_81, %c4_i32 : i32
    %c2_i32_82 = arith.constant 2 : i32
    %209 = arith.muli %c4_i32, %c2_i32_82 : i32
    %210 = arith.index_cast %209 : i32 to index
    %c0_83 = arith.constant 0 : index
    %211 = vector.load %arg20[%210, %c0_83] : memref<16x128xf32, #tpu.memory_space<vmem>>, vector<2x128xf32>
    %c2_i32_84 = arith.constant 2 : i32
    %212 = arith.muli %208, %c2_i32_84 : i32
    %213 = arith.index_cast %212 : i32 to index
    %c0_85 = arith.constant 0 : index
    %214 = vector.load %arg20[%213, %c0_85] : memref<16x128xf32, #tpu.memory_space<vmem>>, vector<2x128xf32>
    %215 = arith.select %70, %211, %214 : vector<2x128xi1>, vector<2x128xf32>
    %216 = arith.truncf %199 : vector<2x32xf32> to vector<2x32xbf16>
    %cst_86 = arith.constant dense<0.000000e+00> : vector<2x128xf32>
    %217 = tpu.matmul %216, %51, %cst_86 {dimension_numbers = #tpu.dot_dimension_numbers<[1], [0], [0], [1], [0, 0, 1, 1], [], []>} : vector<2x32xbf16>, vector<32x128xbf16>, vector<2x128xf32> -> vector<2x128xf32>
    %218 = arith.addf %215, %217 : vector<2x128xf32>
    %219 = arith.negf %218 : vector<2x128xf32>
    %220 = math.exp %219 : vector<2x128xf32>
    %cst_87 = arith.constant 1.000000e+00 : f32
    %221 = vector.broadcast %cst_87 : f32 to vector<2x128xf32>
    %222 = arith.addf %221, %220 : vector<2x128xf32>
    %223 = arith.divf %221, %222 : vector<2x128xf32>
    %224 = math.tanh %218 : vector<2x128xf32>
    %225 = vector.extract_strided_slice %223 {offsets = [0, 0], sizes = [2, 32], strides = [1, 1]} : vector<2x128xf32> to vector<2x32xf32>
    %226 = vector.extract_strided_slice %223 {offsets = [0, 32], sizes = [2, 32], strides = [1, 1]} : vector<2x128xf32> to vector<2x32xf32>
    %227 = vector.extract_strided_slice %224 {offsets = [0, 64], sizes = [2, 32], strides = [1, 1]} : vector<2x128xf32> to vector<2x32xf32>
    %228 = vector.extract_strided_slice %223 {offsets = [0, 96], sizes = [2, 32], strides = [1, 1]} : vector<2x128xf32> to vector<2x32xf32>
    %229 = arith.mulf %226, %197 : vector<2x32xf32>
    %230 = arith.mulf %225, %227 : vector<2x32xf32>
    %231 = arith.addf %229, %230 : vector<2x32xf32>
    %232 = math.tanh %231 : vector<2x32xf32>
    %233 = arith.mulf %228, %232 : vector<2x32xf32>
    %234 = vector.extract_strided_slice %233 {offsets = [0, 0], sizes = [2, 16], strides = [1, 1]} : vector<2x32xf32> to vector<2x16xf32>
    %c2_i32_88 = arith.constant 2 : i32
    %235 = arith.muli %c4_i32, %c2_i32_88 : i32
    %236 = arith.index_cast %235 : i32 to index
    %c0_89 = arith.constant 0 : index
    %237 = vector.load %arg21[%236, %c0_89] : memref<16x16xf32, #tpu.memory_space<vmem>>, vector<2x16xf32>
    tpu.vector_store %arg21[%236, %c0_89], %234 {strides = array<i32>} : memref<16x16xf32, #tpu.memory_space<vmem>>, vector<2x16xf32>,
    %238 = vector.extract_strided_slice %233 {offsets = [0, 16], sizes = [2, 16], strides = [1, 1]} : vector<2x32xf32> to vector<2x16xf32>
    %c2_i32_90 = arith.constant 2 : i32
    %239 = arith.muli %208, %c2_i32_90 : i32
    %240 = arith.index_cast %239 : i32 to index
    %c0_91 = arith.constant 0 : index
    %241 = vector.load %arg22[%240, %c0_91] : memref<16x16xf32, #tpu.memory_space<vmem>>, vector<2x16xf32>
    tpu.vector_store %arg22[%240, %c0_91], %238 {strides = array<i32>} : memref<16x16xf32, #tpu.memory_space<vmem>>, vector<2x16xf32>,
    %c5_i32 = arith.constant 5 : i32
    %c7_i32_92 = arith.constant 7 : i32
    %242 = arith.subi %c7_i32_92, %c5_i32 : i32
    %c2_i32_93 = arith.constant 2 : i32
    %243 = arith.muli %c5_i32, %c2_i32_93 : i32
    %244 = arith.index_cast %243 : i32 to index
    %c0_94 = arith.constant 0 : index
    %245 = vector.load %arg20[%244, %c0_94] : memref<16x128xf32, #tpu.memory_space<vmem>>, vector<2x128xf32>
    %c2_i32_95 = arith.constant 2 : i32
    %246 = arith.muli %242, %c2_i32_95 : i32
    %247 = arith.index_cast %246 : i32 to index
    %c0_96 = arith.constant 0 : index
    %248 = vector.load %arg20[%247, %c0_96] : memref<16x128xf32, #tpu.memory_space<vmem>>, vector<2x128xf32>
    %249 = arith.select %70, %245, %248 : vector<2x128xi1>, vector<2x128xf32>
    %250 = arith.truncf %233 : vector<2x32xf32> to vector<2x32xbf16>
    %cst_97 = arith.constant dense<0.000000e+00> : vector<2x128xf32>
    %251 = tpu.matmul %250, %51, %cst_97 {dimension_numbers = #tpu.dot_dimension_numbers<[1], [0], [0], [1], [0, 0, 1, 1], [], []>} : vector<2x32xbf16>, vector<32x128xbf16>, vector<2x128xf32> -> vector<2x128xf32>
    %252 = arith.addf %249, %251 : vector<2x128xf32>
    %253 = arith.negf %252 : vector<2x128xf32>
    %254 = math.exp %253 : vector<2x128xf32>
    %cst_98 = arith.constant 1.000000e+00 : f32
    %255 = vector.broadcast %cst_98 : f32 to vector<2x128xf32>
    %256 = arith.addf %255, %254 : vector<2x128xf32>
    %257 = arith.divf %255, %256 : vector<2x128xf32>
    %258 = math.tanh %252 : vector<2x128xf32>
    %259 = vector.extract_strided_slice %257 {offsets = [0, 0], sizes = [2, 32], strides = [1, 1]} : vector<2x128xf32> to vector<2x32xf32>
    %260 = vector.extract_strided_slice %257 {offsets = [0, 32], sizes = [2, 32], strides = [1, 1]} : vector<2x128xf32> to vector<2x32xf32>
    %261 = vector.extract_strided_slice %258 {offsets = [0, 64], sizes = [2, 32], strides = [1, 1]} : vector<2x128xf32> to vector<2x32xf32>
    %262 = vector.extract_strided_slice %257 {offsets = [0, 96], sizes = [2, 32], strides = [1, 1]} : vector<2x128xf32> to vector<2x32xf32>
    %263 = arith.mulf %260, %231 : vector<2x32xf32>
    %264 = arith.mulf %259, %261 : vector<2x32xf32>
    %265 = arith.addf %263, %264 : vector<2x32xf32>
    %266 = math.tanh %265 : vector<2x32xf32>
    %267 = arith.mulf %262, %266 : vector<2x32xf32>
    %268 = vector.extract_strided_slice %267 {offsets = [0, 0], sizes = [2, 16], strides = [1, 1]} : vector<2x32xf32> to vector<2x16xf32>
    %c2_i32_99 = arith.constant 2 : i32
    %269 = arith.muli %c5_i32, %c2_i32_99 : i32
    %270 = arith.index_cast %269 : i32 to index
    %c0_100 = arith.constant 0 : index
    %271 = vector.load %arg21[%270, %c0_100] : memref<16x16xf32, #tpu.memory_space<vmem>>, vector<2x16xf32>
    tpu.vector_store %arg21[%270, %c0_100], %268 {strides = array<i32>} : memref<16x16xf32, #tpu.memory_space<vmem>>, vector<2x16xf32>,
    %272 = vector.extract_strided_slice %267 {offsets = [0, 16], sizes = [2, 16], strides = [1, 1]} : vector<2x32xf32> to vector<2x16xf32>
    %c2_i32_101 = arith.constant 2 : i32
    %273 = arith.muli %242, %c2_i32_101 : i32
    %274 = arith.index_cast %273 : i32 to index
    %c0_102 = arith.constant 0 : index
    %275 = vector.load %arg22[%274, %c0_102] : memref<16x16xf32, #tpu.memory_space<vmem>>, vector<2x16xf32>
    tpu.vector_store %arg22[%274, %c0_102], %272 {strides = array<i32>} : memref<16x16xf32, #tpu.memory_space<vmem>>, vector<2x16xf32>,
    %c6_i32 = arith.constant 6 : i32
    %c7_i32_103 = arith.constant 7 : i32
    %276 = arith.subi %c7_i32_103, %c6_i32 : i32
    %c2_i32_104 = arith.constant 2 : i32
    %277 = arith.muli %c6_i32, %c2_i32_104 : i32
    %278 = arith.index_cast %277 : i32 to index
    %c0_105 = arith.constant 0 : index
    %279 = vector.load %arg20[%278, %c0_105] : memref<16x128xf32, #tpu.memory_space<vmem>>, vector<2x128xf32>
    %c2_i32_106 = arith.constant 2 : i32
    %280 = arith.muli %276, %c2_i32_106 : i32
    %281 = arith.index_cast %280 : i32 to index
    %c0_107 = arith.constant 0 : index
    %282 = vector.load %arg20[%281, %c0_107] : memref<16x128xf32, #tpu.memory_space<vmem>>, vector<2x128xf32>
    %283 = arith.select %70, %279, %282 : vector<2x128xi1>, vector<2x128xf32>
    %284 = arith.truncf %267 : vector<2x32xf32> to vector<2x32xbf16>
    %cst_108 = arith.constant dense<0.000000e+00> : vector<2x128xf32>
    %285 = tpu.matmul %284, %51, %cst_108 {dimension_numbers = #tpu.dot_dimension_numbers<[1], [0], [0], [1], [0, 0, 1, 1], [], []>} : vector<2x32xbf16>, vector<32x128xbf16>, vector<2x128xf32> -> vector<2x128xf32>
    %286 = arith.addf %283, %285 : vector<2x128xf32>
    %287 = arith.negf %286 : vector<2x128xf32>
    %288 = math.exp %287 : vector<2x128xf32>
    %cst_109 = arith.constant 1.000000e+00 : f32
    %289 = vector.broadcast %cst_109 : f32 to vector<2x128xf32>
    %290 = arith.addf %289, %288 : vector<2x128xf32>
    %291 = arith.divf %289, %290 : vector<2x128xf32>
    %292 = math.tanh %286 : vector<2x128xf32>
    %293 = vector.extract_strided_slice %291 {offsets = [0, 0], sizes = [2, 32], strides = [1, 1]} : vector<2x128xf32> to vector<2x32xf32>
    %294 = vector.extract_strided_slice %291 {offsets = [0, 32], sizes = [2, 32], strides = [1, 1]} : vector<2x128xf32> to vector<2x32xf32>
    %295 = vector.extract_strided_slice %292 {offsets = [0, 64], sizes = [2, 32], strides = [1, 1]} : vector<2x128xf32> to vector<2x32xf32>
    %296 = vector.extract_strided_slice %291 {offsets = [0, 96], sizes = [2, 32], strides = [1, 1]} : vector<2x128xf32> to vector<2x32xf32>
    %297 = arith.mulf %294, %265 : vector<2x32xf32>
    %298 = arith.mulf %293, %295 : vector<2x32xf32>
    %299 = arith.addf %297, %298 : vector<2x32xf32>
    %300 = math.tanh %299 : vector<2x32xf32>
    %301 = arith.mulf %296, %300 : vector<2x32xf32>
    %302 = vector.extract_strided_slice %301 {offsets = [0, 0], sizes = [2, 16], strides = [1, 1]} : vector<2x32xf32> to vector<2x16xf32>
    %c2_i32_110 = arith.constant 2 : i32
    %303 = arith.muli %c6_i32, %c2_i32_110 : i32
    %304 = arith.index_cast %303 : i32 to index
    %c0_111 = arith.constant 0 : index
    %305 = vector.load %arg21[%304, %c0_111] : memref<16x16xf32, #tpu.memory_space<vmem>>, vector<2x16xf32>
    tpu.vector_store %arg21[%304, %c0_111], %302 {strides = array<i32>} : memref<16x16xf32, #tpu.memory_space<vmem>>, vector<2x16xf32>,
    %306 = vector.extract_strided_slice %301 {offsets = [0, 16], sizes = [2, 16], strides = [1, 1]} : vector<2x32xf32> to vector<2x16xf32>
    %c2_i32_112 = arith.constant 2 : i32
    %307 = arith.muli %276, %c2_i32_112 : i32
    %308 = arith.index_cast %307 : i32 to index
    %c0_113 = arith.constant 0 : index
    %309 = vector.load %arg22[%308, %c0_113] : memref<16x16xf32, #tpu.memory_space<vmem>>, vector<2x16xf32>
    tpu.vector_store %arg22[%308, %c0_113], %306 {strides = array<i32>} : memref<16x16xf32, #tpu.memory_space<vmem>>, vector<2x16xf32>,
    %c7_i32_114 = arith.constant 7 : i32
    %c7_i32_115 = arith.constant 7 : i32
    %310 = arith.subi %c7_i32_115, %c7_i32_114 : i32
    %c2_i32_116 = arith.constant 2 : i32
    %311 = arith.muli %c7_i32_114, %c2_i32_116 : i32
    %312 = arith.index_cast %311 : i32 to index
    %c0_117 = arith.constant 0 : index
    %313 = vector.load %arg20[%312, %c0_117] : memref<16x128xf32, #tpu.memory_space<vmem>>, vector<2x128xf32>
    %c2_i32_118 = arith.constant 2 : i32
    %314 = arith.muli %310, %c2_i32_118 : i32
    %315 = arith.index_cast %314 : i32 to index
    %c0_119 = arith.constant 0 : index
    %316 = vector.load %arg20[%315, %c0_119] : memref<16x128xf32, #tpu.memory_space<vmem>>, vector<2x128xf32>
    %317 = arith.select %70, %313, %316 : vector<2x128xi1>, vector<2x128xf32>
    %318 = arith.truncf %301 : vector<2x32xf32> to vector<2x32xbf16>
    %cst_120 = arith.constant dense<0.000000e+00> : vector<2x128xf32>
    %319 = tpu.matmul %318, %51, %cst_120 {dimension_numbers = #tpu.dot_dimension_numbers<[1], [0], [0], [1], [0, 0, 1, 1], [], []>} : vector<2x32xbf16>, vector<32x128xbf16>, vector<2x128xf32> -> vector<2x128xf32>
    %320 = arith.addf %317, %319 : vector<2x128xf32>
    %321 = arith.negf %320 : vector<2x128xf32>
    %322 = math.exp %321 : vector<2x128xf32>
    %cst_121 = arith.constant 1.000000e+00 : f32
    %323 = vector.broadcast %cst_121 : f32 to vector<2x128xf32>
    %324 = arith.addf %323, %322 : vector<2x128xf32>
    %325 = arith.divf %323, %324 : vector<2x128xf32>
    %326 = math.tanh %320 : vector<2x128xf32>
    %327 = vector.extract_strided_slice %325 {offsets = [0, 0], sizes = [2, 32], strides = [1, 1]} : vector<2x128xf32> to vector<2x32xf32>
    %328 = vector.extract_strided_slice %325 {offsets = [0, 32], sizes = [2, 32], strides = [1, 1]} : vector<2x128xf32> to vector<2x32xf32>
    %329 = vector.extract_strided_slice %326 {offsets = [0, 64], sizes = [2, 32], strides = [1, 1]} : vector<2x128xf32> to vector<2x32xf32>
    %330 = vector.extract_strided_slice %325 {offsets = [0, 96], sizes = [2, 32], strides = [1, 1]} : vector<2x128xf32> to vector<2x32xf32>
    %331 = arith.mulf %328, %299 : vector<2x32xf32>
    %332 = arith.mulf %327, %329 : vector<2x32xf32>
    %333 = arith.addf %331, %332 : vector<2x32xf32>
    %334 = math.tanh %333 : vector<2x32xf32>
    %335 = arith.mulf %330, %334 : vector<2x32xf32>
    %336 = vector.extract_strided_slice %335 {offsets = [0, 0], sizes = [2, 16], strides = [1, 1]} : vector<2x32xf32> to vector<2x16xf32>
    %c2_i32_122 = arith.constant 2 : i32
    %337 = arith.muli %c7_i32_114, %c2_i32_122 : i32
    %338 = arith.index_cast %337 : i32 to index
    %c0_123 = arith.constant 0 : index
    %339 = vector.load %arg21[%338, %c0_123] : memref<16x16xf32, #tpu.memory_space<vmem>>, vector<2x16xf32>
    tpu.vector_store %arg21[%338, %c0_123], %336 {strides = array<i32>} : memref<16x16xf32, #tpu.memory_space<vmem>>, vector<2x16xf32>,
    %340 = vector.extract_strided_slice %335 {offsets = [0, 16], sizes = [2, 16], strides = [1, 1]} : vector<2x32xf32> to vector<2x16xf32>
    %c2_i32_124 = arith.constant 2 : i32
    %341 = arith.muli %310, %c2_i32_124 : i32
    %342 = arith.index_cast %341 : i32 to index
    %c0_125 = arith.constant 0 : index
    %343 = vector.load %arg22[%342, %c0_125] : memref<16x16xf32, #tpu.memory_space<vmem>>, vector<2x16xf32>
    tpu.vector_store %arg22[%342, %c0_125], %340 {strides = array<i32>} : memref<16x16xf32, #tpu.memory_space<vmem>>, vector<2x16xf32>,
    %c8_i32 = arith.constant 8 : i32
    %c0_126 = arith.constant 0 : index
    %c0_127 = arith.constant 0 : index
    %344 = vector.load %arg21[%c0_126, %c0_127] : memref<16x16xf32, #tpu.memory_space<vmem>>, vector<16x16xf32>
    %c0_128 = arith.constant 0 : index
    %c0_129 = arith.constant 0 : index
    %345 = vector.load %arg22[%c0_128, %c0_129] : memref<16x16xf32, #tpu.memory_space<vmem>>, vector<16x16xf32>
    %346 = tpu.concatenate %344, %345 in 1 : vector<16x16xf32>, vector<16x16xf32> -> vector<16x32xf32>
    %347 = arith.truncf %346 : vector<16x32xf32> to vector<16x32xbf16>
    %c0_130 = arith.constant 0 : index
    %c0_131 = arith.constant 0 : index
    %348 = vector.load %arg8[%c0_130, %c0_131] : memref<32x96xbf16, #tpu.memory_space<vmem>>, vector<32x96xbf16>
    %cst_132 = arith.constant dense<0.000000e+00> : vector<16x96xf32>
    %349 = tpu.matmul %347, %348, %cst_132 {dimension_numbers = #tpu.dot_dimension_numbers<[1], [0], [0], [1], [0, 0, 1, 1], [], []>} : vector<16x32xbf16>, vector<32x96xbf16>, vector<16x96xf32> -> vector<16x96xf32>
    %350 = vector.extract_strided_slice %349 {offsets = [0, 0], sizes = [16, 32], strides = [1, 1]} : vector<16x96xf32> to vector<16x32xf32>
    %351 = arith.truncf %350 : vector<16x32xf32> to vector<16x32xbf16>
    %352 = vector.extract_strided_slice %349 {offsets = [0, 32], sizes = [16, 32], strides = [1, 1]} : vector<16x96xf32> to vector<16x32xf32>
    %353 = arith.truncf %352 : vector<16x32xf32> to vector<16x32xbf16>
    %354 = vector.extract_strided_slice %349 {offsets = [0, 64], sizes = [16, 32], strides = [1, 1]} : vector<16x96xf32> to vector<16x32xf32>
    %355 = arith.truncf %354 : vector<16x32xf32> to vector<16x32xbf16>
    "tpu.trace_start"() <{level = 10 : i32, message = "td,sd->ts"}> : () -> ()
    %cst_133 = arith.constant dense<0.000000e+00> : vector<16x16xf32>
    %356 = tpu.matmul %351, %353, %cst_133 {dimension_numbers = #tpu.dot_dimension_numbers<[1], [1], [0], [0], [0, 0, 1, 0], [], []>} : vector<16x32xbf16>, vector<16x32xbf16>, vector<16x16xf32> -> vector<16x16xf32>
    "tpu.trace_stop"() : () -> ()
    %cst_134 = arith.constant 0.176776692 : f32
    %357 = vector.broadcast %cst_134 : f32 to vector<16x16xf32>
    %358 = arith.mulf %356, %357 : vector<16x16xf32>
    %359 = tpu.iota {dimensions = array<i32: 0>} : vector<16x16xi32>
    %360 = tpu.iota {dimensions = array<i32: 1>} : vector<16x16xi32>
    %c2_i32_135 = arith.constant 2 : i32
    %c0_i32_136 = arith.constant 0 : i32
    %361 = arith.cmpi eq, %c2_i32_135, %c0_i32_136 : i32
    %c1_i32_137 = arith.constant 1 : i32
    %362 = arith.select %361, %c1_i32_137, %c2_i32_135 : i32
    %363 = vector.broadcast %362 : i32 to vector<16x16xi32>
    %364 = arith.remsi %359, %363 : vector<16x16xi32>
    %c0_i32_138 = arith.constant 0 : i32
    %365 = vector.broadcast %c0_i32_138 : i32 to vector<16x16xi32>
    %366 = arith.cmpi ne, %364, %365 : vector<16x16xi32>
    %c0_i32_139 = arith.constant 0 : i32
    %367 = vector.broadcast %c0_i32_139 : i32 to vector<16x16xi32>
    %368 = arith.cmpi slt, %364, %367 : vector<16x16xi32>
    %c0_i32_140 = arith.constant 0 : i32
    %369 = arith.cmpi slt, %362, %c0_i32_140 : i32
    %370 = vector.broadcast %369 : i1 to vector<16x16xi1>
    %371 = vector.broadcast %370 : vector<16x16xi1> to vector<16x16xi1>
    %372 = arith.xori %368, %371 : vector<16x16xi1>
    %373 = arith.andi %372, %366 : vector<16x16xi1>
    %374 = vector.broadcast %362 : i32 to vector<16x16xi32>
    %375 = arith.addi %364, %374 : vector<16x16xi32>
    %376 = arith.select %373, %375, %364 : vector<16x16xi1>, vector<16x16xi32>
    %c2_i32_141 = arith.constant 2 : i32
    %c0_i32_142 = arith.constant 0 : i32
    %377 = arith.cmpi eq, %c2_i32_141, %c0_i32_142 : i32
    %c1_i32_143 = arith.constant 1 : i32
    %378 = arith.select %377, %c1_i32_143, %c2_i32_141 : i32
    %379 = vector.broadcast %378 : i32 to vector<16x16xi32>
    %380 = arith.remsi %360, %379 : vector<16x16xi32>
    %c0_i32_144 = arith.constant 0 : i32
    %381 = vector.broadcast %c0_i32_144 : i32 to vector<16x16xi32>
    %382 = arith.cmpi ne, %380, %381 : vector<16x16xi32>
    %c0_i32_145 = arith.constant 0 : i32
    %383 = vector.broadcast %c0_i32_145 : i32 to vector<16x16xi32>
    %384 = arith.cmpi slt, %380, %383 : vector<16x16xi32>
    %c0_i32_146 = arith.constant 0 : i32
    %385 = arith.cmpi slt, %378, %c0_i32_146 : i32
    %386 = vector.broadcast %385 : i1 to vector<16x16xi1>
    %387 = vector.broadcast %386 : vector<16x16xi1> to vector<16x16xi1>
    %388 = arith.xori %384, %387 : vector<16x16xi1>
    %389 = arith.andi %388, %382 : vector<16x16xi1>
    %390 = vector.broadcast %378 : i32 to vector<16x16xi32>
    %391 = arith.addi %380, %390 : vector<16x16xi32>
    %392 = arith.select %389, %391, %380 : vector<16x16xi1>, vector<16x16xi32>
    %393 = arith.cmpi eq, %376, %392 : vector<16x16xi32>
    %c0_147 = arith.constant 0 : index
    %c0_148 = arith.constant 0 : index
    %394 = vector.load %arg2[%c0_147, %c0_148] : memref<1x16xi32, #tpu.memory_space<vmem>>, vector<1x16xi32>
    %c0_i32_149 = arith.constant 0 : i32
    %395 = vector.broadcast %c0_i32_149 : i32 to vector<1x16xi32>
    %396 = arith.cmpi ne, %394, %395 : vector<1x16xi32>
    %397 = vector.broadcast %396 : vector<1x16xi1> to vector<16x16xi1>
    %398 = arith.andi %393, %397 : vector<16x16xi1>
    %cst_150 = arith.constant -1.000000e+30 : f32
    %399 = vector.broadcast %cst_150 : f32 to vector<16x16xf32>
    %400 = arith.select %398, %358, %399 : vector<16x16xi1>, vector<16x16xf32>
    %cst_151 = arith.constant dense<0xFF800000> : vector<16xf32>
    %401 = vector.multi_reduction <maximumf>, %400, %cst_151 [1] : vector<16x16xf32> to vector<16xf32>
    %402 = vector.shape_cast %401 : vector<16xf32> to vector<16x1xf32>
    %403 = vector.broadcast %402 : vector<16x1xf32> to vector<16x16xf32>
    %404 = arith.subf %400, %403 : vector<16x16xf32>
    %405 = math.exp %404 : vector<16x16xf32>
    %cst_152 = arith.constant dense<0.000000e+00> : vector<16xf32>
    %406 = vector.multi_reduction <add>, %405, %cst_152 [1] : vector<16x16xf32> to vector<16xf32>
    %407 = vector.shape_cast %406 : vector<16xf32> to vector<16x1xf32>
    %408 = tpu.reciprocal %407 {approx = true} : vector<16x1xf32> -> vector<16x1xf32>
    %409 = vector.broadcast %408 : vector<16x1xf32> to vector<16x16xf32>
    %410 = arith.mulf %405, %409 : vector<16x16xf32>
    %411 = arith.truncf %410 : vector<16x16xf32> to vector<16x16xbf16>
    %cst_153 = arith.constant dense<0.000000e+00> : vector<16x32xf32>
    %412 = tpu.matmul %411, %355, %cst_153 {dimension_numbers = #tpu.dot_dimension_numbers<[1], [0], [0], [1], [0, 0, 1, 1], [], []>} : vector<16x16xbf16>, vector<16x32xbf16>, vector<16x32xf32> -> vector<16x32xf32>
    %c0_154 = arith.constant 0 : index
    %c0_155 = arith.constant 0 : index
    %413 = vector.load %arg9[%c0_154, %c0_155] : memref<8x32xf32, #tpu.memory_space<vmem>>, vector<8x32xf32>
    %c0_156 = arith.constant 0 : index
    %c0_157 = arith.constant 0 : index
    %414 = vector.load %arg10[%c0_156, %c0_157] : memref<8x32xf32, #tpu.memory_space<vmem>>, vector<8x32xf32>
    %415 = vector.extract_strided_slice %413 {offsets = [0, 0], sizes = [1, 32], strides = [1, 1]} : vector<8x32xf32> to vector<1x32xf32>
    %416 = vector.extract_strided_slice %414 {offsets = [0, 0], sizes = [1, 32], strides = [1, 1]} : vector<8x32xf32> to vector<1x32xf32>
    %417 = arith.addf %415, %416 : vector<1x32xf32>
    %418 = vector.broadcast %417 : vector<1x32xf32> to vector<16x32xf32>
    %419 = arith.mulf %418, %412 : vector<16x32xf32>
    %cst_158 = arith.constant 0.000000e+00 : f32
    %420 = vector.broadcast %cst_158 : f32 to vector<2x32xf32>
    %421 = vector.extract_strided_slice %412 {offsets = [0, 0], sizes = [14, 32], strides = [1, 1]} : vector<16x32xf32> to vector<14x32xf32>
    %422 = tpu.concatenate %420, %421 in 0 : vector<2x32xf32>, vector<14x32xf32> -> vector<16x32xf32>
    %423 = vector.extract_strided_slice %412 {offsets = [2, 0], sizes = [14, 32], strides = [1, 1]} : vector<16x32xf32> to vector<14x32xf32>
    %424 = tpu.concatenate %423, %420 in 0 : vector<14x32xf32>, vector<2x32xf32> -> vector<16x32xf32>
    %425 = vector.extract_strided_slice %413 {offsets = [1, 0], sizes = [1, 32], strides = [1, 1]} : vector<8x32xf32> to vector<1x32xf32>
    %426 = vector.broadcast %425 : vector<1x32xf32> to vector<16x32xf32>
    %427 = arith.mulf %426, %422 : vector<16x32xf32>
    %428 = arith.addf %419, %427 : vector<16x32xf32>
    %429 = vector.extract_strided_slice %414 {offsets = [1, 0], sizes = [1, 32], strides = [1, 1]} : vector<8x32xf32> to vector<1x32xf32>
    %430 = vector.broadcast %429 : vector<1x32xf32> to vector<16x32xf32>
    %431 = arith.mulf %430, %424 : vector<16x32xf32>
    %432 = arith.addf %428, %431 : vector<16x32xf32>
    %cst_159 = arith.constant 0.000000e+00 : f32
    %433 = vector.broadcast %cst_159 : f32 to vector<4x32xf32>
    %434 = vector.extract_strided_slice %412 {offsets = [0, 0], sizes = [12, 32], strides = [1, 1]} : vector<16x32xf32> to vector<12x32xf32>
    %435 = tpu.concatenate %433, %434 in 0 : vector<4x32xf32>, vector<12x32xf32> -> vector<16x32xf32>
    %436 = vector.extract_strided_slice %412 {offsets = [4, 0], sizes = [12, 32], strides = [1, 1]} : vector<16x32xf32> to vector<12x32xf32>
    %437 = tpu.concatenate %436, %433 in 0 : vector<12x32xf32>, vector<4x32xf32> -> vector<16x32xf32>
    %438 = vector.extract_strided_slice %413 {offsets = [2, 0], sizes = [1, 32], strides = [1, 1]} : vector<8x32xf32> to vector<1x32xf32>
    %439 = vector.broadcast %438 : vector<1x32xf32> to vector<16x32xf32>
    %440 = arith.mulf %439, %435 : vector<16x32xf32>
    %441 = arith.addf %432, %440 : vector<16x32xf32>
    %442 = vector.extract_strided_slice %414 {offsets = [2, 0], sizes = [1, 32], strides = [1, 1]} : vector<8x32xf32> to vector<1x32xf32>
    %443 = vector.broadcast %442 : vector<1x32xf32> to vector<16x32xf32>
    %444 = arith.mulf %443, %437 : vector<16x32xf32>
    %445 = arith.addf %441, %444 : vector<16x32xf32>
    %cst_160 = arith.constant 0.000000e+00 : f32
    %446 = vector.broadcast %cst_160 : f32 to vector<6x32xf32>
    %447 = vector.extract_strided_slice %412 {offsets = [0, 0], sizes = [10, 32], strides = [1, 1]} : vector<16x32xf32> to vector<10x32xf32>
    %448 = tpu.concatenate %446, %447 in 0 : vector<6x32xf32>, vector<10x32xf32> -> vector<16x32xf32>
    %449 = vector.extract_strided_slice %412 {offsets = [6, 0], sizes = [10, 32], strides = [1, 1]} : vector<16x32xf32> to vector<10x32xf32>
    %450 = tpu.concatenate %449, %446 in 0 : vector<10x32xf32>, vector<6x32xf32> -> vector<16x32xf32>
    %451 = vector.extract_strided_slice %413 {offsets = [3, 0], sizes = [1, 32], strides = [1, 1]} : vector<8x32xf32> to vector<1x32xf32>
    %452 = vector.broadcast %451 : vector<1x32xf32> to vector<16x32xf32>
    %453 = arith.mulf %452, %448 : vector<16x32xf32>
    %454 = arith.addf %445, %453 : vector<16x32xf32>
    %455 = vector.extract_strided_slice %414 {offsets = [3, 0], sizes = [1, 32], strides = [1, 1]} : vector<8x32xf32> to vector<1x32xf32>
    %456 = vector.broadcast %455 : vector<1x32xf32> to vector<16x32xf32>
    %457 = arith.mulf %456, %450 : vector<16x32xf32>
    %458 = arith.addf %454, %457 : vector<16x32xf32>
    %cst_161 = arith.constant 0.000000e+00 : f32
    %459 = vector.broadcast %cst_161 : f32 to vector<8x32xf32>
    %460 = vector.extract_strided_slice %412 {offsets = [0, 0], sizes = [8, 32], strides = [1, 1]} : vector<16x32xf32> to vector<8x32xf32>
    %461 = tpu.concatenate %459, %460 in 0 : vector<8x32xf32>, vector<8x32xf32> -> vector<16x32xf32>
    %462 = vector.extract_strided_slice %412 {offsets = [8, 0], sizes = [8, 32], strides = [1, 1]} : vector<16x32xf32> to vector<8x32xf32>
    %463 = tpu.concatenate %462, %459 in 0 : vector<8x32xf32>, vector<8x32xf32> -> vector<16x32xf32>
    %464 = vector.extract_strided_slice %413 {offsets = [4, 0], sizes = [1, 32], strides = [1, 1]} : vector<8x32xf32> to vector<1x32xf32>
    %465 = vector.broadcast %464 : vector<1x32xf32> to vector<16x32xf32>
    %466 = arith.mulf %465, %461 : vector<16x32xf32>
    %467 = arith.addf %458, %466 : vector<16x32xf32>
    %468 = vector.extract_strided_slice %414 {offsets = [4, 0], sizes = [1, 32], strides = [1, 1]} : vector<8x32xf32> to vector<1x32xf32>
    %469 = vector.broadcast %468 : vector<1x32xf32> to vector<16x32xf32>
    %470 = arith.mulf %469, %463 : vector<16x32xf32>
    %471 = arith.addf %467, %470 : vector<16x32xf32>
    %cst_162 = arith.constant 0.000000e+00 : f32
    %472 = vector.broadcast %cst_162 : f32 to vector<10x32xf32>
    %473 = vector.extract_strided_slice %412 {offsets = [0, 0], sizes = [6, 32], strides = [1, 1]} : vector<16x32xf32> to vector<6x32xf32>
    %474 = tpu.concatenate %472, %473 in 0 : vector<10x32xf32>, vector<6x32xf32> -> vector<16x32xf32>
    %475 = vector.extract_strided_slice %412 {offsets = [10, 0], sizes = [6, 32], strides = [1, 1]} : vector<16x32xf32> to vector<6x32xf32>
    %476 = tpu.concatenate %475, %472 in 0 : vector<6x32xf32>, vector<10x32xf32> -> vector<16x32xf32>
    %477 = vector.extract_strided_slice %413 {offsets = [5, 0], sizes = [1, 32], strides = [1, 1]} : vector<8x32xf32> to vector<1x32xf32>
    %478 = vector.broadcast %477 : vector<1x32xf32> to vector<16x32xf32>
    %479 = arith.mulf %478, %474 : vector<16x32xf32>
    %480 = arith.addf %471, %479 : vector<16x32xf32>
    %481 = vector.extract_strided_slice %414 {offsets = [5, 0], sizes = [1, 32], strides = [1, 1]} : vector<8x32xf32> to vector<1x32xf32>
    %482 = vector.broadcast %481 : vector<1x32xf32> to vector<16x32xf32>
    %483 = arith.mulf %482, %476 : vector<16x32xf32>
    %484 = arith.addf %480, %483 : vector<16x32xf32>
    %cst_163 = arith.constant 0.000000e+00 : f32
    %485 = vector.broadcast %cst_163 : f32 to vector<12x32xf32>
    %486 = vector.extract_strided_slice %412 {offsets = [0, 0], sizes = [4, 32], strides = [1, 1]} : vector<16x32xf32> to vector<4x32xf32>
    %487 = tpu.concatenate %485, %486 in 0 : vector<12x32xf32>, vector<4x32xf32> -> vector<16x32xf32>
    %488 = vector.extract_strided_slice %412 {offsets = [12, 0], sizes = [4, 32], strides = [1, 1]} : vector<16x32xf32> to vector<4x32xf32>
    %489 = tpu.concatenate %488, %485 in 0 : vector<4x32xf32>, vector<12x32xf32> -> vector<16x32xf32>
    %490 = vector.extract_strided_slice %413 {offsets = [6, 0], sizes = [1, 32], strides = [1, 1]} : vector<8x32xf32> to vector<1x32xf32>
    %491 = vector.broadcast %490 : vector<1x32xf32> to vector<16x32xf32>
    %492 = arith.mulf %491, %487 : vector<16x32xf32>
    %493 = arith.addf %484, %492 : vector<16x32xf32>
    %494 = vector.extract_strided_slice %414 {offsets = [6, 0], sizes = [1, 32], strides = [1, 1]} : vector<8x32xf32> to vector<1x32xf32>
    %495 = vector.broadcast %494 : vector<1x32xf32> to vector<16x32xf32>
    %496 = arith.mulf %495, %489 : vector<16x32xf32>
    %497 = arith.addf %493, %496 : vector<16x32xf32>
    %cst_164 = arith.constant 0.000000e+00 : f32
    %498 = vector.broadcast %cst_164 : f32 to vector<14x32xf32>
    %499 = vector.extract_strided_slice %412 {offsets = [0, 0], sizes = [2, 32], strides = [1, 1]} : vector<16x32xf32> to vector<2x32xf32>
    %500 = tpu.concatenate %498, %499 in 0 : vector<14x32xf32>, vector<2x32xf32> -> vector<16x32xf32>
    %501 = vector.extract_strided_slice %412 {offsets = [14, 0], sizes = [2, 32], strides = [1, 1]} : vector<16x32xf32> to vector<2x32xf32>
    %502 = tpu.concatenate %501, %498 in 0 : vector<2x32xf32>, vector<14x32xf32> -> vector<16x32xf32>
    %503 = vector.extract_strided_slice %413 {offsets = [7, 0], sizes = [1, 32], strides = [1, 1]} : vector<8x32xf32> to vector<1x32xf32>
    %504 = vector.broadcast %503 : vector<1x32xf32> to vector<16x32xf32>
    %505 = arith.mulf %504, %500 : vector<16x32xf32>
    %506 = arith.addf %497, %505 : vector<16x32xf32>
    %507 = vector.extract_strided_slice %414 {offsets = [7, 0], sizes = [1, 32], strides = [1, 1]} : vector<8x32xf32> to vector<1x32xf32>
    %508 = vector.broadcast %507 : vector<1x32xf32> to vector<16x32xf32>
    %509 = arith.mulf %508, %502 : vector<16x32xf32>
    %510 = arith.addf %506, %509 : vector<16x32xf32>
    %c0_165 = arith.constant 0 : index
    %c0_166 = arith.constant 0 : index
    %511 = vector.load %arg11[%c0_165, %c0_166] : memref<1x32xf32, #tpu.memory_space<vmem>>, vector<1x32xf32>
    %512 = vector.broadcast %511 : vector<1x32xf32> to vector<16x32xf32>
    %513 = arith.mulf %412, %512 : vector<16x32xf32>
    %514 = arith.addf %510, %513 : vector<16x32xf32>
    %515 = arith.mulf %514, %514 : vector<16x32xf32>
    %516 = arith.mulf %514, %515 : vector<16x32xf32>
    %cst_167 = arith.constant 4.471500e-02 : f32
    %517 = vector.broadcast %cst_167 : f32 to vector<16x32xf32>
    %518 = arith.mulf %517, %516 : vector<16x32xf32>
    %519 = arith.addf %514, %518 : vector<16x32xf32>
    %cst_168 = arith.constant 0.797884583 : f32
    %520 = vector.broadcast %cst_168 : f32 to vector<16x32xf32>
    %521 = arith.mulf %520, %519 : vector<16x32xf32>
    %522 = math.tanh %521 : vector<16x32xf32>
    %cst_169 = arith.constant 1.000000e+00 : f32
    %523 = vector.broadcast %cst_169 : f32 to vector<16x32xf32>
    %524 = arith.addf %523, %522 : vector<16x32xf32>
    %cst_170 = arith.constant 5.000000e-01 : f32
    %525 = vector.broadcast %cst_170 : f32 to vector<16x32xf32>
    %526 = arith.mulf %525, %524 : vector<16x32xf32>
    %527 = arith.mulf %514, %526 : vector<16x32xf32>
    %528 = arith.truncf %527 : vector<16x32xf32> to vector<16x32xbf16>
    %c0_171 = arith.constant 0 : index
    %c0_172 = arith.constant 0 : index
    %529 = vector.load %arg12[%c0_171, %c0_172] : memref<32x64xbf16, #tpu.memory_space<vmem>>, vector<32x64xbf16>
    %cst_173 = arith.constant dense<0.000000e+00> : vector<16x64xf32>
    %530 = tpu.matmul %528, %529, %cst_173 {dimension_numbers = #tpu.dot_dimension_numbers<[1], [0], [0], [1], [0, 0, 1, 1], [], []>} : vector<16x32xbf16>, vector<32x64xbf16>, vector<16x64xf32> -> vector<16x64xf32>
    %c0_174 = arith.constant 0 : index
    %c0_175 = arith.constant 0 : index
    %531 = vector.load %arg13[%c0_174, %c0_175] : memref<1x64xf32, #tpu.memory_space<vmem>>, vector<1x64xf32>
    %532 = vector.broadcast %531 : vector<1x64xf32> to vector<16x64xf32>
    %533 = arith.addf %530, %532 : vector<16x64xf32>
    %534 = vector.extract_strided_slice %533 {offsets = [0, 0], sizes = [16, 32], strides = [1, 1]} : vector<16x64xf32> to vector<16x32xf32>
    %535 = vector.extract_strided_slice %533 {offsets = [0, 32], sizes = [16, 32], strides = [1, 1]} : vector<16x64xf32> to vector<16x32xf32>
    %536 = arith.negf %535 : vector<16x32xf32>
    %537 = math.exp %536 : vector<16x32xf32>
    %cst_176 = arith.constant 1.000000e+00 : f32
    %538 = vector.broadcast %cst_176 : f32 to vector<16x32xf32>
    %539 = arith.addf %538, %537 : vector<16x32xf32>
    %540 = arith.divf %538, %539 : vector<16x32xf32>
    %541 = arith.mulf %534, %540 : vector<16x32xf32>
    %542 = arith.truncf %541 : vector<16x32xf32> to vector<16x32xbf16>
    %c0_177 = arith.constant 0 : index
    %c0_178 = arith.constant 0 : index
    %543 = vector.load %arg14[%c0_177, %c0_178] : memref<32x128xbf16, #tpu.memory_space<vmem>>, vector<32x128xbf16>
    %cst_179 = arith.constant dense<0.000000e+00> : vector<16x128xf32>
    %544 = tpu.matmul %542, %543, %cst_179 {dimension_numbers = #tpu.dot_dimension_numbers<[1], [0], [0], [1], [0, 0, 1, 1], [], []>} : vector<16x32xbf16>, vector<32x128xbf16>, vector<16x128xf32> -> vector<16x128xf32>
    %c0_180 = arith.constant 0 : index
    %c0_181 = arith.constant 0 : index
    %545 = vector.load %arg16[%c0_180, %c0_181] : memref<1x128xf32, #tpu.memory_space<vmem>>, vector<1x128xf32>
    %546 = vector.broadcast %545 : vector<1x128xf32> to vector<16x128xf32>
    %547 = arith.addf %544, %546 : vector<16x128xf32>
    %c0_182 = arith.constant 0 : index
    %c0_183 = arith.constant 0 : index
    %548 = vector.load %arg23[%c0_182, %c0_183] : memref<16x128xf32, #tpu.memory_space<vmem>>, vector<16x128xf32>
    tpu.vector_store %arg23[%c0_182, %c0_183], %547 {strides = array<i32>} : memref<16x128xf32, #tpu.memory_space<vmem>>, vector<16x128xf32>,
    %c0_184 = arith.constant 0 : index
    %c0_185 = arith.constant 0 : index
    %549 = vector.load %arg15[%c0_184, %c0_185] : memref<32x128xbf16, #tpu.memory_space<vmem>>, vector<32x128xbf16>
    %cst_186 = arith.constant 0.000000e+00 : f32
    %550 = vector.broadcast %cst_186 : f32 to vector<2x32xf32>
    %c0_i32_187 = arith.constant 0 : i32
    %c2_i32_188 = arith.constant 2 : i32
    %551 = arith.muli %c0_i32_187, %c2_i32_188 : i32
    %552 = arith.index_cast %551 : i32 to index
    %c0_189 = arith.constant 0 : index
    %553 = vector.load %arg23[%552, %c0_189] : memref<16x128xf32, #tpu.memory_space<vmem>>, vector<2x128xf32>
    %554 = arith.truncf %550 : vector<2x32xf32> to vector<2x32xbf16>
    %cst_190 = arith.constant dense<0.000000e+00> : vector<2x128xf32>
    %555 = tpu.matmul %554, %549, %cst_190 {dimension_numbers = #tpu.dot_dimension_numbers<[1], [0], [0], [1], [0, 0, 1, 1], [], []>} : vector<2x32xbf16>, vector<32x128xbf16>, vector<2x128xf32> -> vector<2x128xf32>
    %556 = arith.addf %553, %555 : vector<2x128xf32>
    %557 = arith.negf %556 : vector<2x128xf32>
    %558 = math.exp %557 : vector<2x128xf32>
    %cst_191 = arith.constant 1.000000e+00 : f32
    %559 = vector.broadcast %cst_191 : f32 to vector<2x128xf32>
    %560 = arith.addf %559, %558 : vector<2x128xf32>
    %561 = arith.divf %559, %560 : vector<2x128xf32>
    %562 = math.tanh %556 : vector<2x128xf32>
    %563 = vector.extract_strided_slice %561 {offsets = [0, 0], sizes = [2, 32], strides = [1, 1]} : vector<2x128xf32> to vector<2x32xf32>
    %564 = vector.extract_strided_slice %561 {offsets = [0, 32], sizes = [2, 32], strides = [1, 1]} : vector<2x128xf32> to vector<2x32xf32>
    %565 = vector.extract_strided_slice %562 {offsets = [0, 64], sizes = [2, 32], strides = [1, 1]} : vector<2x128xf32> to vector<2x32xf32>
    %566 = vector.extract_strided_slice %561 {offsets = [0, 96], sizes = [2, 32], strides = [1, 1]} : vector<2x128xf32> to vector<2x32xf32>
    %567 = arith.mulf %564, %550 : vector<2x32xf32>
    %568 = arith.mulf %563, %565 : vector<2x32xf32>
    %569 = arith.addf %567, %568 : vector<2x32xf32>
    %570 = math.tanh %569 : vector<2x32xf32>
    %571 = arith.mulf %566, %570 : vector<2x32xf32>
    %c2_i32_192 = arith.constant 2 : i32
    %572 = arith.muli %c0_i32_187, %c2_i32_192 : i32
    %573 = arith.index_cast %572 : i32 to index
    %c0_193 = arith.constant 0 : index
    %574 = vector.load %arg24[%573, %c0_193] : memref<16x32xf32, #tpu.memory_space<vmem>>, vector<2x32xf32>
    tpu.vector_store %arg24[%573, %c0_193], %571 {strides = array<i32>} : memref<16x32xf32, #tpu.memory_space<vmem>>, vector<2x32xf32>,
    %c1_i32_194 = arith.constant 1 : i32
    %c2_i32_195 = arith.constant 2 : i32
    %575 = arith.muli %c1_i32_194, %c2_i32_195 : i32
    %576 = arith.index_cast %575 : i32 to index
    %c0_196 = arith.constant 0 : index
    %577 = vector.load %arg23[%576, %c0_196] : memref<16x128xf32, #tpu.memory_space<vmem>>, vector<2x128xf32>
    %578 = arith.truncf %571 : vector<2x32xf32> to vector<2x32xbf16>
    %cst_197 = arith.constant dense<0.000000e+00> : vector<2x128xf32>
    %579 = tpu.matmul %578, %549, %cst_197 {dimension_numbers = #tpu.dot_dimension_numbers<[1], [0], [0], [1], [0, 0, 1, 1], [], []>} : vector<2x32xbf16>, vector<32x128xbf16>, vector<2x128xf32> -> vector<2x128xf32>
    %580 = arith.addf %577, %579 : vector<2x128xf32>
    %581 = arith.negf %580 : vector<2x128xf32>
    %582 = math.exp %581 : vector<2x128xf32>
    %cst_198 = arith.constant 1.000000e+00 : f32
    %583 = vector.broadcast %cst_198 : f32 to vector<2x128xf32>
    %584 = arith.addf %583, %582 : vector<2x128xf32>
    %585 = arith.divf %583, %584 : vector<2x128xf32>
    %586 = math.tanh %580 : vector<2x128xf32>
    %587 = vector.extract_strided_slice %585 {offsets = [0, 0], sizes = [2, 32], strides = [1, 1]} : vector<2x128xf32> to vector<2x32xf32>
    %588 = vector.extract_strided_slice %585 {offsets = [0, 32], sizes = [2, 32], strides = [1, 1]} : vector<2x128xf32> to vector<2x32xf32>
    %589 = vector.extract_strided_slice %586 {offsets = [0, 64], sizes = [2, 32], strides = [1, 1]} : vector<2x128xf32> to vector<2x32xf32>
    %590 = vector.extract_strided_slice %585 {offsets = [0, 96], sizes = [2, 32], strides = [1, 1]} : vector<2x128xf32> to vector<2x32xf32>
    %591 = arith.mulf %588, %569 : vector<2x32xf32>
    %592 = arith.mulf %587, %589 : vector<2x32xf32>
    %593 = arith.addf %591, %592 : vector<2x32xf32>
    %594 = math.tanh %593 : vector<2x32xf32>
    %595 = arith.mulf %590, %594 : vector<2x32xf32>
    %c2_i32_199 = arith.constant 2 : i32
    %596 = arith.muli %c1_i32_194, %c2_i32_199 : i32
    %597 = arith.index_cast %596 : i32 to index
    %c0_200 = arith.constant 0 : index
    %598 = vector.load %arg24[%597, %c0_200] : memref<16x32xf32, #tpu.memory_space<vmem>>, vector<2x32xf32>
    tpu.vector_store %arg24[%597, %c0_200], %595 {strides = array<i32>} : memref<16x32xf32, #tpu.memory_space<vmem>>, vector<2x32xf32>,
    %c2_i32_201 = arith.constant 2 : i32
    %c2_i32_202 = arith.constant 2 : i32
    %599 = arith.muli %c2_i32_201, %c2_i32_202 : i32
    %600 = arith.index_cast %599 : i32 to index
    %c0_203 = arith.constant 0 : index
    %601 = vector.load %arg23[%600, %c0_203] : memref<16x128xf32, #tpu.memory_space<vmem>>, vector<2x128xf32>
    %602 = arith.truncf %595 : vector<2x32xf32> to vector<2x32xbf16>
    %cst_204 = arith.constant dense<0.000000e+00> : vector<2x128xf32>
    %603 = tpu.matmul %602, %549, %cst_204 {dimension_numbers = #tpu.dot_dimension_numbers<[1], [0], [0], [1], [0, 0, 1, 1], [], []>} : vector<2x32xbf16>, vector<32x128xbf16>, vector<2x128xf32> -> vector<2x128xf32>
    %604 = arith.addf %601, %603 : vector<2x128xf32>
    %605 = arith.negf %604 : vector<2x128xf32>
    %606 = math.exp %605 : vector<2x128xf32>
    %cst_205 = arith.constant 1.000000e+00 : f32
    %607 = vector.broadcast %cst_205 : f32 to vector<2x128xf32>
    %608 = arith.addf %607, %606 : vector<2x128xf32>
    %609 = arith.divf %607, %608 : vector<2x128xf32>
    %610 = math.tanh %604 : vector<2x128xf32>
    %611 = vector.extract_strided_slice %609 {offsets = [0, 0], sizes = [2, 32], strides = [1, 1]} : vector<2x128xf32> to vector<2x32xf32>
    %612 = vector.extract_strided_slice %609 {offsets = [0, 32], sizes = [2, 32], strides = [1, 1]} : vector<2x128xf32> to vector<2x32xf32>
    %613 = vector.extract_strided_slice %610 {offsets = [0, 64], sizes = [2, 32], strides = [1, 1]} : vector<2x128xf32> to vector<2x32xf32>
    %614 = vector.extract_strided_slice %609 {offsets = [0, 96], sizes = [2, 32], strides = [1, 1]} : vector<2x128xf32> to vector<2x32xf32>
    %615 = arith.mulf %612, %593 : vector<2x32xf32>
    %616 = arith.mulf %611, %613 : vector<2x32xf32>
    %617 = arith.addf %615, %616 : vector<2x32xf32>
    %618 = math.tanh %617 : vector<2x32xf32>
    %619 = arith.mulf %614, %618 : vector<2x32xf32>
    %c2_i32_206 = arith.constant 2 : i32
    %620 = arith.muli %c2_i32_201, %c2_i32_206 : i32
    %621 = arith.index_cast %620 : i32 to index
    %c0_207 = arith.constant 0 : index
    %622 = vector.load %arg24[%621, %c0_207] : memref<16x32xf32, #tpu.memory_space<vmem>>, vector<2x32xf32>
    tpu.vector_store %arg24[%621, %c0_207], %619 {strides = array<i32>} : memref<16x32xf32, #tpu.memory_space<vmem>>, vector<2x32xf32>,
    %c3_i32_208 = arith.constant 3 : i32
    %c2_i32_209 = arith.constant 2 : i32
    %623 = arith.muli %c3_i32_208, %c2_i32_209 : i32
    %624 = arith.index_cast %623 : i32 to index
    %c0_210 = arith.constant 0 : index
    %625 = vector.load %arg23[%624, %c0_210] : memref<16x128xf32, #tpu.memory_space<vmem>>, vector<2x128xf32>
    %626 = arith.truncf %619 : vector<2x32xf32> to vector<2x32xbf16>
    %cst_211 = arith.constant dense<0.000000e+00> : vector<2x128xf32>
    %627 = tpu.matmul %626, %549, %cst_211 {dimension_numbers = #tpu.dot_dimension_numbers<[1], [0], [0], [1], [0, 0, 1, 1], [], []>} : vector<2x32xbf16>, vector<32x128xbf16>, vector<2x128xf32> -> vector<2x128xf32>
    %628 = arith.addf %625, %627 : vector<2x128xf32>
    %629 = arith.negf %628 : vector<2x128xf32>
    %630 = math.exp %629 : vector<2x128xf32>
    %cst_212 = arith.constant 1.000000e+00 : f32
    %631 = vector.broadcast %cst_212 : f32 to vector<2x128xf32>
    %632 = arith.addf %631, %630 : vector<2x128xf32>
    %633 = arith.divf %631, %632 : vector<2x128xf32>
    %634 = math.tanh %628 : vector<2x128xf32>
    %635 = vector.extract_strided_slice %633 {offsets = [0, 0], sizes = [2, 32], strides = [1, 1]} : vector<2x128xf32> to vector<2x32xf32>
    %636 = vector.extract_strided_slice %633 {offsets = [0, 32], sizes = [2, 32], strides = [1, 1]} : vector<2x128xf32> to vector<2x32xf32>
    %637 = vector.extract_strided_slice %634 {offsets = [0, 64], sizes = [2, 32], strides = [1, 1]} : vector<2x128xf32> to vector<2x32xf32>
    %638 = vector.extract_strided_slice %633 {offsets = [0, 96], sizes = [2, 32], strides = [1, 1]} : vector<2x128xf32> to vector<2x32xf32>
    %639 = arith.mulf %636, %617 : vector<2x32xf32>
    %640 = arith.mulf %635, %637 : vector<2x32xf32>
    %641 = arith.addf %639, %640 : vector<2x32xf32>
    %642 = math.tanh %641 : vector<2x32xf32>
    %643 = arith.mulf %638, %642 : vector<2x32xf32>
    %c2_i32_213 = arith.constant 2 : i32
    %644 = arith.muli %c3_i32_208, %c2_i32_213 : i32
    %645 = arith.index_cast %644 : i32 to index
    %c0_214 = arith.constant 0 : index
    %646 = vector.load %arg24[%645, %c0_214] : memref<16x32xf32, #tpu.memory_space<vmem>>, vector<2x32xf32>
    tpu.vector_store %arg24[%645, %c0_214], %643 {strides = array<i32>} : memref<16x32xf32, #tpu.memory_space<vmem>>, vector<2x32xf32>,
    %c4_i32_215 = arith.constant 4 : i32
    %c2_i32_216 = arith.constant 2 : i32
    %647 = arith.muli %c4_i32_215, %c2_i32_216 : i32
    %648 = arith.index_cast %647 : i32 to index
    %c0_217 = arith.constant 0 : index
    %649 = vector.load %arg23[%648, %c0_217] : memref<16x128xf32, #tpu.memory_space<vmem>>, vector<2x128xf32>
    %650 = arith.truncf %643 : vector<2x32xf32> to vector<2x32xbf16>
    %cst_218 = arith.constant dense<0.000000e+00> : vector<2x128xf32>
    %651 = tpu.matmul %650, %549, %cst_218 {dimension_numbers = #tpu.dot_dimension_numbers<[1], [0], [0], [1], [0, 0, 1, 1], [], []>} : vector<2x32xbf16>, vector<32x128xbf16>, vector<2x128xf32> -> vector<2x128xf32>
    %652 = arith.addf %649, %651 : vector<2x128xf32>
    %653 = arith.negf %652 : vector<2x128xf32>
    %654 = math.exp %653 : vector<2x128xf32>
    %cst_219 = arith.constant 1.000000e+00 : f32
    %655 = vector.broadcast %cst_219 : f32 to vector<2x128xf32>
    %656 = arith.addf %655, %654 : vector<2x128xf32>
    %657 = arith.divf %655, %656 : vector<2x128xf32>
    %658 = math.tanh %652 : vector<2x128xf32>
    %659 = vector.extract_strided_slice %657 {offsets = [0, 0], sizes = [2, 32], strides = [1, 1]} : vector<2x128xf32> to vector<2x32xf32>
    %660 = vector.extract_strided_slice %657 {offsets = [0, 32], sizes = [2, 32], strides = [1, 1]} : vector<2x128xf32> to vector<2x32xf32>
    %661 = vector.extract_strided_slice %658 {offsets = [0, 64], sizes = [2, 32], strides = [1, 1]} : vector<2x128xf32> to vector<2x32xf32>
    %662 = vector.extract_strided_slice %657 {offsets = [0, 96], sizes = [2, 32], strides = [1, 1]} : vector<2x128xf32> to vector<2x32xf32>
    %663 = arith.mulf %660, %641 : vector<2x32xf32>
    %664 = arith.mulf %659, %661 : vector<2x32xf32>
    %665 = arith.addf %663, %664 : vector<2x32xf32>
    %666 = math.tanh %665 : vector<2x32xf32>
    %667 = arith.mulf %662, %666 : vector<2x32xf32>
    %c2_i32_220 = arith.constant 2 : i32
    %668 = arith.muli %c4_i32_215, %c2_i32_220 : i32
    %669 = arith.index_cast %668 : i32 to index
    %c0_221 = arith.constant 0 : index
    %670 = vector.load %arg24[%669, %c0_221] : memref<16x32xf32, #tpu.memory_space<vmem>>, vector<2x32xf32>
    tpu.vector_store %arg24[%669, %c0_221], %667 {strides = array<i32>} : memref<16x32xf32, #tpu.memory_space<vmem>>, vector<2x32xf32>,
    %c5_i32_222 = arith.constant 5 : i32
    %c2_i32_223 = arith.constant 2 : i32
    %671 = arith.muli %c5_i32_222, %c2_i32_223 : i32
    %672 = arith.index_cast %671 : i32 to index
    %c0_224 = arith.constant 0 : index
    %673 = vector.load %arg23[%672, %c0_224] : memref<16x128xf32, #tpu.memory_space<vmem>>, vector<2x128xf32>
    %674 = arith.truncf %667 : vector<2x32xf32> to vector<2x32xbf16>
    %cst_225 = arith.constant dense<0.000000e+00> : vector<2x128xf32>
    %675 = tpu.matmul %674, %549, %cst_225 {dimension_numbers = #tpu.dot_dimension_numbers<[1], [0], [0], [1], [0, 0, 1, 1], [], []>} : vector<2x32xbf16>, vector<32x128xbf16>, vector<2x128xf32> -> vector<2x128xf32>
    %676 = arith.addf %673, %675 : vector<2x128xf32>
    %677 = arith.negf %676 : vector<2x128xf32>
    %678 = math.exp %677 : vector<2x128xf32>
    %cst_226 = arith.constant 1.000000e+00 : f32
    %679 = vector.broadcast %cst_226 : f32 to vector<2x128xf32>
    %680 = arith.addf %679, %678 : vector<2x128xf32>
    %681 = arith.divf %679, %680 : vector<2x128xf32>
    %682 = math.tanh %676 : vector<2x128xf32>
    %683 = vector.extract_strided_slice %681 {offsets = [0, 0], sizes = [2, 32], strides = [1, 1]} : vector<2x128xf32> to vector<2x32xf32>
    %684 = vector.extract_strided_slice %681 {offsets = [0, 32], sizes = [2, 32], strides = [1, 1]} : vector<2x128xf32> to vector<2x32xf32>
    %685 = vector.extract_strided_slice %682 {offsets = [0, 64], sizes = [2, 32], strides = [1, 1]} : vector<2x128xf32> to vector<2x32xf32>
    %686 = vector.extract_strided_slice %681 {offsets = [0, 96], sizes = [2, 32], strides = [1, 1]} : vector<2x128xf32> to vector<2x32xf32>
    %687 = arith.mulf %684, %665 : vector<2x32xf32>
    %688 = arith.mulf %683, %685 : vector<2x32xf32>
    %689 = arith.addf %687, %688 : vector<2x32xf32>
    %690 = math.tanh %689 : vector<2x32xf32>
    %691 = arith.mulf %686, %690 : vector<2x32xf32>
    %c2_i32_227 = arith.constant 2 : i32
    %692 = arith.muli %c5_i32_222, %c2_i32_227 : i32
    %693 = arith.index_cast %692 : i32 to index
    %c0_228 = arith.constant 0 : index
    %694 = vector.load %arg24[%693, %c0_228] : memref<16x32xf32, #tpu.memory_space<vmem>>, vector<2x32xf32>
    tpu.vector_store %arg24[%693, %c0_228], %691 {strides = array<i32>} : memref<16x32xf32, #tpu.memory_space<vmem>>, vector<2x32xf32>,
    %c6_i32_229 = arith.constant 6 : i32
    %c2_i32_230 = arith.constant 2 : i32
    %695 = arith.muli %c6_i32_229, %c2_i32_230 : i32
    %696 = arith.index_cast %695 : i32 to index
    %c0_231 = arith.constant 0 : index
    %697 = vector.load %arg23[%696, %c0_231] : memref<16x128xf32, #tpu.memory_space<vmem>>, vector<2x128xf32>
    %698 = arith.truncf %691 : vector<2x32xf32> to vector<2x32xbf16>
    %cst_232 = arith.constant dense<0.000000e+00> : vector<2x128xf32>
    %699 = tpu.matmul %698, %549, %cst_232 {dimension_numbers = #tpu.dot_dimension_numbers<[1], [0], [0], [1], [0, 0, 1, 1], [], []>} : vector<2x32xbf16>, vector<32x128xbf16>, vector<2x128xf32> -> vector<2x128xf32>
    %700 = arith.addf %697, %699 : vector<2x128xf32>
    %701 = arith.negf %700 : vector<2x128xf32>
    %702 = math.exp %701 : vector<2x128xf32>
    %cst_233 = arith.constant 1.000000e+00 : f32
    %703 = vector.broadcast %cst_233 : f32 to vector<2x128xf32>
    %704 = arith.addf %703, %702 : vector<2x128xf32>
    %705 = arith.divf %703, %704 : vector<2x128xf32>
    %706 = math.tanh %700 : vector<2x128xf32>
    %707 = vector.extract_strided_slice %705 {offsets = [0, 0], sizes = [2, 32], strides = [1, 1]} : vector<2x128xf32> to vector<2x32xf32>
    %708 = vector.extract_strided_slice %705 {offsets = [0, 32], sizes = [2, 32], strides = [1, 1]} : vector<2x128xf32> to vector<2x32xf32>
    %709 = vector.extract_strided_slice %706 {offsets = [0, 64], sizes = [2, 32], strides = [1, 1]} : vector<2x128xf32> to vector<2x32xf32>
    %710 = vector.extract_strided_slice %705 {offsets = [0, 96], sizes = [2, 32], strides = [1, 1]} : vector<2x128xf32> to vector<2x32xf32>
    %711 = arith.mulf %708, %689 : vector<2x32xf32>
    %712 = arith.mulf %707, %709 : vector<2x32xf32>
    %713 = arith.addf %711, %712 : vector<2x32xf32>
    %714 = math.tanh %713 : vector<2x32xf32>
    %715 = arith.mulf %710, %714 : vector<2x32xf32>
    %c2_i32_234 = arith.constant 2 : i32
    %716 = arith.muli %c6_i32_229, %c2_i32_234 : i32
    %717 = arith.index_cast %716 : i32 to index
    %c0_235 = arith.constant 0 : index
    %718 = vector.load %arg24[%717, %c0_235] : memref<16x32xf32, #tpu.memory_space<vmem>>, vector<2x32xf32>
    tpu.vector_store %arg24[%717, %c0_235], %715 {strides = array<i32>} : memref<16x32xf32, #tpu.memory_space<vmem>>, vector<2x32xf32>,
    %c7_i32_236 = arith.constant 7 : i32
    %c2_i32_237 = arith.constant 2 : i32
    %719 = arith.muli %c7_i32_236, %c2_i32_237 : i32
    %720 = arith.index_cast %719 : i32 to index
    %c0_238 = arith.constant 0 : index
    %721 = vector.load %arg23[%720, %c0_238] : memref<16x128xf32, #tpu.memory_space<vmem>>, vector<2x128xf32>
    %722 = arith.truncf %715 : vector<2x32xf32> to vector<2x32xbf16>
    %cst_239 = arith.constant dense<0.000000e+00> : vector<2x128xf32>
    %723 = tpu.matmul %722, %549, %cst_239 {dimension_numbers = #tpu.dot_dimension_numbers<[1], [0], [0], [1], [0, 0, 1, 1], [], []>} : vector<2x32xbf16>, vector<32x128xbf16>, vector<2x128xf32> -> vector<2x128xf32>
    %724 = arith.addf %721, %723 : vector<2x128xf32>
    %725 = arith.negf %724 : vector<2x128xf32>
    %726 = math.exp %725 : vector<2x128xf32>
    %cst_240 = arith.constant 1.000000e+00 : f32
    %727 = vector.broadcast %cst_240 : f32 to vector<2x128xf32>
    %728 = arith.addf %727, %726 : vector<2x128xf32>
    %729 = arith.divf %727, %728 : vector<2x128xf32>
    %730 = math.tanh %724 : vector<2x128xf32>
    %731 = vector.extract_strided_slice %729 {offsets = [0, 0], sizes = [2, 32], strides = [1, 1]} : vector<2x128xf32> to vector<2x32xf32>
    %732 = vector.extract_strided_slice %729 {offsets = [0, 32], sizes = [2, 32], strides = [1, 1]} : vector<2x128xf32> to vector<2x32xf32>
    %733 = vector.extract_strided_slice %730 {offsets = [0, 64], sizes = [2, 32], strides = [1, 1]} : vector<2x128xf32> to vector<2x32xf32>
    %734 = vector.extract_strided_slice %729 {offsets = [0, 96], sizes = [2, 32], strides = [1, 1]} : vector<2x128xf32> to vector<2x32xf32>
    %735 = arith.mulf %732, %713 : vector<2x32xf32>
    %736 = arith.mulf %731, %733 : vector<2x32xf32>
    %737 = arith.addf %735, %736 : vector<2x32xf32>
    %738 = math.tanh %737 : vector<2x32xf32>
    %739 = arith.mulf %734, %738 : vector<2x32xf32>
    %c2_i32_241 = arith.constant 2 : i32
    %740 = arith.muli %c7_i32_236, %c2_i32_241 : i32
    %741 = arith.index_cast %740 : i32 to index
    %c0_242 = arith.constant 0 : index
    %742 = vector.load %arg24[%741, %c0_242] : memref<16x32xf32, #tpu.memory_space<vmem>>, vector<2x32xf32>
    tpu.vector_store %arg24[%741, %c0_242], %739 {strides = array<i32>} : memref<16x32xf32, #tpu.memory_space<vmem>>, vector<2x32xf32>,
    %c8_i32_243 = arith.constant 8 : i32
    %c0_244 = arith.constant 0 : index
    %c0_245 = arith.constant 0 : index
    %743 = vector.load %arg24[%c0_244, %c0_245] : memref<16x32xf32, #tpu.memory_space<vmem>>, vector<16x32xf32>
    %744 = arith.truncf %743 : vector<16x32xf32> to vector<16x32xbf16>
    %c0_246 = arith.constant 0 : index
    %c0_247 = arith.constant 0 : index
    %745 = vector.load %arg17[%c0_246, %c0_247] : memref<32x128xbf16, #tpu.memory_space<vmem>>, vector<32x128xbf16>
    %cst_248 = arith.constant dense<0.000000e+00> : vector<16x128xf32>
    %746 = tpu.matmul %744, %745, %cst_248 {dimension_numbers = #tpu.dot_dimension_numbers<[1], [0], [0], [1], [0, 0, 1, 1], [], []>} : vector<16x32xbf16>, vector<32x128xbf16>, vector<16x128xf32> -> vector<16x128xf32>
    %c0_249 = arith.constant 0 : index
    %c0_250 = arith.constant 0 : index
    %747 = vector.load %arg18[%c0_249, %c0_250] : memref<1x128xf32, #tpu.memory_space<vmem>>, vector<1x128xf32>
    %748 = vector.broadcast %747 : vector<1x128xf32> to vector<16x128xf32>
    %749 = arith.addf %746, %748 : vector<16x128xf32>
    %cst_251 = arith.constant dense<0xFF800000> : vector<16xf32>
    %750 = vector.multi_reduction <maximumf>, %749, %cst_251 [1] : vector<16x128xf32> to vector<16xf32>
    %751 = vector.shape_cast %750 : vector<16xf32> to vector<16x1xf32>
    %752 = tpu.iota {dimensions = array<i32: 1>} : vector<16x128xi32>
    %753 = vector.broadcast %751 : vector<16x1xf32> to vector<16x128xf32>
    %754 = arith.cmpf oeq, %749, %753 : vector<16x128xf32>
    %c128_i32 = arith.constant 128 : i32
    %755 = vector.broadcast %c128_i32 : i32 to vector<16x128xi32>
    %756 = arith.select %754, %752, %755 : vector<16x128xi1>, vector<16x128xi32>
    %cst_252 = arith.constant dense<2147483647> : vector<16xi32>
    %757 = vector.multi_reduction <minsi>, %756, %cst_252 [1] : vector<16x128xi32> to vector<16xi32>
    %758 = vector.shape_cast %757 : vector<16xi32> to vector<16x1xi32>
    %c0_253 = arith.constant 0 : index
    %c0_254 = arith.constant 0 : index
    %759 = vector.load %arg19[%c0_253, %c0_254] : memref<16x1xi32, #tpu.memory_space<vmem>>, vector<16x1xi32>
    tpu.vector_store %arg19[%c0_253, %c0_254], %758 {strides = array<i32>} : memref<16x1xi32, #tpu.memory_space<vmem>>, vector<16x1xi32>,
    return
  }
}

</mosaic_0001>

<bundles_post_ra>
// kernel: mul.10
= control target key start
LH: loop header
LB: loop body
LE: loop exit
PB: predicated region body
PF: predicated region fallthrough
CT: control target
= control target key end

     0   :  { %s34_s0 = inlined_call_operand.vmem [shape: f32[4,32], index: 0, kind: input, shape index: {}]   ;;  %s35_s1 = inlined_call_operand.vmem [shape: f32[4,32], index: 1, kind: input, shape index: {}]   ;;  %s36_s2 = inlined_call_operand.vmem [shape: f32[4,32], index: 2, kind: output, shape index: {}]  }
   0x1   :  { %v3_v0 = vld [vmem:[%s34_s0] sm:$0xf] }
   0x2   :  { %v4_v1 = vld [vmem:[%s35_s1] sm:$0xf] }
   0x3   :  { %v7_v2 = vmul.f32 %v4_v1, %v3_v0 }
   0x5   :  { %9 = vst [vmem:[%s36_s2] sm:$0xf] %v7_v2 }

// kernel: forward.1
= control target key start
LH: loop header
LB: loop body
LE: loop exit
PB: predicated region body
PF: predicated region fallthrough
CT: control target
= control target key end

     0   :  { %s20497_s0 = inlined_call_operand.hbm [shape: f32[16,16], index: 0, kind: input, shape index: {}]   ;;  %s20498_s1 = inlined_call_operand.hbm [shape: f32[16,19,8], index: 1, kind: input, shape index: {}]   ;;  %s20499_s2 = inlined_call_operand.hbm [shape: s32[1,16], index: 2, kind: input, shape index: {}]   ;;  %s20500_s3 = inlined_call_operand.hbm [shape: bf16[5,8,8], index: 3, kind: input, shape index: {}]   ;;  %s20501_s4 = inlined_call_operand.hbm [shape: f32[1,8], index: 4, kind: input, shape index: {}]   ;;  %s20502_s5 = inlined_call_operand.hbm [shape: bf16[24,128], index: 5, kind: input, shape index: {}]   ;;  %s20503_s6 = inlined_call_operand.hbm [shape: f32[1,128], index: 6, kind: input, shape index: {}]   ;;  %s20504_s7 = inlined_call_operand.hbm [shape: bf16[32,128], index: 7, kind: input, shape index: {}]   ;;  %s20505_s8 = inlined_call_operand.hbm [shape: bf16[32,96], index: 8, kind: input, shape index: {}]   ;;  %s20506_s9 = inlined_call_operand.hbm [shape: f32[8,32], index: 9, kind: input, shape index: {}]   ;;  %s20507_s10 = inlined_call_operand.hbm [shape: f32[8,32], index: 10, kind: input, shape index: {}]   ;;  %s20508_s11 = inlined_call_operand.hbm [shape: f32[1,32], index: 11, kind: input, shape index: {}]   ;;  %s20509_s12 = inlined_call_operand.hbm [shape: bf16[32,64], index: 12, kind: input, shape index: {}]   ;;  %s20510_s13 = inlined_call_operand.hbm [shape: f32[1,64], index: 13, kind: input, shape index: {}]   ;;  %s20511_s14 = inlined_call_operand.hbm [shape: bf16[32,128], index: 14, kind: input, shape index: {}]   ;;  %s20512_s15 = inlined_call_operand.hbm [shape: bf16[32,128], index: 15, kind: input, shape index: {}]   ;;  %s20513_s16 = inlined_call_operand.hbm [shape: f32[1,128], index: 16, kind: input, shape index: {}]   ;;  %s20514_s17 = inlined_call_operand.hbm [shape: bf16[32,128], index: 17, kind: input, shape index: {}]   ;;  %s20515_s18 = inlined_call_operand.hbm [shape: f32[1,128], index: 18, kind: input, shape index: {}]   ;;  %s20516_s19 = inlined_call_operand.hbm [shape: s32[16,1], index: 19, kind: output, shape index: {}]  }
   0x1   :  { %20907 = sst [smem:[#allocation261_spill]] %s20497_s0 }
   0x2   :  { %20908 = sst [smem:[#allocation262_spill]] %s20498_s1 }
   0x3   :  { %20909 = sst [smem:[#allocation263_spill]] %s20499_s2 }
   0x4   :  { %20910 = sst [smem:[#allocation264_spill]] %s20500_s3 }
   0x5   :  { %20911 = sst [smem:[#allocation265_spill]] %s20515_s18 }
   0x6   :  { %20912 = sst [smem:[#allocation266_spill]] %s20516_s19 }
   0x7   :  { %24 = vsyncpa [#allocation8], 0 }
   0x8   :  { %25 = vsyncpa [#allocation11], 0 }
   0x9   :  { %26 = vsyncpa [#allocation14], 0 }
   0xa   :  { %27 = vsyncpa [#allocation17], 0 }
   0xb   :  { %28 = vsyncpa [#allocation20], 0 }
   0xc   :  { %29 = vsyncpa [#allocation23], 0 }
   0xd   :  { %30 = vsyncpa [#allocation26], 0 }
   0xe   :  { %31 = vsyncpa [#allocation29], 0 }
   0xf   :  { %32 = vsyncpa [#allocation32], 0 }
  0x10   :  { %33 = vsyncpa [#allocation35], 0 }
  0x11   :  { %34 = vsyncpa [#allocation9], 0  ;;  %s15702_s0 = smov [#allocation10]   ;;  %s15703_s20 = smov [#allocation13]  }
  0x12   :  { %s52_s30 = sshll.u32 %s15702_s0, 4  ;;  %s74_s21 = sshll.u32 %s15703_s20, 4  ;;  %s53_s30 = int_to_ptr.vmem [resolvable:$true] %s52_s30  ;;  %s15833_s21 = int_to_ptr.vmem [resolvable:$true] %s74_s21 }
  0x13   :  { %s20913_s2 = sld [smem:[#allocation262_spill]] }
  0x19   :  { %s15240_s23 = scalar_lea.hbm %s20913_s2, 6144 }
  0x1a   :  { %p15241_p0 = scmp.ne.s32.totalorder %s20913_s2, %s15240_s23  ;;  %p15244_p1 = scmp.lt.u32.totalorder %s15240_s23, %s20913_s2 }
  0x1c   :  { %p15246_p2 = pnand %p15244_p1, %p15241_p0 }
  0x1e   :  { %15249 = shalt.err (!%p15246_p2)
}
  0x1f   :  { %s15250_s27 = scalar_lea.vmem %s53_s30, 6144  ;;  %p15255_p4 = scmp.lt.s32.totalorder %s53_s30, %s53_s30 }
  0x20   :  { %p15251_p3 = scmp.ne.s32.totalorder %s53_s30, %s15250_s27  ;;  %p15256_p5 = scmp.lt.s32.totalorder %s15250_s27, %s15250_s27 }
  0x22   :  { %p15257_p6 = por %p15256_p5, %p15255_p4 }
  0x24   :  { %p15258_p7 = pnand %p15257_p6, %p15251_p3 }
  0x26   :  { %15261 = shalt.err (!%p15258_p7)
}
  0x27   :  { %s20522_s28 = smov 128   ;;  %s20524_s29 = smov 8  }
  0x28   :  { %58 = dma.hbm_to_vmem [thread:$0]  %s20913_s2, 6144, %s53_s30, [#allocation11], %s20522_s28, %s20522_s28, %s20524_s29  }
  0x29   :  { %s20914_s23 = sld [smem:[#allocation264_spill]] }
  0x2f   :  { %s15262_s24 = scalar_lea.hbm %s20914_s23, 320 }
  0x30   :  { %p15263_p8 = scmp.ne.s32.totalorder %s20914_s23, %s15262_s24  ;;  %p15266_p9 = scmp.lt.u32.totalorder %s15262_s24, %s20914_s23 }
  0x32   :  { %p15268_p10 = pnand %p15266_p9, %p15263_p8 }
  0x34   :  { %15271 = shalt.err (!%p15268_p10)
}
  0x35   :  { %s15272_s19 = scalar_lea.vmem %s15833_s21, 320  ;;  %p15277_p12 = scmp.lt.s32.totalorder %s15833_s21, %s15833_s21 }
  0x36   :  { %p15273_p11 = scmp.ne.s32.totalorder %s15833_s21, %s15272_s19  ;;  %p15278_p13 = scmp.lt.s32.totalorder %s15272_s19, %s15272_s19 }
  0x38   :  { %p15279_p0 = por %p15278_p13, %p15277_p12 }
  0x3a   :  { %p15280_p1 = pnand %p15279_p0, %p15273_p11 }
  0x3c   :  { %15283 = shalt.err (!%p15280_p1)
}
  0x3d   :  { %s15706_s30 = smov 64   ;;  %s15707_s2 = smov 4  }
  0x3e   :  { %80 = dma.hbm_to_vmem [thread:$0]  %s20914_s23, 320, %s15833_s21, [#allocation14], %s15706_s30, %s15706_s30, %s15707_s2  }
  0x3f   :  { %s15708_s1 = smov [#allocation16]   ;;  %s15709_s24 = smov [#allocation19]  }
  0x40   :  { %s96_s22 = sshll.u32 %s15708_s1, 4  ;;  %s118_s25 = sshll.u32 %s15709_s24, 4  ;;  %s97_s22 = int_to_ptr.vmem [resolvable:$true] %s96_s22  ;;  %s15870_s25 = int_to_ptr.vmem [resolvable:$true] %s118_s25 }
  0x41   :  { %s15284_s26 = scalar_lea.hbm %s20502_s5, 192 }
  0x42   :  { %p15285_p2 = scmp.ne.s32.totalorder %s20502_s5, %s15284_s26  ;;  %p15288_p3 = scmp.lt.u32.totalorder %s15284_s26, %s20502_s5 }
  0x44   :  { %p15290_p4 = pnand %p15288_p3, %p15285_p2 }
  0x46   :  { %15293 = shalt.err (!%p15290_p4)
}
  0x47   :  { %s15294_s21 = scalar_lea.vmem %s97_s22, 192  ;;  %p15299_p6 = scmp.lt.s32.totalorder %s97_s22, %s97_s22 }
  0x48   :  { %p15295_p5 = scmp.ne.s32.totalorder %s97_s22, %s15294_s21  ;;  %p15300_p7 = scmp.lt.s32.totalorder %s15294_s21, %s15294_s21 }
  0x4a   :  { %p15301_p8 = por %p15300_p7, %p15299_p6 }
  0x4c   :  { %p15302_p9 = pnand %p15301_p8, %p15295_p5 }
  0x4e   :  { %15305 = shalt.err (!%p15302_p9)
}
  0x4f   :  { %102 = dma.hbm_to_vmem [thread:$0]  %s20502_s5, 192, %s97_s22, [#allocation17], %s15706_s30, %s15706_s30, %s15707_s2  }
  0x50   :  { %s15306_s18 = scalar_lea.hbm %s20504_s7, 256 }
  0x51   :  { %p15307_p10 = scmp.ne.s32.totalorder %s20504_s7, %s15306_s18  ;;  %p15310_p11 = scmp.lt.u32.totalorder %s15306_s18, %s20504_s7 }
  0x53   :  { %p15312_p12 = pnand %p15310_p11, %p15307_p10 }
  0x55   :  { %15315 = shalt.err (!%p15312_p12)
}
  0x56   :  { %s15316_s3 = scalar_lea.vmem %s15870_s25, 256  ;;  %p15321_p0 = scmp.lt.s32.totalorder %s15870_s25, %s15870_s25 }
  0x57   :  { %p15317_p13 = scmp.ne.s32.totalorder %s15870_s25, %s15316_s3  ;;  %p15322_p1 = scmp.lt.s32.totalorder %s15316_s3, %s15316_s3 }
  0x59   :  { %p15323_p2 = por %p15322_p1, %p15321_p0 }
  0x5b   :  { %p15324_p3 = pnand %p15323_p2, %p15317_p13 }
  0x5d   :  { %15327 = shalt.err (!%p15324_p3)
}
  0x5e   :  { %124 = dma.hbm_to_vmem [thread:$0]  %s20504_s7, 256, %s15870_s25, [#allocation20], %s15706_s30, %s15706_s30, %s15707_s2  }
  0x5f   :  { %s15710_s26 = smov [#allocation22]   ;;  %s15711_s21 = smov [#allocation25]  }
  0x60   :  { %s143_s27 = sshll.u32 %s15710_s26, 4  ;;  %s163_s23 = sshll.u32 %s15711_s21, 4  ;;  %s144_s27 = int_to_ptr.vmem [resolvable:$true] %s143_s27  ;;  %s164_s23 = int_to_ptr.vmem [resolvable:$true] %s163_s23 }
  0x61   :  { %s15328_s20 = scalar_lea.hbm %s20506_s9, 128 }
  0x62   :  { %p15329_p4 = scmp.ne.s32.totalorder %s20506_s9, %s15328_s20  ;;  %p15332_p5 = scmp.lt.u32.totalorder %s15328_s20, %s20506_s9 }
  0x64   :  { %p15334_p6 = pnand %p15332_p5, %p15329_p4 }
  0x66   :  { %15337 = shalt.err (!%p15334_p6)
}
  0x67   :  { %s15338_s7 = scalar_lea.vmem %s144_s27, 128  ;;  %p15343_p8 = scmp.lt.s32.totalorder %s144_s27, %s144_s27 }
  0x68   :  { %p15339_p7 = scmp.ne.s32.totalorder %s144_s27, %s15338_s7  ;;  %p15344_p9 = scmp.lt.s32.totalorder %s15338_s7, %s15338_s7 }
  0x6a   :  { %p15345_p10 = por %p15344_p9, %p15343_p8 }
  0x6c   :  { %p15346_p11 = pnand %p15345_p10, %p15339_p7 }
  0x6e   :  { %15349 = shalt.err (!%p15346_p11)
}
  0x6f   :  { %146 = dma.hbm_to_vmem [thread:$0]  %s20506_s9, 128, %s144_s27, [#allocation23]  }
  0x70   :  { %s15350_s22 = scalar_lea.hbm %s20508_s11, 16 }
  0x71   :  { %p15351_p12 = scmp.ne.s32.totalorder %s20508_s11, %s15350_s22  ;;  %p15354_p13 = scmp.lt.u32.totalorder %s15350_s22, %s20508_s11 }
  0x73   :  { %p15356_p0 = pnand %p15354_p13, %p15351_p12 }
  0x75   :  { %15359 = shalt.err (!%p15356_p0)
}
  0x76   :  { %s15360_s20 = scalar_lea.vmem %s164_s23, 16  ;;  %s15364_s18 = scalar_lea.vmem %s164_s23, 32 }
  0x77   :  { %p15361_p1 = scmp.ne.s32.totalorder %s164_s23, %s15360_s20  ;;  %p15365_p2 = scmp.lt.s32.totalorder %s164_s23, %s164_s23 }
  0x78   :  { %p15366_p3 = scmp.lt.s32.totalorder %s15364_s18, %s15360_s20 }
  0x7a   :  { %p15367_p4 = por %p15366_p3, %p15365_p2 }
  0x7c   :  { %p15368_p5 = pnand %p15367_p4, %p15361_p1 }
  0x7e   :  { %15371 = shalt.err (!%p15368_p5)
}
  0x7f   :  { %166 = dma.hbm_to_vmem [thread:$0]  %s20508_s11, 16, %s164_s23, [#allocation26]  }
  0x80   :  { %s15712_s29 = smov [#allocation28]   ;;  %s15713_s24 = smov [#allocation31]  }
  0x81   :  { %s185_s1 = sshll.u32 %s15712_s29, 4  ;;  %s206_s7 = sshll.u32 %s15713_s24, 4  ;;  %s186_s1 = int_to_ptr.vmem [resolvable:$true] %s185_s1  ;;  %s15931_s7 = int_to_ptr.vmem [resolvable:$true] %s206_s7 }
  0x82   :  { %s15372_s3 = scalar_lea.hbm %s20510_s13, 16 }
  0x83   :  { %p15373_p6 = scmp.ne.s32.totalorder %s20510_s13, %s15372_s3  ;;  %p15376_p7 = scmp.lt.u32.totalorder %s15372_s3, %s20510_s13 }
  0x85   :  { %p15378_p8 = pnand %p15376_p7, %p15373_p6 }
  0x87   :  { %15381 = shalt.err (!%p15378_p8)
}
  0x88   :  { %s15382_s11 = scalar_lea.vmem %s186_s1, 16  ;;  %s15386_s23 = scalar_lea.vmem %s186_s1, 32 }
  0x89   :  { %p15383_p9 = scmp.ne.s32.totalorder %s186_s1, %s15382_s11  ;;  %p15387_p10 = scmp.lt.s32.totalorder %s186_s1, %s186_s1 }
  0x8a   :  { %p15388_p11 = scmp.lt.s32.totalorder %s15386_s23, %s15382_s11 }
  0x8c   :  { %p15389_p12 = por %p15388_p11, %p15387_p10 }
  0x8e   :  { %p15390_p13 = pnand %p15389_p12, %p15383_p9 }
  0x90   :  { %15393 = shalt.err (!%p15390_p13)
}
  0x91   :  { %188 = dma.hbm_to_vmem [thread:$0]  %s20510_s13, 16, %s186_s1, [#allocation29]  }
  0x92   :  { %s15394_s9 = scalar_lea.hbm %s20512_s15, 256 }
  0x93   :  { %p15395_p0 = scmp.ne.s32.totalorder %s20512_s15, %s15394_s9  ;;  %p15398_p1 = scmp.lt.u32.totalorder %s15394_s9, %s20512_s15 }
  0x95   :  { %p15400_p2 = pnand %p15398_p1, %p15395_p0 }
  0x97   :  { %15403 = shalt.err (!%p15400_p2)
}
  0x98   :  { %s15404_s19 = scalar_lea.vmem %s15931_s7, 256  ;;  %p15409_p4 = scmp.lt.s32.totalorder %s15931_s7, %s15931_s7 }
  0x99   :  { %p15405_p3 = scmp.ne.s32.totalorder %s15931_s7, %s15404_s19  ;;  %p15410_p5 = scmp.lt.s32.totalorder %s15404_s19, %s15404_s19 }
  0x9b   :  { %p15411_p6 = por %p15410_p5, %p15409_p4 }
  0x9d   :  { %p15412_p7 = pnand %p15411_p6, %p15405_p3 }
  0x9f   :  { %15415 = shalt.err (!%p15412_p7)
}
  0xa0   :  { %212 = dma.hbm_to_vmem [thread:$0]  %s20512_s15, 256, %s15931_s7, [#allocation32], %s15706_s30, %s15706_s30, %s15707_s2  }
  0xa1   :  { %s15714_s3 = smov [#allocation34]   ;;  %s15715_s22 = smov [#allocation7]  }
  0xa2   :  { %s228_s5 = sshll.u32 %s15714_s3, 4  ;;  %s40_s26 = sshll.u32 %s15715_s22, 4  ;;  %s229_s5 = int_to_ptr.vmem [resolvable:$true] %s228_s5  ;;  %s15965_s26 = int_to_ptr.vmem [resolvable:$true] %s40_s26 }
  0xa3   :  { %s15416_s23 = scalar_lea.hbm %s20514_s17, 256 }
  0xa4   :  { %p15417_p8 = scmp.ne.s32.totalorder %s20514_s17, %s15416_s23  ;;  %p15420_p9 = scmp.lt.u32.totalorder %s15416_s23, %s20514_s17 }
  0xa6   :  { %p15422_p10 = pnand %p15420_p9, %p15417_p8 }
  0xa8   :  { %15425 = shalt.err (!%p15422_p10)
}
  0xa9   :  { %s15426_s15 = scalar_lea.vmem %s229_s5, 256  ;;  %p15431_p12 = scmp.lt.s32.totalorder %s229_s5, %s229_s5 }
  0xaa   :  { %p15427_p11 = scmp.ne.s32.totalorder %s229_s5, %s15426_s15  ;;  %p15432_p13 = scmp.lt.s32.totalorder %s15426_s15, %s15426_s15 }
  0xac   :  { %p15433_p0 = por %p15432_p13, %p15431_p12 }
  0xae   :  { %p15434_p1 = pnand %p15433_p0, %p15427_p11 }
  0xb0   :  { %15437 = shalt.err (!%p15434_p1)
}
  0xb1   :  { %234 = dma.hbm_to_vmem [thread:$0]  %s20514_s17, 256, %s229_s5, [#allocation35], %s15706_s30, %s15706_s30, %s15707_s2  }
  0xb2   :  { %s20915_s24 = sld [smem:[#allocation261_spill]] }
  0xb8   :  { %s15438_s25 = scalar_lea.hbm %s20915_s24, 256 }
  0xb9   :  { %p15439_p2 = scmp.ne.s32.totalorder %s20915_s24, %s15438_s25  ;;  %p15442_p3 = scmp.lt.u32.totalorder %s15438_s25, %s20915_s24 }
  0xbb   :  { %p15444_p4 = pnand %p15442_p3, %p15439_p2 }
  0xbd   :  { %15447 = shalt.err (!%p15444_p4)
}
  0xbe   :  { %s15448_s22 = scalar_lea.vmem %s15965_s26, 256  ;;  %p15453_p6 = scmp.lt.s32.totalorder %s15965_s26, %s15965_s26 }
  0xbf   :  { %p15449_p5 = scmp.ne.s32.totalorder %s15965_s26, %s15448_s22  ;;  %p15454_p7 = scmp.lt.s32.totalorder %s15448_s22, %s15448_s22 }
  0xc1   :  { %p15455_p8 = por %p15454_p7, %p15453_p6 }
  0xc3   :  { %p15456_p9 = pnand %p15455_p8, %p15449_p5 }
  0xc5   :  { %15459 = shalt.err (!%p15456_p9)
}
  0xc6   :  { %s20916_s17 = smov 8   ;;  %s20917_s5 = smov 128  }
  0xc7   :  { %46 = dma.hbm_to_vmem [thread:$0]  %s20915_s24, 256, %s15965_s26, [#allocation8], %s20917_s5, %s20917_s5, %s20916_s17  }
  0xc8   :  { %s15716_s23 = smov [#allocation12]   ;;  %s15717_s28 = smov [#allocation15]  }
  0xc9   :  { %s65_s0 = sshll.u32 %s15716_s23, 4  ;;  %s87_s20 = sshll.u32 %s15717_s28, 4  ;;  %s66_s0 = int_to_ptr.vmem [resolvable:$true] %s65_s0  ;;  %s88_s20 = int_to_ptr.vmem [resolvable:$true] %s87_s20 }
  0xca   :  { %s20918_s7 = sld [smem:[#allocation263_spill]] }
  0xd0   :  { %s15460_s9 = scalar_lea.hbm %s20918_s7, 16 }
  0xd1   :  { %p15461_p10 = scmp.ne.s32.totalorder %s20918_s7, %s15460_s9  ;;  %p15464_p11 = scmp.lt.u32.totalorder %s15460_s9, %s20918_s7 }
  0xd3   :  { %p15466_p12 = pnand %p15464_p11, %p15461_p10 }
  0xd5   :  { %15469 = shalt.err (!%p15466_p12)
}
  0xd6   :  { %s15470_s26 = scalar_lea.vmem %s66_s0, 16  ;;  %s15474_s24 = scalar_lea.vmem %s66_s0, 32 }
  0xd7   :  { %p15471_p13 = scmp.ne.s32.totalorder %s66_s0, %s15470_s26  ;;  %p15475_p0 = scmp.lt.s32.totalorder %s66_s0, %s66_s0 }
  0xd8   :  { %p15476_p1 = scmp.lt.s32.totalorder %s15474_s24, %s15470_s26 }
  0xda   :  { %p15477_p2 = por %p15476_p1, %p15475_p0 }
  0xdc   :  { %p15478_p3 = pnand %p15477_p2, %p15471_p13 }
  0xde   :  { %15481 = shalt.err (!%p15478_p3)
}
  0xdf   :  { %68 = dma.hbm_to_vmem [thread:$0]  %s20918_s7, 16, %s66_s0, [#allocation11]  }
  0xe0   :  { %s15482_s21 = scalar_lea.hbm %s20501_s4, 16 }
  0xe1   :  { %p15483_p4 = scmp.ne.s32.totalorder %s20501_s4, %s15482_s21  ;;  %p15486_p5 = scmp.lt.u32.totalorder %s15482_s21, %s20501_s4 }
  0xe3   :  { %p15488_p6 = pnand %p15486_p5, %p15483_p4 }
  0xe5   :  { %15491 = shalt.err (!%p15488_p6)
}
  0xe6   :  { %s15492_s15 = scalar_lea.vmem %s88_s20, 16  ;;  %s15496_s9 = scalar_lea.vmem %s88_s20, 32 }
  0xe7   :  { %p15493_p7 = scmp.ne.s32.totalorder %s88_s20, %s15492_s15  ;;  %p15497_p8 = scmp.lt.s32.totalorder %s88_s20, %s88_s20 }
  0xe8   :  { %p15498_p9 = scmp.lt.s32.totalorder %s15496_s9, %s15492_s15 }
  0xea   :  { %p15499_p10 = por %p15498_p9, %p15497_p8 }
  0xec   :  { %p15500_p11 = pnand %p15499_p10, %p15493_p7 }
  0xee   :  { %15503 = shalt.err (!%p15500_p11)
}
  0xef   :  { %90 = dma.hbm_to_vmem [thread:$0]  %s20501_s4, 16, %s88_s20, [#allocation14]  }
  0xf0   :  { %s15718_s27 = smov [#allocation18]   ;;  %s15719_s25 = smov [#allocation21]  }
  0xf1   :  { %s109_s29 = sshll.u32 %s15718_s27, 4  ;;  %s130_s19 = sshll.u32 %s15719_s25, 4  ;;  %s110_s29 = int_to_ptr.vmem [resolvable:$true] %s109_s29  ;;  %s16026_s19 = int_to_ptr.vmem [resolvable:$true] %s130_s19 }
  0xf2   :  { %s15504_s13 = scalar_lea.hbm %s20503_s6, 16 }
  0xf3   :  { %p15505_p12 = scmp.ne.s32.totalorder %s20503_s6, %s15504_s13  ;;  %p15508_p13 = scmp.lt.u32.totalorder %s15504_s13, %s20503_s6 }
  0xf5   :  { %p15510_p0 = pnand %p15508_p13, %p15505_p12 }
  0xf7   :  { %15513 = shalt.err (!%p15510_p0)
}
  0xf8   :  { %s15514_s4 = scalar_lea.vmem %s110_s29, 16  ;;  %s15518_s20 = scalar_lea.vmem %s110_s29, 32 }
  0xf9   :  { %p15515_p1 = scmp.ne.s32.totalorder %s110_s29, %s15514_s4  ;;  %p15519_p2 = scmp.lt.s32.totalorder %s110_s29, %s110_s29 }
  0xfa   :  { %p15520_p3 = scmp.lt.s32.totalorder %s15518_s20, %s15514_s4 }
  0xfc   :  { %p15521_p4 = por %p15520_p3, %p15519_p2 }
  0xfe   :  { %p15522_p5 = pnand %p15521_p4, %p15515_p1 }
 0x100   :  { %15525 = shalt.err (!%p15522_p5)
}
 0x101   :  { %112 = dma.hbm_to_vmem [thread:$0]  %s20503_s6, 16, %s110_s29, [#allocation17]  }
 0x102   :  { %s15526_s15 = scalar_lea.hbm %s20505_s8, 256 }
 0x103   :  { %p15527_p6 = scmp.ne.s32.totalorder %s20505_s8, %s15526_s15  ;;  %p15530_p7 = scmp.lt.u32.totalorder %s15526_s15, %s20505_s8 }
 0x105   :  { %p15532_p8 = pnand %p15530_p7, %p15527_p6 }
 0x107   :  { %15535 = shalt.err (!%p15532_p8)
}
 0x108   :  { %s15536_s25 = scalar_lea.vmem %s16026_s19, 256  ;;  %p15541_p10 = scmp.lt.s32.totalorder %s16026_s19, %s16026_s19 }
 0x109   :  { %p15537_p9 = scmp.ne.s32.totalorder %s16026_s19, %s15536_s25  ;;  %p15542_p11 = scmp.lt.s32.totalorder %s15536_s25, %s15536_s25 }
 0x10b   :  { %p15543_p12 = por %p15542_p11, %p15541_p10 }
 0x10d   :  { %p15544_p13 = pnand %p15543_p12, %p15537_p9 }
 0x10f   :  { %15547 = shalt.err (!%p15544_p13)
}
 0x110   :  { %136 = dma.hbm_to_vmem [thread:$0]  %s20505_s8, 256, %s16026_s19, [#allocation20], %s15706_s30, %s15706_s30, %s15707_s2  }
 0x111   :  { %s15720_s26 = smov [#allocation24]   ;;  %s15721_s13 = smov [#allocation27]  }
 0x112   :  { %s153_s24 = sshll.u32 %s15720_s26, 4  ;;  %s172_s1 = sshll.u32 %s15721_s13, 4  ;;  %s154_s24 = int_to_ptr.vmem [resolvable:$true] %s153_s24  ;;  %s16060_s1 = int_to_ptr.vmem [resolvable:$true] %s172_s1 }
 0x113   :  { %s15548_s21 = scalar_lea.hbm %s20507_s10, 128 }
 0x114   :  { %p15549_p0 = scmp.ne.s32.totalorder %s20507_s10, %s15548_s21  ;;  %p15552_p1 = scmp.lt.u32.totalorder %s15548_s21, %s20507_s10 }
 0x116   :  { %p15554_p2 = pnand %p15552_p1, %p15549_p0 }
 0x118   :  { %15557 = shalt.err (!%p15554_p2)
}
 0x119   :  { %s15558_s8 = scalar_lea.vmem %s154_s24, 128  ;;  %p15563_p4 = scmp.lt.s32.totalorder %s154_s24, %s154_s24 }
 0x11a   :  { %p15559_p3 = scmp.ne.s32.totalorder %s154_s24, %s15558_s8  ;;  %p15564_p5 = scmp.lt.s32.totalorder %s15558_s8, %s15558_s8 }
 0x11c   :  { %p15565_p6 = por %p15564_p5, %p15563_p4 }
 0x11e   :  { %p15566_p7 = pnand %p15565_p6, %p15559_p3 }
 0x120   :  { %15569 = shalt.err (!%p15566_p7)
}
 0x121   :  { %156 = dma.hbm_to_vmem [thread:$0]  %s20507_s10, 128, %s154_s24, [#allocation23]  }
 0x122   :  { %s15570_s9 = scalar_lea.hbm %s20509_s12, 256 }
 0x123   :  { %p15571_p8 = scmp.ne.s32.totalorder %s20509_s12, %s15570_s9  ;;  %p15574_p9 = scmp.lt.u32.totalorder %s15570_s9, %s20509_s12 }
 0x125   :  { %p15576_p10 = pnand %p15574_p9, %p15571_p8 }
 0x127   :  { %15579 = shalt.err (!%p15576_p10)
}
 0x128   :  { %s15580_s6 = scalar_lea.vmem %s16060_s1, 256  ;;  %p15585_p12 = scmp.lt.s32.totalorder %s16060_s1, %s16060_s1 }
 0x129   :  { %p15581_p11 = scmp.ne.s32.totalorder %s16060_s1, %s15580_s6  ;;  %p15586_p13 = scmp.lt.s32.totalorder %s15580_s6, %s15580_s6 }
 0x12b   :  { %p15587_p0 = por %p15586_p13, %p15585_p12 }
 0x12d   :  { %p15588_p1 = pnand %p15587_p0, %p15581_p11 }
 0x12f   :  { %15591 = shalt.err (!%p15588_p1)
}
 0x130   :  { %178 = dma.hbm_to_vmem [thread:$0]  %s20509_s12, 256, %s16060_s1, [#allocation26], %s15706_s30, %s15706_s30, %s15707_s2  }
 0x131   :  { %s15722_s26 = smov [#allocation30]   ;;  %s15723_s13 = smov [#allocation33]  }
 0x132   :  { %s194_s24 = sshll.u32 %s15722_s26, 4  ;;  %s219_s3 = sshll.u32 %s15723_s13, 4  ;;  %s195_s24 = int_to_ptr.vmem [resolvable:$true] %s194_s24  ;;  %s220_s3 = int_to_ptr.vmem [resolvable:$true] %s219_s3 }
 0x133   :  { %s15592_s4 = scalar_lea.hbm %s20511_s14, 256 }
 0x134   :  { %p15593_p2 = scmp.ne.s32.totalorder %s20511_s14, %s15592_s4  ;;  %p15596_p3 = scmp.lt.u32.totalorder %s15592_s4, %s20511_s14 }
 0x136   :  { %p15598_p4 = pnand %p15596_p3, %p15593_p2 }
 0x138   :  { %15601 = shalt.err (!%p15598_p4)
}
 0x139   :  { %s15602_s12 = scalar_lea.vmem %s195_s24, 256  ;;  %p15607_p6 = scmp.lt.s32.totalorder %s195_s24, %s195_s24 }
 0x13a   :  { %p15603_p5 = scmp.ne.s32.totalorder %s195_s24, %s15602_s12  ;;  %p15608_p7 = scmp.lt.s32.totalorder %s15602_s12, %s15602_s12 }
 0x13c   :  { %p15609_p8 = por %p15608_p7, %p15607_p6 }
 0x13e   :  { %p15610_p9 = pnand %p15609_p8, %p15603_p5 }
 0x140   :  { %15613 = shalt.err (!%p15610_p9)
}
 0x141   :  { %200 = dma.hbm_to_vmem [thread:$0]  %s20511_s14, 256, %s195_s24, [#allocation29], %s15706_s30, %s15706_s30, %s15707_s2  }
 0x142   :  { %s15614_s15 = scalar_lea.hbm %s20513_s16, 16 }
 0x143   :  { %p15615_p10 = scmp.ne.s32.totalorder %s20513_s16, %s15614_s15  ;;  %p15618_p11 = scmp.lt.u32.totalorder %s15614_s15, %s20513_s16 }
 0x145   :  { %p15620_p12 = pnand %p15618_p11, %p15615_p10 }
 0x147   :  { %15623 = shalt.err (!%p15620_p12)
}
 0x148   :  { %s15624_s25 = scalar_lea.vmem %s220_s3, 16  ;;  %s15628_s6 = scalar_lea.vmem %s220_s3, 32 }
 0x149   :  { %p15625_p13 = scmp.ne.s32.totalorder %s220_s3, %s15624_s25  ;;  %p15629_p0 = scmp.lt.s32.totalorder %s220_s3, %s220_s3 }
 0x14a   :  { %p15630_p1 = scmp.lt.s32.totalorder %s15628_s6, %s15624_s25 }
 0x14c   :  { %p15631_p2 = por %p15630_p1, %p15629_p0 }
 0x14e   :  { %p15632_p3 = pnand %p15631_p2, %p15625_p13 }
 0x150   :  { %15635 = shalt.err (!%p15632_p3)
}
 0x151   :  { %222 = dma.hbm_to_vmem [thread:$0]  %s20513_s16, 16, %s220_s3, [#allocation32]  }
 0x152   :  { %s15724_s10 = smov [#allocation36]   ;;  %s20919_s13 = sld [smem:[#allocation265_spill]] }
 0x153   :  { %s241_s29 = sshll.u32 %s15724_s10, 4  ;;  %s242_s29 = int_to_ptr.vmem [resolvable:$true] %s241_s29 }
 0x158   :  { %s15636_s22 = scalar_lea.hbm %s20919_s13, 16 }
 0x159   :  { %p15637_p4 = scmp.ne.s32.totalorder %s20919_s13, %s15636_s22  ;;  %p15640_p5 = scmp.lt.u32.totalorder %s15636_s22, %s20919_s13 }
 0x15b   :  { %p15642_p6 = pnand %p15640_p5, %p15637_p4 }
 0x15d   :  { %15645 = shalt.err (!%p15642_p6)
}
 0x15e   :  { %s15646_s23 = scalar_lea.vmem %s242_s29, 16  ;;  %s15650_s16 = scalar_lea.vmem %s242_s29, 32 }
 0x15f   :  { %p15647_p7 = scmp.ne.s32.totalorder %s242_s29, %s15646_s23  ;;  %p15651_p8 = scmp.lt.s32.totalorder %s242_s29, %s242_s29 }
 0x160   :  { %p15652_p9 = scmp.lt.s32.totalorder %s15650_s16, %s15646_s23 }
 0x162   :  { %p15653_p10 = por %p15652_p9, %p15651_p8 }
 0x164   :  { %p15654_p11 = pnand %p15653_p10, %p15647_p7 }
 0x166   :  { %15657 = shalt.err (!%p15654_p11)
}
 0x167   :  { %244 = dma.hbm_to_vmem [thread:$0]  %s20919_s13, 16, %s242_s29, [#allocation35]  }
 0x168   :  { %15680 = dma.done.wait [#allocation8], 256  }
 0x169   :  { %15681 = vsyncadd [#allocation8], 4294967040 }
 0x16a   :  { %15682 = dma.done.wait [#allocation11], 6160  }
 0x16b   :  { %15683 = vsyncadd [#allocation11], 4294961136 }
 0x16c   :  { %15684 = dma.done.wait [#allocation14], 336  }
 0x16d   :  { %15685 = vsyncadd [#allocation14], 4294966960 }
 0x16e   :  { %15686 = dma.done.wait [#allocation17], 208  }
 0x16f   :  { %15687 = vsyncadd [#allocation17], 4294967088 }
 0x170   :  { %15688 = dma.done.wait [#allocation20], 512  }
 0x171   :  { %15689 = vsyncadd [#allocation20], 4294966784 }
 0x172   :  { %15690 = dma.done.wait [#allocation23], 256  }
 0x173   :  { %15691 = vsyncadd [#allocation23], 4294967040 }
 0x174   :  { %15692 = dma.done.wait [#allocation26], 272  }
 0x175   :  { %15693 = vsyncadd [#allocation26], 4294967024 }
 0x176   :  { %15694 = dma.done.wait [#allocation29], 272  }
 0x177   :  { %15695 = vsyncadd [#allocation29], 4294967024 }
 0x178   :  { %15696 = dma.done.wait [#allocation32], 272  }
 0x179   :  { %15697 = vsyncadd [#allocation32], 4294967024 }
 0x17a   :  { %15698 = dma.done.wait [#allocation35], 272  }
 0x17b   :  { %15699 = vsyncadd [#allocation35], 4294967024  ;;  %v20527_v0 = vlaneseq  ;;  %v20528_v1 = vmov 0.0   ;;  %vm15726_vm0 = vmmov 0   ;;  %v15727_v2 = vmov 1966171168  }
 0x17c   :  { %14350 = vmatprep.subr.bf16.mxu0 %v20528_v1  ;;  %14352 = vmatprep.mubr.msk.bf16.mxu0 %vm15726_vm0, %v20528_v1  ;;  %v385_v3 = vunpack.c.l.s4 %v15727_v2  ;;  %vm5030_vm1 = vcmask 1043456   ;;  %v3450_v7 = vld [vmem:[#allocation13] sm:$0xf]  ;;  %v304_v9 = vld [vmem:[#allocation10 + $0x8] sm:$0xff]  ;;  %v306_v12 = vld [vmem:[#allocation10 + $0x18] sm:$0xff]  ;;  %vm4984_vm2 = vcmask 64512  }
 0x17d   :  { %v16137_v4 = vshrl.u32 %v20527_v0, 7  ;;  %14288 = vmatprep.subr.bf16.mxu1 %v20528_v1  ;;  %14290 = vmatprep.mubr.msk.bf16.mxu1 %vm15726_vm0, %v20528_v1  ;;  %v303_v8 = vld [vmem:[#allocation10] sm:$0xff]  ;;  %v16146_v10 = vsel %vm5030_vm1, %v3450_v7, 0  ;;  %v432_v15 = vcombine.high %v304_v9, %v304_v9  ;;  %v480_v17 = vcombine.high %v306_v12, %v306_v12  ;;  %v6376_v60 = vld [vmem:[#allocation13 + $0x8] sm:$0xf]  ;;  %s15728_s12 = smov 16  }
 0x17e   :  { %v386_v5 = vunpack.c.0.s8 %v385_v3  ;;  %v13985_v11 = vld.sshfl [vmem:[#allocation10 + $0x10] sm:$0x13 pattern:$0x75316420]  ;;  %v383_v13 = vcombine.high %v303_v8, %v303_v8  ;;  %14351 = vmatpush3.bf16.msra.mxu0 %v16146_v10  ;;  %vm11541_vm3 = vcmask 63488   ;;  %vm11727_vm4 = vcmask 1041409  }
 0x17f   :  { %20920 = vst [vmem:[#allocation49_spill] sm:$0xff] %v16137_v4  ;;  %14412 = vmatprep.subr.bf16.mxu0 %v20528_v1  ;;  %v6608_v43 = vcombine.high %v13985_v11, %v13985_v11  ;;  %vm11730_vm5 = vcmask 1042434   ;;  %vm11733_vm6 = vcmask 1043459   ;;  %vm11736_vm7 = vcmask 1044484   ;;  %s15730_s1 = smov 32   ;;  %s15731_s19 = smov 96  }
 0x180   :  { %v16143_v6 = vsub.s32 %v386_v5, %v16137_v4  ;;  %vm11739_vm8 = vcmask 1045509   ;;  %vm11742_vm9 = vcmask 1046534   ;;  %vm11745_vm10 = vcmask 1047559  }
 0x181   :  { %vm11767_vm11 = vcmask 130048   ;;  %vm11790_vm12 = vcmask 195584   ;;  %vm11874_vm14 = vcmask 261120   ;;  %vm11947_vm15 = vcmask 123904  }
 0x182   :  { %v390_v14 = vrot.slane %v303_v8, %v16143_v6  ;;  %v439_v16 = vrot.slane %v304_v9, %v16143_v6  ;;  %v16152_v18 = vrot.slane %v306_v12, %v16143_v6  ;;  %v16155_v19 = vrot.slane %v13985_v11, %v16143_v6 }
 0x183   :  { %v397_v20 = vrot.slane %v383_v13, %v16143_v6  ;;  %v446_v23 = vrot.slane %v432_v15, %v16143_v6  ;;  %v16167_v26 = vrot.slane %v480_v17, %v16143_v6  ;;  %v16228_v59 = vrot.slane %v6608_v43, %v16143_v6 }
 0x184   :  { %v398_v21 = vcombine.high %v390_v14, %v390_v14  ;;  %v16159_v22 = vrot.slane %v390_v14, %v16143_v6  ;;  %v447_v24 = vcombine.high %v439_v16, %v439_v16  ;;  %v16164_v25 = vrot.slane %v439_v16, %v16143_v6 }
 0x185   :  { %v495_v27 = vcombine.high %v16152_v18, %v16152_v18  ;;  %v399_v28 = vcombine.high %v397_v20, %v397_v20  ;;  %v16172_v29 = vrot.slane %v397_v20, %v16143_v6  ;;  %v448_v31 = vcombine.high %v446_v23, %v446_v23 }
 0x186   :  { %v16175_v30 = vrot.slane %v398_v21, %v16143_v6  ;;  %v16178_v32 = vrot.slane %v446_v23, %v16143_v6  ;;  %v16181_v33 = vrot.slane %v447_v24, %v16143_v6  ;;  %v16185_v34 = vrot.slane %v16152_v18, %v16143_v6  ;;  %v307_v24 = vld [vmem:[#allocation10 + $0x20] sm:$0xff] }
 0x187   :  { %v16189_v35 = vrot.slane %v16167_v26, %v16143_v6  ;;  %v16192_v36 = vrot.slane %v399_v28, %v16143_v6  ;;  %v16195_v37 = vrot.slane %v448_v31, %v16143_v6  ;;  %v7716_v13 = vcombine.high %v16155_v19, %v16155_v19 }
 0x188   :  { %v1935_v38 = vcombine.low %v16159_v22, %v16175_v30  ;;  %v13899_v39 = vcombine.high %v16159_v22, %v16175_v30  ;;  %v16203_v40 = vcombine.high %v16178_v32, %v16178_v32  ;;  %v1984_v41 = vcombine.low %v16164_v25, %v16181_v33 }
 0x189   :  { %v13901_v42 = vcombine.high %v16164_v25, %v16181_v33  ;;  %v1937_v44 = vcombine.low %v16172_v29, %v16192_v36  ;;  %v13900_v45 = vcombine.high %v16172_v29, %v16192_v36  ;;  %v1986_v48 = vcombine.low %v16178_v32, %v16195_v37 }
 0x18a   :  { %v1945_v46 = vrot.slane %v1935_v38, %v16143_v6  ;;  %v1952_v47 = vrot.slane %v13899_v39, %v16143_v6  ;;  %v1987_v49 = vcombine.low %v16203_v40, %v16185_v34  ;;  %v1994_v50 = vrot.slane %v1984_v41, %v16143_v6  ;;  %v16255_v39 = vld [vmem:[#allocation10 + $0x30] sm:$0xff] }
 0x18b   :  { %v2001_v51 = vrot.slane %v13901_v42, %v16143_v6  ;;  %v1959_v52 = vrot.slane %v1937_v44, %v16143_v6  ;;  %v1966_v53 = vrot.slane %v13900_v45, %v16143_v6  ;;  %v14001_v55 = vcombine.high %v16178_v32, %v16195_v37 }
 0x18c   :  { %v1967_v54 = vcombine.low %v1945_v46, %v1952_v47  ;;  %v2008_v56 = vrot.slane %v1986_v48, %v16143_v6  ;;  %v2015_v57 = vrot.slane %v1987_v49, %v16143_v6  ;;  %v7733_v16 = vcombine.low %v16155_v19, %v16228_v59 }
 0x18d   :  { %v2016_v58 = vcombine.low %v1994_v50, %v2001_v51  ;;  %v1968_v61 = vcombine.low %v1959_v52, %v1966_v53  ;;  %v5628_v63 = vcombine.low %v1952_v47, %v1959_v52  ;;  %v5629_v2 = vcombine.low %v1966_v53, %v1994_v50  ;;  %v7484_v50 = vld [vmem:[#allocation13 + $0xc] sm:$0xf] }
 0x18e   :  { %v1975_v62 = vrot.slane %v1967_v54, %v16143_v6  ;;  %v2017_v3 = vcombine.low %v2008_v56, %v2015_v57  ;;  %v16233_v7 = vrot.slane %v14001_v55, %v16143_v6  ;;  %v5661_v8 = vcombine.low %v2001_v51, %v2008_v56 }
 0x18f   :  { %v2024_v5 = vrot.slane %v2016_v58, %v16143_v6  ;;  %v1982_v9 = vrot.slane %v1968_v61, %v16143_v6  ;;  %v16237_v11 = vrot.slane %v5628_v63, %v16143_v6  ;;  %v16240_v12 = vrot.slane %v5629_v2, %v16143_v6 }
 0x190   :  { %v2031_v14 = vrot.slane %v2017_v3, %v16143_v6  ;;  %v16246_v15 = vrot.slane %v5661_v8, %v16143_v6  ;;  %v7749_v17 = vcombine.low %v2008_v56, %v16233_v7  ;;  %v7734_v21 = vcombine.low %v7716_v13, %v16189_v35 }
 0x191   :  { %v1983_v18 = vcombine.low %v1975_v62, %v1982_v9  ;;  %v7732_v20 = vcombine.low %v1982_v9, %v2024_v5  ;;  %v6423_v23 = vsel %vm5030_vm1, %v6376_v60, 0  ;;  %v7741_v31 = vrot.slane %v7733_v16, %v16143_v6 }
 0x192   :  { %v2032_v28 = vcombine.low %v2024_v5, %v2031_v14  ;;  %v7757_v38 = vrot.slane %v7749_v17, %v16143_v6  ;;  %v496_v41 = vcombine.high %v16167_v26, %v16167_v26  ;;  %v7748_v42 = vrot.slane %v7734_v21, %v16143_v6 }
 0x193   :  { %v16261_v43 = vrot.slane %v495_v27, %v16143_v6  ;;  %v525_v44 = vcombine.high %v16185_v34, %v16185_v34  ;;  %v526_v45 = vcombine.high %v16189_v35, %v16189_v35  ;;  %v529_v48 = vcombine.high %v307_v24, %v307_v24 }
 0x194   :  { %v3435_v46 = vpack.c.bf16 %v2032_v28, %v1983_v18  ;;  %v16268_v47 = vrot.slane %v496_v41, %v16143_v6  ;;  %v536_v49 = vrot.slane %v307_v24, %v16143_v6  ;;  %v7750_v26 = vcombine.low %v7741_v31, %v7748_v42 }
 0x195   :  { %v527_v51 = vcombine.high %v16261_v43, %v16261_v43  ;;  %v577_v27 = vcombine.high %v16255_v39, %v16255_v39  ;;  %v584_v52 = vrot.slane %v16255_v39, %v16143_v6  ;;  %v543_v54 = vrot.slane %v529_v48, %v16143_v6  ;;  %v310_v48 = vld [vmem:[#allocation10 + $0x38] sm:$0xff] }
 0x196   :  { %14353 = vmatmul.mubr.msk.bf16.vlgmr.msra.gmra.mrb[0].mxu0 %vm4984_vm2, %v3435_v46  ;;  %v528_v53 = vcombine.high %v16268_v47, %v16268_v47  ;;  %v544_v55 = vcombine.high %v536_v49, %v536_v49  ;;  %v16282_v56 = vrot.slane %v536_v49, %v16143_v6  ;;  %v7764_v57 = vrot.slane %v7750_v26, %v16143_v6 }
 0x197   :  { %14413 = vmatpush3.bf16.msra.mxu0 %v6423_v23  ;;  %14356 = vmatprep.mubr.msk.bf16.mxu0 %vm15726_vm0, %v20528_v1  ;;  %v592_v58 = vcombine.high %v584_v52, %v584_v52  ;;  %v16288_v60 = vrot.slane %v584_v52, %v16143_v6  ;;  %v16291_v61 = vsel %vm5030_vm1, %v7484_v50, 0  ;;  %v545_v62 = vcombine.high %v543_v54, %v543_v54 }
 0x198   :  { %v16294_v63 = vrot.slane %v543_v54, %v16143_v6  ;;  %v16297_v2 = vrot.slane %v544_v55, %v16143_v6  ;;  %v574_v3 = vcombine.high %v16282_v56, %v16282_v56  ;;  %14474 = vmatprep.subr.bf16.mxu0 %v20528_v1  ;;  %v7765_v5 = vcombine.low %v7757_v38, %v7764_v57 }
 0x199   :  { %v16303_v8 = vrot.slane %v592_v58, %v16143_v6  ;;  %v2033_v9 = vcombine.low %v16261_v43, %v525_v44  ;;  %v2034_v13 = vcombine.low %v527_v51, %v16189_v35  ;;  %v16308_v14 = vrot.slane %v545_v62, %v16143_v6  ;;  %v312_v62 = vld [vmem:[#allocation10 + $0x48] sm:$0xff] }
 0x19a   :  { %20921 = vst [vmem:[#allocation50_spill] sm:$0xff] %v16294_v63  ;;  %v575_v16 = vcombine.high %v16294_v63, %v16294_v63  ;;  %v576_v17 = vcombine.high %v16297_v2, %v16297_v2  ;;  %v2035_v18 = vcombine.low %v16268_v47, %v526_v45  ;;  %v16315_v21 = vpack.c.bf16 %v7765_v5, %v7732_v20 }
 0x19b   :  { %20922 = vst [vmem:[#allocation51_spill] sm:$0xff] %v16303_v8  ;;  %v2036_v23 = vcombine.low %v528_v53, %v16282_v56  ;;  %v2043_v24 = vrot.slane %v2033_v9, %v16143_v6  ;;  %v16320_v28 = vrot.slane %v2034_v13, %v16143_v6  ;;  %v2082_v38 = vcombine.low %v16297_v2, %v574_v3 }
 0x19c   :  { %20923 = vst [vmem:[#allocation52_spill] sm:$0xff] %v16315_v21  ;;  %v16323_v31 = vrot.slane %v2035_v18, %v16143_v6  ;;  %v2083_v39 = vcombine.low %v576_v17, %v16294_v63  ;;  %v2084_v41 = vcombine.low %v16308_v14, %v575_v16  ;;  %v2085_v45 = vcombine.low %v16288_v60, %v16303_v8 }
 0x19d   :  { %v16329_v42 = vrot.slane %v2036_v23, %v16143_v6  ;;  %v2065_v20 = vcombine.low %v2043_v24, %v16320_v28  ;;  %v5646_v46 = vcombine.low %v16155_v19, %v525_v44  ;;  %v16336_v49 = vrot.slane %v2082_v38, %v16143_v6 }
 0x19e   :  { %v16339_v50 = vrot.slane %v2083_v39, %v16143_v6  ;;  %v16342_v26 = vrot.slane %v2084_v41, %v16143_v6  ;;  %v6754_v52 = vcombine.low %v16228_v59, %v527_v51  ;;  %v2113_v55 = vrot.slane %v2085_v45, %v16143_v6 }
 0x19f   :  { %v2066_v53 = vcombine.low %v16323_v31, %v16329_v42  ;;  %v2073_v54 = vrot.slane %v2065_v20, %v16143_v6  ;;  %v16350_v44 = vrot.slane %v5646_v46, %v16143_v6  ;;  %v591_v3 = vrot.slane %v577_v27, %v16143_v6 }
 0x1a0   :  { %20924 = vst [vmem:[#allocation53_spill] sm:$0xff] %v16342_v26  ;;  %v2114_v57 = vcombine.low %v16336_v49, %v16339_v50  ;;  %v16355_v58 = vrot.slane %v6754_v52, %v16143_v6  ;;  %v626_v59 = vcombine.high %v310_v48, %v310_v48  ;;  %v2115_v5 = vcombine.low %v16342_v26, %v2113_v55 }
 0x1a1   :  { %v16359_v51 = vrot.slane %v2066_v53, %v16143_v6  ;;  %v633_v9 = vrot.slane %v310_v48, %v16143_v6  ;;  %v674_v13 = vcombine.high %v312_v62, %v312_v62  ;;  %v593_v17 = vcombine.high %v591_v3, %v591_v3 }
 0x1a2   :  { %20925 = vst [vmem:[#allocation54_spill] sm:$0xff] %v16355_v58  ;;  %v16364_v16 = vrot.slane %v2114_v57, %v16143_v6  ;;  %v16367_v18 = vrot.slane %v591_v3, %v16143_v6  ;;  %v640_v23 = vrot.slane %v626_v59, %v16143_v6  ;;  %v2129_v24 = vrot.slane %v2115_v5, %v16143_v6 }
 0x1a3   :  { %20926 = vst [vmem:[#allocation55_spill] sm:$0xff] %v16359_v51  ;;  %v2081_v27 = vcombine.low %v2073_v54, %v16359_v51  ;;  %v641_v38 = vcombine.high %v633_v9, %v633_v9  ;;  %v16373_v39 = vrot.slane %v633_v9, %v16143_v6  ;;  %v16376_v41 = vrot.slane %v593_v17, %v16143_v6 }
 0x1a4   :  { %20927 = vst [vmem:[#allocation56_spill] sm:$0xff] %v16364_v16  ;;  %20928 = vst [vmem:[#allocation57_spill] sm:$0xff] %v16367_v18  ;;  %v642_v20 = vcombine.high %v640_v23, %v640_v23  ;;  %v16379_v45 = vrot.slane %v640_v23, %v16143_v6  ;;  %v681_v46 = vrot.slane %v312_v62, %v16143_v6 }
 0x1a5   :  { %20929 = vst [vmem:[#allocation58_spill] sm:$0xff] %v16373_v39  ;;  %20930 = vst [vmem:[#allocation59_spill] sm:$0xff] %v16376_v41  ;;  %v2130_v48 = vcombine.low %v16364_v16, %v2129_v24  ;;  %v16384_v52 = vrot.slane %v641_v38, %v16143_v6  ;;  %v688_v53 = vrot.slane %v674_v13, %v16143_v6 }
 0x1a6   :  { %v13902_v54 = vcombine.high %v16288_v60, %v16303_v8  ;;  %v16390_v55 = vrot.slane %v642_v20, %v16143_v6  ;;  %v16394_v57 = vcombine.high %v16379_v45, %v16379_v45  ;;  %v689_v3 = vcombine.high %v681_v46, %v681_v46 }
 0x1a7   :  { %20931 = vst [vmem:[#allocation60_spill] sm:$0xff] %v16384_v52  ;;  %v16397_v62 = vrot.slane %v681_v46, %v16143_v6  ;;  %v3436_v59 = vpack.c.bf16 %v2130_v48, %v2081_v27  ;;  %v2132_v5 = vcombine.low %v16367_v18, %v16376_v41  ;;  %v13903_v9 = vcombine.high %v16367_v18, %v16376_v41 }
 0x1a8   :  { %20932 = vst [vmem:[#allocation61_spill] sm:$0xff] %v16394_v57  ;;  %v2134_v13 = vcombine.low %v16373_v39, %v16384_v52  ;;  %v16406_v17 = vrot.slane %v689_v3, %v16143_v6  ;;  %v16413_v24 = vrot.slane %v13902_v54, %v16143_v6  ;;  %v13904_v27 = vcombine.high %v16373_v39, %v16384_v52 }
 0x1a9   :  { %20933 = vst [vmem:[#allocation62_spill] sm:$0xff] %v16397_v62  ;;  %v16410_v23 = vcombine.high %v16397_v62, %v16397_v62  ;;  %14357 = vmatmul.mubr.msk.bf16.gmra.mrb[4].mxu0 %vm4984_vm2, %v3436_v59  ;;  %v16419_v38 = vrot.slane %v2132_v5, %v16143_v6  ;;  %v16422_v20 = vrot.slane %v13903_v9, %v16143_v6 }
 0x1aa   :  { %20934 = vst [vmem:[#allocation63_spill] sm:$0xff] %v16406_v17  ;;  %v16425_v46 = vrot.slane %v2134_v13, %v16143_v6  ;;  %v2181_v48 = vcombine.low %v16379_v45, %v16390_v55  ;;  %14360 = vmatprep.mubr.msk.bf16.mxu0 %vm15726_vm0, %v20528_v1  ;;  %v2182_v54 = vcombine.low %v16394_v57, %v16397_v62  ;;  %v313_v1 = vld [vmem:[#allocation10 + $0x50] sm:$0xff] }
 0x1ab   :  { %20935 = vst [vmem:[#allocation64_spill] sm:$0xff] %v16419_v38  ;;  %v2183_v3 = vcombine.low %v16406_v17, %v16410_v23  ;;  %v16436_v59 = vrot.slane %v13904_v27, %v16143_v6  ;;  %v690_v5 = vcombine.high %v688_v53, %v688_v53  ;;  %v2163_v9 = vcombine.low %v16413_v24, %v16419_v38  ;;  %v16450_v27 = vld [vmem:[#allocation10 + $0x60] sm:$0xff] }
 0x1ac   :  { %v2164_v13 = vcombine.low %v16422_v20, %v16425_v46  ;;  %v16443_v0 = vrot.slane %v2181_v48, %v16143_v6  ;;  %v16446_v4 = vrot.slane %v688_v53, %v16143_v6  ;;  %v2204_v21 = vrot.slane %v2182_v54, %v16143_v6 }
 0x1ad   :  { %v2211_v51 = vrot.slane %v2183_v3, %v16143_v6  ;;  %v16453_v16 = vrot.slane %v690_v5, %v16143_v6  ;;  %v16457_v58 = vcombine.high %v16406_v17, %v16406_v17  ;;  %v2171_v48 = vrot.slane %v2163_v9, %v16143_v6 }
 0x1ae   :  { %20936 = vst [vmem:[#allocation65_spill] sm:$0xff] %v16446_v4  ;;  %v16461_v62 = vrot.slane %v2164_v13, %v16143_v6  ;;  %v2212_v53 = vcombine.low %v16436_v59, %v16443_v0  ;;  %v720_v54 = vcombine.high %v16446_v4, %v16446_v4  ;;  %v723_v57 = vcombine.high %v313_v1, %v313_v1 }
 0x1af   :  { %20937 = vst [vmem:[#allocation66_spill] sm:$0xff] %v16453_v16  ;;  %20938 = vst [vmem:[#allocation67_spill] sm:$0xff] %v16457_v58  ;;  %v2213_v3 = vcombine.low %v2204_v21, %v2211_v51  ;;  %v722_v5 = vcombine.high %v16453_v16, %v16453_v16  ;;  %v730_v52 = vrot.slane %v313_v1, %v16143_v6 }
 0x1b0   :  { %20939 = vst [vmem:[#allocation68_spill] sm:$0xff] %v16461_v62  ;;  %v2179_v17 = vcombine.low %v2171_v48, %v16461_v62  ;;  %v16472_v9 = vrot.slane %v2212_v53, %v16143_v6  ;;  %v778_v39 = vrot.slane %v16450_v27, %v16143_v6  ;;  %v737_v21 = vrot.slane %v723_v57, %v16143_v6 }
 0x1b1   :  { %v2227_v41 = vrot.slane %v2213_v3, %v16143_v6  ;;  %v738_v51 = vcombine.high %v730_v52, %v730_v52  ;;  %v16481_v18 = vrot.slane %v730_v52, %v16143_v6  ;;  %v2229_v53 = vcombine.low %v16457_v58, %v16446_v4 }
 0x1b2   :  { %20940 = vst [vmem:[#allocation69_spill] sm:$0xff] %v16472_v9  ;;  %v786_v1 = vcombine.high %v778_v39, %v778_v39  ;;  %v16484_v48 = vrot.slane %v778_v39, %v16143_v6  ;;  %v2230_v13 = vcombine.low %v16453_v16, %v720_v54  ;;  %v739_v8 = vcombine.high %v737_v21, %v737_v21 }
 0x1b3   :  { %20941 = vst [vmem:[#allocation70_spill] sm:$0xff] %v16481_v18  ;;  %v2228_v62 = vcombine.low %v16472_v9, %v2227_v41  ;;  %v16491_v3 = vrot.slane %v737_v21, %v16143_v6  ;;  %v16494_v57 = vrot.slane %v738_v51, %v16143_v6  ;;  %v768_v52 = vcombine.high %v16481_v18, %v16481_v18 }
 0x1b4   :  { %20942 = vst [vmem:[#allocation71_spill] sm:$0xff] %v16484_v48  ;;  %v16499_v39 = vrot.slane %v786_v1, %v16143_v6  ;;  %v2231_v63 = vcombine.low %v722_v5, %v16481_v18  ;;  %v16503_v58 = vrot.slane %v2229_v53, %v16143_v6  ;;  %v16506_v41 = vrot.slane %v739_v8, %v16143_v6 }
 0x1b5   :  { %20943 = vst [vmem:[#allocation72_spill] sm:$0xff] %v16491_v3  ;;  %20944 = vst [vmem:[#allocation73_spill] sm:$0xff] %v16494_v57  ;;  %v3437_v54 = vpack.c.bf16 %v2228_v62, %v2179_v17  ;;  %v769_v21 = vcombine.high %v16491_v3, %v16491_v3  ;;  %v770_v51 = vcombine.high %v16494_v57, %v16494_v57  ;;  %v20947_v18 = vmov 0.0  }
 0x1b6   :  { %20945 = vst [vmem:[#allocation74_spill] sm:$0xff] %v16499_v39  ;;  %v2232_v9 = vcombine.low %v16494_v57, %v768_v52  ;;  %v16514_v1 = vrot.slane %v2230_v13, %v16143_v6  ;;  %v16517_v5 = vrot.slane %v2231_v63, %v16143_v6  ;;  %v2280_v62 = vcombine.low %v16484_v48, %v16499_v39  ;;  %v13986_v13 = vld.sshfl [vmem:[#allocation10 + $0x28] sm:$0x13 pattern:$0x75316420] }
 0x1b7   :  { %14361 = vmatmul.mubr.msk.bf16.gmra.mrb[8].mxu0 %vm4984_vm2, %v3437_v54  ;;  %v2278_v8 = vcombine.low %v770_v51, %v16491_v3  ;;  %v2279_v17 = vcombine.low %v16506_v41, %v769_v21  ;;  %v13905_v53 = vcombine.high %v16484_v48, %v16499_v39  ;;  %v5644_v52 = vcombine.low %v16237_v11, %v16240_v12  ;;  %v13987_v39 = vld.sshfl [vmem:[#allocation10 + $0x40] sm:$0x13 pattern:$0x75316420] }
 0x1b8   :  { %20946 = vst [vmem:[#allocation75_spill] sm:$0xff] %v16514_v1  ;;  %14364 = vmatprep.mubr.msk.bf16.mxu0 %vm15726_vm0, %v20947_v18  ;;  %v16531_v63 = vrot.slane %v2232_v9, %v16143_v6  ;;  %v2261_v54 = vcombine.low %v16503_v58, %v16514_v1  ;;  %v2302_v51 = vrot.slane %v2280_v62, %v16143_v6 }
 0x1b9   :  { %v5662_v21 = vcombine.low %v16233_v7, %v16350_v44  ;;  %v16539_v3 = vrot.slane %v2278_v8, %v16143_v6  ;;  %v16542_v11 = vrot.slane %v2279_v17, %v16143_v6  ;;  %v16545_v12 = vrot.slane %v13905_v53, %v16143_v6 }
 0x1ba   :  { %v3452_v9 = vcombine.high %v16308_v14, %v16308_v14  ;;  %v2262_v57 = vcombine.low %v16517_v5, %v16531_v63  ;;  %v2269_v62 = vrot.slane %v2261_v54, %v16143_v6  ;;  %v16554_v7 = vrot.slane %v13986_v13, %v16143_v6 }
 0x1bb   :  { %v5676_v4 = vrot.slane %v5662_v21, %v16143_v6  ;;  %v2310_v44 = vcombine.low %v16539_v3, %v16542_v11  ;;  %v2311_v8 = vcombine.low %v2302_v51, %v16545_v12  ;;  %v5678_v17 = vcombine.low %v16320_v28, %v16323_v31 }
 0x1bc   :  { %20948 = vst [vmem:[#allocation76_spill] sm:$0xff] %v16554_v7  ;;  %v5679_v53 = vcombine.low %v16329_v42, %v16336_v49  ;;  %v16564_v16 = vrot.slane %v2262_v57, %v16143_v6  ;;  %v5695_v21 = vcombine.low %v3452_v9, %v16554_v7  ;;  %v5703_v13 = vcombine.low %v16339_v50, %v16342_v26 }
 0x1bd   :  { %v5677_v54 = vcombine.low %v16246_v15, %v5676_v4  ;;  %v16571_v48 = vrot.slane %v2310_v44, %v16143_v6  ;;  %v2325_v51 = vrot.slane %v2311_v8, %v16143_v6  ;;  %v5686_v28 = vrot.slane %v5678_v17, %v16143_v6  ;;  %v13988_v17 = vld.sshfl [vmem:[#allocation10 + $0x58] sm:$0x13 pattern:$0x75316420] }
 0x1be   :  { %20949 = vst [vmem:[#allocation77_spill] sm:$0xff] %v16564_v16  ;;  %v5693_v31 = vrot.slane %v5679_v53, %v16143_v6  ;;  %v2277_v42 = vcombine.low %v2269_v62, %v16564_v16  ;;  %v16578_v4 = vrot.slane %v5695_v21, %v16143_v6  ;;  %v5711_v15 = vrot.slane %v5703_v13, %v16143_v6 }
 0x1bf   :  { %20950 = vst [vmem:[#allocation78_spill] sm:$0xff] %v16571_v48  ;;  %v6360_v49 = vpack.c.bf16 %v5677_v54, %v5644_v52  ;;  %v2326_v50 = vcombine.low %v16571_v48, %v2325_v51  ;;  %v16583_v9 = vrot.slane %v13987_v39, %v16143_v6  ;;  %v5720_v44 = vcombine.low %v16419_v38, %v16422_v20 }
 0x1c0   :  { %20951 = vst [vmem:[#allocation79_spill] sm:$0xff] %v16578_v4  ;;  %v5694_v57 = vcombine.low %v5686_v28, %v5693_v31  ;;  %v5704_v8 = vcombine.low %v16578_v4, %v16413_v24  ;;  %v5721_v52 = vcombine.low %v16425_v46, %v16436_v59  ;;  %v14002_v62 = vcombine.high %v16379_v45, %v16390_v55 }
 0x1c1   :  { %20952 = vst [vmem:[#allocation80_spill] sm:$0xff] %v16583_v9  ;;  %v20953_v53 = vcombine.high %v16450_v27, %v16450_v27  ;;  %v3438_v39 = vpack.c.bf16 %v2326_v50, %v2277_v42  ;;  %v5728_v21 = vrot.slane %v5720_v44, %v16143_v6  ;;  %v5738_v20 = vcombine.low %v16583_v9, %v16410_v23  ;;  %v316_v42 = vld [vmem:[#allocation10 + $0x68] sm:$0xff] }
 0x1c2   :  { %v3454_v24 = vcombine.high %v16506_v41, %v16506_v41  ;;  %v5718_v46 = vrot.slane %v5704_v8, %v16143_v6  ;;  %v5735_v59 = vrot.slane %v5721_v52, %v16143_v6  ;;  %v16605_v13 = vrot.slane %v14002_v62, %v16143_v6 }
 0x1c3   :  { %v785_v54 = vrot.slane %v20953_v53, %v16143_v6  ;;  %14365 = vmatmul.mubr.msk.bf16.gmra.mrb[12].mxu0 %vm4984_vm2, %v3438_v39  ;;  %v5752_v27 = vrot.slane %v5738_v20, %v16143_v6  ;;  %v16613_v23 = vrot.slane %v13988_v17, %v16143_v6  ;;  %v5770_v31 = vcombine.low %v16514_v1, %v16517_v5 }
 0x1c4   :  { %20954 = vst [vmem:[#allocation81_spill] sm:$0xff] %v16605_v13  ;;  %14414 = vmatprep.mubr.msk.bf16.mxu0 %vm15726_vm0, %v20947_v18  ;;  %v5719_v50 = vcombine.low %v5711_v15, %v5718_v46  ;;  %v5736_v44 = vcombine.low %v5728_v21, %v5735_v59  ;;  %v5753_v8 = vcombine.low %v16443_v0, %v16605_v13 }
 0x1c5   :  { %v787_v51 = vcombine.high %v785_v54, %v785_v54  ;;  %v16610_v28 = vrot.slane %v785_v54, %v16143_v6  ;;  %20955 = vst [vmem:[#allocation82_spill] sm:$0xff] %v16613_v23  ;;  %v5754_v62 = vcombine.low %v5752_v27, %v16503_v58  ;;  %v5771_v17 = vcombine.low %v16531_v63, %v16539_v3  ;;  %v318_v54 = vld [vmem:[#allocation10 + $0x78] sm:$0xff] }
 0x1c6   :  { %v5778_v53 = vrot.slane %v5770_v31, %v16143_v6  ;;  %v5787_v5 = vcombine.low %v3454_v24, %v16613_v23  ;;  %v6361_v39 = vpack.c.bf16 %v5719_v50, %v5694_v57  ;;  %v5761_v15 = vrot.slane %v5753_v8, %v16143_v6  ;;  %v4983_v8 = vld [vmem:[#allocation13 + $0x4] sm:$0xf] }
 0x1c7   :  { %v16622_v52 = vrot.slane %v787_v51, %v16143_v6  ;;  %v820_v0 = vcombine.high %v316_v42, %v316_v42  ;;  %v5768_v20 = vrot.slane %v5754_v62, %v16143_v6  ;;  %v5785_v46 = vrot.slane %v5771_v17, %v16143_v6 }
 0x1c8   :  { %v16635_v58 = vrot.slane %v5787_v5, %v16143_v6  ;;  %v827_v3 = vrot.slane %v316_v42, %v16143_v6  ;;  %v868_v57 = vcombine.high %v318_v54, %v318_v54  ;;  %v875_v59 = vrot.slane %v318_v54, %v16143_v6 }
 0x1c9   :  { %v2327_v21 = vcombine.low %v16610_v28, %v16622_v52  ;;  %v834_v24 = vrot.slane %v820_v0, %v16143_v6  ;;  %v5769_v51 = vcombine.low %v5761_v15, %v5768_v20  ;;  %v5786_v27 = vcombine.low %v5778_v53, %v5785_v46 }
 0x1ca   :  { %20956 = vst [vmem:[#allocation83_spill] sm:$0xff] %v16635_v58  ;;  %v5795_v31 = vcombine.low %v16542_v11, %v16635_v58  ;;  %v835_v50 = vcombine.high %v827_v3, %v827_v3  ;;  %v16645_v5 = vrot.slane %v827_v3, %v16143_v6  ;;  %v882_v11 = vrot.slane %v868_v57, %v16143_v6  ;;  %v319_v58 = vld [vmem:[#allocation10 + $0x80] sm:$0xff] }
 0x1cb   :  { %v2337_v63 = vrot.slane %v2327_v21, %v16143_v6  ;;  %v836_v17 = vcombine.high %v834_v24, %v834_v24  ;;  %v16648_v42 = vrot.slane %v834_v24, %v16143_v6  ;;  %14415 = vmatmul.mubr.msk.bf16.vlgmr.msra.gmra.mrb[0].mxu0 %vm4984_vm2, %v6360_v49  ;;  %v16651_v21 = vpack.c.bf16 %v5769_v51, %v5736_v44 }
 0x1cc   :  { %v5803_v53 = vrot.slane %v5795_v31, %v16143_v6  ;;  %v16655_v54 = vrot.slane %v835_v50, %v16143_v6  ;;  %14475 = vmatpush3.bf16.msra.mxu0 %v16291_v61  ;;  %14418 = vmatprep.mubr.msk.bf16.mxu0 %vm15726_vm0, %v20947_v18  ;;  %v883_v49 = vcombine.high %v875_v59, %v875_v59  ;;  %v5032_v44 = vsel %vm5030_vm1, %v4983_v8, 0 }
 0x1cd   :  { %v5796_v62 = vcombine.low %v16545_v12, %v2337_v63  ;;  %v16663_v15 = vrot.slane %v836_v17, %v16143_v6  ;;  %v884_v0 = vcombine.high %v882_v11, %v882_v11  ;;  %v16667_v20 = vrot.slane %v875_v59, %v16143_v6  ;;  %14289 = vmatpush3.bf16.msra.mxu1 %v5032_v44  ;;  %v13989_v59 = vld.sshfl [vmem:[#allocation10 + $0x70] sm:$0x13 pattern:$0x75316420] }
 0x1ce   :  { %v16670_v46 = vrot.slane %v882_v11, %v16143_v6  ;;  %v13906_v61 = vcombine.high %v16610_v28, %v16622_v52  ;;  %v16675_v24 = vrot.slane %v883_v49, %v16143_v6  ;;  %v2329_v57 = vcombine.low %v16645_v5, %v16655_v54  ;;  %14536 = vmatprep.subr.bf16.mxu0 %v20947_v18 }
 0x1cf   :  { %v5810_v12 = vrot.slane %v5796_v62, %v16143_v6  ;;  %v13907_v51 = vcombine.high %v16645_v5, %v16655_v54  ;;  %v16683_v31 = vrot.slane %v884_v0, %v16143_v6  ;;  %v913_v50 = vcombine.high %v16667_v20, %v16667_v20  ;;  %14778 = vmatprep.subr.bf16.mxu1 %v20947_v18 }
 0x1d0   :  { %20957 = vst [vmem:[#allocation84_spill] sm:$0xff] %v16670_v46  ;;  %v914_v8 = vcombine.high %v16670_v46, %v16670_v46  ;;  %v2344_v62 = vrot.slane %v13906_v61, %v16143_v6  ;;  %v2351_v11 = vrot.slane %v2329_v57, %v16143_v6  ;;  %v2376_v44 = vcombine.low %v16648_v42, %v16663_v15 }
 0x1d1   :  { %v5811_v3 = vcombine.low %v5803_v53, %v5810_v12  ;;  %v16695_v53 = vcombine.high %v16675_v24, %v16675_v24  ;;  %v2358_v12 = vrot.slane %v13907_v51, %v16143_v6  ;;  %v2378_v0 = vcombine.low %v16675_v24, %v913_v50 }
 0x1d2   :  { %v2359_v49 = vcombine.low %v2337_v63, %v2344_v62  ;;  %v2425_v61 = vcombine.low %v16683_v31, %v914_v8  ;;  %v5812_v48 = vcombine.low %v2344_v62, %v2351_v11  ;;  %v16713_v57 = vrot.slane %v2376_v44, %v16143_v6 }
 0x1d3   :  { %v16691_v17 = vpack.c.bf16 %v5811_v3, %v5786_v27  ;;  %20958 = vst [vmem:[#allocation85_spill] sm:$0xff] %v16695_v53  ;;  %v2360_v16 = vcombine.low %v2351_v11, %v2358_v12  ;;  %v2379_v27 = vcombine.low %v16695_v53, %v16670_v46  ;;  %v16706_v3 = vrot.slane %v13989_v59, %v16143_v6  ;;  %v322_v53 = vld [vmem:[#allocation10 + $0x98] sm:$0xff] }
 0x1d4   :  { %14419 = vmatmul.mubr.msk.bf16.gmra.mrb[4].mxu0 %vm4984_vm2, %v6361_v39  ;;  %v16710_v63 = vrot.slane %v2359_v49, %v16143_v6  ;;  %20961 = vst [vmem:[#allocation88_spill] sm:$0xff] %v16713_v57  ;;  %v2400_v51 = vrot.slane %v2378_v0, %v16143_v6  ;;  %v16717_v8 = vrot.slane %v2425_v61, %v16143_v6  ;;  %v321_v49 = vld [vmem:[#allocation10 + $0x90] sm:$0xff] }
 0x1d5   :  { %20959 = vst [vmem:[#allocation86_spill] sm:$0xff] %v16706_v3  ;;  %14422 = vmatprep.mubr.msk.bf16.mxu0 %vm15726_vm0, %v20947_v18  ;;  %v16722_v59 = vrot.slane %v2360_v16, %v16143_v6  ;;  %v2407_v62 = vrot.slane %v2379_v27, %v16143_v6  ;;  %v5820_v39 = vrot.slane %v5812_v48, %v16143_v6 }
 0x1d6   :  { %20960 = vst [vmem:[#allocation87_spill] sm:$0xff] %v16710_v63  ;;  %20962 = vst [vmem:[#allocation89_spill] sm:$0xff] %v16717_v8  ;;  %v14003_v11 = vcombine.high %v16648_v42, %v16663_v15  ;;  %v5813_v44 = vcombine.low %v2358_v12, %v16713_v57  ;;  %v5830_v0 = vcombine.low %v16706_v3, %v913_v50 }
 0x1d7   :  { %20963 = vst [vmem:[#allocation90_spill] sm:$0xff] %v16722_v59  ;;  %v916_v61 = vcombine.high %v16683_v31, %v16683_v31  ;;  %v917_v1 = vcombine.high %v319_v58, %v319_v58  ;;  %v2409_v13 = vcombine.low %v2400_v51, %v2407_v62  ;;  %v5846_v27 = vcombine.low %v2407_v62, %v16717_v8 }
 0x1d8   :  { %v16733_v16 = vrot.slane %v14003_v11, %v16143_v6  ;;  %v924_v48 = vrot.slane %v319_v58, %v16143_v6  ;;  %v5827_v38 = vrot.slane %v5813_v44, %v16143_v6  ;;  %v5844_v26 = vrot.slane %v5830_v0, %v16143_v6 }
 0x1d9   :  { %v931_v12 = vrot.slane %v917_v1, %v16143_v6  ;;  %v965_v4 = vcombine.high %v321_v49, %v321_v49  ;;  %v16741_v50 = vrot.slane %v2409_v13, %v16143_v6  ;;  %v5860_v57 = vrot.slane %v5846_v27, %v16143_v6 }
 0x1da   :  { %20964 = vst [vmem:[#allocation91_spill] sm:$0xff] %v16733_v16  ;;  %v932_v51 = vcombine.high %v924_v48, %v924_v48  ;;  %v16745_v11 = vrot.slane %v924_v48, %v16143_v6  ;;  %v5828_v63 = vcombine.low %v5820_v39, %v5827_v38  ;;  %v5845_v62 = vcombine.low %v16733_v16, %v5844_v26 }
 0x1db   :  { %20965 = vst [vmem:[#allocation92_spill] sm:$0xff] %v16741_v50  ;;  %v933_v58 = vcombine.high %v931_v12, %v931_v12  ;;  %v16749_v44 = vrot.slane %v931_v12, %v16143_v6  ;;  %v972_v13 = vrot.slane %v321_v49, %v16143_v6  ;;  %v979_v27 = vrot.slane %v965_v4, %v16143_v6  ;;  %v13990_v12 = vld.sshfl [vmem:[#allocation10 + $0x88] sm:$0x13 pattern:$0x75316420] }
 0x1dc   :  { %v16752_v0 = vrot.slane %v932_v51, %v16143_v6  ;;  %v962_v1 = vcombine.high %v16745_v11, %v16745_v11  ;;  %14423 = vmatmul.mubr.msk.bf16.gmra.mrb[8].mxu0 %vm4984_vm2, %v16651_v21  ;;  %v5853_v38 = vrot.slane %v5845_v62, %v16143_v6  ;;  %v2426_v48 = vcombine.low %v916_v61, %v16745_v11 }
 0x1dd   :  { %20966 = vst [vmem:[#allocation93_spill] sm:$0xff] %v16749_v44  ;;  %v16762_v26 = vrot.slane %v933_v58, %v16143_v6  ;;  %v963_v39 = vcombine.high %v16749_v44, %v16749_v44  ;;  %14426 = vmatprep.mubr.msk.bf16.mxu0 %vm15726_vm0, %v20947_v18  ;;  %v980_v49 = vcombine.high %v972_v13, %v972_v13 }
 0x1de   :  { %v964_v4 = vcombine.high %v16752_v0, %v16752_v0  ;;  %v981_v51 = vcombine.high %v979_v27, %v979_v27  ;;  %v16772_v21 = vrot.slane %v972_v13, %v16143_v6  ;;  %v5861_v62 = vcombine.low %v5853_v38, %v5860_v57 }
 0x1df   :  { %20967 = vst [vmem:[#allocation94_spill] sm:$0xff] %v16762_v26  ;;  %v16775_v58 = vrot.slane %v979_v27, %v16143_v6  ;;  %v2427_v16 = vcombine.low %v16752_v0, %v962_v1  ;;  %v16779_v61 = vrot.slane %v2426_v48, %v16143_v6  ;;  %v16782_v8 = vrot.slane %v980_v49, %v16143_v6 }
 0x1e0   :  { %20968 = vst [vmem:[#allocation95_spill] sm:$0xff] %v16772_v21  ;;  %v16785_v50 = vrot.slane %v981_v51, %v16143_v6  ;;  %v2428_v59 = vcombine.low %v964_v4, %v16749_v44  ;;  %v2474_v13 = vcombine.low %v16762_v26, %v963_v39  ;;  %v6364_v57 = vpack.c.bf16 %v5861_v62, %v5828_v63  ;;  %v324_v51 = vld [vmem:[#allocation10 + $0xa8] sm:$0xff] }
 0x1e1   :  { %20969 = vst [vmem:[#allocation96_spill] sm:$0xff] %v16779_v61  ;;  %20970 = vst [vmem:[#allocation97_spill] sm:$0xff] %v16782_v8  ;;  %v16790_v27 = vrot.slane %v2427_v16, %v16143_v6  ;;  %v3456_v1 = vcombine.high %v16762_v26, %v16762_v26  ;;  %v16795_v38 = vrot.slane %v13990_v12, %v16143_v6 }
 0x1e2   :  { %20971 = vst [vmem:[#allocation98_spill] sm:$0xff] %v16785_v50  ;;  %v16798_v48 = vrot.slane %v2428_v59, %v16143_v6  ;;  %v13908_v49 = vcombine.high %v16772_v21, %v16782_v8  ;;  %v2477_v39 = vcombine.low %v16775_v58, %v16785_v50  ;;  %v16805_v63 = vrot.slane %v2474_v13, %v16143_v6 }
 0x1e3   :  { %20972 = vst [vmem:[#allocation99_spill] sm:$0xff] %v16790_v27  ;;  %20973 = vst [vmem:[#allocation100_spill] sm:$0xff] %v16795_v38  ;;  %v13909_v16 = vcombine.high %v16775_v58, %v16785_v50  ;;  %v5862_v4 = vcombine.low %v16779_v61, %v16790_v27  ;;  %v5879_v12 = vcombine.low %v3456_v1, %v16795_v38 }
 0x1e4   :  { %20974 = vst [vmem:[#allocation101_spill] sm:$0xff] %v16798_v48  ;;  %20975 = vst [vmem:[#allocation102_spill] sm:$0xff] %v16805_v63  ;;  %v1014_v59 = vcombine.high %v322_v53, %v322_v53  ;;  %v16813_v62 = vrot.slane %v13908_v49, %v16143_v6  ;;  %v16816_v3 = vrot.slane %v2477_v39, %v16143_v6  ;;  %14427 = vmatmul.mubr.msk.bf16.gmra.mrb[12].mxu0 %vm4984_vm2, %v16691_v17 }
 0x1e5   :  { %v5863_v13 = vcombine.low %v16798_v48, %v16805_v63  ;;  %v1021_v23 = vrot.slane %v322_v53, %v16143_v6  ;;  %v16824_v27 = vrot.slane %v13909_v16, %v16143_v6  ;;  %v5870_v1 = vrot.slane %v5862_v4, %v16143_v6  ;;  %14430 = vmatprep.mubr.msk.bf16.mxu0 %vm15726_vm0, %v20947_v18  ;;  %v325_v63 = vld [vmem:[#allocation10 + $0xb0] sm:$0xff] }
 0x1e6   :  { %20976 = vst [vmem:[#allocation103_spill] sm:$0xff] %v16813_v62  ;;  %20977 = vst [vmem:[#allocation104_spill] sm:$0xff] %v16816_v3  ;;  %v16828_v61 = vrot.slane %v5879_v12, %v16143_v6  ;;  %v1028_v49 = vrot.slane %v1014_v59, %v16143_v6  ;;  %v1062_v17 = vcombine.high %v324_v51, %v324_v51 }
 0x1e7   :  { %20978 = vst [vmem:[#allocation105_spill] sm:$0xff] %v16824_v27  ;;  %v5877_v39 = vrot.slane %v5863_v13, %v16143_v6  ;;  %v1029_v53 = vcombine.high %v1021_v23, %v1021_v23  ;;  %v16835_v48 = vrot.slane %v1021_v23, %v16143_v6  ;;  %v5888_v4 = vcombine.low %v16816_v3, %v16824_v27 }
 0x1e8   :  { %20979 = vst [vmem:[#allocation106_spill] sm:$0xff] %v16828_v61  ;;  %v5887_v16 = vcombine.low %v16828_v61, %v16813_v62  ;;  %v1030_v12 = vcombine.high %v1028_v49, %v1028_v49  ;;  %v16842_v59 = vrot.slane %v1028_v49, %v16143_v6  ;;  %v1069_v13 = vrot.slane %v324_v51, %v16143_v6 }
 0x1e9   :  { %20980 = vst [vmem:[#allocation107_spill] sm:$0xff] %v16835_v48  ;;  %v5878_v38 = vcombine.low %v5870_v1, %v5877_v39  ;;  %v16845_v9 = vrot.slane %v1029_v53, %v16143_v6  ;;  %v1076_v23 = vrot.slane %v1062_v17, %v16143_v6  ;;  %v5902_v50 = vrot.slane %v5888_v4, %v16143_v6  ;;  %v13991_v53 = vld.sshfl [vmem:[#allocation10 + $0xa0] sm:$0x13 pattern:$0x75316420] }
 0x1ea   :  { %20981 = vst [vmem:[#allocation108_spill] sm:$0xff] %v16842_v59  ;;  %v5895_v7 = vrot.slane %v5887_v16, %v16143_v6  ;;  %v16852_v61 = vrot.slane %v1030_v12, %v16143_v6  ;;  %v1118_v27 = vrot.slane %v325_v63, %v16143_v6  ;;  %v1077_v62 = vcombine.high %v1069_v13, %v1069_v13 }
 0x1eb   :  { %20982 = vst [vmem:[#allocation109_spill] sm:$0xff] %v16845_v9  ;;  %v1078_v49 = vcombine.high %v1076_v23, %v1076_v23  ;;  %v16856_v1 = vrot.slane %v1069_v13, %v16143_v6  ;;  %v16859_v39 = vrot.slane %v1076_v23, %v16143_v6  ;;  %v2524_v16 = vcombine.low %v16835_v48, %v16845_v9 }
 0x1ec   :  { %20983 = vst [vmem:[#allocation110_spill] sm:$0xff] %v16852_v61  ;;  %v5903_v51 = vcombine.low %v5895_v7, %v5902_v50  ;;  %v16862_v17 = vrot.slane %v1118_v27, %v16143_v6  ;;  %v13910_v4 = vcombine.high %v16835_v48, %v16845_v9  ;;  %v16869_v12 = vrot.slane %v1077_v62, %v16143_v6 }
 0x1ed   :  { %20984 = vst [vmem:[#allocation111_spill] sm:$0xff] %v16856_v1  ;;  %20985 = vst [vmem:[#allocation112_spill] sm:$0xff] %v16859_v39  ;;  %v16872_v13 = vrot.slane %v1078_v49, %v16143_v6  ;;  %v16876_v23 = vcombine.high %v16856_v1, %v16856_v1  ;;  %v1108_v7 = vcombine.high %v16859_v39, %v16859_v39  ;;  %14431 = vmatmul.mubr.msk.bf16.gmra.mrb[16].mxu0 %vm4984_vm2, %v6364_v57 }
 0x1ee   :  { %20986 = vst [vmem:[#allocation113_spill] sm:$0xff] %v16862_v17  ;;  %20987 = vst [vmem:[#allocation114_spill] sm:$0xff] %v16869_v12  ;;  %v6365_v50 = vpack.c.bf16 %v5903_v51, %v5878_v38  ;;  %v2526_v3 = vcombine.low %v16842_v59, %v16852_v61  ;;  %v16884_v9 = vrot.slane %v2524_v16, %v16143_v6  ;;  %14434 = vmatprep.mubr.msk.bf16.mxu0 %vm15726_vm0, %v20947_v18 }
 0x1ef   :  { %20988 = vst [vmem:[#allocation115_spill] sm:$0xff] %v16872_v13  ;;  %20989 = vst [vmem:[#allocation116_spill] sm:$0xff] %v16876_v23  ;;  %v16887_v62 = vrot.slane %v13910_v4, %v16143_v6  ;;  %v16893_v49 = vcombine.high %v16869_v12, %v16869_v12  ;;  %v1110_v57 = vcombine.high %v16872_v13, %v16872_v13 }
 0x1f0   :  { %20990 = vst [vmem:[#allocation117_spill] sm:$0xff] %v16884_v9  ;;  %v2575_v38 = vcombine.low %v16872_v13, %v1108_v7  ;;  %v16899_v51 = vrot.slane %v13991_v53, %v16143_v6  ;;  %v16902_v16 = vrot.slane %v2526_v3, %v16143_v6  ;;  %v14004_v4 = vcombine.high %v16842_v59, %v16852_v61  ;;  %v327_v61 = vld [vmem:[#allocation10 + $0xc0] sm:$0xff] }
 0x1f1   :  { %20991 = vst [vmem:[#allocation118_spill] sm:$0xff] %v16887_v62  ;;  %20992 = vst [vmem:[#allocation119_spill] sm:$0xff] %v16893_v49  ;;  %v5912_v1 = vcombine.low %v16884_v9, %v16887_v62  ;;  %v1111_v48 = vcombine.high %v325_v63, %v325_v63  ;;  %v2574_v12 = vcombine.low %v16893_v49, %v16859_v39 }
 0x1f2   :  { %20993 = vst [vmem:[#allocation120_spill] sm:$0xff] %v16899_v51  ;;  %20994 = vst [vmem:[#allocation121_spill] sm:$0xff] %v16902_v16  ;;  %v16911_v44 = vrot.slane %v2575_v38, %v16143_v6  ;;  %v2621_v7 = vcombine.low %v1110_v57, %v16862_v17  ;;  %v5929_v53 = vcombine.low %v16899_v51, %v16876_v23 }
 0x1f3   :  { %v16917_v3 = vrot.slane %v14004_v4, %v16143_v6  ;;  %v5920_v13 = vrot.slane %v5912_v1, %v16143_v6  ;;  %v1125_v62 = vrot.slane %v1111_v48, %v16143_v6  ;;  %v1126_v63 = vcombine.high %v1118_v27, %v1118_v27 }
 0x1f4   :  { %20995 = vst [vmem:[#allocation122_spill] sm:$0xff] %v16911_v44  ;;  %v16922_v9 = vrot.slane %v2574_v12, %v16143_v6  ;;  %v16925_v38 = vrot.slane %v2621_v7, %v16143_v6  ;;  %v5936_v57 = vrot.slane %v5929_v53, %v16143_v6  ;;  %v1156_v23 = vcombine.high %v16862_v17, %v16862_v17  ;;  %v16941_v7 = vld [vmem:[#allocation10 + $0xc8] sm:$0xff] }
 0x1f5   :  { %20996 = vst [vmem:[#allocation123_spill] sm:$0xff] %v16917_v3  ;;  %v5913_v4 = vcombine.low %v16902_v16, %v16917_v3  ;;  %v1127_v49 = vcombine.high %v1125_v62, %v1125_v62  ;;  %v16933_v1 = vrot.slane %v1125_v62, %v16143_v6  ;;  %v16936_v27 = vrot.slane %v1126_v63, %v16143_v6 }
 0x1f6   :  { %20997 = vst [vmem:[#allocation124_spill] sm:$0xff] %v16922_v9  ;;  %20998 = vst [vmem:[#allocation125_spill] sm:$0xff] %v16925_v38  ;;  %v5937_v48 = vcombine.low %v5936_v57, %v16922_v9  ;;  %v5938_v12 = vcombine.low %v16911_v44, %v16925_v38  ;;  %v1159_v53 = vcombine.high %v327_v61, %v327_v61  ;;  %14435 = vmatmul.mubr.msk.bf16.gmra.mrb[20].mxu0 %vm4984_vm2, %v6365_v50 }
 0x1f7   :  { %20999 = vst [vmem:[#allocation126_spill] sm:$0xff] %v16933_v1  ;;  %21000 = vst [vmem:[#allocation127_spill] sm:$0xff] %v16936_v27  ;;  %v1166_v51 = vrot.slane %v327_v61, %v16143_v6  ;;  %v5927_v3 = vrot.slane %v5913_v4, %v16143_v6  ;;  %v16947_v62 = vrot.slane %v1127_v49, %v16143_v6  ;;  %14438 = vmatprep.mubr.msk.bf16.mxu0 %vm15726_vm0, %v20947_v18 }
 0x1f8   :  { %v1157_v63 = vcombine.high %v16933_v1, %v16933_v1  ;;  %v1158_v57 = vcombine.high %v16936_v27, %v16936_v27  ;;  %v5945_v38 = vrot.slane %v5937_v48, %v16143_v6  ;;  %v5952_v61 = vrot.slane %v5938_v12, %v16143_v6  ;;  %v13992_v12 = vld.sshfl [vmem:[#allocation10 + $0xb8] sm:$0x13 pattern:$0x75316420] }
 0x1f9   :  { %21001 = vst [vmem:[#allocation128_spill] sm:$0xff] %v16947_v62  ;;  %v1173_v50 = vrot.slane %v1159_v53, %v16143_v6  ;;  %v1174_v9 = vcombine.high %v1166_v51, %v1166_v51  ;;  %v5928_v4 = vcombine.low %v5920_v13, %v5927_v3  ;;  %v16959_v49 = vrot.slane %v1166_v51, %v16143_v6 }
 0x1fa   :  { %v1215_v44 = vrot.slane %v16941_v7, %v16143_v6  ;;  %v2622_v16 = vcombine.low %v16936_v27, %v1156_v23  ;;  %v5953_v17 = vcombine.low %v5945_v38, %v5952_v61  ;;  %v2623_v51 = vcombine.low %v1158_v57, %v16933_v1 }
 0x1fb   :  { %21002 = vst [vmem:[#allocation129_spill] sm:$0xff] %v16959_v49  ;;  %v1175_v39 = vcombine.high %v1173_v50, %v1173_v50  ;;  %v16965_v59 = vrot.slane %v1173_v50, %v16143_v6  ;;  %v16968_v48 = vrot.slane %v1174_v9, %v16143_v6  ;;  %v2624_v3 = vcombine.low %v16947_v62, %v1157_v63 }
 0x1fc   :  { %v1223_v53 = vcombine.high %v1215_v44, %v1215_v44  ;;  %v16971_v13 = vrot.slane %v1215_v44, %v16143_v6  ;;  %v6366_v26 = vpack.c.bf16 %v5953_v17, %v5928_v4  ;;  %v16979_v38 = vrot.slane %v2622_v16, %v16143_v6 }
 0x1fd   :  { %21003 = vst [vmem:[#allocation130_spill] sm:$0xff] %v16965_v59  ;;  %21004 = vst [vmem:[#allocation131_spill] sm:$0xff] %v16968_v48  ;;  %v16976_v23 = vrot.slane %v1175_v39, %v16143_v6  ;;  %v13911_v9 = vcombine.high %v16959_v49, %v16968_v48  ;;  %v16987_v44 = vrot.slane %v2623_v51, %v16143_v6 }
 0x1fe   :  { %21006 = vst [vmem:[#allocation133_spill] sm:$0xff] %v16979_v38  ;;  %v16984_v61 = vrot.slane %v1223_v53, %v16143_v6  ;;  %v16990_v57 = vrot.slane %v2624_v3, %v16143_v6  ;;  %v3458_v17 = vcombine.high %v16947_v62, %v16947_v62  ;;  %v17002_v50 = vrot.slane %v13992_v12, %v16143_v6 }
 0x1ff   :  { %21005 = vst [vmem:[#allocation132_spill] sm:$0xff] %v16976_v23  ;;  %21007 = vst [vmem:[#allocation134_spill] sm:$0xff] %v16987_v44  ;;  %v2672_v39 = vcombine.low %v16965_v59, %v16976_v23  ;;  %v13912_v16 = vcombine.high %v16965_v59, %v16976_v23  ;;  %v16999_v63 = vrot.slane %v13911_v9, %v16143_v6  ;;  %14439 = vmatmul.mubr.msk.bf16.gmra.mrb[24].mxu0 %vm4984_vm2, %v6366_v26 }
 0x200   :  { %21008 = vst [vmem:[#allocation135_spill] sm:$0xff] %v16990_v57  ;;  %21010 = vst [vmem:[#allocation137_spill] sm:$0xff] %v17002_v50  ;;  %v2719_v4 = vcombine.low %v16971_v13, %v16984_v61  ;;  %v5962_v53 = vcombine.low %v16979_v38, %v16987_v44  ;;  %v428_v51 = vcombine.high %v16159_v22, %v16159_v22  ;;  %14442 = vmatprep.mubr.msk.bf16.mxu0 %vm15726_vm0, %v20947_v18 }
 0x201   :  { %21009 = vst [vmem:[#allocation136_spill] sm:$0xff] %v16999_v63  ;;  %v429_v3 = vcombine.high %v16172_v29, %v16172_v29  ;;  %v17016_v12 = vrot.slane %v2672_v39, %v16143_v6  ;;  %v17019_v26 = vrot.slane %v13912_v16, %v16143_v6  ;;  %v5954_v9 = vcombine.low %v3458_v17, %v17002_v50 }
 0x202   :  { %v430_v44 = vcombine.high %v16175_v30, %v16175_v30  ;;  %v17025_v38 = vrot.slane %v2719_v4, %v16143_v6  ;;  %v5970_v22 = vrot.slane %v5962_v53, %v16143_v6  ;;  %v431_v1 = vcombine.high %v16192_v36, %v16192_v36 }
 0x203   :  { %21011 = vst [vmem:[#allocation138_spill] sm:$0xff] %v17016_v12  ;;  %21012 = vst [vmem:[#allocation139_spill] sm:$0xff] %v17019_v26  ;;  %v477_v39 = vcombine.high %v16164_v25, %v16164_v25  ;;  %v17033_v62 = vrot.slane %v5954_v9, %v16143_v6  ;;  %v5979_v17 = vcombine.low %v16999_v63, %v17016_v12 }
 0x204   :  { %21013 = vst [vmem:[#allocation140_spill] sm:$0xff] %v17025_v38  ;;  %v479_v16 = vcombine.high %v16181_v33, %v16181_v33  ;;  %v3451_v4 = vcombine.high %v16195_v37, %v16195_v37  ;;  %v5980_v53 = vcombine.low %v17019_v26, %v17025_v38  ;;  %v3467_v50 = vcombine.low %v16175_v30, %v428_v51 }
 0x205   :  { %21014 = vst [vmem:[#allocation141_spill] sm:$0xff] %v17033_v62  ;;  %v3468_v27 = vcombine.low %v430_v44, %v16172_v29  ;;  %v3469_v23 = vcombine.low %v16192_v36, %v429_v3  ;;  %v5963_v9 = vcombine.low %v16990_v57, %v17033_v62  ;;  %v5987_v63 = vrot.slane %v5979_v17, %v16143_v6 }
 0x206   :  { %v3470_v12 = vcombine.low %v431_v1, %v16164_v25  ;;  %v3516_v48 = vcombine.low %v16181_v33, %v477_v39  ;;  %v5994_v59 = vrot.slane %v5980_v53, %v16143_v6  ;;  %v3477_v49 = vrot.slane %v3467_v50, %v16143_v6 }
 0x207   :  { %v3484_v38 = vrot.slane %v3468_v27, %v16143_v6  ;;  %v3491_v30 = vrot.slane %v3469_v23, %v16143_v6  ;;  %v5977_v29 = vrot.slane %v5963_v9, %v16143_v6  ;;  %v3517_v44 = vcombine.low %v479_v16, %v16178_v32 }
 0x208   :  { %v3498_v36 = vrot.slane %v3470_v12, %v16143_v6  ;;  %v3518_v51 = vcombine.low %v16195_v37, %v16203_v40  ;;  %v5995_v25 = vcombine.low %v5987_v63, %v5994_v59  ;;  %v3519_v33 = vcombine.low %v3451_v4, %v16261_v43 }
 0x209   :  { %v3499_v1 = vcombine.low %v3477_v49, %v3484_v38  ;;  %v3526_v3 = vrot.slane %v3516_v48, %v16143_v6  ;;  %v5978_v50 = vcombine.low %v5970_v22, %v5977_v29  ;;  %v3533_v27 = vrot.slane %v3517_v44, %v16143_v6  ;;  %v330_v49 = vld [vmem:[#allocation10 + $0xd8] sm:$0xff]  ;;  %v13993_v29 = vld.sshfl [vmem:[#allocation10 + $0xd0] sm:$0x13 pattern:$0x75316420]  ;;  %v17074_v44 = vld [vmem:[#allocation10 + $0xe0] sm:$0xff] }
 0x20a   :  { %v3500_v39 = vcombine.low %v3491_v30, %v3498_v36  ;;  %v3540_v23 = vrot.slane %v3518_v51, %v16143_v6  ;;  %v3547_v12 = vrot.slane %v3519_v33, %v16143_v6  ;;  %v6736_v32 = vcombine.low %v3484_v38, %v3491_v30 }
 0x20b   :  { %v3507_v17 = vrot.slane %v3499_v1, %v16143_v6  ;;  %v6737_v16 = vcombine.low %v3498_v36, %v3526_v3  ;;  %v6367_v53 = vpack.c.bf16 %v5995_v25, %v5978_v50  ;;  %v3548_v40 = vcombine.low %v3526_v3, %v3533_v27 }
 0x20c   :  { %v3514_v37 = vrot.slane %v3500_v39, %v16143_v6  ;;  %v6753_v59 = vcombine.low %v3451_v4, %v16155_v19  ;;  %v3549_v48 = vcombine.low %v3540_v23, %v3547_v12  ;;  %v17069_v63 = vrot.slane %v6736_v32, %v16143_v6 }
 0x20d   :  { %v17072_v22 = vrot.slane %v6737_v16, %v16143_v6  ;;  %v6769_v9 = vcombine.low %v3533_v27, %v3540_v23  ;;  %14443 = vmatmul.mubr.msk.bf16.gmra.mrb[28].mxu0 %vm4984_vm2, %v6367_v53  ;;  %v3556_v30 = vrot.slane %v3548_v40, %v16143_v6  ;;  %v1208_v19 = vcombine.high %v16941_v7, %v16941_v7 }
 0x20e   :  { %v3515_v38 = vcombine.low %v3507_v17, %v3514_v37  ;;  %v17079_v36 = vrot.slane %v6753_v59, %v16143_v6  ;;  %v3563_v4 = vrot.slane %v3549_v48, %v16143_v6  ;;  %14446 = vmatprep.mubr.msk.bf16.mxu0 %vm15726_vm0, %v20947_v18  ;;  %v1256_v25 = vcombine.high %v330_v49, %v330_v49 }
 0x20f   :  { %v17085_v51 = vrot.slane %v6769_v9, %v16143_v6  ;;  %v1263_v1 = vrot.slane %v330_v49, %v16143_v6  ;;  %v1222_v33 = vrot.slane %v1208_v19, %v16143_v6  ;;  %v1312_v3 = vrot.slane %v17074_v44, %v16143_v6 }
 0x210   :  { %v13913_v50 = vcombine.high %v16971_v13, %v16984_v61  ;;  %v17096_v7 = vrot.slane %v13993_v29, %v16143_v6  ;;  %v3564_v39 = vcombine.low %v3556_v30, %v3563_v4  ;;  %v1270_v27 = vrot.slane %v1256_v25, %v16143_v6 }
 0x211   :  { %v1271_v23 = vcombine.high %v1263_v1, %v1263_v1  ;;  %v17100_v17 = vrot.slane %v1263_v1, %v16143_v6  ;;  %v1224_v12 = vcombine.high %v1222_v33, %v1222_v33  ;;  %v17103_v32 = vrot.slane %v1222_v33, %v16143_v6 }
 0x212   :  { %21015 = vst [vmem:[#allocation142_spill] sm:$0xff] %v17096_v7  ;;  %v1320_v16 = vcombine.high %v1312_v3, %v1312_v3  ;;  %v17106_v53 = vrot.slane %v1312_v3, %v16143_v6  ;;  %v4967_v37 = vpack.c.bf16 %v3564_v39, %v3515_v38  ;;  %v1272_v40 = vcombine.high %v1270_v27, %v1270_v27 }
 0x213   :  { %21016 = vst [vmem:[#allocation143_spill] sm:$0xff] %v17100_v17  ;;  %v17109_v59 = vrot.slane %v1270_v27, %v16143_v6  ;;  %v17112_v49 = vrot.slane %v1271_v23, %v16143_v6  ;;  %v17115_v48 = vrot.slane %v1224_v12, %v16143_v6  ;;  %v17119_v9 = vcombine.high %v17100_v17, %v17100_v17 }
 0x214   :  { %v17122_v29 = vrot.slane %v1320_v16, %v16143_v6  ;;  %v1350_v38 = vcombine.high %v17106_v53, %v17106_v53  ;;  %14291 = vmatmul.mubr.msk.bf16.vlgmr.msra.gmra.mrb[0].mxu1 %vm4984_vm2, %v4967_v37  ;;  %v17128_v30 = vrot.slane %v1272_v40, %v16143_v6  ;;  %v17137_v25 = vrot.slane %v13913_v50, %v16143_v6 }
 0x215   :  { %21017 = vst [vmem:[#allocation144_spill] sm:$0xff] %v17109_v59  ;;  %21018 = vst [vmem:[#allocation145_spill] sm:$0xff] %v17112_v49  ;;  %v1302_v19 = vcombine.high %v17109_v59, %v17109_v59  ;;  %v17134_v4 = vcombine.high %v17112_v49, %v17112_v49  ;;  %v2721_v1 = vcombine.low %v17103_v32, %v17115_v48  ;;  %14294 = vmatprep.mubr.msk.bf16.mxu1 %vm15726_vm0, %v20947_v18 }
 0x216   :  { %21019 = vst [vmem:[#allocation146_spill] sm:$0xff] %v17119_v9  ;;  %21021 = vst [vmem:[#allocation148_spill] sm:$0xff] %v17137_v25  ;;  %v2817_v33 = vcombine.low %v17122_v29, %v1350_v38  ;;  %v14005_v3 = vcombine.high %v17103_v32, %v17115_v48  ;;  %v5997_v39 = vcombine.low %v17096_v7, %v17119_v9  ;;  %14779 = vmatpush3.bf16.msra.mxu1 %v16146_v10 }
 0x217   :  { %21020 = vst [vmem:[#allocation147_spill] sm:$0xff] %v17134_v4  ;;  %v1304_v27 = vcombine.high %v17128_v30, %v17128_v30  ;;  %v2769_v50 = vcombine.low %v17134_v4, %v17109_v59  ;;  %v2770_v23 = vcombine.low %v17128_v30, %v1302_v19  ;;  %v622_v12 = vcombine.high %v16288_v60, %v16288_v60 }
 0x218   :  { %v17157_v16 = vrot.slane %v2721_v1, %v16143_v6  ;;  %v17160_v37 = vrot.slane %v2817_v33, %v16143_v6  ;;  %v17163_v40 = vrot.slane %v14005_v3, %v16143_v6  ;;  %v6011_v38 = vrot.slane %v5997_v39, %v16143_v6  ;;  %14598 = vmatprep.subr.bf16.mxu1 %v20947_v18 }
 0x219   :  { %v2771_v19 = vcombine.low %v1304_v27, %v17106_v53  ;;  %v17169_v62 = vrot.slane %v2769_v50, %v16143_v6  ;;  %v17172_v10 = vrot.slane %v2770_v23, %v16143_v6  ;;  %v13923_v60 = vcombine.high %v16185_v34, %v16261_v43 }
 0x21a   :  { %21022 = vst [vmem:[#allocation149_spill] sm:$0xff] %v17157_v16  ;;  %21023 = vst [vmem:[#allocation150_spill] sm:$0xff] %v17160_v37  ;;  %v6012_v1 = vcombine.low %v17137_v25, %v17157_v16  ;;  %v6013_v33 = vcombine.low %v17163_v40, %v6011_v38  ;;  %v3566_v3 = vcombine.low %v16189_v35, %v16268_v47 }
 0x21b   :  { %21024 = vst [vmem:[#allocation151_spill] sm:$0xff] %v17163_v40  ;;  %21025 = vst [vmem:[#allocation152_spill] sm:$0xff] %v17169_v62  ;;  %v13924_v39 = vcombine.high %v16189_v35, %v16268_v47  ;;  %v17184_v27 = vrot.slane %v2771_v19, %v16143_v6  ;;  %v6029_v50 = vcombine.low %v17169_v62, %v17172_v10 }
 0x21c   :  { %21026 = vst [vmem:[#allocation153_spill] sm:$0xff] %v17172_v10  ;;  %v3568_v34 = vcombine.low %v16282_v56, %v16297_v2  ;;  %v3575_v43 = vrot.slane %v13923_v60, %v16143_v6  ;;  %v6020_v23 = vrot.slane %v6012_v1, %v16143_v6  ;;  %v6027_v38 = vrot.slane %v6013_v33, %v16143_v6 }
 0x21d   :  { %21027 = vst [vmem:[#allocation154_spill] sm:$0xff] %v17184_v27  ;;  %v17194_v40 = vrot.slane %v3566_v3, %v16143_v6  ;;  %v17197_v35 = vrot.slane %v13924_v39, %v16143_v6  ;;  %v6030_v47 = vcombine.low %v17184_v27, %v17160_v37  ;;  %v6037_v19 = vrot.slane %v6029_v50, %v16143_v6  ;;  %v21028_v3 = vld [vmem:[#allocation50_spill] sm:$0xff]  ;;  %v21029_v37 = vld [vmem:[#allocation51_spill] sm:$0xff] }
 0x21e   :  { %v17203_v62 = vrot.slane %v3568_v34, %v16143_v6  ;;  %v13925_v60 = vcombine.high %v16282_v56, %v16297_v2  ;;  %v6028_v1 = vcombine.low %v6020_v23, %v6027_v38  ;;  %v3615_v16 = vcombine.low %v21028_v3, %v16308_v14  ;;  %v333_v56 = vld [vmem:[#allocation10 + $0xf0] sm:$0xff] }
 0x21f   :  { %v3597_v33 = vcombine.low %v3575_v43, %v17194_v40  ;;  %v13926_v39 = vcombine.high %v21028_v3, %v16308_v14  ;;  %v6044_v10 = vrot.slane %v6030_v47, %v16143_v6  ;;  %v3617_v34 = vcombine.low %v21029_v37, %v622_v12  ;;  %v17226_v14 = vld [vmem:[#allocation10 + $0xf8] sm:$0xff] }
 0x220   :  { %v3598_v50 = vcombine.low %v17197_v35, %v17203_v62  ;;  %v17217_v27 = vrot.slane %v13925_v60, %v16143_v6  ;;  %v17221_v43 = vrot.slane %v3615_v16, %v16143_v6  ;;  %v1305_v38 = vcombine.high %v17074_v44, %v17074_v44 }
 0x221   :  { %v3605_v2 = vrot.slane %v3597_v33, %v16143_v6  ;;  %v17224_v23 = vrot.slane %v13926_v39, %v16143_v6  ;;  %v6045_v47 = vcombine.low %v6037_v19, %v6044_v10  ;;  %v3645_v60 = vrot.slane %v3617_v34, %v16143_v6 }
 0x222   :  { %21030 = vst [vmem:[#allocation50_spill] sm:$0xff] %v17221_v43  ;;  %v3612_v12 = vrot.slane %v3598_v50, %v16143_v6  ;;  %v1352_v3 = vcombine.high %v17122_v29, %v17122_v29  ;;  %v3646_v16 = vcombine.low %v17217_v27, %v17221_v43  ;;  %v1319_v33 = vrot.slane %v1305_v38, %v16143_v6  ;;  %v21054_v43 = vld [vmem:[#allocation61_spill] sm:$0xff] }
 0x223   :  { %21031 = vst [vmem:[#allocation51_spill] sm:$0xff] %v17224_v23  ;;  %v1353_v39 = vcombine.high %v333_v56, %v333_v56  ;;  %v1360_v9 = vrot.slane %v333_v56, %v16143_v6  ;;  %v6368_v25 = vpack.c.bf16 %v6045_v47, %v6028_v1  ;;  %v3647_v44 = vcombine.low %v17224_v23, %v3645_v60 }
 0x224   :  { %v3613_v26 = vcombine.low %v3605_v2, %v3612_v12  ;;  %v1409_v10 = vrot.slane %v17226_v14, %v16143_v6  ;;  %v3654_v19 = vrot.slane %v3646_v16, %v16143_v6  ;;  %v1321_v50 = vcombine.high %v1319_v33, %v1319_v33 }
 0x225   :  { %v17243_v34 = vrot.slane %v1319_v33, %v16143_v6  ;;  %v1367_v57 = vrot.slane %v1353_v39, %v16143_v6  ;;  %14447 = vmatmul.mubr.msk.bf16.gmra.mrb[32].mxu0 %vm4984_vm2, %v6368_v25  ;;  %v3661_v38 = vrot.slane %v3647_v44, %v16143_v6  ;;  %v1368_v56 = vcombine.high %v1360_v9, %v1360_v9  ;;  %v13994_v44 = vld.sshfl [vmem:[#allocation10 + $0xe8] sm:$0x13 pattern:$0x75316420] }
 0x226   :  { %v17249_v1 = vrot.slane %v1360_v9, %v16143_v6  ;;  %v1417_v2 = vcombine.high %v1409_v10, %v1409_v10  ;;  %14450 = vmatprep.mubr.msk.bf16.mxu0 %vm15726_vm0, %v20947_v18  ;;  %v17254_v47 = vrot.slane %v1321_v50, %v16143_v6  ;;  %v17265_v9 = vrot.slane %v1409_v10, %v16143_v6 }
 0x227   :  { %21032 = vst [vmem:[#allocation155_spill] sm:$0xff] %v17243_v34  ;;  %v1351_v12 = vcombine.high %v17243_v34, %v17243_v34  ;;  %v1369_v60 = vcombine.high %v1367_v57, %v1367_v57  ;;  %v17259_v16 = vrot.slane %v1367_v57, %v16143_v6  ;;  %v3662_v25 = vcombine.low %v3654_v19, %v3661_v38 }
 0x228   :  { %21033 = vst [vmem:[#allocation156_spill] sm:$0xff] %v17249_v1  ;;  %21034 = vst [vmem:[#allocation157_spill] sm:$0xff] %v17254_v47  ;;  %v17262_v33 = vrot.slane %v1368_v56, %v16143_v6  ;;  %v17268_v39 = vrot.slane %v1417_v2, %v16143_v6  ;;  %v2818_v4 = vcombine.low %v1352_v3, %v17243_v34 }
 0x229   :  { %21035 = vst [vmem:[#allocation158_spill] sm:$0xff] %v17259_v16  ;;  %21037 = vst [vmem:[#allocation160_spill] sm:$0xff] %v17265_v9  ;;  %v17271_v50 = vrot.slane %v1369_v60, %v16143_v6  ;;  %v2819_v7 = vcombine.low %v17254_v47, %v1351_v12  ;;  %v3460_v57 = vcombine.high %v17254_v47, %v17254_v47  ;;  %v21049_v47 = vld [vmem:[#allocation59_spill] sm:$0xff] }
 0x22a   :  { %21036 = vst [vmem:[#allocation159_spill] sm:$0xff] %v17262_v33  ;;  %21038 = vst [vmem:[#allocation161_spill] sm:$0xff] %v17268_v39  ;;  %v4968_v19 = vpack.c.bf16 %v3662_v25, %v3613_v26  ;;  %v13914_v38 = vcombine.high %v17249_v1, %v17262_v33  ;;  %v2869_v10 = vcombine.low %v17265_v9, %v17268_v39  ;;  %v21051_v33 = vld [vmem:[#allocation60_spill] sm:$0xff] }
 0x22b   :  { %21039 = vst [vmem:[#allocation162_spill] sm:$0xff] %v17271_v50  ;;  %v13916_v56 = vcombine.high %v17265_v9, %v17268_v39  ;;  %v17284_v2 = vrot.slane %v2818_v4, %v16143_v6  ;;  %v17287_v3 = vrot.slane %v2819_v7, %v16143_v6  ;;  %v2867_v12 = vcombine.low %v17259_v16, %v17271_v50 }
 0x22c   :  { %v13915_v26 = vcombine.high %v17259_v16, %v17271_v50  ;;  %14295 = vmatmul.mubr.msk.bf16.gmra.mrb[4].mxu1 %vm4984_vm2, %v4968_v19  ;;  %v17295_v60 = vrot.slane %v13914_v38, %v16143_v6  ;;  %v17298_v25 = vrot.slane %v2869_v10, %v16143_v6  ;;  %v17304_v7 = vrot.slane %v13994_v44, %v16143_v6  ;;  %v21048_v38 = vld [vmem:[#allocation57_spill] sm:$0xff] }
 0x22d   :  { %21040 = vst [vmem:[#allocation163_spill] sm:$0xff] %v17284_v2  ;;  %21041 = vst [vmem:[#allocation164_spill] sm:$0xff] %v17287_v3  ;;  %v17301_v4 = vrot.slane %v13916_v56, %v16143_v6  ;;  %v17307_v39 = vrot.slane %v2867_v12, %v16143_v6  ;;  %v6054_v19 = vcombine.low %v17284_v2, %v17287_v3  ;;  %14298 = vmatprep.mubr.msk.bf16.mxu1 %vm15726_vm0, %v20947_v18  ;;  %v21050_v2 = vld [vmem:[#allocation58_spill] sm:$0xff] }
 0x22e   :  { %21042 = vst [vmem:[#allocation165_spill] sm:$0xff] %v17295_v60  ;;  %21043 = vst [vmem:[#allocation166_spill] sm:$0xff] %v17298_v25  ;;  %v17310_v34 = vrot.slane %v13915_v26, %v16143_v6  ;;  %v623_v10 = vcombine.high %v21048_v38, %v21048_v38  ;;  %v6046_v56 = vcombine.low %v3460_v57, %v17304_v7 }
 0x22f   :  { %21044 = vst [vmem:[#allocation167_spill] sm:$0xff] %v17301_v4  ;;  %21045 = vst [vmem:[#allocation168_spill] sm:$0xff] %v17304_v7  ;;  %v6072_v44 = vcombine.low %v17298_v25, %v17301_v4  ;;  %v624_v12 = vcombine.high %v21029_v37, %v21029_v37  ;;  %v625_v26 = vcombine.high %v21049_v47, %v21049_v47 }
 0x230   :  { %21046 = vst [vmem:[#allocation169_spill] sm:$0xff] %v17307_v39  ;;  %21047 = vst [vmem:[#allocation170_spill] sm:$0xff] %v17310_v34  ;;  %v6062_v9 = vrot.slane %v6054_v19, %v16143_v6  ;;  %v6071_v3 = vcombine.low %v17307_v39, %v17310_v34  ;;  %v671_v50 = vcombine.high %v21050_v2, %v21050_v2 }
 0x231   :  { %v673_v57 = vcombine.high %v21051_v33, %v21051_v33  ;;  %v17333_v7 = vrot.slane %v6046_v56, %v16143_v6  ;;  %v6086_v4 = vrot.slane %v6072_v44, %v16143_v6  ;;  %v17338_v37 = vcombine.high %v16390_v55, %v16390_v55 }
 0x232   :  { %v3663_v19 = vcombine.low %v624_v12, %v21048_v38  ;;  %v6079_v25 = vrot.slane %v6071_v3, %v16143_v6  ;;  %v3664_v34 = vcombine.low %v21049_v47, %v623_v10  ;;  %v3665_v39 = vcombine.low %v625_v26, %v21050_v2  ;;  %v21056_v10 = vld [vmem:[#allocation63_spill] sm:$0xff] }
 0x233   :  { %21052 = vst [vmem:[#allocation57_spill] sm:$0xff] %v17333_v7  ;;  %21053 = vst [vmem:[#allocation59_spill] sm:$0xff] %v17338_v37  ;;  %v3666_v16 = vcombine.low %v21051_v33, %v671_v50  ;;  %v6055_v56 = vcombine.low %v17333_v7, %v17295_v60  ;;  %v3712_v44 = vcombine.low %v673_v57, %v16379_v45  ;;  %v336_v50 = vld [vmem:[#allocation10 + $0x108] sm:$0xff]  ;;  %v21057_v45 = vld [vmem:[#allocation62_spill] sm:$0xff] }
 0x234   :  { %v17348_v1 = vrot.slane %v3663_v19, %v16143_v6  ;;  %v3713_v23 = vcombine.low %v16390_v55, %v21054_v43  ;;  %v6087_v38 = vcombine.low %v6079_v25, %v6086_v4  ;;  %v17354_v3 = vrot.slane %v3664_v34, %v16143_v6  ;;  %v337_v60 = vld [vmem:[#allocation10 + $0x110] sm:$0xff] }
 0x235   :  { %v17357_v47 = vrot.slane %v3665_v39, %v16143_v6  ;;  %v17360_v33 = vrot.slane %v3666_v16, %v16143_v6  ;;  %v6069_v2 = vrot.slane %v6055_v56, %v16143_v6  ;;  %v3714_v12 = vcombine.low %v17338_v37, %v21056_v10 }
 0x236   :  { %v13927_v26 = vcombine.high %v21057_v45, %v21056_v10  ;;  %v17368_v55 = vrot.slane %v3712_v44, %v16143_v6  ;;  %v3695_v43 = vcombine.low %v17348_v1, %v17354_v3  ;;  %v17375_v16 = vrot.slane %v3713_v23, %v16143_v6 }
 0x237   :  { %21055 = vst [vmem:[#allocation58_spill] sm:$0xff] %v17360_v33  ;;  %v3696_v34 = vcombine.low %v17357_v47, %v17360_v33  ;;  %v1402_v39 = vcombine.high %v17226_v14, %v17226_v14  ;;  %v6070_v25 = vcombine.low %v6062_v9, %v6069_v2  ;;  %v3736_v4 = vrot.slane %v3714_v12, %v16143_v6 }
 0x238   :  { %21058 = vst [vmem:[#allocation60_spill] sm:$0xff] %v17368_v55  ;;  %21059 = vst [vmem:[#allocation61_spill] sm:$0xff] %v17375_v16  ;;  %v3743_v57 = vrot.slane %v13927_v26, %v16143_v6  ;;  %v1450_v19 = vcombine.high %v336_v50, %v336_v50  ;;  %v3703_v56 = vrot.slane %v3695_v43, %v16143_v6 }
 0x239   :  { %v3710_v44 = vrot.slane %v3696_v34, %v16143_v6  ;;  %v3744_v10 = vcombine.low %v17368_v55, %v17375_v16  ;;  %v1416_v45 = vrot.slane %v1402_v39, %v16143_v6  ;;  %v6369_v23 = vpack.c.bf16 %v6087_v38, %v6070_v25 }
 0x23a   :  { %v3745_v7 = vcombine.low %v3736_v4, %v3743_v57  ;;  %v1457_v14 = vrot.slane %v336_v50, %v16143_v6  ;;  %v1464_v9 = vrot.slane %v1450_v19, %v16143_v6  ;;  %v1499_v4 = vcombine.high %v337_v60, %v337_v60 }
 0x23b   :  { %v3711_v2 = vcombine.low %v3703_v56, %v3710_v44  ;;  %v3752_v12 = vrot.slane %v3744_v10, %v16143_v6  ;;  %v1418_v26 = vcombine.high %v1416_v45, %v1416_v45  ;;  %v17390_v43 = vrot.slane %v1416_v45, %v16143_v6  ;;  %14451 = vmatmul.mubr.msk.bf16.gmra.mrb[36].mxu0 %vm4984_vm2, %v6369_v23  ;;  %v13995_v10 = vld.sshfl [vmem:[#allocation10 + $0x100] sm:$0x13 pattern:$0x75316420] }
 0x23c   :  { %v3759_v34 = vrot.slane %v3745_v7, %v16143_v6  ;;  %v1465_v16 = vcombine.high %v1457_v14, %v1457_v14  ;;  %v1466_v39 = vcombine.high %v1464_v9, %v1464_v9  ;;  %v17395_v38 = vrot.slane %v1457_v14, %v16143_v6  ;;  %14454 = vmatprep.mubr.msk.bf16.mxu0 %vm15726_vm0, %v20947_v18 }
 0x23d   :  { %21060 = vst [vmem:[#allocation63_spill] sm:$0xff] %v17390_v43  ;;  %v17400_v50 = vrot.slane %v1418_v26, %v16143_v6  ;;  %v17403_v25 = vrot.slane %v1464_v9, %v16143_v6  ;;  %v1506_v57 = vrot.slane %v337_v60, %v16143_v6  ;;  %v17419_v23 = vrot.slane %v1499_v4, %v16143_v6 }
 0x23e   :  { %21061 = vst [vmem:[#allocation62_spill] sm:$0xff] %v17395_v38  ;;  %v3760_v19 = vcombine.low %v3752_v12, %v3759_v34  ;;  %v17407_v7 = vrot.slane %v1465_v16, %v16143_v6  ;;  %v17410_v56 = vrot.slane %v1466_v39, %v16143_v6  ;;  %v17414_v44 = vcombine.high %v17395_v38, %v17395_v38 }
 0x23f   :  { %21062 = vst [vmem:[#allocation171_spill] sm:$0xff] %v17400_v50  ;;  %21063 = vst [vmem:[#allocation172_spill] sm:$0xff] %v17403_v25  ;;  %v1496_v45 = vcombine.high %v17403_v25, %v17403_v25  ;;  %v1514_v14 = vcombine.high %v1506_v57, %v1506_v57  ;;  %v17422_v60 = vrot.slane %v1506_v57, %v16143_v6 }
 0x240   :  { %21064 = vst [vmem:[#allocation173_spill] sm:$0xff] %v17407_v7  ;;  %21065 = vst [vmem:[#allocation174_spill] sm:$0xff] %v17410_v56  ;;  %v4969_v16 = vpack.c.bf16 %v3760_v19, %v3711_v2  ;;  %v17426_v9 = vcombine.high %v17407_v7, %v17407_v7  ;;  %v1498_v12 = vcombine.high %v17410_v56, %v17410_v56 }
 0x241   :  { %21066 = vst [vmem:[#allocation175_spill] sm:$0xff] %v17414_v44  ;;  %21067 = vst [vmem:[#allocation176_spill] sm:$0xff] %v17422_v60  ;;  %v2916_v26 = vcombine.low %v17390_v43, %v17400_v50  ;;  %v17434_v34 = vrot.slane %v17419_v23, %v16143_v6  ;;  %v17437_v39 = vrot.slane %v1514_v14, %v16143_v6 }
 0x242   :  { %21068 = vst [vmem:[#allocation177_spill] sm:$0xff] %v17426_v9  ;;  %v1544_v2 = vcombine.high %v17422_v60, %v17422_v60  ;;  %v2965_v4 = vcombine.low %v17410_v56, %v1496_v45  ;;  %14299 = vmatmul.mubr.msk.bf16.gmra.mrb[8].mxu1 %vm4984_vm2, %v4969_v16  ;;  %v2964_v19 = vcombine.low %v17426_v9, %v17403_v25  ;;  %v21076_v9 = vld [vmem:[#allocation71_spill] sm:$0xff]  ;;  %v21079_v25 = vld [vmem:[#allocation74_spill] sm:$0xff] }
 0x243   :  { %21069 = vst [vmem:[#allocation178_spill] sm:$0xff] %v17434_v34  ;;  %21070 = vst [vmem:[#allocation179_spill] sm:$0xff] %v17437_v39  ;;  %v17444_v57 = vrot.slane %v2916_v26, %v16143_v6  ;;  %v2966_v38 = vcombine.low %v1498_v12, %v17422_v60  ;;  %v17450_v7 = vrot.slane %v13995_v10, %v16143_v6  ;;  %14302 = vmatprep.mubr.msk.bf16.mxu1 %vm15726_vm0, %v20947_v18 }
 0x244   :  { %v1546_v14 = vcombine.high %v17437_v39, %v17437_v39  ;;  %v2967_v37 = vcombine.low %v17437_v39, %v1544_v2  ;;  %v17456_v45 = vrot.slane %v2965_v4, %v16143_v6  ;;  %v14006_v16 = vcombine.high %v17390_v43, %v17400_v50  ;;  %v21084_v43 = vld [vmem:[#allocation70_spill] sm:$0xff] }
 0x245   :  { %21071 = vst [vmem:[#allocation180_spill] sm:$0xff] %v17444_v57  ;;  %21072 = vst [vmem:[#allocation181_spill] sm:$0xff] %v17450_v7  ;;  %v17463_v26 = vrot.slane %v2964_v19, %v16143_v6  ;;  %v17466_v10 = vrot.slane %v2966_v38, %v16143_v6  ;;  %v6089_v12 = vcombine.low %v17450_v7, %v17414_v44  ;;  %v21080_v44 = vld [vmem:[#allocation66_spill] sm:$0xff]  ;;  %v21081_v7 = vld [vmem:[#allocation65_spill] sm:$0xff] }
 0x246   :  { %21073 = vst [vmem:[#allocation182_spill] sm:$0xff] %v17456_v45  ;;  %v816_v2 = vcombine.high %v21076_v9, %v21076_v9  ;;  %v17473_v4 = vrot.slane %v2967_v37, %v16143_v6  ;;  %v3013_v60 = vcombine.low %v1546_v14, %v17434_v34  ;;  %v17477_v39 = vrot.slane %v14006_v16, %v16143_v6  ;;  %v21083_v16 = vld [vmem:[#allocation73_spill] sm:$0xff] }
 0x247   :  { %21074 = vst [vmem:[#allocation183_spill] sm:$0xff] %v17463_v26  ;;  %21075 = vst [vmem:[#allocation184_spill] sm:$0xff] %v17466_v10  ;;  %v818_v19 = vcombine.high %v21079_v25, %v21079_v25  ;;  %v6103_v38 = vrot.slane %v6089_v12, %v16143_v6  ;;  %v6121_v56 = vcombine.low %v17456_v45, %v17466_v10 }
 0x248   :  { %21077 = vst [vmem:[#allocation71_spill] sm:$0xff] %v17473_v4  ;;  %21078 = vst [vmem:[#allocation185_spill] sm:$0xff] %v17477_v39  ;;  %v3761_v50 = vcombine.low %v21081_v7, %v21080_v44  ;;  %v13928_v37 = vcombine.high %v21081_v7, %v21080_v44  ;;  %v17489_v9 = vrot.slane %v3013_v60, %v16143_v6 }
 0x249   :  { %v6104_v14 = vcombine.low %v17444_v57, %v17477_v39  ;;  %v3763_v33 = vcombine.low %v21084_v43, %v21083_v16  ;;  %v13929_v12 = vcombine.high %v21084_v43, %v21083_v16  ;;  %v6105_v10 = vcombine.low %v6103_v38, %v17463_v26 }
 0x24a   :  { %21082 = vst [vmem:[#allocation74_spill] sm:$0xff] %v17489_v9  ;;  %v6129_v45 = vrot.slane %v6121_v56, %v16143_v6  ;;  %v17500_v55 = vrot.slane %v3761_v50, %v16143_v6  ;;  %v17503_v44 = vrot.slane %v13928_v37, %v16143_v6  ;;  %v6122_v39 = vcombine.low %v17473_v4, %v17489_v9  ;;  %v21087_v56 = vld [vmem:[#allocation72_spill] sm:$0xff] }
 0x24b   :  { %v6112_v60 = vrot.slane %v6104_v14, %v16143_v6  ;;  %v17509_v7 = vrot.slane %v3763_v33, %v16143_v6  ;;  %v17512_v43 = vrot.slane %v13929_v12, %v16143_v6  ;;  %v6119_v38 = vrot.slane %v6105_v10, %v16143_v6  ;;  %v339_v4 = vld [vmem:[#allocation10 + $0x120] sm:$0xff] }
 0x24c   :  { %21085 = vst [vmem:[#allocation66_spill] sm:$0xff] %v17503_v44  ;;  %v3793_v50 = vcombine.low %v17500_v55, %v17503_v44  ;;  %v3810_v37 = vcombine.low %v21087_v56, %v16506_v41  ;;  %v13930_v14 = vcombine.high %v21087_v56, %v16506_v41  ;;  %v6136_v16 = vrot.slane %v6122_v39, %v16143_v6 }
 0x24d   :  { %21086 = vst [vmem:[#allocation73_spill] sm:$0xff] %v17512_v43  ;;  %v3794_v33 = vcombine.low %v17509_v7, %v17512_v43  ;;  %v3812_v9 = vcombine.low %v21079_v25, %v816_v2  ;;  %v3813_v12 = vcombine.low %v818_v19, %v16610_v28  ;;  %v6120_v10 = vcombine.low %v6112_v60, %v6119_v38  ;;  %v340_v25 = vld [vmem:[#allocation10 + $0x128] sm:$0xff] }
 0x24e   :  { %v3801_v26 = vrot.slane %v3793_v50, %v16143_v6  ;;  %v17528_v57 = vrot.slane %v3810_v37, %v16143_v6  ;;  %v17531_v44 = vrot.slane %v13930_v14, %v16143_v6  ;;  %v6137_v41 = vcombine.low %v6129_v45, %v6136_v16 }
 0x24f   :  { %v3808_v39 = vrot.slane %v3794_v33, %v16143_v6  ;;  %v3834_v56 = vrot.slane %v3812_v9, %v16143_v6  ;;  %v17536_v43 = vrot.slane %v3813_v12, %v16143_v6  ;;  %v1515_v19 = vcombine.high %v17419_v23, %v17419_v23 }
 0x250   :  { %21088 = vst [vmem:[#allocation70_spill] sm:$0xff] %v17531_v44  ;;  %v3842_v2 = vcombine.low %v17528_v57, %v17531_v44  ;;  %v1545_v60 = vcombine.high %v17434_v34, %v17434_v34  ;;  %v1547_v38 = vcombine.high %v339_v4, %v339_v4  ;;  %v6370_v50 = vpack.c.bf16 %v6137_v41, %v6120_v10 }
 0x251   :  { %v3809_v45 = vcombine.low %v3801_v26, %v3808_v39  ;;  %v3843_v37 = vcombine.low %v3834_v56, %v17536_v43  ;;  %v1554_v9 = vrot.slane %v339_v4, %v16143_v6  ;;  %v17548_v16 = vrot.slane %v1515_v19, %v16143_v6  ;;  %v13996_v19 = vld.sshfl [vmem:[#allocation10 + $0x118] sm:$0x13 pattern:$0x75316420] }
 0x252   :  { %v3850_v14 = vrot.slane %v3842_v2, %v16143_v6  ;;  %v1561_v33 = vrot.slane %v1547_v38, %v16143_v6  ;;  %v1596_v12 = vcombine.high %v340_v25, %v340_v25  ;;  %14455 = vmatmul.mubr.msk.bf16.gmra.mrb[40].mxu0 %vm4984_vm2, %v6370_v50  ;;  %v1603_v26 = vrot.slane %v340_v25, %v16143_v6 }
 0x253   :  { %21089 = vst [vmem:[#allocation72_spill] sm:$0xff] %v17548_v16  ;;  %v3857_v23 = vrot.slane %v3843_v37, %v16143_v6  ;;  %v1562_v44 = vcombine.high %v1554_v9, %v1554_v9  ;;  %v17554_v10 = vrot.slane %v1554_v9, %v16143_v6  ;;  %14458 = vmatprep.mubr.msk.bf16.mxu0 %vm15726_vm0, %v20947_v18 }
 0x254   :  { %v1563_v4 = vcombine.high %v1561_v33, %v1561_v33  ;;  %v17560_v41 = vrot.slane %v1561_v33, %v16143_v6  ;;  %v1610_v39 = vrot.slane %v1596_v12, %v16143_v6  ;;  %v3014_v56 = vcombine.low %v17548_v16, %v1545_v60 }
 0x255   :  { %21090 = vst [vmem:[#allocation186_spill] sm:$0xff] %v17554_v10  ;;  %v3858_v2 = vcombine.low %v3850_v14, %v3857_v23  ;;  %v17565_v38 = vrot.slane %v1562_v44, %v16143_v6  ;;  %v1611_v50 = vcombine.high %v1603_v26, %v1603_v26  ;;  %v17568_v37 = vrot.slane %v1603_v26, %v16143_v6 }
 0x256   :  { %21091 = vst [vmem:[#allocation187_spill] sm:$0xff] %v17560_v41  ;;  %v17571_v25 = vrot.slane %v1563_v4, %v16143_v6  ;;  %v1612_v9 = vcombine.high %v1610_v39, %v1610_v39  ;;  %v17574_v33 = vrot.slane %v1610_v39, %v16143_v6  ;;  %v17577_v12 = vrot.slane %v3014_v56, %v16143_v6 }
 0x257   :  { %21092 = vst [vmem:[#allocation188_spill] sm:$0xff] %v17565_v38  ;;  %21093 = vst [vmem:[#allocation189_spill] sm:$0xff] %v17568_v37  ;;  %v4970_v60 = vpack.c.bf16 %v3858_v2, %v3809_v45  ;;  %v17580_v14 = vrot.slane %v1611_v50, %v16143_v6  ;;  %v13917_v44 = vcombine.high %v17554_v10, %v17565_v38 }
 0x258   :  { %21094 = vst [vmem:[#allocation190_spill] sm:$0xff] %v17571_v25  ;;  %21095 = vst [vmem:[#allocation191_spill] sm:$0xff] %v17577_v12  ;;  %v3462_v23 = vcombine.high %v17548_v16, %v17548_v16  ;;  %v17587_v26 = vrot.slane %v1612_v9, %v16143_v6  ;;  %v3062_v4 = vcombine.low %v17560_v41, %v17571_v25 }
 0x259   :  { %21096 = vst [vmem:[#allocation192_spill] sm:$0xff] %v17580_v14  ;;  %v13918_v39 = vcombine.high %v17560_v41, %v17571_v25  ;;  %v17594_v45 = vrot.slane %v13996_v19, %v16143_v6  ;;  %14303 = vmatmul.mubr.msk.bf16.gmra.mrb[12].mxu1 %vm4984_vm2, %v4970_v60  ;;  %v17598_v56 = vrot.slane %v13917_v44, %v16143_v6 }
 0x25a   :  { %v3064_v2 = vcombine.low %v17568_v37, %v17580_v14  ;;  %v13919_v50 = vcombine.high %v17568_v37, %v17580_v14  ;;  %v817_v9 = vcombine.high %v16610_v28, %v16610_v28  ;;  %v17607_v34 = vrot.slane %v3062_v4, %v16143_v6  ;;  %14306 = vmatprep.mubr.msk.bf16.mxu1 %vm15726_vm0, %v20947_v18 }
 0x25b   :  { %21097 = vst [vmem:[#allocation193_spill] sm:$0xff] %v17594_v45  ;;  %21098 = vst [vmem:[#allocation194_spill] sm:$0xff] %v17598_v56  ;;  %v17610_v19 = vrot.slane %v13918_v39, %v16143_v6  ;;  %v3111_v60 = vcombine.low %v17574_v33, %v17587_v26  ;;  %v6138_v44 = vcombine.low %v3462_v23, %v17594_v45 }
 0x25c   :  { %21099 = vst [vmem:[#allocation195_spill] sm:$0xff] %v17607_v34  ;;  %v17618_v16 = vrot.slane %v3064_v2, %v16143_v6  ;;  %v17621_v14 = vrot.slane %v13919_v50, %v16143_v6  ;;  %v819_v28 = vcombine.high %v16622_v52, %v16622_v52  ;;  %v865_v4 = vcombine.high %v16645_v5, %v16645_v5 }
 0x25d   :  { %21100 = vst [vmem:[#allocation196_spill] sm:$0xff] %v17610_v19  ;;  %v17628_v39 = vrot.slane %v3111_v60, %v16143_v6  ;;  %v17631_v23 = vrot.slane %v6138_v44, %v16143_v6  ;;  %v6147_v45 = vcombine.low %v17598_v56, %v17607_v34  ;;  %v866_v2 = vcombine.high %v16648_v42, %v16648_v42 }
 0x25e   :  { %21101 = vst [vmem:[#allocation197_spill] sm:$0xff] %v17618_v16  ;;  %21102 = vst [vmem:[#allocation198_spill] sm:$0xff] %v17621_v14  ;;  %v6163_v50 = vcombine.low %v17610_v19, %v17618_v16  ;;  %v867_v37 = vcombine.high %v16655_v54, %v16655_v54  ;;  %v17643_v25 = vcombine.high %v16663_v15, %v16663_v15 }
 0x25f   :  { %21103 = vst [vmem:[#allocation199_spill] sm:$0xff] %v17628_v39  ;;  %21104 = vst [vmem:[#allocation200_spill] sm:$0xff] %v17631_v23  ;;  %v3859_v60 = vcombine.low %v16622_v52, %v817_v9  ;;  %v6146_v44 = vcombine.low %v17577_v12, %v17631_v23  ;;  %v6161_v56 = vrot.slane %v6147_v45, %v16143_v6 }
 0x260   :  { %21105 = vst [vmem:[#allocation201_spill] sm:$0xff] %v17643_v25  ;;  %v6164_v34 = vcombine.low %v17621_v14, %v17628_v39  ;;  %v2377_v38 = vcombine.low %v866_v2, %v16667_v20  ;;  %v6171_v16 = vrot.slane %v6163_v50, %v16143_v6  ;;  %v3860_v19 = vcombine.low %v819_v28, %v16645_v5 }
 0x261   :  { %v3861_v41 = vcombine.low %v16655_v54, %v865_v4  ;;  %v3862_v10 = vcombine.low %v867_v37, %v16648_v42  ;;  %v6154_v52 = vrot.slane %v6146_v44, %v16143_v6  ;;  %v17662_v45 = vrot.slane %v3859_v60, %v16143_v6  ;;  %v342_v54 = vld [vmem:[#allocation10 + $0x138] sm:$0xff] }
 0x262   :  { %v6178_v9 = vrot.slane %v6164_v34, %v16143_v6  ;;  %v17659_v23 = vrot.slane %v2377_v38, %v16143_v6  ;;  %v17665_v39 = vrot.slane %v3860_v19, %v16143_v6  ;;  %v3908_v42 = vcombine.low %v16663_v15, %v866_v2 }
 0x263   :  { %v17668_v50 = vrot.slane %v3861_v41, %v16143_v6  ;;  %v17671_v5 = vrot.slane %v3862_v10, %v16143_v6  ;;  %v6162_v37 = vcombine.low %v6154_v52, %v6161_v56  ;;  %v3909_v38 = vcombine.low %v17643_v25, %v16675_v24  ;;  %v343_v56 = vld [vmem:[#allocation10 + $0x140] sm:$0xff] }
 0x264   :  { %21106 = vst [vmem:[#allocation202_spill] sm:$0xff] %v17659_v23  ;;  %v6179_v34 = vcombine.low %v6171_v16, %v6178_v9  ;;  %v13931_v28 = vcombine.high %v16667_v20, %v16675_v24  ;;  %v3891_v19 = vcombine.low %v17662_v45, %v17665_v39  ;;  %v3911_v10 = vcombine.low %v16670_v46, %v16683_v31 }
 0x265   :  { %v3892_v41 = vcombine.low %v17668_v50, %v17671_v5  ;;  %v17685_v15 = vrot.slane %v3908_v42, %v16143_v6  ;;  %v3925_v4 = vrot.slane %v3909_v38, %v16143_v6  ;;  %v1644_v60 = vcombine.high %v342_v54, %v342_v54 }
 0x266   :  { %v6371_v16 = vpack.c.bf16 %v6179_v34, %v6162_v37  ;;  %v3932_v2 = vrot.slane %v13931_v28, %v16143_v6  ;;  %v3899_v20 = vrot.slane %v3891_v19, %v16143_v6  ;;  %v17692_v44 = vrot.slane %v3911_v10, %v16143_v6 }
 0x267   :  { %v3906_v24 = vrot.slane %v3892_v41, %v16143_v6  ;;  %v1651_v52 = vrot.slane %v342_v54, %v16143_v6  ;;  %v3940_v9 = vcombine.low %v17685_v15, %v3925_v4  ;;  %v1658_v42 = vrot.slane %v1644_v60, %v16143_v6 }
 0x268   :  { %21107 = vst [vmem:[#allocation203_spill] sm:$0xff] %v17692_v44  ;;  %14459 = vmatmul.mubr.msk.bf16.gmra.mrb[44].mxu0 %vm4984_vm2, %v6371_v16  ;;  %v1693_v37 = vcombine.high %v343_v56, %v343_v56  ;;  %v1700_v34 = vrot.slane %v343_v56, %v16143_v6  ;;  %v3941_v28 = vcombine.low %v3932_v2, %v17692_v44 }
 0x269   :  { %v3907_v38 = vcombine.low %v3899_v20, %v3906_v24  ;;  %14462 = vmatprep.mubr.msk.bf16.mxu0 %vm15726_vm0, %v20947_v18  ;;  %v1659_v19 = vcombine.high %v1651_v52, %v1651_v52  ;;  %v17703_v41 = vrot.slane %v1651_v52, %v16143_v6  ;;  %v3948_v54 = vrot.slane %v3940_v9, %v16143_v6 }
 0x26a   :  { %v1660_v10 = vcombine.high %v1658_v42, %v1658_v42  ;;  %v17707_v16 = vrot.slane %v1658_v42, %v16143_v6  ;;  %v1707_v4 = vrot.slane %v1693_v37, %v16143_v6  ;;  %v3955_v56 = vrot.slane %v3941_v28, %v16143_v6  ;;  %v13997_v28 = vld.sshfl [vmem:[#allocation10 + $0x130] sm:$0x13 pattern:$0x75316420] }
 0x26b   :  { %21108 = vst [vmem:[#allocation204_spill] sm:$0xff] %v17703_v41  ;;  %v17712_v60 = vrot.slane %v1659_v19, %v16143_v6  ;;  %v17716_v2 = vcombine.high %v17703_v41, %v17703_v41  ;;  %v1708_v20 = vcombine.high %v1700_v34, %v1700_v34  ;;  %v17724_v42 = vrot.slane %v1700_v34, %v16143_v6 }
 0x26c   :  { %21109 = vst [vmem:[#allocation205_spill] sm:$0xff] %v17707_v16  ;;  %v17719_v24 = vrot.slane %v1660_v10, %v16143_v6  ;;  %v1690_v52 = vcombine.high %v17707_v16, %v17707_v16  ;;  %v1709_v9 = vcombine.high %v1707_v4, %v1707_v4  ;;  %v3956_v37 = vcombine.low %v3948_v54, %v3955_v56 }
 0x26d   :  { %21110 = vst [vmem:[#allocation206_spill] sm:$0xff] %v17712_v60  ;;  %21111 = vst [vmem:[#allocation207_spill] sm:$0xff] %v17716_v2  ;;  %v17728_v19 = vcombine.high %v17712_v60, %v17712_v60  ;;  %v17731_v14 = vrot.slane %v1707_v4, %v16143_v6  ;;  %v17734_v12 = vrot.slane %v1708_v20, %v16143_v6 }
 0x26e   :  { %21112 = vst [vmem:[#allocation208_spill] sm:$0xff] %v17724_v42  ;;  %v1692_v10 = vcombine.high %v17719_v24, %v17719_v24  ;;  %v17739_v23 = vrot.slane %v1709_v9, %v16143_v6  ;;  %v1738_v34 = vcombine.high %v17724_v42, %v17724_v42  ;;  %v3160_v54 = vcombine.low %v17719_v24, %v1690_v52 }
 0x26f   :  { %21113 = vst [vmem:[#allocation209_spill] sm:$0xff] %v17728_v19  ;;  %21114 = vst [vmem:[#allocation210_spill] sm:$0xff] %v17731_v14  ;;  %v4971_v56 = vpack.c.bf16 %v3956_v37, %v3907_v38  ;;  %v1739_v41 = vcombine.high %v17731_v14, %v17731_v14  ;;  %v1740_v4 = vcombine.high %v17734_v12, %v17734_v12 }
 0x270   :  { %21115 = vst [vmem:[#allocation211_spill] sm:$0xff] %v17739_v23  ;;  %v3114_v20 = vcombine.low %v17728_v19, %v17707_v16  ;;  %v3161_v60 = vcombine.low %v1692_v10, %v17724_v42  ;;  %v3162_v9 = vcombine.low %v17734_v12, %v1738_v34  ;;  %v17753_v44 = vrot.slane %v3160_v54, %v16143_v6 }
 0x271   :  { %v17756_v25 = vrot.slane %v13997_v28, %v16143_v6  ;;  %14307 = vmatmul.mubr.msk.bf16.gmra.mrb[16].mxu1 %vm4984_vm2, %v4971_v56  ;;  %v3163_v52 = vcombine.low %v1740_v4, %v17731_v14  ;;  %v3209_v37 = vcombine.low %v17739_v23, %v1739_v41  ;;  %v14007_v10 = vcombine.high %v17574_v33, %v17587_v26 }
 0x272   :  { %21116 = vst [vmem:[#allocation212_spill] sm:$0xff] %v17753_v44  ;;  %v17760_v38 = vrot.slane %v3114_v20, %v16143_v6  ;;  %v17767_v34 = vrot.slane %v3161_v60, %v16143_v6  ;;  %v17770_v54 = vrot.slane %v3162_v9, %v16143_v6  ;;  %14310 = vmatprep.mubr.msk.bf16.mxu1 %vm15726_vm0, %v20947_v18 }
 0x273   :  { %21117 = vst [vmem:[#allocation213_spill] sm:$0xff] %v17756_v25  ;;  %v6181_v28 = vcombine.low %v17756_v25, %v17716_v2  ;;  %v1010_v56 = vcombine.high %v16772_v21, %v16772_v21  ;;  %v17779_v41 = vrot.slane %v3163_v52, %v16143_v6  ;;  %v17782_v4 = vrot.slane %v3209_v37, %v16143_v6  ;;  %v21125_v21 = vld [vmem:[#allocation93_spill] sm:$0xff] }
 0x274   :  { %21118 = vst [vmem:[#allocation214_spill] sm:$0xff] %v17760_v38  ;;  %21119 = vst [vmem:[#allocation215_spill] sm:$0xff] %v17767_v34  ;;  %v17785_v60 = vrot.slane %v14007_v10, %v16143_v6  ;;  %v6197_v20 = vcombine.low %v17760_v38, %v17753_v44  ;;  %v6213_v2 = vcombine.low %v17767_v34, %v17770_v54  ;;  %v21124_v34 = vld [vmem:[#allocation94_spill] sm:$0xff] }
 0x275   :  { %21120 = vst [vmem:[#allocation216_spill] sm:$0xff] %v17770_v54  ;;  %21121 = vst [vmem:[#allocation217_spill] sm:$0xff] %v17779_v41  ;;  %v6195_v9 = vrot.slane %v6181_v28, %v16143_v6  ;;  %v1011_v19 = vcombine.high %v16775_v58, %v16775_v58  ;;  %v1012_v52 = vcombine.high %v16782_v8, %v16782_v8 }
 0x276   :  { %21122 = vst [vmem:[#allocation218_spill] sm:$0xff] %v17782_v4  ;;  %21123 = vst [vmem:[#allocation219_spill] sm:$0xff] %v17785_v60  ;;  %v6211_v37 = vrot.slane %v6197_v20, %v16143_v6  ;;  %v6214_v10 = vcombine.low %v17779_v41, %v17782_v4  ;;  %v13932_v25 = vcombine.high %v16670_v46, %v16683_v31  ;;  %v21129_v41 = vld [vmem:[#allocation98_spill] sm:$0xff] }
 0x277   :  { %v3958_v28 = vcombine.low %v16745_v11, %v16752_v0  ;;  %v6196_v38 = vcombine.low %v17785_v60, %v6195_v9  ;;  %v6221_v54 = vrot.slane %v6213_v2, %v16143_v6  ;;  %v13933_v44 = vcombine.high %v16745_v11, %v16752_v0 }
 0x278   :  { %v3960_v14 = vcombine.low %v21125_v21, %v21124_v34  ;;  %v6228_v20 = vrot.slane %v6214_v10, %v16143_v6  ;;  %v17811_v4 = vrot.slane %v13932_v25, %v16143_v6  ;;  %v13934_v46 = vcombine.high %v21125_v21, %v21124_v34  ;;  %v345_v10 = vld [vmem:[#allocation10 + $0x150] sm:$0xff]  ;;  %v346_v34 = vld [vmem:[#allocation10 + $0x158] sm:$0xff] }
 0x279   :  { %v17814_v31 = vrot.slane %v3958_v28, %v16143_v6  ;;  %v6204_v9 = vrot.slane %v6196_v38, %v16143_v6  ;;  %v17820_v2 = vrot.slane %v13933_v44, %v16143_v6  ;;  %v4007_v0 = vcombine.low %v16782_v8, %v1010_v56 }
 0x27a   :  { %v17823_v11 = vrot.slane %v3960_v14, %v16143_v6  ;;  %v6229_v60 = vcombine.low %v6221_v54, %v6228_v20  ;;  %v4008_v28 = vcombine.low %v1012_v52, %v16775_v58  ;;  %v4009_v42 = vcombine.low %v21129_v41, %v1011_v19 }
 0x27b   :  { %21126 = vst [vmem:[#allocation94_spill] sm:$0xff] %v17814_v31  ;;  %21127 = vst [vmem:[#allocation93_spill] sm:$0xff] %v17820_v2  ;;  %v3989_v25 = vcombine.low %v17811_v4, %v17814_v31  ;;  %v6212_v21 = vcombine.low %v6204_v9, %v6211_v37  ;;  %v17833_v44 = vrot.slane %v13934_v46, %v16143_v6  ;;  %v21192_v31 = vld [vmem:[#allocation126_spill] sm:$0xff] }
 0x27c   :  { %21128 = vst [vmem:[#allocation220_spill] sm:$0xff] %v17823_v11  ;;  %v3990_v38 = vcombine.low %v17820_v2, %v17823_v11  ;;  %v4023_v14 = vrot.slane %v4007_v0, %v16143_v6  ;;  %v17838_v54 = vrot.slane %v4008_v28, %v16143_v6  ;;  %v17841_v20 = vrot.slane %v4009_v42, %v16143_v6 }
 0x27d   :  { %21130 = vst [vmem:[#allocation98_spill] sm:$0xff] %v17833_v44  ;;  %v3997_v56 = vrot.slane %v3989_v25, %v16143_v6  ;;  %v1741_v58 = vcombine.high %v345_v10, %v345_v10  ;;  %v6372_v19 = vpack.c.bf16 %v6229_v60, %v6212_v21  ;;  %v1748_v46 = vrot.slane %v345_v10, %v16143_v6  ;;  %v13998_v10 = vld.sshfl [vmem:[#allocation10 + $0x148] sm:$0x13 pattern:$0x75316420] }
 0x27e   :  { %21131 = vst [vmem:[#allocation221_spill] sm:$0xff] %v17838_v54  ;;  %21132 = vst [vmem:[#allocation222_spill] sm:$0xff] %v17841_v20  ;;  %v4004_v52 = vrot.slane %v3990_v38, %v16143_v6  ;;  %v4038_v37 = vcombine.low %v17833_v44, %v4023_v14  ;;  %v4039_v9 = vcombine.low %v17838_v54, %v17841_v20 }
 0x27f   :  { %v1755_v0 = vrot.slane %v1741_v58, %v16143_v6  ;;  %v1790_v25 = vcombine.high %v346_v34, %v346_v34  ;;  %v1797_v28 = vrot.slane %v346_v34, %v16143_v6  ;;  %14463 = vmatmul.mubr.msk.bf16.gmra.mrb[48].mxu0 %vm4984_vm2, %v6372_v19  ;;  %v1756_v60 = vcombine.high %v1748_v46, %v1748_v46 }
 0x280   :  { %v4005_v42 = vcombine.low %v3997_v56, %v4004_v52  ;;  %v4046_v8 = vrot.slane %v4038_v37, %v16143_v6  ;;  %v17853_v21 = vrot.slane %v1748_v46, %v16143_v6  ;;  %v4053_v38 = vrot.slane %v4039_v9, %v16143_v6  ;;  %14466 = vmatprep.mubr.msk.bf16.mxu0 %vm15726_vm0, %v20947_v18 }
 0x281   :  { %v1757_v14 = vcombine.high %v1755_v0, %v1755_v0  ;;  %v17859_v58 = vrot.slane %v1755_v0, %v16143_v6  ;;  %v1804_v34 = vrot.slane %v1790_v25, %v16143_v6  ;;  %v17863_v56 = vrot.slane %v1756_v60, %v16143_v6 }
 0x282   :  { %21133 = vst [vmem:[#allocation223_spill] sm:$0xff] %v17853_v21  ;;  %v1805_v19 = vcombine.high %v1797_v28, %v1797_v28  ;;  %v17866_v52 = vrot.slane %v1797_v28, %v16143_v6  ;;  %v3464_v37 = vcombine.high %v17739_v23, %v17739_v23  ;;  %v4054_v46 = vcombine.low %v4046_v8, %v4053_v38 }
 0x283   :  { %21134 = vst [vmem:[#allocation224_spill] sm:$0xff] %v17859_v58  ;;  %21135 = vst [vmem:[#allocation225_spill] sm:$0xff] %v17863_v56  ;;  %v17871_v9 = vrot.slane %v1757_v14, %v16143_v6  ;;  %v1806_v54 = vcombine.high %v1804_v34, %v1804_v34  ;;  %v17874_v0 = vrot.slane %v1804_v34, %v16143_v6 }
 0x284   :  { %21136 = vst [vmem:[#allocation226_spill] sm:$0xff] %v17866_v52  ;;  %v17877_v25 = vrot.slane %v1805_v19, %v16143_v6  ;;  %v13920_v60 = vcombine.high %v17853_v21, %v17863_v56  ;;  %v17882_v28 = vrot.slane %v13998_v10, %v16143_v6  ;;  %v1013_v20 = vcombine.high %v21129_v41, %v21129_v41 }
 0x285   :  { %21137 = vst [vmem:[#allocation227_spill] sm:$0xff] %v17871_v9  ;;  %21138 = vst [vmem:[#allocation228_spill] sm:$0xff] %v17874_v0  ;;  %v4972_v8 = vpack.c.bf16 %v4054_v46, %v4005_v42  ;;  %v17887_v38 = vrot.slane %v1806_v54, %v16143_v6  ;;  %v3212_v14 = vcombine.low %v17859_v58, %v17871_v9 }
 0x286   :  { %21139 = vst [vmem:[#allocation229_spill] sm:$0xff] %v17877_v25  ;;  %21140 = vst [vmem:[#allocation230_spill] sm:$0xff] %v17882_v28  ;;  %v13921_v34 = vcombine.high %v17859_v58, %v17871_v9  ;;  %v17894_v19 = vrot.slane %v13920_v60, %v16143_v6  ;;  %v3259_v10 = vcombine.low %v17866_v52, %v17877_v25  ;;  %v21154_v58 = vld [vmem:[#allocation110_spill] sm:$0xff] }
 0x287   :  { %21141 = vst [vmem:[#allocation231_spill] sm:$0xff] %v17887_v38  ;;  %v13922_v56 = vcombine.high %v17866_v52, %v17877_v25  ;;  %v6230_v41 = vcombine.low %v3464_v37, %v17882_v28  ;;  %14311 = vmatmul.mubr.msk.bf16.gmra.mrb[20].mxu1 %vm4984_vm2, %v4972_v8  ;;  %v17903_v54 = vrot.slane %v3212_v14, %v16143_v6  ;;  %v21148_v8 = vld [vmem:[#allocation107_spill] sm:$0xff]  ;;  %v21153_v52 = vld [vmem:[#allocation109_spill] sm:$0xff] }
 0x288   :  { %21142 = vst [vmem:[#allocation232_spill] sm:$0xff] %v17894_v19  ;;  %v3261_v42 = vcombine.low %v17874_v0, %v17887_v38  ;;  %v17908_v46 = vrot.slane %v13921_v34, %v16143_v6  ;;  %v14008_v60 = vcombine.high %v17874_v0, %v17887_v38  ;;  %v17913_v9 = vrot.slane %v3259_v10, %v16143_v6 }
 0x289   :  { %21143 = vst [vmem:[#allocation233_spill] sm:$0xff] %v17903_v54  ;;  %v17916_v25 = vrot.slane %v13922_v56, %v16143_v6  ;;  %v17919_v37 = vrot.slane %v6230_v41, %v16143_v6  ;;  %14314 = vmatprep.mubr.msk.bf16.mxu1 %vm15726_vm0, %v20947_v18  ;;  %v1059_v14 = vcombine.high %v21148_v8, %v21148_v8  ;;  %v21151_v56 = vld [vmem:[#allocation108_spill] sm:$0xff] }
 0x28a   :  { %21144 = vst [vmem:[#allocation234_spill] sm:$0xff] %v17908_v46  ;;  %21145 = vst [vmem:[#allocation235_spill] sm:$0xff] %v17913_v9  ;;  %v17926_v34 = vrot.slane %v3261_v42, %v16143_v6  ;;  %v6239_v28 = vcombine.low %v17903_v54, %v17908_v46  ;;  %v17931_v10 = vrot.slane %v14008_v60, %v16143_v6 }
 0x28b   :  { %21146 = vst [vmem:[#allocation236_spill] sm:$0xff] %v17916_v25  ;;  %21147 = vst [vmem:[#allocation237_spill] sm:$0xff] %v17919_v37  ;;  %v17935_v38 = vcombine.high %v21151_v56, %v21151_v56  ;;  %v6238_v41 = vcombine.low %v17919_v37, %v17894_v19  ;;  %v6263_v0 = vcombine.low %v17913_v9, %v17916_v25 }
 0x28c   :  { %21149 = vst [vmem:[#allocation107_spill] sm:$0xff] %v17926_v34  ;;  %21150 = vst [vmem:[#allocation238_spill] sm:$0xff] %v17931_v10  ;;  %v1061_v42 = vcombine.high %v21153_v52, %v21153_v52  ;;  %v17945_v21 = vcombine.high %v21154_v58, %v21154_v58  ;;  %v6253_v60 = vrot.slane %v6239_v28, %v16143_v6 }
 0x28d   :  { %21152 = vst [vmem:[#allocation108_spill] sm:$0xff] %v17935_v38  ;;  %v6264_v46 = vcombine.low %v17926_v34, %v17931_v10  ;;  %v4055_v54 = vcombine.low %v1013_v20, %v21148_v8  ;;  %v4056_v11 = vcombine.low %v21153_v52, %v1059_v14  ;;  %v6246_v37 = vrot.slane %v6238_v41, %v16143_v6  ;;  %v21158_v20 = vld [vmem:[#allocation114_spill] sm:$0xff]  ;;  %v348_v8 = vld [vmem:[#allocation10 + $0x168] sm:$0xff] }
 0x28e   :  { %21155 = vst [vmem:[#allocation109_spill] sm:$0xff] %v17945_v21  ;;  %v6271_v25 = vrot.slane %v6263_v0, %v16143_v6  ;;  %v4057_v9 = vcombine.low %v1061_v42, %v21151_v56  ;;  %v4058_v19 = vcombine.low %v21154_v58, %v17935_v38  ;;  %v4104_v52 = vcombine.low %v17945_v21, %v21158_v20  ;;  %v21161_v58 = vld [vmem:[#allocation111_spill] sm:$0xff]  ;;  %v21163_v42 = vld [vmem:[#allocation112_spill] sm:$0xff]  ;;  %v349_v21 = vld [vmem:[#allocation10 + $0x170] sm:$0xff] }
 0x28f   :  { %v6278_v44 = vrot.slane %v6264_v46, %v16143_v6  ;;  %v17959_v28 = vrot.slane %v4055_v54, %v16143_v6  ;;  %v17962_v10 = vrot.slane %v4056_v11, %v16143_v6  ;;  %v6254_v14 = vcombine.low %v6246_v37, %v6253_v60  ;;  %v21162_v11 = vld [vmem:[#allocation115_spill] sm:$0xff] }
 0x290   :  { %v17967_v0 = vrot.slane %v4057_v9, %v16143_v6  ;;  %v17970_v56 = vrot.slane %v4058_v19, %v16143_v6  ;;  %v13935_v46 = vcombine.high %v21161_v58, %v21158_v20  ;;  %v4106_v34 = vcombine.low %v21163_v42, %v21162_v11  ;;  %v13999_v60 = vld.sshfl [vmem:[#allocation10 + $0x160] sm:$0x13 pattern:$0x75316420] }
 0x291   :  { %21156 = vst [vmem:[#allocation110_spill] sm:$0xff] %v17959_v28  ;;  %21157 = vst [vmem:[#allocation239_spill] sm:$0xff] %v17962_v10  ;;  %v6279_v41 = vcombine.low %v6271_v25, %v6278_v44  ;;  %v4087_v54 = vcombine.low %v17959_v28, %v17962_v10  ;;  %v13936_v38 = vcombine.high %v21163_v42, %v21162_v11  ;;  %v21191_v28 = vld [vmem:[#allocation128_spill] sm:$0xff] }
 0x292   :  { %21159 = vst [vmem:[#allocation240_spill] sm:$0xff] %v17967_v0  ;;  %21160 = vst [vmem:[#allocation241_spill] sm:$0xff] %v17970_v56  ;;  %v4088_v9 = vcombine.low %v17967_v0, %v17970_v56  ;;  %v4114_v37 = vrot.slane %v4104_v52, %v16143_v6  ;;  %v4121_v19 = vrot.slane %v13935_v46, %v16143_v6 }
 0x293   :  { %v1838_v20 = vcombine.high %v348_v8, %v348_v8  ;;  %v6373_v44 = vpack.c.bf16 %v6279_v41, %v6254_v14  ;;  %v4095_v25 = vrot.slane %v4087_v54, %v16143_v6  ;;  %v17986_v58 = vrot.slane %v4106_v34, %v16143_v6 }
 0x294   :  { %v17989_v10 = vrot.slane %v13936_v38, %v16143_v6  ;;  %v4102_v11 = vrot.slane %v4088_v9, %v16143_v6  ;;  %v4136_v42 = vcombine.low %v4114_v37, %v4121_v19  ;;  %v1845_v56 = vrot.slane %v348_v8, %v16143_v6 }
 0x295   :  { %21164 = vst [vmem:[#allocation115_spill] sm:$0xff] %v17986_v58  ;;  %v1852_v52 = vrot.slane %v1838_v20, %v16143_v6  ;;  %14467 = vmatmul.mubr.msk.bf16.gmra.mrb[52].mxu0 %vm4984_vm2, %v6373_v44  ;;  %v1887_v46 = vcombine.high %v349_v21, %v349_v21  ;;  %v1894_v41 = vrot.slane %v349_v21, %v16143_v6 }
 0x296   :  { %21165 = vst [vmem:[#allocation242_spill] sm:$0xff] %v17989_v10  ;;  %v4137_v14 = vcombine.low %v17986_v58, %v17989_v10  ;;  %v17999_v34 = vrot.slane %v13999_v60, %v16143_v6  ;;  %v4103_v38 = vcombine.low %v4095_v25, %v4102_v11  ;;  %v4144_v54 = vrot.slane %v4136_v42, %v16143_v6 }
 0x297   :  { %14470 = vmatprep.mubr.msk.bf16.mxu0 %vm15726_vm0, %v20947_v18  ;;  %v1853_v8 = vcombine.high %v1845_v56, %v1845_v56  ;;  %v1854_v9 = vcombine.high %v1852_v52, %v1852_v52  ;;  %v18006_v37 = vrot.slane %v1845_v56, %v16143_v6  ;;  %v18009_v19 = vrot.slane %v1852_v52, %v16143_v6 }
 0x298   :  { %21166 = vst [vmem:[#allocation243_spill] sm:$0xff] %v17999_v34  ;;  %v4151_v20 = vrot.slane %v4137_v14, %v16143_v6  ;;  %v1901_v21 = vrot.slane %v1887_v46, %v16143_v6  ;;  %v1902_v44 = vcombine.high %v1894_v41, %v1894_v41  ;;  %v18019_v25 = vrot.slane %v1894_v41, %v16143_v6  ;;  %v14000_v46 = vld.sshfl [vmem:[#allocation10 + $0x178] sm:$0x13 pattern:$0x75316420] }
 0x299   :  { %21167 = vst [vmem:[#allocation244_spill] sm:$0xff] %v18006_v37  ;;  %21168 = vst [vmem:[#allocation245_spill] sm:$0xff] %v18009_v19  ;;  %v18013_v60 = vrot.slane %v1853_v8, %v16143_v6  ;;  %v18016_v42 = vrot.slane %v1854_v9, %v16143_v6  ;;  %v18023_v56 = vcombine.high %v18006_v37, %v18006_v37 }
 0x29a   :  { %21171 = vst [vmem:[#allocation248_spill] sm:$0xff] %v18019_v25  ;;  %v4152_v11 = vcombine.low %v4144_v54, %v4151_v20  ;;  %v1884_v52 = vcombine.high %v18009_v19, %v18009_v19  ;;  %v1903_v14 = vcombine.high %v1901_v21, %v1901_v21  ;;  %v18034_v41 = vrot.slane %v1901_v21, %v16143_v6 }
 0x29b   :  { %21169 = vst [vmem:[#allocation246_spill] sm:$0xff] %v18013_v60  ;;  %21170 = vst [vmem:[#allocation247_spill] sm:$0xff] %v18016_v42  ;;  %v18029_v8 = vcombine.high %v18013_v60, %v18013_v60  ;;  %v1886_v9 = vcombine.high %v18016_v42, %v18016_v42  ;;  %v18037_v54 = vrot.slane %v1902_v44, %v16143_v6 }
 0x29c   :  { %21172 = vst [vmem:[#allocation249_spill] sm:$0xff] %v18023_v56  ;;  %21174 = vst [vmem:[#allocation251_spill] sm:$0xff] %v18034_v41  ;;  %v4973_v20 = vpack.c.bf16 %v4152_v11, %v4103_v38  ;;  %v18040_v58 = vrot.slane %v1903_v14, %v16143_v6  ;;  %v1932_v37 = vcombine.high %v18019_v25, %v18019_v25 }
 0x29d   :  { %21173 = vst [vmem:[#allocation250_spill] sm:$0xff] %v18029_v8  ;;  %21175 = vst [vmem:[#allocation252_spill] sm:$0xff] %v18037_v54  ;;  %v3310_v10 = vcombine.low %v18016_v42, %v1884_v52  ;;  %v1933_v60 = vcombine.high %v18034_v41, %v18034_v41  ;;  %v1934_v0 = vcombine.high %v18037_v54, %v18037_v54 }
 0x29e   :  { %21176 = vst [vmem:[#allocation253_spill] sm:$0xff] %v18040_v58  ;;  %v3309_v21 = vcombine.low %v18029_v8, %v18009_v19  ;;  %v3356_v44 = vcombine.low %v1886_v9, %v18019_v25  ;;  %14315 = vmatmul.mubr.msk.bf16.gmra.mrb[24].mxu1 %vm4984_vm2, %v4973_v20  ;;  %v3357_v11 = vcombine.low %v18037_v54, %v1932_v37 }
 0x29f   :  { %v18054_v38 = vrot.slane %v3310_v10, %v16143_v6  ;;  %v3466_v52 = vcombine.high %v18040_v58, %v18040_v58  ;;  %v18060_v14 = vrot.slane %v14000_v46, %v16143_v6  ;;  %v3358_v8 = vcombine.low %v1934_v0, %v18034_v41  ;;  %14318 = vmatprep.mubr.msk.bf16.mxu1 %vm15726_vm0, %v20947_v18  ;;  %v21185_v41 = vld [vmem:[#allocation130_spill] sm:$0xff] }
 0x2a0   :  { %v18063_v42 = vrot.slane %v3309_v21, %v16143_v6  ;;  %v3359_v9 = vcombine.low %v18040_v58, %v1933_v60  ;;  %v18068_v20 = vrot.slane %v3356_v44, %v16143_v6  ;;  %v18073_v10 = vrot.slane %v3357_v11, %v16143_v6  ;;  %v21182_v21 = vld [vmem:[#allocation129_spill] sm:$0xff] }
 0x2a1   :  { %21177 = vst [vmem:[#allocation254_spill] sm:$0xff] %v18054_v38  ;;  %21178 = vst [vmem:[#allocation255_spill] sm:$0xff] %v18060_v14  ;;  %v6280_v37 = vcombine.low %v17999_v34, %v18023_v56  ;;  %v6305_v46 = vcombine.low %v3466_v52, %v18060_v14  ;;  %v1204_v25 = vcombine.high %v21182_v21, %v21182_v21  ;;  %v21187_v52 = vld [vmem:[#allocation131_spill] sm:$0xff]  ;;  %v21188_v34 = vld [vmem:[#allocation132_spill] sm:$0xff] }
 0x2a2   :  { %21179 = vst [vmem:[#allocation256_spill] sm:$0xff] %v18063_v42  ;;  %21180 = vst [vmem:[#allocation257_spill] sm:$0xff] %v18068_v20  ;;  %v18081_v0 = vrot.slane %v3358_v8, %v16143_v6  ;;  %v18084_v60 = vrot.slane %v3359_v9, %v16143_v6  ;;  %v6289_v44 = vcombine.low %v18054_v38, %v18068_v20  ;;  %v21189_v20 = vld [vmem:[#allocation127_spill] sm:$0xff]  ;;  %v21190_v38 = vld [vmem:[#allocation113_spill] sm:$0xff] }
 0x2a3   :  { %21181 = vst [vmem:[#allocation258_spill] sm:$0xff] %v18073_v10  ;;  %v1205_v11 = vcombine.high %v21185_v41, %v21185_v41  ;;  %v6287_v58 = vrot.slane %v6280_v37, %v16143_v6  ;;  %v18092_v56 = vrot.slane %v6305_v46, %v16143_v6  ;;  %v1206_v14 = vcombine.high %v21187_v52, %v21187_v52 }
 0x2a4   :  { %21183 = vst [vmem:[#allocation259_spill] sm:$0xff] %v18081_v0  ;;  %21184 = vst [vmem:[#allocation260_spill] sm:$0xff] %v18084_v60  ;;  %v1207_v8 = vcombine.high %v21188_v34, %v21188_v34  ;;  %v6303_v9 = vrot.slane %v6289_v44, %v16143_v6  ;;  %v6313_v21 = vcombine.low %v18073_v10, %v18081_v0 }
 0x2a5   :  { %21186 = vst [vmem:[#allocation130_spill] sm:$0xff] %v18092_v56  ;;  %v4153_v54 = vcombine.low %v21190_v38, %v21189_v20  ;;  %v13937_v37 = vcombine.high %v21190_v38, %v21189_v20  ;;  %v6288_v46 = vcombine.low %v6287_v58, %v18063_v42  ;;  %v6314_v19 = vcombine.low %v18084_v60, %v18092_v56 }
 0x2a6   :  { %v4155_v2 = vcombine.low %v21192_v31, %v21191_v28  ;;  %v13938_v44 = vcombine.high %v21192_v31, %v21191_v28  ;;  %v6321_v23 = vrot.slane %v6313_v21, %v16143_v6  ;;  %v4202_v38 = vcombine.low %v21187_v52, %v1204_v25 }
 0x2a7   :  { %v18114_v0 = vrot.slane %v4153_v54, %v16143_v6  ;;  %v18117_v10 = vrot.slane %v13937_v37, %v16143_v6  ;;  %v6296_v58 = vrot.slane %v6288_v46, %v16143_v6  ;;  %v6328_v20 = vrot.slane %v6314_v19, %v16143_v6  ;;  %v8224_v46 = vld [vmem:[#allocation13 + $0x10] sm:$0xf] }
 0x2a8   :  { %v18123_v56 = vrot.slane %v4155_v2, %v16143_v6  ;;  %v18126_v60 = vrot.slane %v13938_v44, %v16143_v6  ;;  %v4203_v28 = vcombine.low %v1206_v14, %v21185_v41  ;;  %v4204_v54 = vcombine.low %v21188_v34, %v1205_v11  ;;  %v21193_v11 = vld [vmem:[#allocation54_spill] sm:$0xff] }
 0x2a9   :  { %v4185_v31 = vcombine.low %v18114_v0, %v18117_v10  ;;  %v4205_v21 = vcombine.low %v1207_v8, %v16971_v13  ;;  %v6304_v25 = vcombine.low %v6296_v58, %v6303_v9  ;;  %v6329_v37 = vcombine.low %v6321_v23, %v6328_v20 }
 0x2aa   :  { %v4186_v19 = vcombine.low %v18123_v56, %v18126_v60  ;;  %v4212_v2 = vrot.slane %v4202_v38, %v16143_v6  ;;  %v18138_v42 = vrot.slane %v4203_v28, %v16143_v6  ;;  %v18141_v52 = vrot.slane %v4204_v54, %v16143_v6 }
 0x2ab   :  { %v4193_v44 = vrot.slane %v4185_v31, %v16143_v6  ;;  %v18144_v34 = vrot.slane %v4205_v21, %v16143_v6  ;;  %v6374_v41 = vpack.c.bf16 %v6329_v37, %v6304_v25  ;;  %v6752_v14 = vcombine.low %v17069_v63, %v17072_v22 }
 0x2ac   :  { %v4200_v23 = vrot.slane %v4186_v19, %v16143_v6  ;;  %v6770_v8 = vcombine.low %v17079_v36, %v21193_v11  ;;  %v4234_v9 = vcombine.low %v4212_v2, %v18138_v42  ;;  %v8271_v58 = vsel %vm5030_vm1, %v8224_v46, 0 }
 0x2ad   :  { %v4235_v38 = vcombine.low %v18141_v52, %v18144_v34  ;;  %v1253_v20 = vcombine.high %v16971_v13, %v16971_v13  ;;  %14471 = vmatmul.mubr.msk.bf16.gmra.mrb[56].mxu0 %vm4984_vm2, %v6374_v41  ;;  %v18161_v63 = vcombine.high %v17103_v32, %v17103_v32  ;;  %v1255_v22 = vcombine.high %v16984_v61, %v16984_v61 }
 0x2ae   :  { %v4201_v31 = vcombine.low %v4193_v44, %v4200_v23  ;;  %v6784_v28 = vrot.slane %v6770_v8, %v16143_v6  ;;  %v4242_v36 = vrot.slane %v4234_v9, %v16143_v6  ;;  %14476 = vmatprep.mubr.msk.bf16.mxu0 %vm15726_vm0, %v20947_v18  ;;  %v18171_v13 = vcombine.high %v17115_v48, %v17115_v48 }
 0x2af   :  { %21194 = vst [vmem:[#allocation132_spill] sm:$0xff] %v18161_v63  ;;  %v4249_v54 = vrot.slane %v4235_v38, %v16143_v6  ;;  %v4251_v21 = vcombine.low %v16984_v61, %v1253_v20  ;;  %v4252_v37 = vcombine.low %v1255_v22, %v17103_v32  ;;  %v4253_v19 = vcombine.low %v17115_v48, %v18161_v63  ;;  %v15225_v22 = vld.sshfl [vmem:[#allocation10 + $0x28] sm:$0x13 pattern:$0x75316420] }
 0x2b0   :  { %v6785_v25 = vcombine.low %v17085_v51, %v6784_v28  ;;  %v13939_v2 = vcombine.high %v17100_v17, %v17112_v49  ;;  %v4254_v44 = vcombine.low %v18171_v13, %v17112_v49  ;;  %v4301_v61 = vcombine.low %v17109_v59, %v17128_v30 }
 0x2b1   :  { %v4250_v46 = vcombine.low %v4242_v36, %v4249_v54  ;;  %v18183_v41 = vrot.slane %v4251_v21, %v16143_v6  ;;  %v18188_v51 = vrot.slane %v4252_v37, %v16143_v6  ;;  %v18191_v32 = vrot.slane %v4253_v19, %v16143_v6 }
 0x2b2   :  { %v7468_v23 = vpack.c.bf16 %v6785_v25, %v6752_v14  ;;  %v13940_v48 = vcombine.high %v17109_v59, %v17128_v30  ;;  %v4282_v8 = vrot.slane %v4254_v44, %v16143_v6  ;;  %v4303_v9 = vcombine.low %v17106_v53, %v17122_v29  ;;  %v21202_v59 = vld [vmem:[#allocation162_spill] sm:$0xff] }
 0x2b3   :  { %v4974_v11 = vpack.c.bf16 %v4250_v46, %v4201_v31  ;;  %v4310_v38 = vrot.slane %v13939_v2, %v16143_v6  ;;  %v4283_v14 = vcombine.low %v18183_v41, %v18188_v51  ;;  %v18202_v20 = vrot.slane %v4301_v61, %v16143_v6  ;;  %v21196_v46 = vld [vmem:[#allocation76_spill] sm:$0xff]  ;;  %v21197_v61 = vld [vmem:[#allocation51_spill] sm:$0xff] }
 0x2b4   :  { %v18205_v28 = vrot.slane %v13940_v48, %v16143_v6  ;;  %v6616_v36 = vcombine.high %v15225_v22, %v15225_v22  ;;  %v4284_v30 = vcombine.low %v18191_v32, %v4282_v8  ;;  %v18210_v31 = vrot.slane %v4303_v9, %v16143_v6  ;;  %v21199_v8 = vld [vmem:[#allocation156_spill] sm:$0xff] }
 0x2b5   :  { %14319 = vmatmul.mubr.msk.bf16.gmra.mrb[28].mxu1 %vm4984_vm2, %v4974_v11  ;;  %v6786_v54 = vcombine.low %v17194_v40, %v17197_v35  ;;  %v6787_v21 = vcombine.low %v17203_v62, %v17217_v27  ;;  %14477 = vmatmul.mubr.msk.bf16.vlgmr.msra.gmra.mrb[0].mxu0 %vm4984_vm2, %v7468_v23  ;;  %v4291_v25 = vrot.slane %v4283_v14, %v16143_v6  ;;  %v21198_v23 = vld [vmem:[#allocation50_spill] sm:$0xff] }
 0x2b6   :  { %14322 = vmatprep.mubr.msk.bf16.mxu1 %vm15726_vm0, %v20947_v18  ;;  %v4332_v37 = vcombine.low %v4310_v38, %v18202_v20  ;;  %v18222_v19 = vrot.slane %v6616_v36, %v16143_v6  ;;  %14537 = vmatpush3.bf16.msra.mxu0 %v8271_v58  ;;  %v4298_v2 = vrot.slane %v4284_v30, %v16143_v6  ;;  %v21200_v38 = vld [vmem:[#allocation158_spill] sm:$0xff] }
 0x2b7   :  { %v4333_v40 = vcombine.low %v18205_v28, %v18210_v31  ;;  %14480 = vmatprep.mubr.msk.bf16.mxu0 %vm15726_vm0, %v20947_v18  ;;  %v6794_v62 = vrot.slane %v6786_v54, %v16143_v6  ;;  %v6801_v35 = vrot.slane %v6787_v21, %v16143_v6  ;;  %v6811_v58 = vcombine.low %v21198_v23, %v21197_v61  ;;  %v21201_v54 = vld [vmem:[#allocation159_spill] sm:$0xff] }
 0x2b8   :  { %21195 = vst [vmem:[#allocation127_spill] sm:$0xff] %v18222_v19  ;;  %v4340_v27 = vrot.slane %v4332_v37, %v16143_v6  ;;  %v6803_v44 = vcombine.low %v21196_v46, %v18222_v19  ;;  %v4299_v48 = vcombine.low %v4291_v25, %v4298_v2  ;;  %v1398_v9 = vcombine.high %v21199_v8, %v21199_v8  ;;  %v21203_v2 = vld [vmem:[#allocation160_spill] sm:$0xff] }
 0x2b9   :  { %v4347_v11 = vrot.slane %v4333_v40, %v16143_v6  ;;  %v1399_v14 = vcombine.high %v21200_v38, %v21200_v38  ;;  %v6802_v22 = vcombine.low %v6794_v62, %v6801_v35  ;;  %v6819_v30 = vrot.slane %v6811_v58, %v16143_v6  ;;  %v21204_v62 = vld [vmem:[#allocation157_spill] sm:$0xff]  ;;  %v21205_v35 = vld [vmem:[#allocation155_spill] sm:$0xff] }
 0x2ba   :  { %v6810_v36 = vrot.slane %v6803_v44, %v16143_v6  ;;  %v1400_v21 = vcombine.high %v21201_v54, %v21201_v54  ;;  %v1401_v25 = vcombine.high %v21202_v59, %v21202_v59  ;;  %v1447_v40 = vcombine.high %v21203_v2, %v21203_v2 }
 0x2bb   :  { %v4348_v37 = vcombine.low %v4340_v27, %v4347_v11  ;;  %v13941_v61 = vcombine.high %v17106_v53, %v17122_v29  ;;  %v4350_v44 = vcombine.low %v21205_v35, %v21204_v62  ;;  %v13942_v58 = vcombine.high %v21205_v35, %v21204_v62 }
 0x2bc   :  { %v6812_v23 = vcombine.low %v6810_v36, %v17348_v1  ;;  %v4352_v19 = vcombine.low %v21201_v54, %v1398_v9  ;;  %v4398_v46 = vcombine.low %v1400_v21, %v21200_v38  ;;  %v4399_v8 = vcombine.low %v21202_v59, %v1399_v14  ;;  %v21206_v9 = vld [vmem:[#allocation161_spill] sm:$0xff] }
 0x2bd   :  { %v4975_v27 = vpack.c.bf16 %v4348_v37, %v4299_v48  ;;  %v18258_v11 = vrot.slane %v13941_v61, %v16143_v6  ;;  %v18264_v29 = vrot.slane %v4350_v44, %v16143_v6  ;;  %v18267_v1 = vrot.slane %v13942_v58, %v16143_v6  ;;  %v15226_v61 = vld.sshfl [vmem:[#allocation10 + $0x40] sm:$0x13 pattern:$0x75316420]  ;;  %v21219_v54 = vld [vmem:[#allocation61_spill] sm:$0xff] }
 0x2be   :  { %v6826_v53 = vrot.slane %v6812_v23, %v16143_v6  ;;  %v4380_v36 = vrot.slane %v4352_v19, %v16143_v6  ;;  %v4400_v48 = vcombine.low %v1401_v25, %v21203_v2  ;;  %v4401_v37 = vcombine.low %v21206_v9, %v1447_v40 }
 0x2bf   :  { %14323 = vmatmul.mubr.msk.bf16.gmra.mrb[32].mxu1 %vm4984_vm2, %v4975_v27  ;;  %v18274_v38 = vrot.slane %v4398_v46, %v16143_v6  ;;  %v18277_v59 = vrot.slane %v4399_v8, %v16143_v6  ;;  %v4381_v21 = vcombine.low %v18258_v11, %v18264_v29  ;;  %v6624_v23 = vcombine.high %v15226_v61, %v15226_v61  ;;  %v21208_v27 = vld [vmem:[#allocation60_spill] sm:$0xff] }
 0x2c0   :  { %v6827_v14 = vcombine.low %v6819_v30, %v6826_v53  ;;  %14326 = vmatprep.mubr.msk.bf16.mxu1 %vm15726_vm0, %v20947_v18  ;;  %v4382_v19 = vcombine.low %v18267_v1, %v4380_v36  ;;  %v18285_v25 = vrot.slane %v4400_v48, %v16143_v6  ;;  %v18288_v46 = vrot.slane %v4401_v37, %v16143_v6  ;;  %v21209_v53 = vld [vmem:[#allocation58_spill] sm:$0xff] }
 0x2c1   :  { %v4430_v8 = vcombine.low %v18274_v38, %v18277_v59  ;;  %v6828_v30 = vcombine.low %v17354_v3, %v17357_v47  ;;  %v4389_v40 = vrot.slane %v4381_v21, %v16143_v6  ;;  %v18297_v35 = vrot.slane %v6624_v23, %v16143_v6  ;;  %v21210_v47 = vld [vmem:[#allocation80_spill] sm:$0xff] }
 0x2c2   :  { %v7469_v2 = vpack.c.bf16 %v6827_v14, %v6802_v22  ;;  %v4396_v62 = vrot.slane %v4382_v19, %v16143_v6  ;;  %v4431_v44 = vcombine.low %v18285_v25, %v18288_v46  ;;  %v6829_v36 = vcombine.low %v21209_v53, %v21208_v27  ;;  %v21211_v22 = vld [vmem:[#allocation59_spill] sm:$0xff] }
 0x2c3   :  { %21207 = vst [vmem:[#allocation113_spill] sm:$0xff] %v18297_v35  ;;  %v4438_v58 = vrot.slane %v4430_v8, %v16143_v6  ;;  %v6836_v48 = vrot.slane %v6828_v30, %v16143_v6  ;;  %v6845_v37 = vcombine.low %v21211_v22, %v21210_v47  ;;  %v21212_v14 = vld [vmem:[#allocation67_spill] sm:$0xff]  ;;  %v1449_v30 = vcombine.high %v21206_v9, %v21206_v9  ;;  %v21218_v22 = vld [vmem:[#allocation62_spill] sm:$0xff] }
 0x2c4   :  { %14481 = vmatmul.mubr.msk.bf16.gmra.mrb[4].mxu0 %vm4984_vm2, %v7469_v2  ;;  %v4397_v3 = vcombine.low %v4389_v40, %v4396_v62  ;;  %v6846_v21 = vcombine.low %v18297_v35, %v21212_v14  ;;  %v21213_v19 = vld [vmem:[#allocation63_spill] sm:$0xff]  ;;  %v4445_v23 = vrot.slane %v4431_v44, %v16143_v6  ;;  %v6843_v8 = vrot.slane %v6829_v36, %v16143_v6  ;;  %v21217_v44 = vld [vmem:[#allocation173_spill] sm:$0xff] }
 0x2c5   :  { %v18312_v61 = vcombine.high %v21213_v19, %v21213_v19  ;;  %14484 = vmatprep.mubr.msk.bf16.mxu0 %vm15726_vm0, %v20947_v18  ;;  %v21215_v2 = vld [vmem:[#allocation171_spill] sm:$0xff]  ;;  %v6853_v62 = vrot.slane %v6845_v37, %v16143_v6  ;;  %v13943_v14 = vcombine.high %v21218_v22, %v21217_v44  ;;  %v4447_v36 = vcombine.low %v1449_v30, %v21213_v19  ;;  %v21222_v19 = vld [vmem:[#allocation172_spill] sm:$0xff]  ;;  %v21240_v22 = vld [vmem:[#allocation178_spill] sm:$0xff] }
 0x2c6   :  { %v18322_v40 = vcombine.high %v21215_v2, %v21215_v2  ;;  %v6860_v27 = vrot.slane %v6846_v21, %v16143_v6  ;;  %v4446_v35 = vcombine.low %v4438_v58, %v4445_v23  ;;  %v6844_v47 = vcombine.low %v6836_v48, %v6843_v8  ;;  %v21221_v48 = vld [vmem:[#allocation174_spill] sm:$0xff]  ;;  %v21223_v30 = vld [vmem:[#allocation179_spill] sm:$0xff] }
 0x2c7   :  { %21214 = vst [vmem:[#allocation128_spill] sm:$0xff] %v18312_v61  ;;  %v4448_v53 = vcombine.low %v21215_v2, %v18312_v61  ;;  %v6861_v49 = vcombine.low %v21219_v54, %v6853_v62  ;;  %v4478_v21 = vrot.slane %v13943_v14, %v16143_v6  ;;  %v18340_v61 = vrot.slane %v4447_v36, %v16143_v6  ;;  %v21224_v62 = vld [vmem:[#allocation176_spill] sm:$0xff] }
 0x2c8   :  { %21216 = vst [vmem:[#allocation126_spill] sm:$0xff] %v18322_v40  ;;  %v4449_v9 = vcombine.low %v18322_v40, %v21217_v44  ;;  %v6862_v63 = vcombine.low %v6860_v27, %v17500_v55  ;;  %v4976_v2 = vpack.c.bf16 %v4446_v35, %v4397_v3  ;;  %v4496_v23 = vcombine.low %v21222_v19, %v21221_v48 }
 0x2c9   :  { %v18336_v37 = vrot.slane %v4448_v53, %v16143_v6  ;;  %v6869_v8 = vrot.slane %v6861_v49, %v16143_v6  ;;  %v13944_v55 = vcombine.high %v21222_v19, %v21221_v48  ;;  %v4498_v27 = vcombine.low %v21224_v62, %v21223_v30 }
 0x2ca   :  { %v4471_v58 = vrot.slane %v4449_v9, %v16143_v6  ;;  %v6876_v54 = vrot.slane %v6862_v63, %v16143_v6  ;;  %14327 = vmatmul.mubr.msk.bf16.gmra.mrb[36].mxu1 %vm4984_vm2, %v4976_v2  ;;  %v13945_v53 = vcombine.high %v21224_v62, %v21223_v30  ;;  %v18357_v14 = vrot.slane %v4496_v23, %v16143_v6  ;;  %v15227_v9 = vld.sshfl [vmem:[#allocation10 + $0x58] sm:$0x13 pattern:$0x75316420]  ;;  %v21231_v62 = vld [vmem:[#allocation73_spill] sm:$0xff] }
 0x2cb   :  { %21220 = vst [vmem:[#allocation54_spill] sm:$0xff] %v18336_v37  ;;  %v4479_v35 = vcombine.low %v18340_v61, %v18336_v37  ;;  %14330 = vmatprep.mubr.msk.bf16.mxu1 %vm15726_vm0, %v20947_v18  ;;  %v18362_v63 = vrot.slane %v13944_v55, %v16143_v6  ;;  %v18365_v36 = vrot.slane %v4498_v27, %v16143_v6  ;;  %v21229_v23 = vld [vmem:[#allocation66_spill] sm:$0xff] }
 0x2cc   :  { %v4480_v3 = vcombine.low %v4471_v58, %v4478_v21  ;;  %21225 = vst [vmem:[#allocation51_spill] sm:$0xff] %v18357_v14  ;;  %v6877_v49 = vcombine.low %v6869_v8, %v6876_v54  ;;  %v6632_v2 = vcombine.high %v15227_v9, %v15227_v9  ;;  %v18370_v48 = vrot.slane %v13945_v53, %v16143_v6  ;;  %v21241_v37 = vld [vmem:[#allocation70_spill] sm:$0xff] }
 0x2cd   :  { %21226 = vst [vmem:[#allocation50_spill] sm:$0xff] %v18362_v63  ;;  %21227 = vst [vmem:[#allocation158_spill] sm:$0xff] %v18365_v36  ;;  %v4487_v21 = vrot.slane %v4479_v35, %v16143_v6  ;;  %v6878_v8 = vcombine.low %v21229_v23, %v17509_v7  ;;  %v4528_v55 = vcombine.low %v18357_v14, %v18362_v63  ;;  %v21233_v23 = vld [vmem:[#allocation186_spill] sm:$0xff] }
 0x2ce   :  { %v4494_v58 = vrot.slane %v4480_v3, %v16143_v6  ;;  %21228 = vst [vmem:[#allocation162_spill] sm:$0xff] %v18370_v48  ;;  %v7470_v54 = vpack.c.bf16 %v6877_v49, %v6844_v47  ;;  %v18377_v30 = vrot.slane %v6632_v2, %v16143_v6  ;;  %v6879_v27 = vcombine.low %v21231_v62, %v17528_v57  ;;  %v21232_v49 = vld [vmem:[#allocation82_spill] sm:$0xff] }
 0x2cf   :  { %v4529_v35 = vcombine.low %v18365_v36, %v18370_v48  ;;  %v6886_v3 = vrot.slane %v6878_v8, %v16143_v6  ;;  %v6904_v53 = vcombine.low %v17536_v43, %v17662_v45  ;;  %v4536_v7 = vrot.slane %v4528_v55, %v16143_v6  ;;  %v21234_v43 = vld [vmem:[#allocation187_spill] sm:$0xff]  ;;  %v21235_v8 = vld [vmem:[#allocation188_spill] sm:$0xff] }
 0x2d0   :  { %21230 = vst [vmem:[#allocation160_spill] sm:$0xff] %v18377_v30  ;;  %v4495_v9 = vcombine.low %v4487_v21, %v4494_v58  ;;  %14485 = vmatmul.mubr.msk.bf16.gmra.mrb[8].mxu0 %vm4984_vm2, %v7470_v54  ;;  %v6893_v47 = vrot.slane %v6879_v27, %v16143_v6  ;;  %v6895_v2 = vcombine.low %v21232_v49, %v18377_v30  ;;  %v21236_v27 = vld [vmem:[#allocation190_spill] sm:$0xff]  ;;  %v21237_v30 = vld [vmem:[#allocation189_spill] sm:$0xff] }
 0x2d1   :  { %v1592_v57 = vcombine.high %v21233_v23, %v21233_v23  ;;  %v4543_v21 = vrot.slane %v4529_v35, %v16143_v6  ;;  %14488 = vmatprep.mubr.msk.bf16.mxu0 %vm15726_vm0, %v20947_v18  ;;  %v6918_v58 = vrot.slane %v6904_v53, %v16143_v6  ;;  %v1593_v45 = vcombine.high %v21234_v43, %v21234_v43  ;;  %v21238_v23 = vld [vmem:[#allocation192_spill] sm:$0xff] }
 0x2d2   :  { %v1594_v54 = vcombine.high %v21235_v8, %v21235_v8  ;;  %v6894_v55 = vcombine.low %v6886_v3, %v6893_v47  ;;  %v6902_v62 = vrot.slane %v6895_v2, %v16143_v6  ;;  %v1595_v19 = vcombine.high %v21236_v27, %v21236_v27  ;;  %v21239_v53 = vld [vmem:[#allocation72_spill] sm:$0xff] }
 0x2d3   :  { %v1641_v35 = vcombine.high %v21237_v30, %v21237_v30  ;;  %v4544_v49 = vcombine.low %v4536_v7, %v4543_v21  ;;  %v1643_v44 = vcombine.high %v21238_v23, %v21238_v23  ;;  %v4545_v17 = vcombine.low %v21240_v22, %v21239_v53 }
 0x2d4   :  { %v13946_v14 = vcombine.high %v21240_v22, %v21239_v53  ;;  %v6903_v3 = vcombine.low %v21241_v37, %v6902_v62  ;;  %v4547_v47 = vcombine.low %v21235_v8, %v1592_v57  ;;  %v4548_v2 = vcombine.low %v1594_v54, %v21234_v43 }
 0x2d5   :  { %v4594_v48 = vcombine.low %v21236_v27, %v1593_v45  ;;  %v4977_v63 = vpack.c.bf16 %v4544_v49, %v4495_v9  ;;  %v18417_v7 = vrot.slane %v4545_v17, %v16143_v6  ;;  %v4595_v36 = vcombine.low %v1595_v19, %v21237_v30 }
 0x2d6   :  { %v18420_v21 = vrot.slane %v13946_v14, %v16143_v6  ;;  %v6911_v40 = vrot.slane %v6903_v3, %v16143_v6  ;;  %v4569_v22 = vrot.slane %v4547_v47, %v16143_v6  ;;  %v18426_v37 = vrot.slane %v4548_v2, %v16143_v6  ;;  %v21243_v3 = vld [vmem:[#allocation86_spill] sm:$0xff]  ;;  %v21244_v47 = vld [vmem:[#allocation201_spill] sm:$0xff] }
 0x2d7   :  { %v4596_v57 = vcombine.low %v21238_v23, %v1641_v35  ;;  %14331 = vmatmul.mubr.msk.bf16.gmra.mrb[40].mxu1 %vm4984_vm2, %v4977_v63  ;;  %v4597_v9 = vcombine.low %v1643_v44, %v17574_v33  ;;  %v18434_v14 = vrot.slane %v4594_v48, %v16143_v6  ;;  %v18437_v19 = vrot.slane %v4595_v36, %v16143_v6  ;;  %v15228_v63 = vld.sshfl [vmem:[#allocation10 + $0x70] sm:$0x13 pattern:$0x75316420] }
 0x2d8   :  { %v4577_v17 = vcombine.low %v18417_v7, %v18420_v21  ;;  %v6919_v30 = vcombine.low %v6911_v40, %v6918_v58  ;;  %14334 = vmatprep.mubr.msk.bf16.mxu1 %vm15726_vm0, %v20947_v18  ;;  %v4578_v49 = vcombine.low %v4569_v22, %v18426_v37  ;;  %v6640_v43 = vcombine.high %v15228_v63, %v15228_v63 }
 0x2d9   :  { %v18443_v23 = vrot.slane %v4596_v57, %v16143_v6  ;;  %v18447_v44 = vrot.slane %v4597_v9, %v16143_v6  ;;  %v4626_v36 = vcombine.low %v18434_v14, %v18437_v19  ;;  %v6920_v40 = vcombine.low %v17665_v39, %v17668_v50 }
 0x2da   :  { %v4585_v45 = vrot.slane %v4577_v17, %v16143_v6  ;;  %v7471_v48 = vpack.c.bf16 %v6919_v30, %v6894_v55  ;;  %v4592_v58 = vrot.slane %v4578_v49, %v16143_v6  ;;  %v18455_v54 = vrot.slane %v6640_v43, %v16143_v6  ;;  %v21245_v55 = vld [vmem:[#allocation85_spill] sm:$0xff]  ;;  %v21248_v43 = vld [vmem:[#allocation206_spill] sm:$0xff] }
 0x2db   :  { %v6921_v62 = vcombine.low %v17671_v5, %v17685_v15  ;;  %v4627_v27 = vcombine.low %v18443_v23, %v18447_v44  ;;  %v4634_v35 = vrot.slane %v4626_v36, %v16143_v6  ;;  %v6928_v53 = vrot.slane %v6920_v40, %v16143_v6  ;;  %v21246_v5 = vld [vmem:[#allocation203_spill] sm:$0xff] }
 0x2dc   :  { %21242 = vst [vmem:[#allocation157_spill] sm:$0xff] %v18455_v54  ;;  %v6937_v2 = vcombine.low %v21244_v47, %v21243_v3  ;;  %14489 = vmatmul.mubr.msk.bf16.gmra.mrb[12].mxu0 %vm4984_vm2, %v7471_v48  ;;  %v4593_v39 = vcombine.low %v4585_v45, %v4592_v58  ;;  %v6938_v22 = vcombine.low %v18455_v54, %v21245_v55  ;;  %v21249_v45 = vld [vmem:[#allocation204_spill] sm:$0xff]  ;;  %v21263_v54 = vld [vmem:[#allocation110_spill] sm:$0xff] }
 0x2dd   :  { %v6935_v50 = vrot.slane %v6921_v62, %v16143_v6  ;;  %v6954_v15 = vcombine.low %v21246_v5, %v17811_v4  ;;  %v4641_v57 = vrot.slane %v4627_v27, %v16143_v6  ;;  %14492 = vmatprep.mubr.msk.bf16.mxu0 %vm15726_vm0, %v20947_v18  ;;  %v18477_v9 = vcombine.high %v17574_v33, %v17574_v33  ;;  %v21250_v47 = vld [vmem:[#allocation208_spill] sm:$0xff]  ;;  %v21264_v3 = vld [vmem:[#allocation222_spill] sm:$0xff] }
 0x2de   :  { %v6945_v17 = vrot.slane %v6937_v2, %v16143_v6  ;;  %v18481_v30 = vcombine.high %v17587_v26, %v17587_v26  ;;  %v6952_v63 = vrot.slane %v6938_v22, %v16143_v6  ;;  %v13947_v36 = vcombine.high %v21249_v45, %v21248_v43  ;;  %v21272_v45 = vld [vmem:[#allocation221_spill] sm:$0xff] }
 0x2df   :  { %21247 = vst [vmem:[#allocation155_spill] sm:$0xff] %v18477_v9  ;;  %v6936_v49 = vcombine.low %v6928_v53, %v6935_v50  ;;  %v6968_v4 = vrot.slane %v6954_v15, %v16143_v6  ;;  %v4642_v40 = vcombine.low %v4634_v35, %v4641_v57  ;;  %v4643_v48 = vcombine.low %v17587_v26, %v18477_v9  ;;  %v21252_v15 = vld [vmem:[#allocation211_spill] sm:$0xff]  ;;  %v21253_v57 = vld [vmem:[#allocation210_spill] sm:$0xff] }
 0x2e0   :  { %v4644_v33 = vcombine.low %v18481_v30, %v21248_v43  ;;  %v4646_v58 = vcombine.low %v17707_v16, %v17719_v24  ;;  %v6953_v62 = vcombine.low %v6945_v17, %v6952_v63  ;;  %v4667_v27 = vrot.slane %v13947_v36, %v16143_v6 }
 0x2e1   :  { %v13948_v53 = vcombine.high %v17707_v16, %v17719_v24  ;;  %v4693_v2 = vcombine.low %v21250_v47, %v17734_v12  ;;  %v4978_v50 = vpack.c.bf16 %v4642_v40, %v4593_v39  ;;  %v18499_v35 = vrot.slane %v4643_v48, %v16143_v6  ;;  %v15229_v40 = vld.sshfl [vmem:[#allocation10 + $0x88] sm:$0x13 pattern:$0x75316420] }
 0x2e2   :  { %v4660_v26 = vrot.slane %v4644_v33, %v16143_v6  ;;  %v18503_v55 = vrot.slane %v4646_v58, %v16143_v6  ;;  %v6961_v22 = vrot.slane %v6953_v62, %v16143_v6  ;;  %v13949_v5 = vcombine.high %v21250_v47, %v17734_v12  ;;  %v21257_v62 = vld [vmem:[#allocation93_spill] sm:$0xff] }
 0x2e3   :  { %v4695_v24 = vcombine.low %v21253_v57, %v21252_v15  ;;  %v18511_v17 = vrot.slane %v13948_v53, %v16143_v6  ;;  %14335 = vmatmul.mubr.msk.bf16.gmra.mrb[44].mxu1 %vm4984_vm2, %v4978_v50  ;;  %v18517_v36 = vrot.slane %v4693_v2, %v16143_v6  ;;  %v6648_v48 = vcombine.high %v15229_v40, %v15229_v40  ;;  %v21258_v53 = vld [vmem:[#allocation94_spill] sm:$0xff] }
 0x2e4   :  { %21251 = vst [vmem:[#allocation161_spill] sm:$0xff] %v18503_v55  ;;  %v4675_v39 = vcombine.low %v18499_v35, %v4660_v26  ;;  %v4676_v63 = vcombine.low %v4667_v27, %v18503_v55  ;;  %v6969_v33 = vcombine.low %v6961_v22, %v6968_v4  ;;  %14338 = vmatprep.mubr.msk.bf16.mxu1 %vm15726_vm0, %v20947_v18 }
 0x2e5   :  { %21254 = vst [vmem:[#allocation60_spill] sm:$0xff] %v18517_v36  ;;  %v18522_v12 = vrot.slane %v13949_v5, %v16143_v6  ;;  %v18525_v58 = vrot.slane %v4695_v24, %v16143_v6  ;;  %v6970_v47 = vcombine.low %v21258_v53, %v21257_v62  ;;  %v4724_v50 = vcombine.low %v18511_v17, %v18517_v36  ;;  %v21260_v5 = vld [vmem:[#allocation98_spill] sm:$0xff]  ;;  %v21261_v24 = vld [vmem:[#allocation220_spill] sm:$0xff] }
 0x2e6   :  { %v4683_v27 = vrot.slane %v4675_v39, %v16143_v6  ;;  %v4690_v2 = vrot.slane %v4676_v63, %v16143_v6  ;;  %v18534_v4 = vrot.slane %v6648_v48, %v16143_v6  ;;  %v7472_v26 = vpack.c.bf16 %v6969_v33, %v6936_v49  ;;  %v21262_v63 = vld [vmem:[#allocation100_spill] sm:$0xff]  ;;  %v21265_v33 = vld [vmem:[#allocation223_spill] sm:$0xff] }
 0x2e7   :  { %21255 = vst [vmem:[#allocation58_spill] sm:$0xff] %v18522_v12  ;;  %21256 = vst [vmem:[#allocation59_spill] sm:$0xff] %v18525_v58  ;;  %v4725_v22 = vcombine.low %v18522_v12, %v18525_v58  ;;  %v6971_v40 = vcombine.low %v21261_v24, %v21260_v5  ;;  %v6978_v16 = vrot.slane %v6970_v47, %v16143_v6  ;;  %v21266_v24 = vld [vmem:[#allocation224_spill] sm:$0xff] }
 0x2e8   :  { %21259 = vst [vmem:[#allocation67_spill] sm:$0xff] %v18534_v4  ;;  %v4691_v62 = vcombine.low %v4683_v27, %v4690_v2  ;;  %v4732_v39 = vrot.slane %v4724_v50, %v16143_v6  ;;  %v6987_v53 = vcombine.low %v21262_v63, %v18534_v4  ;;  %v6996_v43 = vcombine.low %v21264_v3, %v21263_v54  ;;  %v21267_v54 = vld [vmem:[#allocation225_spill] sm:$0xff]  ;;  %v21268_v50 = vld [vmem:[#allocation227_spill] sm:$0xff]  ;;  %v21269_v4 = vld [vmem:[#allocation226_spill] sm:$0xff] }
 0x2e9   :  { %14493 = vmatmul.mubr.msk.bf16.gmra.mrb[16].mxu0 %vm4984_vm2, %v7472_v26  ;;  %v4739_v49 = vrot.slane %v4725_v22, %v16143_v6  ;;  %v6985_v48 = vrot.slane %v6971_v40, %v16143_v6  ;;  %v1786_v5 = vcombine.high %v21265_v33, %v21265_v33  ;;  %v1787_v47 = vcombine.high %v21266_v24, %v21266_v24  ;;  %v21270_v33 = vld [vmem:[#allocation228_spill] sm:$0xff] }
 0x2ea   :  { %14496 = vmatprep.mubr.msk.bf16.mxu0 %vm15726_vm0, %v20947_v18  ;;  %v6994_v27 = vrot.slane %v6987_v53, %v16143_v6  ;;  %v7010_v2 = vrot.slane %v6996_v43, %v16143_v6  ;;  %v1788_v3 = vcombine.high %v21267_v54, %v21267_v54  ;;  %v1789_v26 = vcombine.high %v21268_v50, %v21268_v50  ;;  %v21273_v53 = vld [vmem:[#allocation229_spill] sm:$0xff] }
 0x2eb   :  { %v4740_v22 = vcombine.low %v4732_v39, %v4739_v49  ;;  %v6986_v40 = vcombine.low %v6978_v16, %v6985_v48  ;;  %v1835_v63 = vcombine.high %v21269_v4, %v21269_v4  ;;  %v18565_v9 = vcombine.high %v21270_v33, %v21270_v33 }
 0x2ec   :  { %v6995_v8 = vcombine.low %v6994_v27, %v21272_v45  ;;  %v1837_v43 = vcombine.high %v21273_v53, %v21273_v53  ;;  %v13950_v58 = vcombine.high %v21253_v57, %v21252_v15  ;;  %v4742_v36 = vcombine.low %v21267_v54, %v1786_v5 }
 0x2ed   :  { %21271 = vst [vmem:[#allocation63_spill] sm:$0xff] %v18565_v9  ;;  %v4979_v12 = vpack.c.bf16 %v4740_v22, %v4691_v62  ;;  %v4743_v16 = vcombine.low %v1788_v3, %v21266_v24  ;;  %v4744_v39 = vcombine.low %v21268_v50, %v1787_v47  ;;  %v4790_v49 = vcombine.low %v1789_v26, %v21269_v4  ;;  %v21275_v4 = vld [vmem:[#allocation231_spill] sm:$0xff]  ;;  %v21276_v22 = vld [vmem:[#allocation120_spill] sm:$0xff] }
 0x2ee   :  { %v7003_v48 = vrot.slane %v6995_v8, %v16143_v6  ;;  %v18578_v55 = vrot.slane %v13950_v58, %v16143_v6  ;;  %v4758_v45 = vrot.slane %v4742_v36, %v16143_v6  ;;  %v4791_v27 = vcombine.low %v21273_v53, %v1835_v63  ;;  %v15230_v47 = vld.sshfl [vmem:[#allocation10 + $0xa0] sm:$0x13 pattern:$0x75316420]  ;;  %v21277_v53 = vld [vmem:[#allocation109_spill] sm:$0xff] }
 0x2ef   :  { %14339 = vmatmul.mubr.msk.bf16.gmra.mrb[48].mxu1 %vm4984_vm2, %v4979_v12  ;;  %v18584_v15 = vrot.slane %v4743_v16, %v16143_v6  ;;  %v18587_v57 = vrot.slane %v4744_v39, %v16143_v6  ;;  %v4792_v62 = vcombine.low %v1837_v43, %v21270_v33  ;;  %v4793_v8 = vcombine.low %v21275_v4, %v18565_v9 }
 0x2f0   :  { %v7011_v5 = vcombine.low %v7003_v48, %v7010_v2  ;;  %14342 = vmatprep.mubr.msk.bf16.mxu1 %vm15726_vm0, %v20947_v18  ;;  %v4773_v36 = vcombine.low %v18578_v55, %v4758_v45  ;;  %v18596_v58 = vrot.slane %v4790_v49, %v16143_v6  ;;  %v18599_v12 = vrot.slane %v4791_v27, %v16143_v6  ;;  %v21279_v48 = vld [vmem:[#allocation240_spill] sm:$0xff]  ;;  %v21280_v45 = vld [vmem:[#allocation239_spill] sm:$0xff] }
 0x2f1   :  { %21274 = vst [vmem:[#allocation171_spill] sm:$0xff] %v18584_v15  ;;  %v4774_v63 = vcombine.low %v18584_v15, %v18587_v57  ;;  %v18604_v33 = vrot.slane %v4792_v62, %v16143_v6  ;;  %v18607_v24 = vrot.slane %v4793_v8, %v16143_v6  ;;  %v6656_v2 = vcombine.high %v15230_v47, %v15230_v47  ;;  %v21281_v8 = vld [vmem:[#allocation242_spill] sm:$0xff] }
 0x2f2   :  { %v7473_v3 = vpack.c.bf16 %v7011_v5, %v6986_v40  ;;  %v4781_v50 = vrot.slane %v4773_v36, %v16143_v6  ;;  %v4822_v26 = vcombine.low %v18596_v58, %v18599_v12  ;;  %v7012_v43 = vcombine.low %v21277_v53, %v21276_v22  ;;  %v21283_v53 = vld [vmem:[#allocation241_spill] sm:$0xff] }
 0x2f3   :  { %v4788_v16 = vrot.slane %v4774_v63, %v16143_v6  ;;  %v4823_v39 = vcombine.low %v18604_v33, %v18607_v24  ;;  %v18618_v49 = vrot.slane %v6656_v2, %v16143_v6  ;;  %v7020_v27 = vcombine.low %v21280_v45, %v21279_v48  ;;  %v21287_v22 = vld [vmem:[#allocation245_spill] sm:$0xff] }
 0x2f4   :  { %14497 = vmatmul.mubr.msk.bf16.gmra.mrb[20].mxu0 %vm4984_vm2, %v7473_v3  ;;  %v4830_v40 = vrot.slane %v4822_v26, %v16143_v6  ;;  %v7019_v62 = vrot.slane %v7012_v43, %v16143_v6  ;;  %v7046_v5 = vcombine.low %v21281_v8, %v18114_v0  ;;  %v18629_v36 = vcombine.high %v21275_v4, %v21275_v4  ;;  %v21282_v3 = vld [vmem:[#allocation119_spill] sm:$0xff]  ;;  %v21284_v0 = vld [vmem:[#allocation246_spill] sm:$0xff]  ;;  %v21285_v4 = vld [vmem:[#allocation244_spill] sm:$0xff] }
 0x2f5   :  { %21278 = vst [vmem:[#allocation61_spill] sm:$0xff] %v18618_v49  ;;  %v4789_v63 = vcombine.low %v4781_v50, %v4788_v16  ;;  %v4837_v47 = vrot.slane %v4823_v39, %v16143_v6  ;;  %14500 = vmatprep.mubr.msk.bf16.mxu0 %vm15726_vm0, %v20947_v18  ;;  %v7028_v2 = vrot.slane %v7020_v27, %v16143_v6  ;;  %v21286_v8 = vld [vmem:[#allocation247_spill] sm:$0xff] }
 0x2f6   :  { %v7037_v26 = vcombine.low %v18618_v49, %v21282_v3  ;;  %v7021_v43 = vcombine.low %v21283_v53, %v7019_v62  ;;  %v7060_v48 = vrot.slane %v7046_v5, %v16143_v6  ;;  %v4839_v45 = vcombine.low %v18629_v36, %v21284_v0  ;;  %v21288_v53 = vld [vmem:[#allocation252_spill] sm:$0xff] }
 0x2f7   :  { %v13951_v50 = vcombine.high %v21285_v4, %v21284_v0  ;;  %v4838_v16 = vcombine.low %v4830_v40, %v4837_v47  ;;  %v4841_v9 = vcombine.low %v21287_v22, %v21286_v8  ;;  %v13952_v27 = vcombine.high %v21287_v22, %v21286_v8  ;;  %v21289_v49 = vld [vmem:[#allocation248_spill] sm:$0xff]  ;;  %v21290_v0 = vld [vmem:[#allocation115_spill] sm:$0xff] }
 0x2f8   :  { %v7044_v39 = vrot.slane %v7037_v26, %v16143_v6  ;;  %v7035_v3 = vrot.slane %v7021_v43, %v16143_v6  ;;  %v4849_v62 = vrot.slane %v4839_v45, %v16143_v6  ;;  %v4888_v54 = vcombine.low %v21289_v49, %v21288_v53  ;;  %v21291_v45 = vld [vmem:[#allocation253_spill] sm:$0xff]  ;;  %v21292_v22 = vld [vmem:[#allocation251_spill] sm:$0xff] }
 0x2f9   :  { %v4856_v5 = vrot.slane %v13951_v50, %v16143_v6  ;;  %v4980_v15 = vpack.c.bf16 %v4838_v16, %v4789_v63  ;;  %v18655_v47 = vrot.slane %v4841_v9, %v16143_v6  ;;  %v18658_v26 = vrot.slane %v13952_v27, %v16143_v6 }
 0x2fa   :  { %v7045_v40 = vcombine.low %v7044_v39, %v21290_v0  ;;  %v7036_v4 = vcombine.low %v7028_v2, %v7035_v3  ;;  %v13953_v43 = vcombine.high %v21289_v49, %v21288_v53  ;;  %v4890_v50 = vcombine.low %v21292_v22, %v21291_v45  ;;  %v15231_v39 = vld.sshfl [vmem:[#allocation10 + $0xb8] sm:$0x13 pattern:$0x75316420] }
 0x2fb   :  { %v4871_v8 = vcombine.low %v4849_v62, %v4856_v5  ;;  %14343 = vmatmul.mubr.msk.bf16.gmra.mrb[52].mxu1 %vm4984_vm2, %v4980_v15  ;;  %v4872_v0 = vcombine.low %v18655_v47, %v18658_v26  ;;  %v13954_v9 = vcombine.high %v21292_v22, %v21291_v45  ;;  %v18671_v16 = vrot.slane %v4888_v54, %v16143_v6 }
 0x2fc   :  { %v7053_v63 = vrot.slane %v7045_v40, %v16143_v6  ;;  %14346 = vmatprep.mubr.msk.bf16.mxu1 %vm15726_vm0, %v20947_v18  ;;  %v18677_v2 = vrot.slane %v13953_v43, %v16143_v6  ;;  %v18680_v15 = vrot.slane %v4890_v50, %v16143_v6  ;;  %v6664_v27 = vcombine.high %v15231_v39, %v15231_v39 }
 0x2fd   :  { %v4879_v49 = vrot.slane %v4871_v8, %v16143_v6  ;;  %v4886_v62 = vrot.slane %v4872_v0, %v16143_v6  ;;  %v18684_v22 = vrot.slane %v13954_v9, %v16143_v6  ;;  %v7070_v54 = vcombine.low %v18117_v10, %v18123_v56  ;;  %v21294_v10 = vld [vmem:[#allocation137_spill] sm:$0xff] }
 0x2fe   :  { %v7061_v3 = vcombine.low %v7053_v63, %v7060_v48  ;;  %v4920_v5 = vcombine.low %v18671_v16, %v18677_v2  ;;  %v18691_v53 = vrot.slane %v6664_v27, %v16143_v6  ;;  %v7087_v40 = vcombine.low %v18138_v42, %v18141_v52  ;;  %v21295_v52 = vld [vmem:[#allocation90_spill] sm:$0xff]  ;;  %v15232_v27 = vld.sshfl [vmem:[#allocation10 + $0xd0] sm:$0x13 pattern:$0x75316420] }
 0x2ff   :  { %v7088_v48 = vcombine.low %v18144_v34, %v18183_v41  ;;  %v4887_v43 = vcombine.low %v4879_v49, %v4886_v62  ;;  %v4921_v45 = vcombine.low %v18680_v15, %v18684_v22  ;;  %v7078_v50 = vrot.slane %v7070_v54, %v16143_v6  ;;  %v21296_v34 = vld [vmem:[#allocation87_spill] sm:$0xff]  ;;  %v21298_v49 = vld [vmem:[#allocation88_spill] sm:$0xff] }
 0x300   :  { %21293 = vst [vmem:[#allocation174_spill] sm:$0xff] %v18691_v53  ;;  %v7474_v8 = vpack.c.bf16 %v7061_v3, %v7036_v4  ;;  %v4928_v56 = vrot.slane %v4920_v5, %v16143_v6  ;;  %v7062_v63 = vcombine.low %v21294_v10, %v18691_v53  ;;  %v7095_v0 = vrot.slane %v7087_v40, %v16143_v6  ;;  %v21297_v4 = vld [vmem:[#allocation202_spill] sm:$0xff] }
 0x301   :  { %v7102_v9 = vrot.slane %v7088_v48, %v16143_v6  ;;  %v4935_v42 = vrot.slane %v4921_v45, %v16143_v6  ;;  %v2375_v41 = vcombine.low %v21296_v34, %v21295_v52  ;;  %v2408_v39 = vcombine.low %v21298_v49, %v21297_v4  ;;  %v21299_v5 = vld [vmem:[#allocation142_spill] sm:$0xff] }
 0x302   :  { %14501 = vmatmul.mubr.msk.bf16.gmra.mrb[24].mxu0 %vm4984_vm2, %v7474_v8  ;;  %v6672_v3 = vcombine.high %v15232_v27, %v15232_v27  ;;  %v7069_v62 = vrot.slane %v7062_v63, %v16143_v6  ;;  %v7104_v40 = vcombine.low %v18171_v13, %v21299_v5  ;;  %v7120_v48 = vcombine.low %v18188_v51, %v18191_v32  ;;  %v21301_v51 = vld [vmem:[#allocation92_spill] sm:$0xff] }
 0x303   :  { %14504 = vmatprep.mubr.msk.bf16.mxu0 %vm15726_vm0, %v20947_v18  ;;  %v7103_v54 = vcombine.low %v7095_v0, %v7102_v9  ;;  %v4936_v8 = vcombine.low %v4928_v56, %v4935_v42  ;;  %v2416_v45 = vrot.slane %v2408_v39, %v16143_v6  ;;  %v7137_v4 = vcombine.low %v18202_v20, %v18205_v28  ;;  %v21302_v56 = vld [vmem:[#allocation147_spill] sm:$0xff]  ;;  %v21304_v28 = vld [vmem:[#allocation89_spill] sm:$0xff] }
 0x304   :  { %v18720_v53 = vrot.slane %v6672_v3, %v16143_v6  ;;  %v7071_v27 = vcombine.low %v18126_v60, %v7069_v62  ;;  %v7112_v63 = vrot.slane %v7104_v40, %v16143_v6  ;;  %v7128_v0 = vrot.slane %v7120_v48, %v16143_v6  ;;  %v21303_v60 = vld [vmem:[#allocation96_spill] sm:$0xff]  ;;  %v21305_v40 = vld [vmem:[#allocation101_spill] sm:$0xff]  ;;  %v21306_v48 = vld [vmem:[#allocation99_spill] sm:$0xff] }
 0x305   :  { %v7138_v13 = vcombine.low %v18210_v31, %v18258_v11  ;;  %v4981_v9 = vpack.c.bf16 %v4936_v8, %v4887_v43  ;;  %v2424_v32 = vcombine.low %v2416_v45, %v21301_v51  ;;  %v7145_v39 = vrot.slane %v7137_v4, %v16143_v6  ;;  %v21307_v43 = vld [vmem:[#allocation97_spill] sm:$0xff]  ;;  %v21308_v8 = vld [vmem:[#allocation95_spill] sm:$0xff]  ;;  %v21309_v51 = vld [vmem:[#allocation104_spill] sm:$0xff] }
 0x306   :  { %21300 = vst [vmem:[#allocation179_spill] sm:$0xff] %v18720_v53  ;;  %v7105_v42 = vcombine.low %v18720_v53, %v21302_v56  ;;  %v7085_v3 = vrot.slane %v7071_v27, %v16143_v6  ;;  %v2457_v62 = vcombine.low %v21304_v28, %v21303_v60  ;;  %v2458_v5 = vcombine.low %v21306_v48, %v21305_v40  ;;  %v21310_v4 = vld [vmem:[#allocation103_spill] sm:$0xff]  ;;  %v21440_v53 = vld [vmem:[#allocation160_spill] sm:$0xff] }
 0x307   :  { %v7152_v20 = vrot.slane %v7138_v13, %v16143_v6  ;;  %14347 = vmatmul.mubr.msk.bf16.gmra.mrb[56].mxu1 %vm4984_vm2, %v4981_v9  ;;  %v3439_v31 = vpack.c.bf16 %v2424_v32, %v2375_v41  ;;  %v2475_v45 = vcombine.low %v21308_v8, %v21307_v43  ;;  %v2507_v56 = vcombine.low %v21310_v4, %v21309_v51 }
 0x308   :  { %v7119_v11 = vrot.slane %v7105_v42, %v16143_v6  ;;  %v7086_v27 = vcombine.low %v7078_v50, %v7085_v3  ;;  %14368 = vmatprep.mubr.msk.bf16.mxu1 %vm15726_vm0, %v20947_v18  ;;  %v18748_v60 = vrot.slane %v2457_v62, %v16143_v6  ;;  %v18751_v28 = vrot.slane %v2458_v5, %v16143_v6  ;;  %v15233_v42 = vld.sshfl [vmem:[#allocation10 + $0xe8] sm:$0x13 pattern:$0x75316420] }
 0x309   :  { %v7153_v13 = vcombine.low %v7145_v39, %v7152_v20  ;;  %v2491_v9 = vrot.slane %v2475_v45, %v16143_v6  ;;  %v2521_v32 = vrot.slane %v2507_v56, %v16143_v6  ;;  %v6680_v40 = vcombine.high %v15233_v42, %v15233_v42  ;;  %v21311_v20 = vld [vmem:[#allocation102_spill] sm:$0xff]  ;;  %v21319_v42 = vld [vmem:[#allocation111_spill] sm:$0xff] }
 0x30a   :  { %v7121_v41 = vcombine.low %v7112_v63, %v7119_v11  ;;  %v7475_v48 = vpack.c.bf16 %v7103_v54, %v7086_v27  ;;  %v2473_v50 = vcombine.low %v18748_v60, %v18751_v28  ;;  %v7162_v39 = vcombine.low %v18264_v29, %v18267_v1  ;;  %v21313_v29 = vld [vmem:[#allocation117_spill] sm:$0xff] }
 0x30b   :  { %v7179_v3 = vcombine.low %v18277_v59, %v18285_v25  ;;  %v2506_v63 = vcombine.low %v21311_v20, %v2491_v9  ;;  %v18764_v62 = vrot.slane %v6680_v40, %v16143_v6  ;;  %v7180_v11 = vcombine.low %v18288_v46, %v18340_v61  ;;  %v21314_v1 = vld [vmem:[#allocation105_spill] sm:$0xff]  ;;  %v21316_v25 = vld [vmem:[#allocation118_spill] sm:$0xff]  ;;  %v21317_v46 = vld [vmem:[#allocation168_spill] sm:$0xff] }
 0x30c   :  { %v7135_v5 = vrot.slane %v7121_v41, %v16143_v6  ;;  %14505 = vmatmul.mubr.msk.bf16.gmra.mrb[28].mxu0 %vm4984_vm2, %v7475_v48  ;;  %v7170_v54 = vrot.slane %v7162_v39, %v16143_v6  ;;  %v2555_v8 = vcombine.low %v21314_v1, %v21313_v29  ;;  %v21315_v59 = vld [vmem:[#allocation121_spill] sm:$0xff]  ;;  %v21320_v40 = vld [vmem:[#allocation108_spill] sm:$0xff] }
 0x30d   :  { %21312 = vst [vmem:[#allocation176_spill] sm:$0xff] %v18764_v62  ;;  %v7187_v43 = vrot.slane %v7179_v3, %v16143_v6  ;;  %v2556_v45 = vcombine.low %v21316_v25, %v21315_v59  ;;  %14508 = vmatprep.mubr.msk.bf16.mxu0 %vm15726_vm0, %v20947_v18  ;;  %v2514_v56 = vrot.slane %v2506_v63, %v16143_v6  ;;  %v21321_v39 = vld [vmem:[#allocation116_spill] sm:$0xff]  ;;  %v21322_v3 = vld [vmem:[#allocation114_spill] sm:$0xff] }
 0x30e   :  { %v7136_v4 = vcombine.low %v7128_v0, %v7135_v5  ;;  %v7154_v61 = vcombine.low %v21317_v46, %v18764_v62  ;;  %v7194_v27 = vrot.slane %v7180_v11, %v16143_v6  ;;  %v18782_v41 = vrot.slane %v2555_v8, %v16143_v6  ;;  %v21323_v25 = vld [vmem:[#allocation122_spill] sm:$0xff] }
 0x30f   :  { %v18785_v9 = vrot.slane %v2556_v45, %v16143_v6  ;;  %v2572_v48 = vcombine.low %v21320_v40, %v21319_v42  ;;  %v2573_v29 = vcombine.low %v21322_v3, %v21321_v39  ;;  %14369 = vmatmul.mubr.msk.bf16.vlgmr.msra.gmra.mrb[16].mxu1 %vm4984_vm2, %v3439_v31  ;;  %v2522_v5 = vcombine.low %v2514_v56, %v2521_v32  ;;  %v21324_v45 = vld [vmem:[#allocation124_spill] sm:$0xff]  ;;  %v21327_v39 = vld [vmem:[#allocation158_spill] sm:$0xff] }
 0x310   :  { %v7476_v0 = vpack.c.bf16 %v7153_v13, %v7136_v4  ;;  %v7161_v63 = vrot.slane %v7154_v61, %v16143_v6  ;;  %v7195_v1 = vcombine.low %v7187_v43, %v7194_v27  ;;  %14372 = vmatprep.mubr.msk.bf16.mxu1 %vm15726_vm0, %v20947_v18  ;;  %v2605_v42 = vcombine.low %v21324_v45, %v21323_v25  ;;  %v15234_v13 = vld.sshfl [vmem:[#allocation10 + $0x100] sm:$0x13 pattern:$0x75316420]  ;;  %v21325_v4 = vld [vmem:[#allocation181_spill] sm:$0xff]  ;;  %v21326_v43 = vld [vmem:[#allocation126_spill] sm:$0xff] }
 0x311   :  { %21318 = vst [vmem:[#allocation66_spill] sm:$0xff] %v18785_v9  ;;  %v2571_v11 = vcombine.low %v18782_v41, %v18785_v9  ;;  %v2582_v8 = vrot.slane %v2572_v48, %v16143_v6  ;;  %v2589_v59 = vrot.slane %v2573_v29, %v16143_v6  ;;  %v3440_v40 = vpack.c.bf16 %v2522_v5, %v2473_v50  ;;  %v21328_v3 = vld [vmem:[#allocation50_spill] sm:$0xff]  ;;  %v21331_v5 = vld [vmem:[#allocation133_spill] sm:$0xff] }
 0x312   :  { %v7163_v31 = vcombine.low %v7161_v63, %v18274_v38  ;;  %v6688_v32 = vcombine.high %v15234_v13, %v15234_v13  ;;  %v7196_v56 = vcombine.low %v21326_v43, %v21325_v4  ;;  %v2619_v27 = vrot.slane %v2605_v42, %v16143_v6  ;;  %v21329_v48 = vld [vmem:[#allocation162_spill] sm:$0xff]  ;;  %v21332_v63 = vld [vmem:[#allocation125_spill] sm:$0xff]  ;;  %v21333_v13 = vld [vmem:[#allocation135_spill] sm:$0xff] }
 0x313   :  { %v2604_v61 = vcombine.low %v2582_v8, %v2589_v59  ;;  %v7229_v62 = vcombine.low %v21328_v3, %v21327_v39  ;;  %v7230_v29 = vcombine.low %v21329_v48, %v18417_v7  ;;  %v2653_v45 = vcombine.low %v21332_v63, %v21331_v5  ;;  %v21334_v7 = vld [vmem:[#allocation134_spill] sm:$0xff]  ;;  %v21339_v5 = vld [vmem:[#allocation129_spill] sm:$0xff]  ;;  %v21397_v4 = vld [vmem:[#allocation207_spill] sm:$0xff] }
 0x314   :  { %v7177_v46 = vrot.slane %v7163_v31, %v16143_v6  ;;  %v18811_v50 = vrot.slane %v6688_v32, %v16143_v6  ;;  %v7204_v38 = vrot.slane %v7196_v56, %v16143_v6  ;;  %14509 = vmatmul.mubr.msk.bf16.gmra.mrb[32].mxu0 %vm4984_vm2, %v7476_v0  ;;  %v2654_v43 = vcombine.low %v21334_v7, %v21333_v13  ;;  %v21335_v32 = vld [vmem:[#allocation177_spill] sm:$0xff]  ;;  %v21336_v39 = vld [vmem:[#allocation54_spill] sm:$0xff] }
 0x315   :  { %v2612_v8 = vrot.slane %v2604_v61, %v16143_v6  ;;  %v7237_v59 = vrot.slane %v7229_v62, %v16143_v6  ;;  %v7244_v42 = vrot.slane %v7230_v29, %v16143_v6  ;;  %14512 = vmatprep.mubr.msk.bf16.mxu0 %vm15726_vm0, %v20947_v18  ;;  %v18828_v61 = vrot.slane %v2653_v45, %v16143_v6  ;;  %v21338_v62 = vld [vmem:[#allocation131_spill] sm:$0xff]  ;;  %v21342_v7 = vld [vmem:[#allocation138_spill] sm:$0xff] }
 0x316   :  { %21330 = vst [vmem:[#allocation73_spill] sm:$0xff] %v18811_v50  ;;  %v7178_v31 = vcombine.low %v7170_v54, %v7177_v46  ;;  %v7197_v56 = vcombine.low %v18811_v50, %v21335_v32  ;;  %v7212_v3 = vcombine.low %v21336_v39, %v7204_v38  ;;  %v2670_v29 = vcombine.low %v21339_v5, %v21338_v62  ;;  %v21341_v46 = vld [vmem:[#allocation139_spill] sm:$0xff]  ;;  %v21346_v62 = vld [vmem:[#allocation132_spill] sm:$0xff] }
 0x317   :  { %v2620_v48 = vcombine.low %v2612_v8, %v2619_v27  ;;  %v7245_v0 = vcombine.low %v7237_v59, %v7244_v42  ;;  %21337 = vst [vmem:[#allocation187_spill] sm:$0xff] %v18828_v61  ;;  %14373 = vmatmul.mubr.msk.bf16.gmra.mrb[20].mxu1 %vm4984_vm2, %v3440_v40  ;;  %v18835_v54 = vrot.slane %v2654_v43, %v16143_v6  ;;  %v15235_v8 = vld.sshfl [vmem:[#allocation10 + $0x118] sm:$0x13 pattern:$0x75316420]  ;;  %v21343_v40 = vld [vmem:[#allocation51_spill] sm:$0xff] }
 0x318   :  { %v7477_v63 = vpack.c.bf16 %v7195_v1, %v7178_v31  ;;  %v7211_v13 = vrot.slane %v7197_v56, %v16143_v6  ;;  %v2703_v32 = vcombine.low %v21342_v7, %v21341_v46  ;;  %14376 = vmatprep.mubr.msk.bf16.mxu1 %vm15726_vm0, %v20947_v18  ;;  %v7220_v38 = vrot.slane %v7212_v3, %v16143_v6  ;;  %v21344_v56 = vld [vmem:[#allocation136_spill] sm:$0xff]  ;;  %v21349_v7 = vld [vmem:[#allocation193_spill] sm:$0xff] }
 0x319   :  { %21340 = vst [vmem:[#allocation190_spill] sm:$0xff] %v18835_v54  ;;  %v3441_v27 = vpack.c.bf16 %v2620_v48, %v2571_v11  ;;  %v2680_v45 = vrot.slane %v2670_v29, %v16143_v6  ;;  %v6696_v59 = vcombine.high %v15235_v8, %v15235_v8  ;;  %v7255_v43 = vcombine.low %v18426_v37, %v18434_v14  ;;  %v21345_v48 = vld [vmem:[#allocation143_spill] sm:$0xff]  ;;  %v21347_v14 = vld [vmem:[#allocation148_spill] sm:$0xff] }
 0x31a   :  { %v7213_v1 = vcombine.low %v7211_v13, %v21343_v40  ;;  %v18845_v42 = vrot.slane %v2703_v32, %v16143_v6  ;;  %v7271_v31 = vcombine.low %v18437_v19, %v18443_v23  ;;  %v7272_v3 = vcombine.low %v18447_v44, %v18499_v35  ;;  %v21348_v19 = vld [vmem:[#allocation140_spill] sm:$0xff]  ;;  %v21351_v40 = vld [vmem:[#allocation145_spill] sm:$0xff] }
 0x31b   :  { %v2702_v39 = vcombine.low %v2680_v45, %v21344_v56  ;;  %v18853_v11 = vrot.slane %v6696_v59, %v16143_v6  ;;  %v2722_v5 = vcombine.low %v21346_v62, %v21345_v48  ;;  %v2669_v13 = vcombine.low %v18828_v61, %v18835_v54  ;;  %v21350_v59 = vld [vmem:[#allocation146_spill] sm:$0xff] }
 0x31c   :  { %v7227_v29 = vrot.slane %v7213_v1, %v16143_v6  ;;  %v7279_v37 = vrot.slane %v7271_v31, %v16143_v6  ;;  %v2751_v23 = vcombine.low %v21348_v19, %v21347_v14  ;;  %14513 = vmatmul.mubr.msk.bf16.gmra.mrb[36].mxu0 %vm4984_vm2, %v7477_v63  ;;  %v7286_v35 = vrot.slane %v7272_v3, %v16143_v6  ;;  %v21352_v31 = vld [vmem:[#allocation154_spill] sm:$0xff]  ;;  %v21353_v63 = vld [vmem:[#allocation153_spill] sm:$0xff] }
 0x31d   :  { %v2710_v46 = vrot.slane %v2702_v39, %v16143_v6  ;;  %v7246_v44 = vcombine.low %v21349_v7, %v18853_v11  ;;  %v2750_v32 = vrot.slane %v2722_v5, %v16143_v6  ;;  %14516 = vmatprep.mubr.msk.bf16.mxu0 %vm15726_vm0, %v20947_v18  ;;  %v7269_v8 = vrot.slane %v7255_v43, %v16143_v6  ;;  %v21354_v3 = vld [vmem:[#allocation149_spill] sm:$0xff] }
 0x31e   :  { %v7228_v45 = vcombine.low %v7220_v38, %v7227_v29  ;;  %v2768_v1 = vcombine.low %v21351_v40, %v21350_v59  ;;  %v2801_v56 = vcombine.low %v21353_v63, %v21352_v31  ;;  %v7287_v62 = vcombine.low %v7279_v37, %v7286_v35  ;;  %v15236_v29 = vld.sshfl [vmem:[#allocation10 + $0x130] sm:$0x13 pattern:$0x75316420]  ;;  %v21358_v40 = vld [vmem:[#allocation58_spill] sm:$0xff] }
 0x31f   :  { %v2718_v39 = vcombine.low %v2710_v46, %v18845_v42  ;;  %v7253_v48 = vrot.slane %v7246_v44, %v16143_v6  ;;  %v2752_v14 = vcombine.low %v21354_v3, %v2750_v32  ;;  %14377 = vmatmul.mubr.msk.bf16.gmra.mrb[24].mxu1 %vm4984_vm2, %v3441_v27  ;;  %v18883_v38 = vrot.slane %v2751_v23, %v16143_v6  ;;  %v21355_v35 = vld [vmem:[#allocation213_spill] sm:$0xff]  ;;  %v21356_v27 = vld [vmem:[#allocation152_spill] sm:$0xff] }
 0x320   :  { %v7478_v5 = vpack.c.bf16 %v7245_v0, %v7228_v45  ;;  %v2778_v43 = vrot.slane %v2768_v1, %v16143_v6  ;;  %v6704_v19 = vcombine.high %v15236_v29, %v15236_v29  ;;  %14380 = vmatprep.mubr.msk.bf16.mxu1 %vm15726_vm0, %v20947_v18  ;;  %v18891_v37 = vrot.slane %v2801_v56, %v16143_v6  ;;  %v21357_v45 = vld [vmem:[#allocation161_spill] sm:$0xff]  ;;  %v21359_v1 = vld [vmem:[#allocation60_spill] sm:$0xff]  ;;  %v21360_v56 = vld [vmem:[#allocation59_spill] sm:$0xff] }
 0x321   :  { %v7254_v46 = vcombine.low %v18420_v21, %v7253_v48  ;;  %v2766_v44 = vrot.slane %v2752_v14, %v16143_v6  ;;  %v7288_v0 = vcombine.low %v18481_v30, %v21355_v35  ;;  %v7305_v59 = vcombine.low %v21357_v45, %v18511_v17  ;;  %v21361_v30 = vld [vmem:[#allocation209_spill] sm:$0xff]  ;;  %v21364_v45 = vld [vmem:[#allocation163_spill] sm:$0xff]  ;;  %v21428_v3 = vld [vmem:[#allocation244_spill] sm:$0xff] }
 0x322   :  { %v2800_v23 = vcombine.low %v2778_v43, %v21356_v27  ;;  %v18897_v32 = vrot.slane %v6704_v19, %v16143_v6  ;;  %v7321_v31 = vcombine.low %v21359_v1, %v21358_v40  ;;  %v3442_v21 = vpack.c.bf16 %v2718_v39, %v2669_v13  ;;  %v21362_v13 = vld [vmem:[#allocation159_spill] sm:$0xff]  ;;  %v21363_v39 = vld [vmem:[#allocation156_spill] sm:$0xff]  ;;  %v21365_v40 = vld [vmem:[#allocation150_spill] sm:$0xff] }
 0x323   :  { %v7262_v63 = vrot.slane %v7254_v46, %v16143_v6  ;;  %v7322_v48 = vcombine.low %v21360_v56, %v18578_v55  ;;  %v7296_v29 = vrot.slane %v7288_v0, %v16143_v6  ;;  %v2820_v46 = vcombine.low %v21363_v39, %v21362_v13  ;;  %v21369_v13 = vld [vmem:[#allocation170_spill] sm:$0xff] }
 0x324   :  { %v2808_v14 = vrot.slane %v2800_v23, %v16143_v6  ;;  %v7289_v43 = vcombine.low %v18897_v32, %v21361_v30  ;;  %v7329_v19 = vrot.slane %v7321_v31, %v16143_v6  ;;  %14517 = vmatmul.mubr.msk.bf16.gmra.mrb[40].mxu0 %vm4984_vm2, %v7478_v5  ;;  %v2849_v55 = vcombine.low %v21365_v40, %v21364_v45  ;;  %v21366_v31 = vld [vmem:[#allocation169_spill] sm:$0xff]  ;;  %v21368_v30 = vld [vmem:[#allocation166_spill] sm:$0xff] }
 0x325   :  { %v7270_v17 = vcombine.low %v7262_v63, %v7269_v8  ;;  %v7336_v27 = vrot.slane %v7322_v48, %v16143_v6  ;;  %14520 = vmatprep.mubr.msk.bf16.mxu0 %vm15726_vm0, %v20947_v18  ;;  %v2767_v23 = vcombine.low %v18883_v38, %v2766_v44  ;;  %v21367_v5 = vld [vmem:[#allocation165_spill] sm:$0xff]  ;;  %v2848_v48 = vrot.slane %v2820_v46, %v16143_v6 }
 0x326   :  { %v2816_v0 = vcombine.low %v2808_v14, %v18891_v37  ;;  %v7303_v1 = vrot.slane %v7289_v43, %v16143_v6  ;;  %v2898_v8 = vcombine.low %v21367_v5, %v21366_v31  ;;  %v2899_v39 = vcombine.low %v21369_v13, %v21368_v30  ;;  %v21370_v14 = vld [vmem:[#allocation164_spill] sm:$0xff] }
 0x327   :  { %v7479_v63 = vpack.c.bf16 %v7287_v62, %v7270_v17  ;;  %v7337_v56 = vcombine.low %v7329_v19, %v7336_v27  ;;  %14381 = vmatmul.mubr.msk.bf16.gmra.mrb[28].mxu1 %vm4984_vm2, %v3442_v21  ;;  %v7319_v40 = vrot.slane %v7305_v59, %v16143_v6  ;;  %v18930_v44 = vrot.slane %v2849_v55, %v16143_v6  ;;  %v15237_v62 = vld.sshfl [vmem:[#allocation10 + $0x148] sm:$0x13 pattern:$0x75316420]  ;;  %v21371_v27 = vld [vmem:[#allocation243_spill] sm:$0xff]  ;;  %v21372_v55 = vld [vmem:[#allocation62_spill] sm:$0xff] }
 0x328   :  { %v7304_v45 = vcombine.low %v7296_v29, %v7303_v1  ;;  %14384 = vmatprep.mubr.msk.bf16.mxu1 %vm15726_vm0, %v20947_v18  ;;  %v2850_v43 = vcombine.low %v21370_v14, %v2848_v48  ;;  %v6712_v19 = vcombine.high %v15237_v62, %v15237_v62  ;;  %v7347_v17 = vcombine.low %v18587_v57, %v18596_v58  ;;  %v21373_v1 = vld [vmem:[#allocation128_spill] sm:$0xff] }
 0x329   :  { %v7363_v46 = vcombine.low %v18629_v36, %v21371_v27  ;;  %v3443_v21 = vpack.c.bf16 %v2816_v0, %v2767_v23  ;;  %v7371_v59 = vcombine.low %v18599_v12, %v18604_v33  ;;  %v2917_v5 = vcombine.low %v21373_v1, %v21372_v55  ;;  %v21374_v23 = vld [vmem:[#allocation175_spill] sm:$0xff]  ;;  %v21375_v0 = vld [vmem:[#allocation173_spill] sm:$0xff]  ;;  %v21376_v33 = vld [vmem:[#allocation230_spill] sm:$0xff] }
 0x32a   :  { %v7312_v29 = vrot.slane %v7304_v45, %v16143_v6  ;;  %v2906_v30 = vrot.slane %v2898_v8, %v16143_v6  ;;  %v18946_v48 = vrot.slane %v2899_v39, %v16143_v6  ;;  %v18949_v13 = vrot.slane %v6712_v19, %v16143_v6  ;;  %v21377_v19 = vld [vmem:[#allocation180_spill] sm:$0xff]  ;;  %v21378_v55 = vld [vmem:[#allocation167_spill] sm:$0xff] }
 0x32b   :  { %v7370_v57 = vrot.slane %v7363_v46, %v16143_v6  ;;  %v2864_v36 = vrot.slane %v2850_v43, %v16143_v6  ;;  %v2918_v45 = vcombine.low %v21375_v0, %v21374_v23  ;;  %v2939_v12 = vrot.slane %v2917_v5, %v16143_v6  ;;  %v21380_v1 = vld [vmem:[#allocation183_spill] sm:$0xff]  ;;  %v21382_v23 = vld [vmem:[#allocation184_spill] sm:$0xff] }
 0x32c   :  { %v7320_v58 = vcombine.low %v7312_v29, %v7319_v40  ;;  %14521 = vmatmul.mubr.msk.bf16.gmra.mrb[44].mxu0 %vm4984_vm2, %v7479_v63  ;;  %v7338_v8 = vcombine.low %v21376_v33, %v18949_v13  ;;  %v7379_v62 = vrot.slane %v7371_v59, %v16143_v6  ;;  %v2947_v46 = vcombine.low %v21378_v55, %v21377_v19  ;;  %v21379_v29 = vld [vmem:[#allocation182_spill] sm:$0xff]  ;;  %v21381_v63 = vld [vmem:[#allocation71_spill] sm:$0xff]  ;;  %v21395_v31 = vld [vmem:[#allocation204_spill] sm:$0xff] }
 0x32d   :  { %v7372_v39 = vcombine.low %v18607_v24, %v7370_v57  ;;  %14524 = vmatprep.mubr.msk.bf16.mxu0 %vm15726_vm0, %v20947_v18  ;;  %v2946_v43 = vrot.slane %v2918_v45, %v16143_v6  ;;  %v2996_v5 = vcombine.low %v21380_v1, %v21379_v29  ;;  %v2997_v0 = vcombine.low %v21382_v23, %v21381_v63  ;;  %v15238_v45 = vld.sshfl [vmem:[#allocation10 + $0x160] sm:$0x13 pattern:$0x75316420]  ;;  %v21394_v29 = vld [vmem:[#allocation194_spill] sm:$0xff] }
 0x32e   :  { %v7480_v40 = vpack.c.bf16 %v7337_v56, %v7320_v58  ;;  %v2914_v50 = vcombine.low %v2906_v30, %v18946_v48  ;;  %v7345_v24 = vrot.slane %v7338_v8, %v16143_v6  ;;  %v2865_v57 = vcombine.low %v18930_v44, %v2864_v36  ;;  %v21383_v55 = vld [vmem:[#allocation171_spill] sm:$0xff]  ;;  %v15239_v8 = vld.sshfl [vmem:[#allocation10 + $0x178] sm:$0x13 pattern:$0x75316420] }
 0x32f   :  { %v7386_v59 = vrot.slane %v7372_v39, %v16143_v6  ;;  %14385 = vmatmul.mubr.msk.bf16.gmra.mrb[32].mxu1 %vm4984_vm2, %v3443_v21  ;;  %v7361_v56 = vrot.slane %v7347_v17, %v16143_v6  ;;  %v2948_v58 = vcombine.low %v2939_v12, %v2946_v43  ;;  %v6720_v19 = vcombine.high %v15238_v45, %v15238_v45  ;;  %v21386_v45 = vld [vmem:[#allocation250_spill] sm:$0xff] }
 0x330   :  { %14388 = vmatprep.mubr.msk.bf16.mxu1 %vm15726_vm0, %v20947_v18  ;;  %v7346_v1 = vcombine.low %v7345_v24, %v21383_v55  ;;  %v18980_v30 = vrot.slane %v2947_v46, %v16143_v6  ;;  %v6728_v39 = vcombine.high %v15239_v8, %v15239_v8  ;;  %v3004_v36 = vrot.slane %v2996_v5, %v16143_v6  ;;  %v21385_v46 = vld [vmem:[#allocation186_spill] sm:$0xff] }
 0x331   :  { %v7387_v63 = vcombine.low %v7379_v62, %v7386_v59  ;;  %v2962_v21 = vrot.slane %v2948_v58, %v16143_v6  ;;  %v18985_v17 = vrot.slane %v2997_v0, %v16143_v6  ;;  %v18988_v12 = vrot.slane %v6720_v19, %v16143_v6  ;;  %v21384_v62 = vld [vmem:[#allocation188_spill] sm:$0xff]  ;;  %v21387_v19 = vld [vmem:[#allocation255_spill] sm:$0xff] }
 0x332   :  { %v7354_v43 = vrot.slane %v7346_v1, %v16143_v6  ;;  %v18992_v23 = vrot.slane %v6728_v39, %v16143_v6  ;;  %v3015_v24 = vcombine.low %v21385_v46, %v21384_v62  ;;  %v3444_v59 = vpack.c.bf16 %v2914_v50, %v2865_v57  ;;  %v21390_v62 = vld [vmem:[#allocation196_spill] sm:$0xff]  ;;  %v21391_v46 = vld [vmem:[#allocation195_spill] sm:$0xff] }
 0x333   :  { %v7388_v58 = vcombine.low %v18988_v12, %v21386_v45  ;;  %v7397_v5 = vcombine.low %v18658_v26, %v18671_v16  ;;  %v7421_v1 = vcombine.low %v18677_v2, %v18680_v15  ;;  %v2963_v50 = vcombine.low %v18980_v30, %v2962_v21  ;;  %v21388_v16 = vld [vmem:[#allocation191_spill] sm:$0xff]  ;;  %v21392_v15 = vld [vmem:[#allocation198_spill] sm:$0xff] }
 0x334   :  { %14525 = vmatmul.mubr.msk.bf16.gmra.mrb[48].mxu0 %vm4984_vm2, %v7480_v40  ;;  %v7362_v0 = vcombine.low %v7354_v43, %v7361_v56  ;;  %v7413_v55 = vcombine.low %v21387_v19, %v18992_v23  ;;  %v3037_v8 = vrot.slane %v3015_v24, %v16143_v6  ;;  %v3012_v57 = vcombine.low %v3004_v36, %v18985_v17  ;;  %v21389_v40 = vld [vmem:[#allocation74_spill] sm:$0xff]  ;;  %v21393_v24 = vld [vmem:[#allocation197_spill] sm:$0xff] }
 0x335   :  { %14528 = vmatprep.mubr.msk.bf16.mxu0 %vm15726_vm0, %v20947_v18  ;;  %v7395_v26 = vrot.slane %v7388_v58, %v16143_v6  ;;  %v3045_v56 = vcombine.low %v21389_v40, %v21388_v16  ;;  %v3094_v2 = vcombine.low %v21391_v46, %v21390_v62  ;;  %v3095_v45 = vcombine.low %v21393_v24, %v21392_v15  ;;  %v21396_v58 = vld [vmem:[#allocation155_spill] sm:$0xff]  ;;  %v21398_v16 = vld [vmem:[#allocation206_spill] sm:$0xff]  ;;  %v21402_v62 = vld [vmem:[#allocation212_spill] sm:$0xff] }
 0x336   :  { %v7481_v39 = vpack.c.bf16 %v7387_v63, %v7362_v0  ;;  %v7420_v43 = vrot.slane %v7413_v55, %v16143_v6  ;;  %v3046_v36 = vcombine.low %v3037_v8, %v21394_v29  ;;  %v3112_v14 = vcombine.low %v21396_v58, %v21395_v31  ;;  %v21404_v15 = vld [vmem:[#allocation216_spill] sm:$0xff]  ;;  %v21406_v58 = vld [vmem:[#allocation199_spill] sm:$0xff] }
 0x337   :  { %14389 = vmatmul.mubr.msk.bf16.gmra.mrb[36].mxu1 %vm4984_vm2, %v3444_v59  ;;  %v7396_v21 = vcombine.low %v7395_v26, %v18655_v47  ;;  %v3113_v63 = vcombine.low %v21398_v16, %v21397_v4  ;;  %v7411_v0 = vrot.slane %v7397_v5, %v16143_v6  ;;  %v7429_v40 = vrot.slane %v7421_v1, %v16143_v6  ;;  %v21399_v1 = vld [vmem:[#allocation76_spill] sm:$0xff] }
 0x338   :  { %14392 = vmatprep.mubr.msk.bf16.mxu1 %vm15726_vm0, %v20947_v18  ;;  %v7422_v55 = vcombine.low %v18684_v22, %v7420_v43  ;;  %v3445_v59 = vpack.c.bf16 %v3012_v57, %v2963_v50  ;;  %v19033_v8 = vrot.slane %v3045_v56, %v16143_v6  ;;  %v3128_v31 = vrot.slane %v3112_v14, %v16143_v6  ;;  %v19047_v43 = vpop.f32.mrb[0].mxu1  ;;  %v21401_v14 = vld [vmem:[#allocation215_spill] sm:$0xff] }
 0x339   :  { %v7404_v47 = vrot.slane %v7396_v21, %v16143_v6  ;;  %v3135_v4 = vrot.slane %v3113_v63, %v16143_v6  ;;  %v3060_v26 = vrot.slane %v3046_v36, %v16143_v6  ;;  %v19039_v5 = vrot.slane %v3094_v2, %v16143_v6  ;;  %21400 = vst [vmem:[#allocation189_spill] sm:$0xff] %v19047_v43  ;;  %v21403_v2 = vld [vmem:[#allocation217_spill] sm:$0xff]  ;;  %v14292_v36 = vpop.f32.mrb[1].mxu1  ;;  %v21407_v63 = vld [vmem:[#allocation214_spill] sm:$0xff] }
 0x33a   :  { %v7436_v29 = vrot.slane %v7422_v55, %v16143_v6  ;;  %v19042_v22 = vrot.slane %v3095_v45, %v16143_v6  ;;  %v7717_v50 = vcombine.high %v21399_v1, %v21399_v1  ;;  %v3192_v46 = vcombine.low %v21402_v62, %v21401_v14  ;;  %v21405_v45 = vld [vmem:[#allocation127_spill] sm:$0xff] }
 0x33b   :  { %v7412_v57 = vcombine.low %v7404_v47, %v7411_v0  ;;  %v3193_v24 = vcombine.low %v21404_v15, %v21403_v2  ;;  %v3143_v16 = vcombine.low %v21406_v58, %v3128_v31  ;;  %v21408_v0 = vld [vmem:[#allocation225_spill] sm:$0xff]  ;;  %v21409_v55 = vld [vmem:[#allocation223_spill] sm:$0xff]  ;;  %v19060_v47 = vpop.f32.mrb[2].mxu1  ;;  %v21411_v31 = vld [vmem:[#allocation80_spill] sm:$0xff] }
 0x33c   :  { %14529 = vmatmul.mubr.msk.bf16.gmra.mrb[52].mxu0 %vm4984_vm2, %v7481_v39  ;;  %v7437_v56 = vcombine.low %v7429_v40, %v7436_v29  ;;  %v7767_v21 = vcombine.low %v21405_v45, %v7717_v50  ;;  %v3144_v39 = vcombine.low %v3135_v4, %v21407_v63  ;;  %v3210_v40 = vcombine.low %v21409_v55, %v21408_v0  ;;  %v14293_v50 = vpop.f32.mrb[3].mxu1  ;;  %v21414_v63 = vld [vmem:[#allocation79_spill] sm:$0xff]  ;;  %v21415_v0 = vld [vmem:[#allocation53_spill] sm:$0xff] }
 0x33d   :  { %14532 = vmatprep.mubr.msk.bf16.mxu0 %vm15726_vm0, %v20947_v18  ;;  %21410 = vst [vmem:[#allocation192_spill] sm:$0xff] %v19060_v47  ;;  %v3061_v29 = vcombine.low %v19033_v8, %v3060_v26  ;;  %v3110_v1 = vcombine.low %v19039_v5, %v19042_v22  ;;  %v7718_v4 = vcombine.high %v21411_v31, %v21411_v31  ;;  %v19071_v2 = vpop.f32.mrb[4].mxu1  ;;  %v21416_v50 = vld [vmem:[#allocation64_spill] sm:$0xff]  ;;  %v21418_v47 = vld [vmem:[#allocation65_spill] sm:$0xff] }
 0x33e   :  { %v7774_v14 = vrot.slane %v7767_v21, %v16143_v6  ;;  %v7482_v62 = vpack.c.bf16 %v7437_v56, %v7412_v57  ;;  %21412 = vst [vmem:[#allocation72_spill] sm:$0xff] %v19071_v2  ;;  %v19074_v15 = vrot.slane %v3192_v46, %v16143_v6  ;;  %v14296_v26 = vpop.f32.mrb[5].mxu1  ;;  %v3151_v45 = vrot.slane %v3143_v16, %v16143_v6 }
 0x33f   :  { %14393 = vmatmul.mubr.msk.bf16.gmra.mrb[40].mxu1 %vm4984_vm2, %v3445_v59  ;;  %v19077_v59 = vrot.slane %v3193_v24, %v16143_v6  ;;  %v3158_v21 = vrot.slane %v3144_v39, %v16143_v6  ;;  %v3226_v57 = vrot.slane %v3210_v40, %v16143_v6  ;;  %v19082_v56 = vpop.f32.mrb[6].mxu1  ;;  %v3446_v36 = vpack.c.bf16 %v3110_v1, %v3061_v29  ;;  %v21417_v24 = vld [vmem:[#allocation113_spill] sm:$0xff]  ;;  %v21421_v29 = vld [vmem:[#allocation232_spill] sm:$0xff] }
 0x340   :  { %14396 = vmatprep.mubr.msk.bf16.mxu1 %vm15726_vm0, %v20947_v18  ;;  %21413 = vst [vmem:[#allocation178_spill] sm:$0xff] %v19082_v56  ;;  %v7775_v55 = vcombine.low %v21415_v0, %v21414_v63  ;;  %v7776_v2 = vcombine.low %v7774_v14, %v21416_v50  ;;  %v14297_v46 = vpop.f32.mrb[7].mxu1  ;;  %v7793_v26 = vcombine.low %v21411_v31, %v21417_v24  ;;  %v21420_v40 = vld [vmem:[#allocation233_spill] sm:$0xff]  ;;  %v21422_v0 = vld [vmem:[#allocation218_spill] sm:$0xff]  ;;  %v21423_v50 = vld [vmem:[#allocation235_spill] sm:$0xff] }
 0x341   :  { %v7794_v16 = vcombine.low %v7718_v4, %v21418_v47  ;;  %v19091_v43 = vpop.f32.mrb[8].mxu1  ;;  %v3208_v39 = vcombine.low %v19074_v15, %v19077_v59  ;;  %v3242_v1 = vcombine.low %v21421_v29, %v21420_v40  ;;  %v3159_v63 = vcombine.low %v3151_v45, %v3158_v21  ;;  %v21424_v46 = vld [vmem:[#allocation234_spill] sm:$0xff]  ;;  %v21425_v24 = vld [vmem:[#allocation107_spill] sm:$0xff]  ;;  %v21426_v47 = vld [vmem:[#allocation236_spill] sm:$0xff] }
 0x342   :  { %21419 = vst [vmem:[#allocation70_spill] sm:$0xff] %v19091_v43  ;;  %v14300_v14 = vpop.f32.mrb[9].mxu1  ;;  %v3290_v31 = vcombine.low %v21424_v46, %v21423_v50  ;;  %v3291_v4 = vcombine.low %v21426_v47, %v21425_v24  ;;  %v7783_v56 = vrot.slane %v7775_v55, %v16143_v6  ;;  %v7790_v54 = vrot.slane %v7776_v2, %v16143_v6  ;;  %v21429_v29 = vld [vmem:[#allocation63_spill] sm:$0xff]  ;;  %v21430_v45 = vld [vmem:[#allocation249_spill] sm:$0xff]  ;;  %v21431_v21 = vld [vmem:[#allocation246_spill] sm:$0xff] }
 0x343   :  { %v19104_v43 = vpop.f32.mrb[10].mxu1  ;;  %v3307_v14 = vcombine.low %v21429_v29, %v21428_v3  ;;  %v7801_v50 = vrot.slane %v7793_v26, %v16143_v6  ;;  %v7808_v46 = vrot.slane %v7794_v16, %v16143_v6  ;;  %v21432_v24 = vld [vmem:[#allocation82_spill] sm:$0xff]  ;;  %v21434_v2 = vld [vmem:[#allocation56_spill] sm:$0xff]  ;;  %v21435_v47 = vld [vmem:[#allocation55_spill] sm:$0xff] }
 0x344   :  { %14533 = vmatmul.mubr.msk.bf16.gmra.mrb[56].mxu0 %vm4984_vm2, %v7482_v62  ;;  %v3241_v62 = vcombine.low %v21422_v0, %v3226_v57  ;;  %21427 = vst [vmem:[#allocation201_spill] sm:$0xff] %v19104_v43  ;;  %v3308_v57 = vcombine.low %v21431_v21, %v21430_v45  ;;  %v14301_v61 = vpop.f32.mrb[11].mxu1  ;;  %v7766_v43 = vcombine.low %v21435_v47, %v21434_v2  ;;  %v21437_v47 = vld [vmem:[#allocation52_spill] sm:$0xff] }
 0x345   :  { %14538 = vmatprep.mubr.msk.bf16.mxu0 %vm15726_vm0, %v20947_v18  ;;  %v19119_v55 = vpop.f32.mrb[12].mxu1  ;;  %v3256_v61 = vrot.slane %v3242_v1, %v16143_v6  ;;  %v19126_v45 = vrot.slane %v3290_v31, %v16143_v6  ;;  %v19129_v26 = vrot.slane %v3291_v4, %v16143_v6  ;;  %v3447_v21 = vpack.c.bf16 %v3208_v39, %v3159_v63  ;;  %v21442_v39 = vld [vmem:[#allocation256_spill] sm:$0xff] }
 0x346   :  { %21433 = vst [vmem:[#allocation85_spill] sm:$0xff] %v19119_v55  ;;  %v14304_v3 = vpop.f32.mrb[13].mxu1  ;;  %v3249_v29 = vrot.slane %v3241_v62, %v16143_v6  ;;  %v3317_v55 = vrot.slane %v3307_v14, %v16143_v6  ;;  %v3324_v9 = vrot.slane %v3308_v57, %v16143_v6  ;;  %v21438_v62 = vld [vmem:[#allocation81_spill] sm:$0xff]  ;;  %v21443_v14 = vld [vmem:[#allocation258_spill] sm:$0xff] }
 0x347   :  { %14397 = vmatmul.mubr.msk.bf16.gmra.mrb[44].mxu1 %vm4984_vm2, %v3446_v36  ;;  %v7719_v36 = vcombine.high %v21432_v24, %v21432_v24  ;;  %v19131_v16 = vpop.f32.mrb[14].mxu1  ;;  %v7791_v24 = vcombine.low %v7783_v56, %v7790_v54  ;;  %v7809_v1 = vcombine.low %v21438_v62, %v7801_v50  ;;  %v21439_v3 = vld [vmem:[#allocation75_spill] sm:$0xff]  ;;  %v3306_v54 = vcombine.low %v19126_v45, %v19129_v26  ;;  %v21441_v56 = vld [vmem:[#allocation254_spill] sm:$0xff]  ;;  %v21444_v57 = vld [vmem:[#allocation257_spill] sm:$0xff] }
 0x348   :  { %14400 = vmatprep.mubr.msk.bf16.mxu1 %vm15726_vm0, %v20947_v18  ;;  %21436 = vst [vmem:[#allocation203_spill] sm:$0xff] %v19131_v16  ;;  %v14305_v2 = vpop.f32.mrb[15].mxu1  ;;  %v7810_v31 = vcombine.low %v7808_v46, %v21439_v3  ;;  %v3257_v4 = vcombine.low %v3249_v29, %v3256_v61  ;;  %v3340_v63 = vcombine.low %v21442_v39, %v21441_v56  ;;  %v21445_v46 = vld [vmem:[#allocation260_spill] sm:$0xff]  ;;  %v21446_v62 = vld [vmem:[#allocation259_spill] sm:$0xff] }
 0x349   :  { %v7827_v25 = vcombine.low %v21440_v53, %v7719_v36  ;;  %v3388_v2 = vcombine.low %v21444_v57, %v21443_v14  ;;  %v8209_v50 = vpack.c.bf16 %v7791_v24, %v7766_v43  ;;  %v3389_v53 = vcombine.low %v21446_v62, %v21445_v46  ;;  %v21447_v36 = vld [vmem:[#allocation86_spill] sm:$0xff]  ;;  %v21448_v57 = vld [vmem:[#allocation157_spill] sm:$0xff]  ;;  %v21451_v62 = vld [vmem:[#allocation68_spill] sm:$0xff] }
 0x34a   :  { %v7720_v3 = vcombine.high %v21447_v36, %v21447_v36  ;;  %v7817_v29 = vrot.slane %v7809_v1, %v16143_v6  ;;  %v7824_v61 = vrot.slane %v7810_v31, %v16143_v6  ;;  %v3448_v43 = vpack.c.bf16 %v3306_v54, %v3257_v4  ;;  %v21449_v31 = vld [vmem:[#allocation84_spill] sm:$0xff] }
 0x34b   :  { %v7834_v39 = vrot.slane %v7827_v25, %v16143_v6  ;;  %v19166_v14 = vrot.slane %v3389_v53, %v16143_v6  ;;  %v7853_v1 = vcombine.low %v21447_v36, %v21448_v57  ;;  %v21450_v25 = vld [vmem:[#allocation69_spill] sm:$0xff]  ;;  %v21454_v53 = vld [vmem:[#allocation100_spill] sm:$0xff]  ;;  %v7989_v36 = vcombine.low %v18891_v37, %v18930_v44 }
 0x34c   :  { %14539 = vmatmul.mubr.msk.bf16.vlgmr.msra.gmra.mrb[0].mxu0 %vm4984_vm2, %v21437_v47  ;;  %v3339_v47 = vcombine.low %v3317_v55, %v3324_v9  ;;  %v3354_v9 = vrot.slane %v3340_v63, %v16143_v6  ;;  %v19162_v55 = vrot.slane %v3388_v2, %v16143_v6  ;;  %v7854_v46 = vcombine.low %v7720_v3, %v21449_v31  ;;  %v21452_v63 = vld [vmem:[#allocation83_spill] sm:$0xff] }
 0x34d   :  { %14542 = vmatprep.mubr.msk.bf16.mxu0 %vm15726_vm0, %v20947_v18  ;;  %v7792_v4 = vcombine.low %v21451_v62, %v21450_v25  ;;  %v7825_v54 = vcombine.low %v7817_v29, %v7824_v61  ;;  %v21453_v2 = vld [vmem:[#allocation91_spill] sm:$0xff]  ;;  %v7721_v16 = vcombine.high %v21454_v53, %v21454_v53  ;;  %v7861_v29 = vrot.slane %v7853_v1, %v16143_v6  ;;  %v21457_v62 = vld [vmem:[#allocation78_spill] sm:$0xff] }
 0x34e   :  { %v3347_v24 = vrot.slane %v3339_v47, %v16143_v6  ;;  %v7844_v47 = vcombine.low %v21298_v49, %v21453_v2  ;;  %v3404_v3 = vcombine.low %v19162_v55, %v19166_v14  ;;  %v7868_v61 = vrot.slane %v7854_v46, %v16143_v6 }
 0x34f   :  { %14401 = vmatmul.mubr.msk.bf16.gmra.mrb[48].mxu1 %vm4984_vm2, %v3447_v21  ;;  %v7835_v21 = vcombine.low %v21452_v63, %v7834_v39  ;;  %v8210_v39 = vpack.c.bf16 %v7825_v54, %v7792_v4  ;;  %v8015_v57 = vcombine.low %v18946_v48, %v18980_v30  ;;  %v8049_v1 = vcombine.low %v18985_v17, %v19033_v8  ;;  %v21458_v4 = vld [vmem:[#allocation77_spill] sm:$0xff] }
 0x350   :  { %14404 = vmatprep.mubr.msk.bf16.mxu1 %vm15726_vm0, %v20947_v18  ;;  %v7851_v31 = vrot.slane %v7844_v47, %v16143_v6  ;;  %v7826_v54 = vcombine.low %v21458_v4, %v21457_v62  ;;  %v7869_v63 = vcombine.low %v7861_v29, %v7868_v61  ;;  %v7727_v2 = vcombine.high %v21349_v7, %v21349_v7  ;;  %v21459_v47 = vld [vmem:[#allocation219_spill] sm:$0xff]  ;;  %v21463_v62 = vld [vmem:[#allocation237_spill] sm:$0xff]  ;;  %v21464_v4 = vld [vmem:[#allocation112_spill] sm:$0xff] }
 0x351   :  { %v7842_v49 = vrot.slane %v7835_v21, %v16143_v6 }
 0x352   :  { %v7852_v53 = vcombine.low %v21295_v52, %v7851_v31  ;;  %v7876_v52 = vrot.slane %v7869_v63, %v16143_v6  ;;  %v7723_v31 = vcombine.high %v21294_v10, %v21294_v10  ;;  %v7729_v10 = vcombine.high %v21376_v33, %v21376_v33 }
 0x353   :  { %v7843_v21 = vcombine.low %v7842_v49, %v21296_v34  ;;  %v8076_v34 = vcombine.low %v21355_v35, %v18897_v32  ;;  %v21462_v49 = vld [vmem:[#allocation205_spill] sm:$0xff] }
 0x354   :  { %14543 = vmatmul.mubr.msk.bf16.gmra.mrb[4].mxu0 %vm4984_vm2, %v8209_v50  ;;  %v3355_v50 = vcombine.low %v3347_v24, %v3354_v9  ;;  %v21456_v24 = vld [vmem:[#allocation106_spill] sm:$0xff] }
 0x355   :  { %14546 = vmatprep.mubr.msk.bf16.mxu0 %vm15726_vm0, %v20947_v18  ;;  %v7878_v25 = vcombine.low %v21311_v20, %v21456_v24  ;;  %v7728_v20 = vcombine.high %v21355_v35, %v21355_v35  ;;  %v8084_v35 = vrot.slane %v8076_v34, %v16143_v6  ;;  %v8211_v32 = vpack.c.bf16 %v7843_v21, %v7826_v54  ;;  %v21465_v21 = vld [vmem:[#allocation200_spill] sm:$0xff] }
 0x356   :  { %v3449_v46 = vpack.c.bf16 %v3404_v3, %v3355_v50  ;;  %v21460_v3 = vld [vmem:[#allocation120_spill] sm:$0xff]  ;;  %v8127_v54 = vcombine.low %v21371_v27, %v18988_v12  ;;  %v7731_v34 = vcombine.high %v21387_v19, %v21387_v19 }
 0x357   :  { %14405 = vmatmul.mubr.msk.bf16.gmra.mrb[52].mxu1 %vm4984_vm2, %v3448_v43  ;;  %v21455_v43 = vld [vmem:[#allocation67_spill] sm:$0xff]  ;;  %v7722_v29 = vcombine.high %v21460_v3, %v21460_v3  ;;  %v19218_v7 = vrot.slane %v7878_v25, %v16143_v6 }
 0x358   :  { %14408 = vmatprep.mubr.msk.bf16.mxu1 %vm15726_vm0, %v20947_v18  ;;  %v7887_v9 = vcombine.low %v21455_v43, %v7721_v16  ;;  %v8067_v16 = vcombine.low %v21406_v58, %v21459_v47  ;;  %v21461_v58 = vld [vmem:[#allocation61_spill] sm:$0xff]  ;;  %v8077_v43 = vcombine.low %v7728_v20, %v21462_v49  ;;  %v7877_v20 = vcombine.low %v7876_v52, %v18748_v60 }
 0x359   :  { %v7904_v61 = vcombine.low %v21460_v3, %v21461_v58  ;;  %v7921_v63 = vcombine.low %v7722_v29, %v21464_v4  ;;  %v8134_v3 = vrot.slane %v8127_v54, %v16143_v6  ;;  %v21467_v58 = vld [vmem:[#allocation245_spill] sm:$0xff]  ;;  %v8161_v52 = vcombine.low %v18992_v23, %v7731_v34  ;;  %v21469_v4 = vld [vmem:[#allocation174_spill] sm:$0xff] }
 0x35a   :  { %v7894_v50 = vrot.slane %v7887_v9, %v16143_v6  ;;  %v8074_v9 = vrot.slane %v8067_v16, %v16143_v6  ;;  %v8091_v25 = vrot.slane %v8077_v43, %v16143_v6  ;;  %v21476_v34 = vld [vmem:[#allocation141_spill] sm:$0xff] }
 0x35b   :  { %v7911_v60 = vrot.slane %v7904_v61, %v16143_v6  ;;  %v7928_v49 = vrot.slane %v7921_v63, %v16143_v6  ;;  %v7938_v63 = vcombine.low %v21469_v4, %v7723_v31  ;;  %v21484_v4 = vld [vmem:[#allocation181_spill] sm:$0xff] }
 0x35c   :  { %14547 = vmatmul.mubr.msk.bf16.gmra.mrb[8].mxu0 %vm4984_vm2, %v8210_v39  ;;  %v8050_v39 = vcombine.low %v18853_v11, %v7727_v2  ;;  %v8101_v11 = vcombine.low %v21422_v0, %v21463_v62  ;;  %v8092_v47 = vcombine.low %v8084_v35, %v8091_v25  ;;  %v7730_v0 = vcombine.high %v21371_v27, %v21371_v27 }
 0x35d   :  { %14550 = vmatprep.mubr.msk.bf16.mxu0 %vm15726_vm0, %v20947_v18  ;;  %v8168_v62 = vrot.slane %v8161_v52, %v16143_v6  ;;  %v7945_v31 = vrot.slane %v7938_v63, %v16143_v6  ;;  %v21479_v52 = vld [vmem:[#allocation151_spill] sm:$0xff]  ;;  %v7726_v63 = vcombine.high %v21484_v4, %v21484_v4 }
 0x35e   :  { %v8057_v24 = vrot.slane %v8050_v39, %v16143_v6  ;;  %v8108_v16 = vrot.slane %v8101_v11, %v16143_v6  ;;  %v8099_v12 = vrot.slane %v8092_v47, %v16143_v6  ;;  %v8144_v39 = vcombine.low %v7730_v0, %v21467_v58  ;;  %v21468_v11 = vld [vmem:[#allocation130_spill] sm:$0xff] }
 0x35f   :  { %14409 = vmatmul.mubr.msk.bf16.gmra.mrb[56].mxu1 %vm4984_vm2, %v3449_v46  ;;  %v7895_v46 = vcombine.low %v7894_v50, %v21309_v51  ;;  %v8075_v51 = vcombine.low %v19042_v22, %v8074_v9  ;;  %v8110_v50 = vcombine.low %v18949_v13, %v7729_v10  ;;  %v21466_v13 = vld [vmem:[#allocation238_spill] sm:$0xff] }
 0x360   :  { %14602 = vmatprep.mubr.msk.bf16.mxu1 %vm15726_vm0, %v20947_v18  ;;  %v8058_v2 = vcombine.low %v21465_v21, %v8057_v24  ;;  %v8109_v29 = vcombine.low %v19077_v59, %v8108_v16  ;;  %v8135_v22 = vcombine.low %v21466_v13, %v8134_v3  ;;  %v8100_v59 = vcombine.low %v8099_v12, %v19074_v15  ;;  %v21470_v21 = vld [vmem:[#allocation123_spill] sm:$0xff]  ;;  %v21472_v16 = vld [vmem:[#allocation142_spill] sm:$0xff] }
 0x361   :  { %v8117_v27 = vrot.slane %v8110_v50, %v16143_v6  ;;  %v7902_v19 = vrot.slane %v7895_v46, %v16143_v6  ;;  %v8151_v35 = vrot.slane %v8144_v39, %v16143_v6  ;;  %v8169_v46 = vcombine.low %v21468_v11, %v8168_v62  ;;  %v21473_v3 = vld [vmem:[#allocation179_spill] sm:$0xff]  ;;  %v21482_v62 = vld [vmem:[#allocation176_spill] sm:$0xff] }
 0x362   :  { %v8065_v33 = vrot.slane %v8058_v2, %v16143_v6  ;;  %v8142_v61 = vrot.slane %v8135_v22, %v16143_v6  ;;  %v19272_v25 = vpack.c.bf16 %v8109_v29, %v8100_v59  ;;  %v7912_v2 = vcombine.low %v21470_v21, %v7911_v60  ;;  %v21475_v12 = vld [vmem:[#allocation187_spill] sm:$0xff] }
 0x363   :  { %v8118_v9 = vcombine.low %v8117_v27, %v21420_v40  ;;  %v8152_v23 = vcombine.low %v8151_v35, %v21441_v56  ;;  %v7886_v40 = vcombine.low %v18751_v28, %v19218_v7  ;;  %v7903_v54 = vcombine.low %v7902_v19, %v18782_v41  ;;  %v21477_v27 = vld [vmem:[#allocation144_spill] sm:$0xff]  ;;  %v21480_v19 = vld [vmem:[#allocation149_spill] sm:$0xff] }
 0x364   :  { %14551 = vmatmul.mubr.msk.bf16.gmra.mrb[12].mxu0 %vm4984_vm2, %v8211_v32  ;;  %v8066_v43 = vcombine.low %v8065_v33, %v19039_v5  ;;  %v8212_v32 = vpack.c.bf16 %v7877_v20, %v7852_v53  ;;  %v8143_v15 = vcombine.low %v19129_v26, %v8142_v61  ;;  %v21471_v26 = vld [vmem:[#allocation122_spill] sm:$0xff]  ;;  %v8176_v56 = vrot.slane %v8169_v46, %v16143_v6 }
 0x365   :  { %14554 = vmatprep.mubr.msk.bf16.mxu0 %vm15726_vm0, %v20947_v18  ;;  %v8125_v5 = vrot.slane %v8118_v9, %v16143_v6  ;;  %v8159_v10 = vrot.slane %v8152_v23, %v16143_v6  ;;  %v7929_v47 = vcombine.low %v7928_v49, %v21471_v26  ;;  %v7724_v41 = vcombine.high %v21472_v16, %v21472_v16  ;;  %v21481_v61 = vld [vmem:[#allocation190_spill] sm:$0xff] }
 0x366   :  { %v19270_v24 = vpack.c.bf16 %v8075_v51, %v8066_v43  ;;  %v8213_v0 = vpack.c.bf16 %v7903_v54, %v7886_v40  ;;  %v7919_v20 = vrot.slane %v7912_v2, %v16143_v6  ;;  %v7946_v60 = vcombine.low %v21476_v34, %v7945_v31  ;;  %v21478_v43 = vld [vmem:[#allocation168_spill] sm:$0xff]  ;;  %v21487_v2 = vld [vmem:[#allocation169_spill] sm:$0xff] }
 0x367   :  { %v8126_v53 = vcombine.low %v8125_v5, %v19126_v45  ;;  %v19292_v7 = vcombine.low %v8159_v10, %v19162_v55  ;;  %v19295_v45 = vcombine.low %v19166_v14, %v8176_v56  ;;  %v7936_v51 = vrot.slane %v7929_v47, %v16143_v6  ;;  %v21474_v14 = vld [vmem:[#allocation66_spill] sm:$0xff]  ;;  %v21486_v10 = vld [vmem:[#allocation164_spill] sm:$0xff]  ;;  %v21488_v47 = vld [vmem:[#allocation73_spill] sm:$0xff] }
 0x368   :  { %v7956_v55 = vcombine.low %v21472_v16, %v21473_v3  ;;  %v7920_v33 = vcombine.low %v21474_v14, %v7919_v20  ;;  %v7957_v13 = vcombine.low %v7724_v41, %v21477_v27  ;;  %v7953_v39 = vrot.slane %v7946_v60, %v16143_v6  ;;  %v21490_v20 = vld [vmem:[#allocation185_spill] sm:$0xff]  ;;  %v21491_v3 = vld [vmem:[#allocation182_spill] sm:$0xff] }
 0x369   :  { %v8221_v28 = vpack.c.bf16 %v8143_v15, %v8126_v53  ;;  %v8222_v50 = vpack.c.bf16 %v19295_v45, %v19292_v7  ;;  %v7937_v29 = vcombine.low %v7936_v51, %v21475_v12  ;;  %v7725_v59 = vcombine.high %v21478_v43, %v21478_v43  ;;  %v21485_v53 = vld [vmem:[#allocation57_spill] sm:$0xff] }
 0x36a   :  { %v7964_v22 = vrot.slane %v7956_v55, %v16143_v6  ;;  %v7971_v49 = vrot.slane %v7957_v13, %v16143_v6  ;;  %v7972_v9 = vcombine.low %v21480_v19, %v21479_v52  ;;  %v7954_v35 = vcombine.low %v21481_v61, %v7953_v39 }
 0x36b   :  { %v8214_v58 = vpack.c.bf16 %v7937_v29, %v7920_v33  ;;  %v7990_v5 = vcombine.low %v21482_v62, %v7725_v59  ;;  %v21483_v23 = vcombine.low %v18845_v42, %v18883_v38  ;;  %v7998_v54 = vcombine.low %v21486_v10, %v21485_v53  ;;  %v21489_v42 = vld [vmem:[#allocation172_spill] sm:$0xff] }
 0x36c   :  { %14555 = vmatmul.mubr.msk.bf16.gmra.mrb[16].mxu0 %vm4984_vm2, %v8212_v32  ;;  %v7973_v32 = vcombine.low %v7964_v22, %v7971_v49  ;;  %v7980_v15 = vrot.slane %v7972_v9, %v16143_v6  ;;  %v8016_v56 = vcombine.low %v21484_v4, %v21488_v47  ;;  %v8017_v38 = vcombine.low %v7726_v63, %v21489_v42 }
 0x36d   :  { %14558 = vmatprep.mubr.msk.bf16.mxu0 %vm15726_vm0, %v20947_v18  ;;  %v8215_v11 = vpack.c.bf16 %v21483_v23, %v7954_v35  ;;  %v7997_v40 = vrot.slane %v7990_v5, %v16143_v6  ;;  %v8006_v7 = vrot.slane %v7998_v54, %v16143_v6  ;;  %v21493_v54 = vld [vmem:[#allocation192_spill] sm:$0xff] }
 0x36e   :  { %v7987_v46 = vrot.slane %v7973_v32, %v16143_v6  ;;  %v8024_v16 = vrot.slane %v8016_v56, %v16143_v6  ;;  %v8031_v41 = vrot.slane %v8017_v38, %v16143_v6 }
 0x36f   :  { %v7999_v26 = vcombine.low %v7997_v40, %v21487_v2 }
 0x370   :  { %v7988_v21 = vcombine.low %v7980_v15, %v7987_v46  ;;  %v8032_v51 = vcombine.low %v21490_v20, %v8024_v16  ;;  %v8033_v55 = vcombine.low %v8031_v41, %v21491_v3  ;;  %v21492_v46 = vld [vmem:[#allocation189_spill] sm:$0xff] }
 0x371   :  { %v8013_v31 = vrot.slane %v7999_v26, %v16143_v6 }
 0x372   :  { %v8216_v45 = vpack.c.bf16 %v7989_v36, %v7988_v21  ;;  %v8040_v44 = vrot.slane %v8032_v51, %v16143_v6  ;;  %v8047_v36 = vrot.slane %v8033_v55, %v16143_v6 }
 0x374   :  { %14559 = vmatmul.mubr.msk.bf16.gmra.mrb[20].mxu0 %vm4984_vm2, %v8213_v0  ;;  %v8014_v0 = vcombine.low %v8006_v7, %v8013_v31  ;;  %v8048_v14 = vcombine.low %v8040_v44, %v8047_v36 }
 0x375   :  { %14562 = vmatprep.mubr.msk.bf16.mxu0 %vm15726_vm0, %v20947_v18 }
 0x376   :  { %v8217_v37 = vpack.c.bf16 %v8015_v57, %v8014_v0  ;;  %v8218_v33 = vpack.c.bf16 %v8049_v1, %v8048_v14 }
 0x37c   :  { %14563 = vmatmul.mubr.msk.bf16.gmra.mrb[24].mxu0 %vm4984_vm2, %v8214_v58 }
 0x37d   :  { %14566 = vmatprep.mubr.msk.bf16.mxu0 %vm15726_vm0, %v20947_v18 }
 0x384   :  { %14567 = vmatmul.mubr.msk.bf16.gmra.mrb[28].mxu0 %vm4984_vm2, %v8215_v11 }
 0x385   :  { %14570 = vmatprep.mubr.msk.bf16.mxu0 %vm15726_vm0, %v20947_v18 }
 0x38c   :  { %14571 = vmatmul.mubr.msk.bf16.gmra.mrb[32].mxu0 %vm4984_vm2, %v8216_v45 }
 0x38d   :  { %14574 = vmatprep.mubr.msk.bf16.mxu0 %vm15726_vm0, %v20947_v18 }
 0x394   :  { %14575 = vmatmul.mubr.msk.bf16.gmra.mrb[36].mxu0 %vm4984_vm2, %v8217_v37 }
 0x395   :  { %14578 = vmatprep.mubr.msk.bf16.mxu0 %vm15726_vm0, %v20947_v18 }
 0x39c   :  { %14579 = vmatmul.mubr.msk.bf16.gmra.mrb[40].mxu0 %vm4984_vm2, %v8218_v33 }
 0x39d   :  { %14582 = vmatprep.mubr.msk.bf16.mxu0 %vm15726_vm0, %v20947_v18 }
 0x3a4   :  { %14583 = vmatmul.mubr.msk.bf16.gmra.mrb[44].mxu0 %vm4984_vm2, %v19270_v24 }
 0x3a5   :  { %14586 = vmatprep.mubr.msk.bf16.mxu0 %vm15726_vm0, %v20947_v18 }
 0x3ac   :  { %14587 = vmatmul.mubr.msk.bf16.gmra.mrb[48].mxu0 %vm4984_vm2, %v19272_v25 }
 0x3ad   :  { %14590 = vmatprep.mubr.msk.bf16.mxu0 %vm15726_vm0, %v20947_v18 }
 0x3b4   :  { %14591 = vmatmul.mubr.msk.bf16.gmra.mrb[52].mxu0 %vm4984_vm2, %v8221_v28 }
 0x3b5   :  { %14594 = vmatprep.mubr.msk.bf16.mxu0 %vm15726_vm0, %v20947_v18 }
 0x3bc   :  { %14595 = vmatmul.mubr.msk.bf16.gmra.mrb[56].mxu0 %vm4984_vm2, %v8222_v50 }
 0x3e2   :  { %v19380_v48 = vpop.f32.mrb[16].mxu1 }
 0x3e3   :  { %v14370_v30 = vpop.f32.mrb[17].mxu1 }
 0x3e4   :  { %v19382_v17 = vpop.f32.mrb[18].mxu1 }
 0x3e5   :  { %v14371_v8 = vpop.f32.mrb[19].mxu1 }
 0x3ea   :  { %v19384_v57 = vpop.f32.mrb[20].mxu1 }
 0x3eb   :  { %v14374_v1 = vpop.f32.mrb[21].mxu1 }
 0x3ec   :  { %v19386_v24 = vpop.f32.mrb[22].mxu1 }
 0x3ed   :  { %v14375_v25 = vpop.f32.mrb[23].mxu1 }
 0x3ee   :  { %v21494_v25 = vld [vmem:[#allocation72_spill] sm:$0xff] }
 0x3f2   :  { %v19388_v12 = vpop.f32.mrb[24].mxu1 }
 0x3f3   :  { %v14378_v28 = vpop.f32.mrb[25].mxu1 }
 0x3f4   :  { %v19390_v29 = vpop.f32.mrb[26].mxu1 }
 0x3f5   :  { %v14379_v34 = vpop.f32.mrb[27].mxu1 }
 0x3fa   :  { %v19392_v60 = vpop.f32.mrb[28].mxu1 }
 0x3fb   :  { %v14382_v50 = vpop.f32.mrb[29].mxu1 }
 0x3fc   :  { %v19394_v27 = vpop.f32.mrb[30].mxu1 }
 0x3fd   :  { %v14383_v13 = vpop.f32.mrb[31].mxu1 }
 0x402   :  { %v19396_v22 = vpop.f32.mrb[32].mxu1 }
 0x403   :  { %v14386_v58 = vpop.f32.mrb[33].mxu1 }
 0x404   :  { %v19398_v39 = vpop.f32.mrb[34].mxu1 }
 0x405   :  { %v14387_v49 = vpop.f32.mrb[35].mxu1 }
 0x40a   :  { %v19400_v43 = vpop.f32.mrb[36].mxu1 }
 0x40b   :  { %v14390_v59 = vpop.f32.mrb[37].mxu1 }
 0x40c   :  { %v19402_v52 = vpop.f32.mrb[38].mxu1 }
 0x40d   :  { %v14391_v19 = vpop.f32.mrb[39].mxu1 }
 0x412   :  { %v19404_v9 = vpop.f32.mrb[40].mxu1 }
 0x413   :  { %v14394_v61 = vpop.f32.mrb[41].mxu1 }
 0x414   :  { %v19406_v35 = vpop.f32.mrb[42].mxu1 }
 0x415   :  { %v14395_v32 = vpop.f32.mrb[43].mxu1 }
 0x41a   :  { %v19408_v62 = vpop.f32.mrb[44].mxu1 }
 0x41b   :  { %v14398_v5 = vpop.f32.mrb[45].mxu1 }
 0x41c   :  { %v19410_v15 = vpop.f32.mrb[46].mxu1 }
 0x41d   :  { %v14399_v23 = vpop.f32.mrb[47].mxu1 }
 0x41f   :  { %v8307_v11 = vpop.f32.mrb[0].mxu0 }
 0x420   :  { %v14780_v40 = vadd.f32 %v8307_v11, %v21492_v46  ;;  %v14540_v4 = vpop.f32.mrb[1].mxu0 }
 0x421   :  { %v8310_v63 = vpop.f32.mrb[2].mxu0 }
 0x422   :  { %v8486_v53 = vcombine.high %v14780_v40, %v14780_v40  ;;  %v8493_v10 = vrot.slane %v14780_v40, %v16143_v6  ;;  %v14781_v21 = vadd.f32 %v8310_v63, %v21493_v54  ;;  %v14541_v2 = vpop.f32.mrb[3].mxu0  ;;  %v19415_v26 = vpop.f32.mrb[48].mxu1 }
 0x423   :  { %v14402_v47 = vpop.f32.mrb[49].mxu1 }
 0x424   :  { %v8500_v56 = vrot.slane %v8486_v53, %v16143_v6  ;;  %v8501_v42 = vcombine.high %v8493_v10, %v8493_v10  ;;  %v8535_v38 = vcombine.high %v14781_v21, %v14781_v21  ;;  %v19418_v7 = vpop.f32.mrb[50].mxu1  ;;  %v8542_v45 = vrot.slane %v14781_v21, %v16143_v6 }
 0x425   :  { %v14403_v31 = vpop.f32.mrb[51].mxu1  ;;  %v8509_v41 = vrot.slane %v8493_v10, %v16143_v6 }
 0x426   :  { %v8502_v16 = vcombine.high %v8500_v56, %v8500_v56  ;;  %v8523_v0 = vrot.slane %v8501_v42, %v16143_v6  ;;  %v8549_v20 = vrot.slane %v8535_v38, %v16143_v6  ;;  %v8516_v51 = vrot.slane %v8500_v56, %v16143_v6 }
 0x427   :  { %v8550_v3 = vcombine.high %v8542_v45, %v8542_v45  ;;  %v8315_v55 = vpop.f32.mrb[4].mxu0  ;;  %v8558_v30 = vrot.slane %v8542_v45, %v16143_v6 }
 0x428   :  { %v8530_v37 = vrot.slane %v8502_v16, %v16143_v6  ;;  %v9956_v44 = vcombine.low %v8509_v41, %v8523_v0  ;;  %v14054_v36 = vcombine.high %v8509_v41, %v8523_v0  ;;  %v8551_v14 = vcombine.high %v8549_v20, %v8549_v20  ;;  %v14544_v33 = vpop.f32.mrb[5].mxu0  ;;  %v21495_v0 = vld [vmem:[#allocation178_spill] sm:$0xff] }
 0x429   :  { %v8565_v8 = vrot.slane %v8549_v20, %v16143_v6  ;;  %v8572_v1 = vrot.slane %v8550_v3, %v16143_v6  ;;  %v14782_v28 = vadd.f32 %v8315_v55, %v21494_v25  ;;  %v8318_v34 = vpop.f32.mrb[6].mxu0 }
 0x42a   :  { %v9958_v50 = vcombine.low %v8516_v51, %v8530_v37  ;;  %v14055_v13 = vcombine.high %v8516_v51, %v8530_v37  ;;  %v9966_v58 = vrot.slane %v9956_v44, %v16143_v6  ;;  %v9973_v49 = vrot.slane %v14054_v36, %v16143_v6  ;;  %v14545_v59 = vpop.f32.mrb[7].mxu0  ;;  %v19432_v19 = vpop.f32.mrb[52].mxu1  ;;  %v21496_v44 = vld [vmem:[#allocation70_spill] sm:$0xff] }
 0x42b   :  { %v8579_v61 = vrot.slane %v8551_v14, %v16143_v6  ;;  %v8581_v32 = vcombine.high %v8565_v8, %v8565_v8  ;;  %v10005_v5 = vcombine.low %v8558_v30, %v8572_v1  ;;  %v14056_v23 = vcombine.high %v8558_v30, %v8572_v1  ;;  %v14406_v11 = vpop.f32.mrb[53].mxu1 }
 0x42c   :  { %v9980_v46 = vrot.slane %v9958_v50, %v16143_v6  ;;  %v9987_v40 = vrot.slane %v14055_v13, %v16143_v6  ;;  %v9988_v4 = vcombine.low %v9966_v58, %v9973_v49  ;;  %v8584_v63 = vcombine.high %v14782_v28, %v14782_v28  ;;  %v19437_v53 = vpop.f32.mrb[54].mxu1 }
 0x42d   :  { %v10007_v10 = vcombine.low %v8565_v8, %v8579_v61  ;;  %v10014_v54 = vrot.slane %v10005_v5, %v16143_v6  ;;  %v10021_v21 = vrot.slane %v14056_v23, %v16143_v6  ;;  %v10035_v2 = vrot.slane %v8581_v32, %v16143_v6  ;;  %v14407_v47 = vpop.f32.mrb[55].mxu1 }
 0x42e   :  { %v9989_v56 = vcombine.low %v9980_v46, %v9987_v40  ;;  %v9996_v42 = vrot.slane %v9988_v4, %v16143_v6  ;;  %v8583_v38 = vcombine.high %v8579_v61, %v8579_v61  ;;  %v8591_v45 = vrot.slane %v14782_v28, %v16143_v6 }
 0x42f   :  { %v10028_v31 = vrot.slane %v10007_v10, %v16143_v6  ;;  %v10036_v16 = vcombine.low %v10014_v54, %v10021_v21  ;;  %v8598_v41 = vrot.slane %v8584_v63, %v16143_v6  ;;  %v14783_v20 = vadd.f32 %v8318_v34, %v21495_v0  ;;  %v8323_v51 = vpop.f32.mrb[8].mxu0 }
 0x430   :  { %v10003_v3 = vrot.slane %v9989_v56, %v16143_v6  ;;  %v8599_v55 = vcombine.high %v8591_v45, %v8591_v45  ;;  %v8607_v37 = vrot.slane %v8591_v45, %v16143_v6  ;;  %v19450_v36 = vadd.f32 %v8323_v51, %v21496_v44  ;;  %v14548_v14 = vpop.f32.mrb[9].mxu0 }
 0x431   :  { %v10037_v33 = vcombine.low %v10028_v31, %v10035_v2  ;;  %v10044_v30 = vrot.slane %v10036_v16, %v16143_v6  ;;  %v8600_v8 = vcombine.high %v8598_v41, %v8598_v41  ;;  %v8614_v1 = vrot.slane %v8598_v41, %v16143_v6  ;;  %v19454_v25 = vpop.f32.mrb[10].mxu0 }
 0x432   :  { %v10004_v28 = vcombine.low %v9996_v42, %v10003_v3  ;;  %v8621_v34 = vrot.slane %v8599_v55, %v16143_v6  ;;  %v8629_v50 = vcombine.high %v8607_v37, %v8607_v37  ;;  %v10053_v13 = vcombine.low %v8583_v38, %v8607_v37  ;;  %v14549_v58 = vpop.f32.mrb[11].mxu0  ;;  %v19457_v49 = vpop.f32.mrb[56].mxu1 }
 0x433   :  { %v10051_v59 = vrot.slane %v10037_v33, %v16143_v6  ;;  %v8628_v61 = vrot.slane %v8600_v8, %v16143_v6  ;;  %v8630_v32 = vcombine.high %v8614_v1, %v8614_v1  ;;  %v8633_v5 = vcombine.high %v14783_v20, %v14783_v20  ;;  %v14410_v23 = vpop.f32.mrb[57].mxu1 }
 0x434   :  { %v11540_v11 = vsel %vm4984_vm2, %v10004_v28, -inf  ;;  %v8631_v46 = vcombine.high %v8621_v34, %v8621_v34  ;;  %v10054_v40 = vcombine.low %v8621_v34, %v8629_v50  ;;  %v10063_v4 = vrot.slane %v10053_v13, %v16143_v6  ;;  %v19463_v63 = vpop.f32.mrb[58].mxu1 }
 0x435   :  { %v10052_v10 = vcombine.low %v10044_v30, %v10051_v59  ;;  %v10056_v54 = vcombine.low %v8628_v61, %v8630_v32  ;;  %v8632_v21 = vcombine.high %v8628_v61, %v8628_v61  ;;  %v8640_v2 = vrot.slane %v14783_v20, %v16143_v6  ;;  %v14411_v47 = vpop.f32.mrb[59].mxu1 }
 0x436   :  { %v10055_v56 = vcombine.low %v8631_v46, %v8614_v1  ;;  %v10070_v42 = vrot.slane %v10054_v40, %v16143_v6  ;;  %v8647_v38 = vrot.slane %v8633_v5, %v16143_v6  ;;  %v8682_v45 = vcombine.high %v19450_v36, %v19450_v36 }
 0x437   :  { %v11542_v31 = vsel %vm11541_vm3, %v10052_v10, -inf  ;;  %v10084_v16 = vrot.slane %v10056_v54, %v16143_v6  ;;  %v8648_v41 = vcombine.high %v8640_v2, %v8640_v2  ;;  %v8656_v0 = vrot.slane %v8640_v2, %v16143_v6  ;;  %v8331_v51 = vpop.f32.mrb[12].mxu0 }
 0x438   :  { %v11543_v3 = vmax.f32 %v11540_v11, %v11542_v31  ;;  %v10077_v20 = vrot.slane %v10055_v56, %v16143_v6  ;;  %v10085_v55 = vcombine.low %v10063_v4, %v10070_v42  ;;  %v8649_v37 = vcombine.high %v8647_v38, %v8647_v38  ;;  %v14552_v44 = vpop.f32.mrb[13].mxu0 }
 0x439   :  { %v8663_v14 = vrot.slane %v8647_v38, %v16143_v6  ;;  %v8670_v33 = vrot.slane %v8648_v41, %v16143_v6  ;;  %v8678_v30 = vcombine.high %v8656_v0, %v8656_v0  ;;  %v10102_v8 = vcombine.low %v8632_v21, %v8656_v0  ;;  %v19476_v1 = vpop.f32.mrb[14].mxu0 }
 0x43a   :  { %v11544_v28 = vrot.slane %v11543_v3, 4  ;;  %v10086_v34 = vcombine.low %v10077_v20, %v10084_v16  ;;  %v10093_v50 = vrot.slane %v10085_v55, %v16143_v6  ;;  %v8677_v13 = vrot.slane %v8649_v37, %v16143_v6  ;;  %v14553_v58 = vpop.f32.mrb[15].mxu0  ;;  %v21497_v20 = vld [vmem:[#allocation201_spill] sm:$0xff] }
 0x43b   :  { %v8680_v59 = vcombine.high %v8670_v33, %v8670_v33  ;;  %v10103_v61 = vcombine.low %v8670_v33, %v8678_v30  ;;  %v10111_v32 = vrot.slane %v10102_v8, %v16143_v6  ;;  %v8689_v5 = vrot.slane %v19450_v36, %v16143_v6  ;;  %v21498_v30 = vld [vmem:[#allocation85_spill] sm:$0xff] }
 0x43c   :  { %v11545_v23 = vmax.f32 %v11543_v3, %v11544_v28  ;;  %v10100_v11 = vrot.slane %v10086_v34, %v16143_v6  ;;  %v10132_v46 = vrot.slane %v8677_v13, %v16143_v6  ;;  %v14057_v40 = vcombine.high %v8663_v14, %v8677_v13 }
 0x43d   :  { %v10104_v4 = vcombine.low %v8680_v59, %v8663_v14  ;;  %v10118_v10 = vrot.slane %v10103_v61, %v16143_v6  ;;  %v8696_v54 = vrot.slane %v8682_v45, %v16143_v6  ;;  %v8697_v21 = vcombine.high %v8689_v5, %v8689_v5 }
 0x43e   :  { %v11546_v2 = vrot.slane %v11545_v23, 2  ;;  %v10101_v47 = vcombine.low %v10093_v50, %v10100_v11  ;;  %v10160_v56 = vrot.slane %v14057_v40, %v16143_v6  ;;  %v8705_v42 = vrot.slane %v8689_v5, %v16143_v6 }
 0x43f   :  { %v10125_v36 = vrot.slane %v10104_v4, %v16143_v6  ;;  %v10133_v38 = vcombine.low %v10111_v32, %v10118_v10  ;;  %v8698_v31 = vcombine.high %v8696_v54, %v8696_v54  ;;  %v8712_v16 = vrot.slane %v8696_v54, %v16143_v6  ;;  %v19491_v41 = vpop.f32.mrb[16].mxu0 }
 0x440   :  { %v19493_v0 = vmax.f32 %v11545_v23, %v11546_v2  ;;  %v11550_v3 = vsel %vm4984_vm2, %v10101_v47, -inf  ;;  %v8719_v45 = vrot.slane %v8697_v21, %v16143_v6  ;;  %v14785_v55 = vadd.f32 %v19454_v25, %v21497_v20  ;;  %v14556_v37 = vpop.f32.mrb[17].mxu0 }
 0x441   :  { %v10134_v44 = vcombine.low %v10125_v36, %v10132_v46  ;;  %v10141_v14 = vrot.slane %v10133_v38, %v16143_v6  ;;  %v8726_v33 = vrot.slane %v8698_v31, %v16143_v6  ;;  %v14786_v8 = vadd.f32 %v8331_v51, %v21498_v30  ;;  %v19502_v28 = vpop.f32.mrb[18].mxu0 }
 0x442   :  { %v11548_v34 = vrot.slane %v19493_v0, 1  ;;  %v10151_v50 = vcombine.low %v8705_v42, %v8719_v45  ;;  %v14058_v13 = vcombine.high %v8705_v42, %v8719_v45  ;;  %v8731_v58 = vcombine.high %v14785_v55, %v14785_v55  ;;  %v14557_v59 = vpop.f32.mrb[19].mxu0 }
 0x443   :  { %v10148_v61 = vrot.slane %v10134_v44, %v16143_v6  ;;  %v10153_v32 = vcombine.low %v8712_v16, %v8726_v33  ;;  %v14059_v25 = vcombine.high %v8712_v16, %v8726_v33  ;;  %v8738_v5 = vrot.slane %v14785_v55, %v16143_v6 }
 0x444   :  { %v10167_v23 = vrot.slane %v10151_v50, %v16143_v6  ;;  %v10174_v11 = vrot.slane %v14058_v13, %v16143_v6  ;;  %v8745_v51 = vrot.slane %v8731_v58, %v16143_v6  ;;  %v8780_v46 = vcombine.high %v14786_v8, %v14786_v8 }
 0x445   :  { %v10149_v40 = vcombine.low %v10141_v14, %v10148_v61  ;;  %v10181_v4 = vrot.slane %v10153_v32, %v16143_v6  ;;  %v10208_v10 = vrot.slane %v14059_v25, %v16143_v6  ;;  %v8746_v54 = vcombine.high %v8738_v5, %v8738_v5 }
 0x446   :  { %v10182_v21 = vcombine.low %v10160_v56, %v10167_v23  ;;  %v8747_v2 = vcombine.high %v8745_v51, %v8745_v51  ;;  %v8754_v47 = vrot.slane %v8738_v5, %v16143_v6  ;;  %v8761_v42 = vrot.slane %v8745_v51, %v16143_v6 }
 0x447   :  { %v11551_v36 = vsel %vm11541_vm3, %v10149_v40, -inf  ;;  %v10183_v38 = vcombine.low %v10174_v11, %v10181_v4  ;;  %v8768_v31 = vrot.slane %v8746_v54, %v16143_v6  ;;  %v8787_v16 = vrot.slane %v14786_v8, %v16143_v6  ;;  %v19517_v45 = vpop.f32.mrb[20].mxu0 }
 0x448   :  { %v11552_v20 = vmax.f32 %v11550_v3, %v11551_v36  ;;  %v10190_v55 = vrot.slane %v10182_v21, %v16143_v6  ;;  %v8775_v37 = vrot.slane %v8747_v2, %v16143_v6  ;;  %v8777_v56 = vcombine.high %v8761_v42, %v8761_v42  ;;  %v14560_v44 = vpop.f32.mrb[21].mxu0 }
 0x449   :  { %v10197_v14 = vrot.slane %v10183_v38, %v16143_v6  ;;  %v10200_v33 = vcombine.low %v8754_v47, %v8768_v31  ;;  %v14060_v30 = vcombine.high %v8754_v47, %v8768_v31  ;;  %v10229_v50 = vrot.slane %v8761_v42, %v16143_v6  ;;  %v19523_v13 = vpop.f32.mrb[22].mxu0 }
 0x44a   :  { %v11553_v58 = vrot.slane %v11552_v20, 4  ;;  %v10247_v59 = vcombine.low %v8775_v37, %v8777_v56  ;;  %v8779_v8 = vcombine.high %v8775_v37, %v8775_v37  ;;  %v8794_v61 = vrot.slane %v8780_v46, %v16143_v6  ;;  %v14561_v3 = vpop.f32.mrb[23].mxu0 }
 0x44b   :  { %v10198_v32 = vcombine.low %v10190_v55, %v10197_v14  ;;  %v10215_v25 = vrot.slane %v10200_v33, %v16143_v6  ;;  %v10222_v5 = vrot.slane %v14060_v30, %v16143_v6  ;;  %v8795_v23 = vcombine.high %v8787_v16, %v8787_v16 }
 0x44c   :  { %v11554_v11 = vmax.f32 %v11552_v20, %v11553_v58  ;;  %v8796_v51 = vcombine.high %v8794_v61, %v8794_v61  ;;  %v8803_v40 = vrot.slane %v8787_v16, %v16143_v6  ;;  %v8810_v4 = vrot.slane %v8794_v61, %v16143_v6  ;;  %v21499_v61 = vld [vmem:[#allocation203_spill] sm:$0xff] }
 0x44d   :  { %v11559_v54 = vsel %vm4984_vm2, %v10198_v32, -inf  ;;  %v10230_v21 = vcombine.low %v10208_v10, %v10215_v25  ;;  %v10231_v2 = vcombine.low %v10222_v5, %v10229_v50  ;;  %v8817_v47 = vrot.slane %v8795_v23, %v16143_v6 }
 0x44e   :  { %v11555_v46 = vrot.slane %v11554_v11, 2  ;;  %v8824_v42 = vrot.slane %v8796_v51, %v16143_v6  ;;  %v8825_v36 = vcombine.high %v8803_v40, %v8803_v40  ;;  %v8826_v38 = vcombine.high %v8810_v4, %v8810_v4 }
 0x44f   :  { %v10238_v31 = vrot.slane %v10230_v21, %v16143_v6  ;;  %v10245_v20 = vrot.slane %v10231_v2, %v16143_v6  ;;  %v8827_v55 = vcombine.high %v8817_v47, %v8817_v47  ;;  %v10248_v37 = vcombine.low %v8779_v8, %v8803_v40  ;;  %v19535_v16 = vpop.f32.mrb[24].mxu0 }
 0x450   :  { %v19537_v56 = vmax.f32 %v11554_v11, %v11555_v46  ;;  %v10249_v44 = vcombine.low %v8817_v47, %v8825_v36  ;;  %v10257_v10 = vrot.slane %v10247_v59, %v16143_v6  ;;  %v10296_v14 = vcombine.low %v8824_v42, %v8826_v38  ;;  %v14564_v33 = vpop.f32.mrb[25].mxu0 }
 0x451   :  { %v10246_v30 = vcombine.low %v10238_v31, %v10245_v20  ;;  %v10250_v50 = vcombine.low %v8827_v55, %v8810_v4  ;;  %v10264_v58 = vrot.slane %v10248_v37, %v16143_v6  ;;  %v14787_v3 = vadd.f32 %v19476_v1, %v21499_v61  ;;  %v19543_v32 = vpop.f32.mrb[26].mxu0 }
 0x452   :  { %v11557_v8 = vrot.slane %v19537_v56, 1  ;;  %v10271_v25 = vrot.slane %v10249_v44, %v16143_v6  ;;  %v8828_v5 = vcombine.high %v8824_v42, %v8824_v42  ;;  %v10305_v23 = vrot.slane %v10296_v14, %v16143_v6  ;;  %v14565_v11 = vpop.f32.mrb[27].mxu0 }
 0x453   :  { %v11560_v59 = vsel %vm11541_vm3, %v10246_v30, -inf  ;;  %v10278_v51 = vrot.slane %v10250_v50, %v16143_v6  ;;  %v10279_v40 = vcombine.low %v10257_v10, %v10264_v58  ;;  %v8829_v4 = vcombine.high %v14787_v3, %v14787_v3 }
 0x454   :  { %v11561_v21 = vmax.f32 %v11559_v54, %v11560_v59  ;;  %v8836_v2 = vrot.slane %v14787_v3, %v16143_v6  ;;  %v14788_v1 = vadd.f32 %v19491_v41, %v19380_v48  ;;  %v14789_v47 = vadd.f32 %v19502_v28, %v19382_v17 }
 0x455   :  { %v10280_v46 = vcombine.low %v10271_v25, %v10278_v51  ;;  %v10287_v42 = vrot.slane %v10279_v40, %v16143_v6  ;;  %v8843_v36 = vrot.slane %v8829_v4, %v16143_v6  ;;  %v19559_v38 = vadd.f32 %v19517_v45, %v19384_v57 }
 0x456   :  { %v11562_v31 = vrot.slane %v11561_v21, 4  ;;  %v8844_v20 = vcombine.high %v8836_v2, %v8836_v2  ;;  %v8852_v54 = vrot.slane %v8836_v2, %v16143_v6  ;;  %v8878_v55 = vcombine.high %v14788_v1, %v14788_v1 }
 0x457   :  { %v10294_v37 = vrot.slane %v10280_v46, %v16143_v6  ;;  %v8845_v48 = vcombine.high %v8843_v36, %v8843_v36  ;;  %v8859_v41 = vrot.slane %v8843_v36, %v16143_v6  ;;  %v8885_v17 = vrot.slane %v14788_v1, %v16143_v6  ;;  %v19565_v28 = vpop.f32.mrb[28].mxu0 }
 0x458   :  { %v11563_v44 = vmax.f32 %v11561_v21, %v11562_v31  ;;  %v8866_v10 = vrot.slane %v8844_v20, %v16143_v6  ;;  %v8874_v14 = vcombine.high %v8852_v54, %v8852_v54  ;;  %v10297_v57 = vcombine.low %v8828_v5, %v8852_v54  ;;  %v14568_v45 = vpop.f32.mrb[29].mxu0 }
 0x459   :  { %v10295_v33 = vcombine.low %v10287_v42, %v10294_v37  ;;  %v8873_v30 = vrot.slane %v8845_v48, %v16143_v6  ;;  %v8892_v50 = vrot.slane %v8878_v55, %v16143_v6  ;;  %v8893_v58 = vcombine.high %v8885_v17, %v8885_v17  ;;  %v19570_v61 = vpop.f32.mrb[30].mxu0 }
 0x45a   :  { %v11564_v3 = vrot.slane %v11563_v44, 2  ;;  %v8876_v25 = vcombine.high %v8866_v10, %v8866_v10  ;;  %v10298_v11 = vcombine.low %v8866_v10, %v8874_v14  ;;  %v10312_v59 = vrot.slane %v10297_v57, %v16143_v6  ;;  %v14569_v51 = vpop.f32.mrb[31].mxu0 }
 0x45b   :  { %v11568_v40 = vsel %vm4984_vm2, %v10295_v33, -inf  ;;  %v10344_v4 = vcombine.low %v8859_v41, %v8873_v30  ;;  %v14061_v21 = vcombine.high %v8859_v41, %v8873_v30  ;;  %v8894_v5 = vcombine.high %v8892_v50, %v8892_v50 }
 0x45c   :  { %v19574_v2 = vmax.f32 %v11563_v44, %v11564_v3  ;;  %v10319_v1 = vrot.slane %v10298_v11, %v16143_v6  ;;  %v10326_v46 = vrot.slane %v8876_v25, %v16143_v6  ;;  %v10327_v42 = vcombine.low %v10305_v23, %v10312_v59 }
 0x45d   :  { %v10354_v36 = vrot.slane %v10344_v4, %v16143_v6  ;;  %v10361_v31 = vrot.slane %v14061_v21, %v16143_v6  ;;  %v8901_v20 = vrot.slane %v8885_v17, %v16143_v6  ;;  %v8908_v54 = vrot.slane %v8892_v50, %v16143_v6 }
 0x45e   :  { %v10328_v55 = vcombine.low %v10319_v1, %v10326_v46  ;;  %v10335_v37 = vrot.slane %v10327_v42, %v16143_v6  ;;  %v8915_v48 = vrot.slane %v8893_v58, %v16143_v6  ;;  %v8922_v41 = vrot.slane %v8894_v5, %v16143_v6 }
 0x45f   :  { %v10376_v44 = vcombine.low %v10354_v36, %v10361_v31  ;;  %v8927_v10 = vcombine.high %v14789_v47, %v14789_v47  ;;  %v8934_v14 = vrot.slane %v14789_v47, %v16143_v6  ;;  %v8976_v23 = vcombine.high %v19559_v38, %v19559_v38  ;;  %v19588_v57 = vpop.f32.mrb[32].mxu0 }
 0x460   :  { %v10342_v17 = vrot.slane %v10328_v55, %v16143_v6  ;;  %v10346_v45 = vcombine.low %v8901_v20, %v8915_v48  ;;  %v14062_v33 = vcombine.high %v8901_v20, %v8915_v48  ;;  %v10393_v30 = vcombine.low %v8908_v54, %v8922_v41  ;;  %v14572_v50 = vpop.f32.mrb[33].mxu0 }
 0x461   :  { %v10384_v3 = vrot.slane %v10376_v44, %v16143_v6  ;;  %v14063_v58 = vcombine.high %v8908_v54, %v8922_v41  ;;  %v8941_v25 = vrot.slane %v8927_v10, %v16143_v6  ;;  %v8942_v11 = vcombine.high %v8934_v14, %v8934_v14  ;;  %v19593_v59 = vpop.f32.mrb[34].mxu0 }
 0x462   :  { %v10343_v47 = vcombine.low %v10335_v37, %v10342_v17  ;;  %v10368_v51 = vrot.slane %v10346_v45, %v16143_v6  ;;  %v10375_v4 = vrot.slane %v14062_v33, %v16143_v6  ;;  %v10402_v21 = vrot.slane %v10393_v30, %v16143_v6  ;;  %v14573_v5 = vpop.f32.mrb[35].mxu0 }
 0x463   :  { %v10409_v1 = vrot.slane %v14063_v58, %v16143_v6  ;;  %v8943_v46 = vcombine.high %v8941_v25, %v8941_v25  ;;  %v8950_v42 = vrot.slane %v8934_v14, %v16143_v6  ;;  %v8957_v36 = vrot.slane %v8941_v25, %v16143_v6 }
 0x464   :  { %v11569_v31 = vsel %vm11541_vm3, %v10343_v47, -inf  ;;  %v10377_v20 = vcombine.low %v10368_v51, %v10375_v4  ;;  %v8964_v54 = vrot.slane %v8942_v11, %v16143_v6  ;;  %v8983_v55 = vrot.slane %v19559_v38, %v16143_v6 }
 0x465   :  { %v11570_v37 = vmax.f32 %v11568_v40, %v11569_v31  ;;  %v10424_v48 = vcombine.low %v10402_v21, %v10409_v1  ;;  %v8971_v41 = vrot.slane %v8943_v46, %v16143_v6  ;;  %v8972_v44 = vcombine.high %v8950_v42, %v8950_v42 }
 0x466   :  { %v10391_v10 = vrot.slane %v10377_v20, %v16143_v6  ;;  %v8973_v17 = vcombine.high %v8957_v36, %v8957_v36  ;;  %v8974_v45 = vcombine.high %v8964_v54, %v8964_v54  ;;  %v10395_v14 = vcombine.low %v8950_v42, %v8964_v54 }
 0x467   :  { %v11571_v33 = vrot.slane %v11570_v37, 4  ;;  %v10432_v30 = vrot.slane %v10424_v48, %v16143_v6  ;;  %v10423_v50 = vrot.slane %v8972_v44, %v16143_v6  ;;  %v8975_v58 = vcombine.high %v8971_v41, %v8971_v41  ;;  %v19609_v25 = vpop.f32.mrb[36].mxu0 }
 0x468   :  { %v10392_v11 = vcombine.low %v10384_v3, %v10391_v10  ;;  %v10416_v38 = vrot.slane %v10395_v14, %v16143_v6  ;;  %v10441_v40 = vcombine.low %v8974_v45, %v8957_v36  ;;  %v10442_v47 = vcombine.low %v8971_v41, %v8973_v17  ;;  %v14576_v51 = vpop.f32.mrb[37].mxu0 }
 0x469   :  { %v19612_v4 = vmax.f32 %v11570_v37, %v11571_v33  ;;  %v8990_v21 = vrot.slane %v8976_v23, %v16143_v6  ;;  %v8991_v5 = vcombine.high %v8983_v55, %v8983_v55  ;;  %v8999_v1 = vrot.slane %v8983_v55, %v16143_v6  ;;  %v19616_v46 = vpop.f32.mrb[38].mxu0 }
 0x46a   :  { %v11577_v42 = vsel %vm4984_vm2, %v10392_v11, -inf  ;;  %v10425_v31 = vcombine.low %v10416_v38, %v10423_v50  ;;  %v10451_v20 = vrot.slane %v10441_v40, %v16143_v6  ;;  %v10458_v3 = vrot.slane %v10442_v47, %v16143_v6  ;;  %v14577_v54 = vpop.f32.mrb[39].mxu0 }
 0x46b   :  { %v11573_v36 = vrot.slane %v19612_v4, 2  ;;  %v8992_v48 = vcombine.high %v8990_v21, %v8990_v21  ;;  %v9006_v37 = vrot.slane %v8990_v21, %v16143_v6  ;;  %v9013_v23 = vrot.slane %v8991_v5, %v16143_v6 }
 0x46c   :  { %v10439_v41 = vrot.slane %v10425_v31, %v16143_v6  ;;  %v10473_v55 = vcombine.low %v10451_v20, %v10458_v3  ;;  %v9021_v44 = vcombine.high %v8999_v1, %v8999_v1  ;;  %v10443_v10 = vcombine.low %v8975_v58, %v8999_v1 }
 0x46d   :  { %v9020_v17 = vrot.slane %v8992_v48, %v16143_v6  ;;  %v9022_v45 = vcombine.high %v9006_v37, %v9006_v37  ;;  %v9023_v14 = vcombine.high %v9013_v23, %v9013_v23  ;;  %v14791_v33 = vadd.f32 %v19523_v13, %v19386_v24 }
 0x46e   :  { %v10440_v50 = vcombine.low %v10432_v30, %v10439_v41  ;;  %v10481_v11 = vrot.slane %v10473_v55, %v16143_v6  ;;  %v10444_v38 = vcombine.low %v9013_v23, %v9021_v44  ;;  %v10465_v40 = vrot.slane %v10443_v10, %v16143_v6 }
 0x46f   :  { %v10490_v47 = vcombine.low %v9023_v14, %v9006_v37  ;;  %v10491_v51 = vcombine.low %v9020_v17, %v9022_v45  ;;  %v9024_v21 = vcombine.high %v9020_v17, %v9020_v17  ;;  %v9025_v5 = vcombine.high %v14791_v33, %v14791_v33  ;;  %v19630_v31 = vpop.f32.mrb[40].mxu0 }
 0x470   :  { %v11578_v58 = vsel %vm11541_vm3, %v10440_v50, -inf  ;;  %v10472_v1 = vrot.slane %v10444_v38, %v16143_v6  ;;  %v9032_v20 = vrot.slane %v14791_v33, %v16143_v6  ;;  %v14792_v24 = vadd.f32 %v19535_v16, %v19388_v12  ;;  %v14580_v13 = vpop.f32.mrb[41].mxu0 }
 0x471   :  { %v11579_v30 = vmax.f32 %v11577_v42, %v11578_v58  ;;  %v10499_v3 = vrot.slane %v10490_v47, %v16143_v6  ;;  %v10506_v54 = vrot.slane %v10491_v51, %v16143_v6  ;;  %v9039_v48 = vrot.slane %v9025_v5, %v16143_v6  ;;  %v19640_v37 = vpop.f32.mrb[42].mxu0 }
 0x472   :  { %v10474_v23 = vcombine.low %v10465_v40, %v10472_v1  ;;  %v9040_v41 = vcombine.high %v9032_v20, %v9032_v20  ;;  %v9048_v55 = vrot.slane %v9032_v20, %v16143_v6  ;;  %v9074_v44 = vcombine.high %v14792_v24, %v14792_v24  ;;  %v14581_v10 = vpop.f32.mrb[43].mxu0 }
 0x473   :  { %v11580_v17 = vrot.slane %v11579_v30, 4  ;;  %v10521_v45 = vcombine.low %v10499_v3, %v10506_v54  ;;  %v9041_v14 = vcombine.high %v9039_v48, %v9039_v48  ;;  %v9055_v12 = vrot.slane %v9039_v48, %v16143_v6 }
 0x474   :  { %v10488_v16 = vrot.slane %v10474_v23, %v16143_v6  ;;  %v9062_v42 = vrot.slane %v9040_v41, %v16143_v6  ;;  %v10492_v33 = vcombine.low %v9024_v21, %v9048_v55  ;;  %v9081_v50 = vrot.slane %v14792_v24, %v16143_v6 }
 0x475   :  { %v19647_v38 = vmax.f32 %v11579_v30, %v11580_v17  ;;  %v10529_v40 = vrot.slane %v10521_v45, %v16143_v6  ;;  %v9069_v47 = vrot.slane %v9041_v14, %v16143_v6  ;;  %v9088_v51 = vrot.slane %v9074_v44, %v16143_v6 }
 0x476   :  { %v10489_v5 = vcombine.low %v10481_v11, %v10488_v16  ;;  %v10513_v58 = vrot.slane %v10492_v33, %v16143_v6  ;;  %v10520_v1 = vrot.slane %v9062_v42, %v16143_v6  ;;  %v14064_v20 = vcombine.high %v9048_v55, %v9062_v42 }
 0x477   :  { %v10539_v13 = vcombine.low %v9055_v12, %v9069_v47  ;;  %v14065_v3 = vcombine.high %v9055_v12, %v9069_v47  ;;  %v9089_v54 = vcombine.high %v9081_v50, %v9081_v50  ;;  %v9090_v21 = vcombine.high %v9088_v51, %v9088_v51  ;;  %v19654_v48 = vpop.f32.mrb[44].mxu0 }
 0x478   :  { %v11586_v24 = vsel %vm4984_vm2, %v10489_v5, -inf  ;;  %v10522_v30 = vcombine.low %v10513_v58, %v10520_v1  ;;  %v10548_v23 = vrot.slane %v14064_v20, %v16143_v6  ;;  %v9097_v41 = vrot.slane %v9081_v50, %v16143_v6  ;;  %v14584_v44 = vpop.f32.mrb[45].mxu0 }
 0x479   :  { %v10555_v11 = vrot.slane %v10539_v13, %v16143_v6  ;;  %v10562_v10 = vrot.slane %v14065_v3, %v16143_v6  ;;  %v9104_v55 = vrot.slane %v9088_v51, %v16143_v6  ;;  %v9111_v17 = vrot.slane %v9089_v54, %v16143_v6  ;;  %v19663_v45 = vpop.f32.mrb[46].mxu0 }
 0x47a   :  { %v10536_v14 = vrot.slane %v10522_v30, %v16143_v6  ;;  %v9118_v12 = vrot.slane %v9090_v21, %v16143_v6  ;;  %v14793_v16 = vadd.f32 %v19543_v32, %v19390_v29  ;;  %v14794_v42 = vadd.f32 %v19565_v28, %v19392_v60  ;;  %v14585_v33 = vpop.f32.mrb[47].mxu0 }
 0x47b   :  { %v10570_v50 = vcombine.low %v10548_v23, %v10555_v11  ;;  %v10541_v47 = vcombine.low %v9097_v41, %v9111_v17  ;;  %v14066_v5 = vcombine.high %v9097_v41, %v9111_v17  ;;  %v19673_v51 = vadd.f32 %v19570_v61, %v19394_v27 }
 0x47c   :  { %v10537_v58 = vcombine.low %v10529_v40, %v10536_v14  ;;  %v10588_v1 = vcombine.low %v9104_v55, %v9118_v12  ;;  %v14067_v20 = vcombine.high %v9104_v55, %v9118_v12  ;;  %v9123_v13 = vcombine.high %v14793_v16, %v14793_v16 }
 0x47d   :  { %v10578_v3 = vrot.slane %v10570_v50, %v16143_v6  ;;  %v10569_v54 = vrot.slane %v10541_v47, %v16143_v6  ;;  %v10596_v29 = vrot.slane %v14066_v5, %v16143_v6  ;;  %v9130_v60 = vrot.slane %v14793_v16, %v16143_v6 }
 0x47e   :  { %v11587_v32 = vsel %vm11541_vm3, %v10537_v58, -inf  ;;  %v10603_v28 = vrot.slane %v10588_v1, %v16143_v6  ;;  %v9137_v21 = vrot.slane %v9123_v13, %v16143_v6  ;;  %v10610_v27 = vrot.slane %v14067_v20, %v16143_v6 }
 0x47f   :  { %v19683_v61 = vmax.f32 %v11586_v24, %v11587_v32  ;;  %v10571_v40 = vcombine.low %v10562_v10, %v10569_v54  ;;  %v9138_v30 = vcombine.high %v9130_v60, %v9130_v60  ;;  %v9146_v23 = vrot.slane %v9130_v60, %v16143_v6  ;;  %v19686_v41 = vpop.f32.mrb[48].mxu0 }
 0x480   :  { %v10618_v44 = vcombine.low %v10596_v29, %v10603_v28  ;;  %v9139_v11 = vcombine.high %v9137_v21, %v9137_v21  ;;  %v9153_v55 = vrot.slane %v9137_v21, %v16143_v6  ;;  %v9172_v17 = vcombine.high %v14794_v42, %v14794_v42  ;;  %v14588_v14 = vpop.f32.mrb[49].mxu0 }
 0x481   :  { %v10585_v16 = vrot.slane %v10571_v40, %v16143_v6  ;;  %v9160_v33 = vrot.slane %v9138_v30, %v16143_v6  ;;  %v9168_v24 = vcombine.high %v9146_v23, %v9146_v23  ;;  %v19692_v50 = vpop.f32.mrb[50].mxu0  ;;  %v10617_v58 = vrot.slane %v9146_v23, %v16143_v6 }
 0x482   :  { %v10626_v10 = vrot.slane %v10618_v44, %v16143_v6  ;;  %v9167_v47 = vrot.slane %v9139_v11, %v16143_v6  ;;  %v9169_v5 = vcombine.high %v9153_v55, %v9153_v55  ;;  %v14589_v1 = vpop.f32.mrb[51].mxu0  ;;  %v9179_v29 = vrot.slane %v14794_v42, %v16143_v6 }
 0x483   :  { %v10586_v20 = vcombine.low %v10578_v3, %v10585_v16  ;;  %v9170_v13 = vcombine.high %v9160_v33, %v9160_v33  ;;  %v10635_v54 = vcombine.low %v9160_v33, %v9168_v24  ;;  %v10619_v60 = vcombine.low %v10610_v27, %v10617_v58 }
 0x484   :  { %v10637_v32 = vcombine.low %v9167_v47, %v9169_v5  ;;  %v9171_v28 = vcombine.high %v9167_v47, %v9167_v47  ;;  %v9186_v21 = vrot.slane %v9172_v17, %v16143_v6  ;;  %v9187_v11 = vcombine.high %v9179_v29, %v9179_v29 }
 0x485   :  { %v10636_v40 = vcombine.low %v9170_v13, %v9153_v55  ;;  %v10645_v30 = vrot.slane %v10635_v54, %v16143_v6  ;;  %v11595_v44 = vsel %vm4984_vm2, %v10586_v20, -inf  ;;  %v10633_v14 = vrot.slane %v10619_v60, %v16143_v6 }
 0x486   :  { %v9188_v23 = vcombine.high %v9186_v21, %v9186_v21  ;;  %v9195_v3 = vrot.slane %v9179_v29, %v16143_v6  ;;  %v9202_v16 = vrot.slane %v9186_v21, %v16143_v6  ;;  %v9209_v27 = vrot.slane %v9187_v11, %v16143_v6 }
 0x487   :  { %v10652_v42 = vrot.slane %v10636_v40, %v16143_v6  ;;  %v10659_v33 = vrot.slane %v10637_v32, %v16143_v6  ;;  %v9221_v55 = vcombine.high %v19673_v51, %v19673_v51  ;;  %v19709_v17 = vpop.f32.mrb[52].mxu0  ;;  %v10634_v24 = vcombine.low %v10626_v10, %v10633_v14 }
 0x488   :  { %v9216_v47 = vrot.slane %v9188_v23, %v16143_v6  ;;  %v9217_v5 = vcombine.high %v9195_v3, %v9195_v3  ;;  %v9218_v58 = vcombine.high %v9202_v16, %v9202_v16  ;;  %v14592_v1 = vpop.f32.mrb[53].mxu0  ;;  %v9219_v13 = vcombine.high %v9209_v27, %v9209_v27 }
 0x489   :  { %v10667_v20 = vcombine.low %v10645_v30, %v10652_v42  ;;  %v10638_v54 = vcombine.low %v9171_v28, %v9195_v3  ;;  %v9228_v29 = vrot.slane %v19673_v51, %v16143_v6  ;;  %v19714_v60 = vpop.f32.mrb[54].mxu0  ;;  %v11596_v32 = vsel %vm11541_vm3, %v10634_v24, -inf }
 0x48a   :  { %v9220_v21 = vcombine.high %v9216_v47, %v9216_v47  ;;  %v10684_v40 = vcombine.low %v9209_v27, %v9217_v5  ;;  %v10686_v11 = vcombine.low %v9216_v47, %v9218_v58  ;;  %v14593_v12 = vpop.f32.mrb[55].mxu0  ;;  %v19718_v14 = vmax.f32 %v11595_v44, %v11596_v32 }
 0x48b   :  { %v10675_v10 = vrot.slane %v10667_v20, %v16143_v6  ;;  %v10666_v23 = vrot.slane %v10638_v54, %v16143_v6  ;;  %v10685_v30 = vcombine.low %v9219_v13, %v9202_v16  ;;  %v9235_v42 = vrot.slane %v9221_v55, %v16143_v6 }
 0x48c   :  { %v10693_v28 = vrot.slane %v10684_v40, %v16143_v6  ;;  %v10707_v3 = vrot.slane %v10686_v11, %v16143_v6  ;;  %v10714_v51 = vrot.slane %v9220_v21, %v16143_v6  ;;  %v11598_v24 = vrot.slane %v19718_v14, 4 }
 0x48d   :  { %v10668_v27 = vcombine.low %v10659_v33, %v10666_v23  ;;  %v10700_v12 = vrot.slane %v10685_v30, %v16143_v6  ;;  %v9236_v47 = vcombine.high %v9228_v29, %v9228_v29  ;;  %v9237_v44 = vcombine.high %v9235_v42, %v9235_v42 }
 0x48e   :  { %v10716_v5 = vcombine.low %v10707_v3, %v10714_v51  ;;  %v9244_v58 = vrot.slane %v9228_v29, %v16143_v6  ;;  %v9251_v16 = vrot.slane %v9235_v42, %v16143_v6  ;;  %v14796_v55 = vadd.f32 %v19588_v57, %v19396_v22 }
 0x48f   :  { %v10682_v1 = vrot.slane %v10668_v27, %v16143_v6  ;;  %v10715_v20 = vcombine.low %v10693_v28, %v10700_v12  ;;  %v9258_v13 = vrot.slane %v9236_v47, %v16143_v6  ;;  %v19733_v54 = vpop.f32.mrb[56].mxu0  ;;  %v9265_v32 = vrot.slane %v9237_v44, %v16143_v6 }
 0x490   :  { %v10730_v33 = vrot.slane %v10716_v5, %v16143_v6  ;;  %v14797_v21 = vadd.f32 %v19593_v59, %v19398_v39  ;;  %v19741_v29 = vadd.f32 %v19609_v25, %v19400_v43  ;;  %v14596_v40 = vpop.f32.mrb[57].mxu0  ;;  %v9270_v51 = vcombine.high %v14796_v55, %v14796_v55 }
 0x491   :  { %v19743_v11 = vcombine.low %v10675_v10, %v10682_v1  ;;  %v10723_v23 = vrot.slane %v10715_v20, %v16143_v6  ;;  %v10732_v30 = vcombine.low %v9244_v58, %v9258_v13  ;;  %v14068_v22 = vcombine.high %v9244_v58, %v9258_v13  ;;  %v19746_v57 = vpop.f32.mrb[58].mxu0 }
 0x492   :  { %v10734_v28 = vcombine.low %v9251_v16, %v9265_v32  ;;  %v14069_v3 = vcombine.high %v9251_v16, %v9265_v32  ;;  %v9277_v42 = vrot.slane %v14796_v55, %v16143_v6  ;;  %v14597_v27 = vpop.f32.mrb[59].mxu0  ;;  %v9319_v25 = vcombine.high %v14797_v21, %v14797_v21 }
 0x493   :  { %v19749_v39 = vcombine.low %v10723_v23, %v10730_v33  ;;  %v10742_v43 = vrot.slane %v10732_v30, %v16143_v6  ;;  %v10749_v59 = vrot.slane %v14068_v22, %v16143_v6  ;;  %v9284_v47 = vrot.slane %v9270_v51, %v16143_v6 }
 0x494   :  { %v10756_v10 = vrot.slane %v10734_v28, %v16143_v6  ;;  %v10763_v12 = vrot.slane %v14069_v3, %v16143_v6  ;;  %v9285_v5 = vcombine.high %v9277_v42, %v9277_v42  ;;  %v9293_v58 = vrot.slane %v9277_v42, %v16143_v6 }
 0x495   :  { %v10764_v44 = vcombine.low %v10742_v43, %v10749_v59  ;;  %v9326_v16 = vrot.slane %v14797_v21, %v16143_v6  ;;  %v9333_v1 = vrot.slane %v9319_v25, %v16143_v6  ;;  %v9286_v13 = vcombine.high %v9284_v47, %v9284_v47 }
 0x496   :  { %v10765_v20 = vcombine.low %v10756_v10, %v10763_v12  ;;  %v9300_v55 = vrot.slane %v9284_v47, %v16143_v6  ;;  %v9307_v33 = vrot.slane %v9285_v5, %v16143_v6  ;;  %v15063_v47 = vld [vmem:[#allocation16] sm:$0xff]  }
 0x497   :  { %v10772_v32 = vrot.slane %v10764_v44, %v16143_v6  ;;  %v9334_v40 = vcombine.high %v9326_v16, %v9326_v16  ;;  %v9335_v23 = vcombine.high %v9333_v1, %v9333_v1  ;;  %v9342_v30 = vrot.slane %v9326_v16, %v16143_v6  ;;  %14599 = vmatpush3.bf16.msra.mxu1 %v15063_v47 }
 0x498   :  { %v10779_v22 = vrot.slane %v10765_v20, %v16143_v6  ;;  %v9314_v28 = vrot.slane %v9286_v13, %v16143_v6  ;;  %v9316_v3 = vcombine.high %v9300_v55, %v9300_v55  ;;  %v10781_v21 = vcombine.low %v9293_v58, %v9307_v33  ;;  %14600 = vmatprep.subr.bf16.mxu1 %v20947_v18 }
 0x499   :  { %v14070_v51 = vcombine.high %v9293_v58, %v9307_v33  ;;  %v9349_v42 = vrot.slane %v9333_v1, %v16143_v6  ;;  %v9356_v27 = vrot.slane %v9334_v40, %v16143_v6  ;;  %v9363_v43 = vrot.slane %v9335_v23, %v16143_v6 }
 0x49a   :  { %v10780_v59 = vcombine.low %v10772_v32, %v10779_v22  ;;  %v10783_v25 = vcombine.low %v9300_v55, %v9314_v28  ;;  %v10790_v10 = vrot.slane %v10781_v21, %v16143_v6  ;;  %v10811_v12 = vrot.slane %v9316_v3, %v16143_v6 }
 0x49b   :  { %v10797_v5 = vrot.slane %v14070_v51, %v16143_v6  ;;  %v9318_v44 = vcombine.high %v9314_v28, %v9314_v28  ;;  %v9364_v16 = vcombine.high %v9342_v30, %v9342_v30  ;;  %v9365_v20 = vcombine.high %v9349_v42, %v9349_v42 }
 0x49c   :  { %v11613_v58 = vsel %vm4984_vm2, %v10780_v59, -inf  ;;  %v10804_v1 = vrot.slane %v10783_v25, %v16143_v6  ;;  %v9366_v13 = vcombine.high %v9356_v27, %v9356_v27  ;;  %v9367_v33 = vcombine.high %v9363_v43, %v9363_v43 }
 0x49d   :  { %v10812_v40 = vcombine.low %v10790_v10, %v10797_v5  ;;  %v10829_v32 = vcombine.low %v9318_v44, %v9342_v30  ;;  %v10830_v55 = vcombine.low %v9356_v27, %v9364_v16  ;;  %v10832_v23 = vcombine.low %v9363_v43, %v9365_v20 }
 0x49e   :  { %v10813_v22 = vcombine.low %v10804_v1, %v10811_v12  ;;  %v10831_v3 = vcombine.low %v9366_v13, %v9349_v42  ;;  %v9368_v28 = vcombine.high %v19741_v29, %v19741_v29  ;;  %v9375_v21 = vrot.slane %v19741_v29, %v16143_v6 }
 0x49f   :  { %v10820_v51 = vrot.slane %v10812_v40, %v16143_v6  ;;  %v10839_v59 = vrot.slane %v10829_v32, %v16143_v6  ;;  %v10846_v25 = vrot.slane %v10830_v55, %v16143_v6  ;;  %v10860_v30 = vrot.slane %v10832_v23, %v16143_v6 }
 0x4a0   :  { %v10827_v27 = vrot.slane %v10813_v22, %v16143_v6  ;;  %v10853_v43 = vrot.slane %v10831_v3, %v16143_v6  ;;  %v9382_v42 = vrot.slane %v9368_v28, %v16143_v6  ;;  %v9383_v10 = vcombine.high %v9375_v21, %v9375_v21 }
 0x4a1   :  { %v10861_v12 = vcombine.low %v10839_v59, %v10846_v25  ;;  %v9391_v47 = vrot.slane %v9375_v21, %v16143_v6  ;;  %v14799_v29 = vadd.f32 %v19616_v46, %v19402_v52  ;;  %v14800_v5 = vadd.f32 %v19630_v31, %v19404_v9 }
 0x4a2   :  { %v10828_v44 = vcombine.low %v10820_v51, %v10827_v27  ;;  %v10862_v16 = vcombine.low %v10853_v43, %v10860_v30  ;;  %v9384_v20 = vcombine.high %v9382_v42, %v9382_v42  ;;  %v9398_v1 = vrot.slane %v9382_v42, %v16143_v6 }
 0x4a3   :  { %v10869_v13 = vrot.slane %v10861_v12, %v16143_v6  ;;  %v9405_v40 = vrot.slane %v9383_v10, %v16143_v6  ;;  %v9413_v32 = vcombine.high %v9391_v47, %v9391_v47  ;;  %v10878_v55 = vcombine.low %v9367_v33, %v9391_v47 }
 0x4a4   :  { %v11614_v23 = vsel %vm11541_vm3, %v10828_v44, -inf  ;;  %v10876_v22 = vrot.slane %v10862_v16, %v16143_v6  ;;  %v9412_v52 = vrot.slane %v9384_v20, %v16143_v6  ;;  %v9417_v46 = vcombine.high %v14799_v29, %v14799_v29 }
 0x4a5   :  { %v11615_v3 = vmax.f32 %v11613_v58, %v11614_v23  ;;  %v9415_v9 = vcombine.high %v9405_v40, %v9405_v40  ;;  %v10879_v31 = vcombine.low %v9405_v40, %v9413_v32  ;;  %v10887_v28 = vrot.slane %v10878_v55, %v16143_v6 }
 0x4a6   :  { %v10877_v21 = vcombine.low %v10869_v13, %v10876_v22  ;;  %v10908_v51 = vrot.slane %v9412_v52, %v16143_v6  ;;  %v14071_v59 = vcombine.high %v9398_v1, %v9412_v52  ;;  %v9424_v25 = vrot.slane %v14799_v29, %v16143_v6 }
 0x4a7   :  { %v11616_v30 = vrot.slane %v11615_v3, 4  ;;  %v10880_v33 = vcombine.low %v9415_v9, %v9398_v1  ;;  %v10894_v27 = vrot.slane %v10879_v31, %v16143_v6  ;;  %v9431_v43 = vrot.slane %v9417_v46, %v16143_v6 }
 0x4a8   :  { %v11622_v42 = vsel %vm4984_vm2, %v10877_v21, -inf  ;;  %v10936_v58 = vrot.slane %v14071_v59, %v16143_v6  ;;  %v9432_v10 = vcombine.high %v9424_v25, %v9424_v25  ;;  %v9440_v12 = vrot.slane %v9424_v25, %v16143_v6 }
 0x4a9   :  { %v11617_v47 = vmax.f32 %v11615_v3, %v11616_v30  ;;  %v10901_v44 = vrot.slane %v10880_v33, %v16143_v6  ;;  %v10909_v16 = vcombine.low %v10887_v28, %v10894_v27  ;;  %v9433_v20 = vcombine.high %v9431_v43, %v9431_v43 }
 0x4aa   :  { %v9447_v29 = vrot.slane %v9431_v43, %v16143_v6  ;;  %v9454_v1 = vrot.slane %v9432_v10, %v16143_v6  ;;  %v9466_v13 = vcombine.high %v14800_v5, %v14800_v5  ;;  %v9473_v40 = vrot.slane %v14800_v5, %v16143_v6 }
 0x4ab   :  { %v11618_v32 = vrot.slane %v11617_v47, 2  ;;  %v10910_v55 = vcombine.low %v10901_v44, %v10908_v51  ;;  %v10917_v23 = vrot.slane %v10909_v16, %v16143_v6  ;;  %v9461_v22 = vrot.slane %v9433_v20, %v16143_v6 }
 0x4ac   :  { %v10927_v52 = vcombine.low %v9440_v12, %v9454_v1  ;;  %v14072_v46 = vcombine.high %v9440_v12, %v9454_v1  ;;  %v9480_v3 = vrot.slane %v9466_v13, %v16143_v6  ;;  %v9481_v9 = vcombine.high %v9473_v40, %v9473_v40 }
 0x4ad   :  { %v19811_v31 = vmax.f32 %v11617_v47, %v11618_v32  ;;  %v10924_v28 = vrot.slane %v10910_v55, %v16143_v6  ;;  %v10929_v21 = vcombine.low %v9447_v29, %v9461_v22  ;;  %v14073_v59 = vcombine.high %v9447_v29, %v9461_v22 }
 0x4ae   :  { %v10943_v25 = vrot.slane %v10927_v52, %v16143_v6  ;;  %v10950_v5 = vrot.slane %v14072_v46, %v16143_v6  ;;  %v9482_v51 = vcombine.high %v9480_v3, %v9480_v3  ;;  %v9489_v30 = vrot.slane %v9473_v40, %v16143_v6 }
 0x4af   :  { %v11620_v33 = vrot.slane %v19811_v31, 1  ;;  %v10925_v27 = vcombine.low %v10917_v23, %v10924_v28  ;;  %v10957_v43 = vrot.slane %v10929_v21, %v16143_v6  ;;  %v10984_v10 = vrot.slane %v14073_v59, %v16143_v6 }
 0x4b0   :  { %v10958_v12 = vcombine.low %v10936_v58, %v10943_v25  ;;  %v9496_v47 = vrot.slane %v9480_v3, %v16143_v6  ;;  %v9503_v44 = vrot.slane %v9481_v9, %v16143_v6  ;;  %v9510_v16 = vrot.slane %v9482_v51, %v16143_v6 }
 0x4b1   :  { %v11623_v20 = vsel %vm11541_vm3, %v10925_v27, -inf  ;;  %v10959_v29 = vcombine.low %v10950_v5, %v10957_v43  ;;  %v14801_v1 = vadd.f32 %v19640_v37, %v19406_v35  ;;  %v14802_v13 = vadd.f32 %v19654_v48, %v19408_v62 }
 0x4b2   :  { %v11624_v40 = vmax.f32 %v11622_v42, %v11623_v20  ;;  %v10966_v32 = vrot.slane %v10958_v12, %v16143_v6  ;;  %v9512_v55 = vcombine.high %v9496_v47, %v9496_v47  ;;  %v10976_v58 = vcombine.low %v9489_v30, %v9503_v44 }
 0x4b3   :  { %v10973_v23 = vrot.slane %v10959_v29, %v16143_v6  ;;  %v14074_v22 = vcombine.high %v9489_v30, %v9503_v44  ;;  %v11005_v52 = vrot.slane %v9496_v47, %v16143_v6  ;;  %v9514_v46 = vcombine.high %v9510_v16, %v9510_v16 }
 0x4b4   :  { %v11625_v3 = vrot.slane %v11624_v40, 4  ;;  %v10991_v9 = vrot.slane %v10976_v58, %v16143_v6  ;;  %v11023_v28 = vcombine.low %v9510_v16, %v9512_v55  ;;  %v9515_v21 = vcombine.high %v14801_v1, %v14801_v1 }
 0x4b5   :  { %v10974_v35 = vcombine.low %v10966_v32, %v10973_v23  ;;  %v10998_v37 = vrot.slane %v14074_v22, %v16143_v6  ;;  %v9522_v62 = vrot.slane %v14801_v1, %v16143_v6  ;;  %v9564_v48 = vcombine.high %v14802_v13, %v14802_v13 }
 0x4b6   :  { %v11626_v42 = vmax.f32 %v11624_v40, %v11625_v3  ;;  %v11006_v59 = vcombine.low %v10984_v10, %v10991_v9  ;;  %v9529_v25 = vrot.slane %v9515_v21, %v16143_v6  ;;  %v11033_v5 = vrot.slane %v11023_v28, %v16143_v6 }
 0x4b7   :  { %v11631_v51 = vsel %vm4984_vm2, %v10974_v35, -inf  ;;  %v11007_v30 = vcombine.low %v10998_v37, %v11005_v52  ;;  %v9530_v27 = vcombine.high %v9522_v62, %v9522_v62  ;;  %v9538_v43 = vrot.slane %v9522_v62, %v16143_v6 }
 0x4b8   :  { %v11627_v12 = vrot.slane %v11626_v42, 2  ;;  %v11014_v47 = vrot.slane %v11006_v59, %v16143_v6  ;;  %v9531_v44 = vcombine.high %v9529_v25, %v9529_v25  ;;  %v9545_v16 = vrot.slane %v9529_v25, %v16143_v6 }
 0x4b9   :  { %v11021_v20 = vrot.slane %v11007_v30, %v16143_v6  ;;  %v9552_v10 = vrot.slane %v9530_v27, %v16143_v6  ;;  %v9560_v29 = vcombine.high %v9538_v43, %v9538_v43  ;;  %v11024_v1 = vcombine.low %v9514_v46, %v9538_v43 }
 0x4ba   :  { %v19842_v40 = vmax.f32 %v11626_v42, %v11627_v12  ;;  %v9559_v32 = vrot.slane %v9531_v44, %v16143_v6  ;;  %v9561_v55 = vcombine.high %v9545_v16, %v9545_v16  ;;  %v9571_v58 = vrot.slane %v14802_v13, %v16143_v6 }
 0x4bb   :  { %v11022_v23 = vcombine.low %v11014_v47, %v11021_v20  ;;  %v9562_v22 = vcombine.high %v9552_v10, %v9552_v10  ;;  %v11025_v52 = vcombine.low %v9552_v10, %v9560_v29  ;;  %v11040_v3 = vrot.slane %v11024_v1, %v16143_v6 }
 0x4bc   :  { %v11629_v9 = vrot.slane %v19842_v40, 1  ;;  %v11072_v28 = vcombine.low %v9559_v32, %v9561_v55  ;;  %v9563_v21 = vcombine.high %v9559_v32, %v9559_v32  ;;  %v9578_v35 = vrot.slane %v9564_v48, %v16143_v6 }
 0x4bd   :  { %v11632_v46 = vsel %vm11541_vm3, %v11022_v23, -inf  ;;  %v11026_v37 = vcombine.low %v9562_v22, %v9545_v16  ;;  %v11047_v62 = vrot.slane %v11025_v52, %v16143_v6  ;;  %v11055_v42 = vcombine.low %v11033_v5, %v11040_v3 }
 0x4be   :  { %v11633_v59 = vmax.f32 %v11631_v51, %v11632_v46  ;;  %v9579_v25 = vcombine.high %v9571_v58, %v9571_v58  ;;  %v9580_v13 = vcombine.high %v9578_v35, %v9578_v35  ;;  %v9587_v30 = vrot.slane %v9571_v58, %v16143_v6 }
 0x4bf   :  { %v11054_v27 = vrot.slane %v11026_v37, %v16143_v6  ;;  %v11063_v43 = vrot.slane %v11055_v42, %v16143_v6  ;;  %v9594_v12 = vrot.slane %v9578_v35, %v16143_v6  ;;  %v11081_v47 = vrot.slane %v11072_v28, %v16143_v6 }
 0x4c0   :  { %v11634_v48 = vrot.slane %v11633_v59, 4  ;;  %v9601_v44 = vrot.slane %v9579_v25, %v16143_v6  ;;  %v9608_v16 = vrot.slane %v9580_v13, %v16143_v6  ;;  %v9609_v20 = vcombine.high %v9587_v30, %v9587_v30 }
 0x4c1   :  { %v11056_v5 = vcombine.low %v11047_v62, %v11054_v27  ;;  %v11073_v51 = vcombine.low %v9563_v21, %v9587_v30  ;;  %v14803_v10 = vadd.f32 %v19663_v45, %v19410_v15  ;;  %v14804_v29 = vadd.f32 %v19686_v41, %v19415_v26 }
 0x4c2   :  { %v11635_v1 = vmax.f32 %v11633_v59, %v11634_v48  ;;  %v9611_v32 = vcombine.high %v9601_v44, %v9601_v44  ;;  %v11074_v55 = vcombine.low %v9601_v44, %v9609_v20  ;;  %v11120_v58 = vcombine.low %v9594_v12, %v9608_v16 }
 0x4c3   :  { %v11070_v23 = vrot.slane %v11056_v5, %v16143_v6  ;;  %v11088_v22 = vrot.slane %v11073_v51, %v16143_v6  ;;  %v14075_v52 = vcombine.high %v9594_v12, %v9608_v16  ;;  %v9613_v3 = vcombine.high %v14803_v10, %v14803_v10 }
 0x4c4   :  { %v11636_v28 = vrot.slane %v11635_v1, 2  ;;  %v11095_v35 = vrot.slane %v11074_v55, %v16143_v6  ;;  %v11102_v21 = vrot.slane %v9611_v32, %v16143_v6  ;;  %v11130_v15 = vrot.slane %v11120_v58, %v16143_v6 }
 0x4c5   :  { %v11071_v45 = vcombine.low %v11063_v43, %v11070_v23  ;;  %v11103_v46 = vcombine.low %v11081_v47, %v11088_v22  ;;  %v11137_v26 = vrot.slane %v14075_v52, %v16143_v6  ;;  %v9620_v41 = vrot.slane %v14803_v10, %v16143_v6 }
 0x4c6   :  { %v19869_v37 = vmax.f32 %v11635_v1, %v11636_v28  ;;  %v11104_v62 = vcombine.low %v11095_v35, %v11102_v21  ;;  %v9627_v42 = vrot.slane %v9613_v3, %v16143_v6  ;;  %v9662_v59 = vcombine.high %v14804_v29, %v14804_v29 }
 0x4c7   :  { %v11640_v25 = vsel %vm4984_vm2, %v11071_v45, -inf  ;;  %v11111_v13 = vrot.slane %v11103_v46, %v16143_v6  ;;  %v11152_v30 = vcombine.low %v11130_v15, %v11137_v26  ;;  %v9628_v27 = vcombine.high %v9620_v41, %v9620_v41 }
 0x4c8   :  { %v11118_v12 = vrot.slane %v11104_v62, %v16143_v6  ;;  %v9629_v43 = vcombine.high %v9627_v42, %v9627_v42  ;;  %v9636_v47 = vrot.slane %v9620_v41, %v16143_v6  ;;  %v9643_v48 = vrot.slane %v9627_v42, %v16143_v6 }
 0x4c9   :  { %v11160_v44 = vrot.slane %v11152_v30, %v16143_v6  ;;  %v9650_v16 = vrot.slane %v9628_v27, %v16143_v6  ;;  %v9669_v20 = vrot.slane %v14804_v29, %v16143_v6  ;;  %v9676_v5 = vrot.slane %v9662_v59, %v16143_v6 }
 0x4ca   :  { %v11119_v51 = vcombine.low %v11111_v13, %v11118_v12  ;;  %v9657_v10 = vrot.slane %v9629_v43, %v16143_v6  ;;  %v14805_v1 = vadd.f32 %v19692_v50, %v19418_v7  ;;  %v14806_v32 = vadd.f32 %v19709_v17, %v19432_v19 }
 0x4cb   :  { %v11122_v55 = vcombine.low %v9636_v47, %v9650_v16  ;;  %v14076_v58 = vcombine.high %v9636_v47, %v9650_v16  ;;  %v9677_v23 = vcombine.high %v9669_v20, %v9669_v20  ;;  %v9678_v22 = vcombine.high %v9676_v5, %v9676_v5 }
 0x4cc   :  { %v11641_v52 = vsel %vm11541_vm3, %v11119_v51, -inf  ;;  %v11169_v3 = vcombine.low %v9643_v48, %v9657_v10  ;;  %v14077_v28 = vcombine.high %v9643_v48, %v9657_v10  ;;  %v9685_v29 = vrot.slane %v9669_v20, %v16143_v6 }
 0x4cd   :  { %v11642_v35 = vmax.f32 %v11640_v25, %v11641_v52  ;;  %v11144_v21 = vrot.slane %v11122_v55, %v16143_v6  ;;  %v11151_v15 = vrot.slane %v14076_v58, %v16143_v6  ;;  %v9692_v7 = vrot.slane %v9676_v5, %v16143_v6 }
 0x4ce   :  { %v11178_v50 = vrot.slane %v11169_v3, %v16143_v6  ;;  %v11185_v19 = vrot.slane %v14077_v28, %v16143_v6  ;;  %v9699_v17 = vrot.slane %v9677_v23, %v16143_v6  ;;  %v9706_v45 = vrot.slane %v9678_v22, %v16143_v6 }
 0x4cf   :  { %v11643_v46 = vrot.slane %v11642_v35, 4  ;;  %v11153_v26 = vcombine.low %v11144_v21, %v11151_v15  ;;  %v9707_v41 = vcombine.high %v9685_v29, %v9685_v29  ;;  %v9708_v62 = vcombine.high %v9692_v7, %v9692_v7 }
 0x4d0   :  { %v11200_v42 = vcombine.low %v11178_v50, %v11185_v19  ;;  %v9709_v59 = vcombine.high %v9699_v17, %v9699_v17  ;;  %v11171_v25 = vcombine.low %v9685_v29, %v9699_v17  ;;  %v9710_v13 = vcombine.high %v9706_v45, %v9706_v45 }
 0x4d1   :  { %v19895_v30 = vmax.f32 %v11642_v35, %v11643_v46  ;;  %v11167_v27 = vrot.slane %v11153_v26, %v16143_v6  ;;  %v11199_v12 = vrot.slane %v9707_v41, %v16143_v6  ;;  %v11218_v43 = vcombine.low %v9706_v45, %v9708_v62 }
 0x4d2   :  { %v11208_v47 = vrot.slane %v11200_v42, %v16143_v6  ;;  %v11192_v48 = vrot.slane %v11171_v25, %v16143_v6  ;;  %v11217_v16 = vcombine.low %v9709_v59, %v9692_v7  ;;  %v9711_v20 = vcombine.high %v14805_v1, %v14805_v1 }
 0x4d3   :  { %v11645_v5 = vrot.slane %v19895_v30, 2  ;;  %v11168_v51 = vcombine.low %v11160_v44, %v11167_v27  ;;  %v11234_v10 = vrot.slane %v11218_v43, %v16143_v6  ;;  %v9718_v55 = vrot.slane %v14805_v1, %v16143_v6 }
 0x4d4   :  { %v11201_v58 = vcombine.low %v11192_v48, %v11199_v12  ;;  %v11227_v23 = vrot.slane %v11217_v16, %v16143_v6  ;;  %v9725_v22 = vrot.slane %v9711_v20, %v16143_v6  ;;  %v9760_v52 = vcombine.high %v14806_v32, %v14806_v32 }
 0x4d5   :  { %v11649_v3 = vsel %vm4984_vm2, %v11168_v51, -inf  ;;  %v9726_v28 = vcombine.high %v9718_v55, %v9718_v55  ;;  %v9734_v29 = vrot.slane %v9718_v55, %v16143_v6  ;;  %v9767_v35 = vrot.slane %v14806_v32, %v16143_v6 }
 0x4d6   :  { %v11215_v21 = vrot.slane %v11201_v58, %v16143_v6  ;;  %v11249_v44 = vcombine.low %v11227_v23, %v11234_v10  ;;  %v9727_v15 = vcombine.high %v9725_v22, %v9725_v22  ;;  %v9741_v7 = vrot.slane %v9725_v22, %v16143_v6 }
 0x4d7   :  { %v9748_v1 = vrot.slane %v9726_v28, %v16143_v6  ;;  %v9756_v50 = vcombine.high %v9734_v29, %v9734_v29  ;;  %v11219_v19 = vcombine.low %v9710_v13, %v9734_v29  ;;  %v9774_v17 = vrot.slane %v9760_v52, %v16143_v6 }
 0x4d8   :  { %v11216_v45 = vcombine.low %v11208_v47, %v11215_v21  ;;  %v11257_v46 = vrot.slane %v11249_v44, %v16143_v6  ;;  %v9755_v26 = vrot.slane %v9727_v15, %v16143_v6  ;;  %v9757_v41 = vcombine.high %v9741_v7, %v9741_v7 }
 0x4d9   :  { %v9758_v62 = vcombine.high %v9748_v1, %v9748_v1  ;;  %v11220_v32 = vcombine.low %v9748_v1, %v9756_v50  ;;  %v11241_v42 = vrot.slane %v11219_v19, %v16143_v6  ;;  %v9775_v59 = vcombine.high %v9767_v35, %v9767_v35 }
 0x4da   :  { %v11650_v25 = vsel %vm11541_vm3, %v11216_v45, -inf  ;;  %v11267_v27 = vcombine.low %v9755_v26, %v9757_v41  ;;  %v9759_v12 = vcombine.high %v9755_v26, %v9755_v26  ;;  %v9776_v43 = vcombine.high %v9774_v17, %v9774_v17 }
 0x4db   :  { %v11651_v48 = vmax.f32 %v11649_v3, %v11650_v25  ;;  %v11248_v13 = vrot.slane %v11220_v32, %v16143_v6  ;;  %v11266_v16 = vcombine.low %v9758_v62, %v9741_v7  ;;  %v9783_v47 = vrot.slane %v9767_v35, %v16143_v6 }
 0x4dc   :  { %v11282_v20 = vrot.slane %v11267_v27, %v16143_v6  ;;  %v9790_v51 = vrot.slane %v9774_v17, %v16143_v6  ;;  %v9797_v10 = vrot.slane %v9775_v59, %v16143_v6  ;;  %v9804_v55 = vrot.slane %v9776_v43, %v16143_v6 }
 0x4dd   :  { %v11652_v58 = vrot.slane %v11651_v48, 4  ;;  %v11250_v23 = vcombine.low %v11241_v42, %v11248_v13  ;;  %v11275_v22 = vrot.slane %v11266_v16, %v16143_v6  ;;  %v11268_v52 = vcombine.low %v9759_v12, %v9783_v47 }
 0x4de   :  { %v11296_v3 = vrot.slane %v9797_v10, %v16143_v6  ;;  %v14078_v28 = vcombine.high %v9783_v47, %v9797_v10  ;;  %v11315_v29 = vcombine.low %v9790_v51, %v9804_v55  ;;  %v14079_v21 = vcombine.high %v9790_v51, %v9804_v55 }
 0x4df   :  { %v19925_v44 = vmax.f32 %v11651_v48, %v11652_v58  ;;  %v11264_v35 = vrot.slane %v11250_v23, %v16143_v6  ;;  %v11297_v15 = vcombine.low %v11275_v22, %v11282_v20  ;;  %v11289_v7 = vrot.slane %v11268_v52, %v16143_v6 }
 0x4e0   :  { %v11324_v1 = vrot.slane %v14078_v28, %v16143_v6  ;;  %v11331_v50 = vrot.slane %v11315_v29, %v16143_v6  ;;  %v11338_v19 = vrot.slane %v14079_v21, %v16143_v6  ;;  %v14807_v17 = vadd.f32 %v19714_v60, %v19437_v53 }
 0x4e1   :  { %v11265_v45 = vcombine.low %v11257_v46, %v11264_v35  ;;  %v11305_v26 = vrot.slane %v11297_v15, %v16143_v6  ;;  %v11298_v41 = vcombine.low %v11289_v7, %v11296_v3  ;;  %v14808_v62 = vadd.f32 %v19733_v54, %v19457_v49 }
 0x4e2   :  { %v11346_v32 = vcombine.low %v11324_v1, %v11331_v50  ;;  %v9809_v42 = vcombine.high %v14807_v17, %v14807_v17  ;;  %v9816_v59 = vrot.slane %v14807_v17, %v16143_v6  ;;  %v14809_v25 = vadd.f32 %v19746_v57, %v19463_v63 }
 0x4e3   :  { %v11658_v27 = vsel %vm4984_vm2, %v11265_v45, -inf  ;;  %v11312_v12 = vrot.slane %v11298_v41, %v16143_v6  ;;  %v9858_v43 = vcombine.high %v14808_v62, %v14808_v62  ;;  %v9865_v53 = vrot.slane %v14808_v62, %v16143_v6 }
 0x4e4   :  { %v11354_v60 = vrot.slane %v11346_v32, %v16143_v6  ;;  %v9823_v46 = vrot.slane %v9809_v42, %v16143_v6  ;;  %v9824_v48 = vcombine.high %v9816_v59, %v9816_v59  ;;  %v9832_v49 = vrot.slane %v9816_v59, %v16143_v6 }
 0x4e5   :  { %v11313_v54 = vcombine.low %v11305_v26, %v11312_v12  ;;  %v9872_v13 = vrot.slane %v9858_v43, %v16143_v6  ;;  %v9873_v16 = vcombine.high %v9865_v53, %v9865_v53  ;;  %v9881_v63 = vrot.slane %v9865_v53, %v16143_v6 }
 0x4e6   :  { %v9825_v57 = vcombine.high %v9823_v46, %v9823_v46  ;;  %v9839_v47 = vrot.slane %v9823_v46, %v16143_v6  ;;  %v9846_v20 = vrot.slane %v9824_v48, %v16143_v6  ;;  %v9907_v51 = vcombine.high %v14809_v25, %v14809_v25 }
 0x4e7   :  { %v11659_v10 = vsel %vm11541_vm3, %v11313_v54, -inf  ;;  %v9874_v55 = vcombine.high %v9872_v13, %v9872_v13  ;;  %v9888_v58 = vrot.slane %v9872_v13, %v16143_v6  ;;  %v9895_v23 = vrot.slane %v9873_v16, %v16143_v6 }
 0x4e8   :  { %v19953_v22 = vmax.f32 %v11658_v27, %v11659_v10  ;;  %v9853_v52 = vrot.slane %v9825_v57, %v16143_v6  ;;  %v11317_v3 = vcombine.low %v9832_v49, %v9846_v20  ;;  %v14080_v28 = vcombine.high %v9832_v49, %v9846_v20 }
 0x4e9   :  { %v9902_v29 = vrot.slane %v9874_v55, %v16143_v6  ;;  %v9903_v21 = vcombine.high %v9881_v63, %v9881_v63  ;;  %v9904_v35 = vcombine.high %v9888_v58, %v9888_v58  ;;  %v9905_v15 = vcombine.high %v9895_v23, %v9895_v23 }
 0x4ea   :  { %v11661_v7 = vrot.slane %v19953_v22, 4  ;;  %v11345_v1 = vrot.slane %v11317_v3, %v16143_v6  ;;  %v11364_v50 = vcombine.low %v9839_v47, %v9853_v52  ;;  %v14081_v17 = vcombine.high %v9839_v47, %v9853_v52 }
 0x4eb   :  { %v11372_v45 = vrot.slane %v14080_v28, %v16143_v6  ;;  %v11393_v26 = vrot.slane %v9881_v63, %v16143_v6  ;;  %v11411_v41 = vcombine.low %v9895_v23, %v9903_v21  ;;  %v11412_v62 = vcombine.low %v9905_v15, %v9888_v58 }
 0x4ec   :  { %v11347_v32 = vcombine.low %v11338_v19, %v11345_v1  ;;  %v11379_v42 = vrot.slane %v11364_v50, %v16143_v6  ;;  %v11386_v59 = vrot.slane %v14081_v17, %v16143_v6  ;;  %v11413_v27 = vcombine.low %v9902_v29, %v9904_v35 }
 0x4ed   :  { %v11421_v12 = vrot.slane %v11411_v41, %v16143_v6  ;;  %v11428_v43 = vrot.slane %v11412_v62, %v16143_v6  ;;  %v9906_v53 = vcombine.high %v9902_v29, %v9902_v29  ;;  %v9914_v46 = vrot.slane %v14809_v25, %v16143_v6 }
 0x4ee   :  { %v11361_v48 = vrot.slane %v11347_v32, %v16143_v6  ;;  %v11394_v49 = vcombine.low %v11372_v45, %v11379_v42  ;;  %v11395_v54 = vcombine.low %v11386_v59, %v11393_v26  ;;  %v9921_v13 = vrot.slane %v9907_v51, %v16143_v6 }
 0x4ef   :  { %v11443_v16 = vcombine.low %v11421_v12, %v11428_v43  ;;  %v9922_v19 = vcombine.high %v9914_v46, %v9914_v46  ;;  %v9930_v63 = vrot.slane %v9914_v46, %v16143_v6  ;;  %v11435_v57 = vrot.slane %v11413_v27, %v16143_v6 }
 0x4f0   :  { %v11362_v47 = vcombine.low %v11354_v60, %v11361_v48  ;;  %v11402_v20 = vrot.slane %v11394_v49, %v16143_v6  ;;  %v11409_v10 = vrot.slane %v11395_v54, %v16143_v6  ;;  %v9923_v55 = vcombine.high %v9921_v13, %v9921_v13 }
 0x4f1   :  { %v11451_v25 = vrot.slane %v11443_v16, %v16143_v6  ;;  %v9937_v58 = vrot.slane %v9921_v13, %v16143_v6  ;;  %v9944_v23 = vrot.slane %v9922_v19, %v16143_v6  ;;  %v9952_v52 = vcombine.high %v9930_v63, %v9930_v63 }
 0x4f2   :  { %v11410_v51 = vcombine.low %v11402_v20, %v11409_v10  ;;  %v11667_v3 = vsel %vm4984_vm2, %v11362_v47, -inf  ;;  %v9951_v28 = vrot.slane %v9923_v55, %v16143_v6  ;;  %v11414_v29 = vcombine.low %v9906_v53, %v9930_v63 }
 0x4f3   :  { %v9953_v21 = vcombine.high %v9937_v58, %v9937_v58  ;;  %v9954_v60 = vcombine.high %v9944_v23, %v9944_v23  ;;  %v11460_v35 = vcombine.low %v9944_v23, %v9952_v52  ;;  %v19980_v15 = vmax.f32 %v19493_v0, %v11548_v34 }
 0x4f4   :  { %v11668_v1 = vsel %vm11541_vm3, %v11410_v51, -inf  ;;  %v9955_v50 = vcombine.high %v9951_v28, %v9951_v28  ;;  %v11442_v17 = vrot.slane %v11414_v29, %v16143_v6  ;;  %v19987_v45 = vmax.f32 %v19537_v56, %v11557_v8 }
 0x4f5   :  { %v11669_v26 = vmax.f32 %v11667_v3, %v11668_v1  ;;  %v11461_v41 = vcombine.low %v9954_v60, %v9937_v58  ;;  %v11462_v62 = vcombine.low %v9951_v28, %v9953_v21  ;;  %v11469_v32 = vrot.slane %v11460_v35, %v16143_v6 }
 0x4f6   :  { %v11444_v42 = vcombine.low %v11435_v57, %v11442_v17  ;;  %v11490_v59 = vrot.slane %v9955_v50, %v16143_v6  ;;  %v11566_v0 = vrot.slane %v19574_v2, 1  ;;  %v11574_v34 = vmax.f32 %v19612_v4, %v11573_v36 }
 0x4f7   :  { %v11670_v27 = vrot.slane %v11669_v26, 4  ;;  %v11476_v12 = vrot.slane %v11461_v41, %v16143_v6  ;;  %v11483_v56 = vrot.slane %v11462_v62, %v16143_v6  ;;  %v11582_v8 = vrot.slane %v19647_v38, 2 }
 0x4f8   :  { %v11458_v43 = vrot.slane %v11444_v42, %v16143_v6  ;;  %v11567_v53 = vmax.f32 %v19574_v2, %v11566_v0  ;;  %v11575_v46 = vrot.slane %v11574_v34, 1  ;;  %v21500_v48 = vrot.slane %v19683_v61, 4 }
 0x4f9   :  { %v11491_v54 = vcombine.low %v11469_v32, %v11476_v12  ;;  %v11492_v13 = vcombine.low %v11483_v56, %v11490_v59  ;;  %v11583_v4 = vmax.f32 %v19647_v38, %v11582_v8  ;;  %v11599_v36 = vmax.f32 %v19718_v14, %v11598_v24 }
 0x4fa   :  { %v11590_v49 = vmax.f32 %v19683_v61, %v21500_v48  ;;  %v11459_v16 = vcombine.low %v11451_v25, %v11458_v43  ;;  %v11576_v19 = vmax.f32 %v11574_v34, %v11575_v46  ;;  %v11604_v57 = vsel %vm4984_vm2, %v19743_v11, -inf }
 0x4fb   :  { %v11499_v2 = vrot.slane %v11491_v54, %v16143_v6  ;;  %v11506_v47 = vrot.slane %v11492_v13, %v16143_v6  ;;  %v11584_v20 = vrot.slane %v11583_v4, 1  ;;  %v11600_v61 = vrot.slane %v11599_v36, 2 }
 0x4fc   :  { %v11591_v63 = vrot.slane %v11590_v49, 2  ;;  %v11605_v38 = vsel %vm11541_vm3, %v19749_v39, -inf  ;;  %v11621_v14 = vmax.f32 %v19811_v31, %v11620_v33  ;;  %v11630_v24 = vmax.f32 %v19842_v40, %v11629_v9 }
 0x4fd   :  { %v11507_v55 = vcombine.low %v11499_v2, %v11506_v47  ;;  %v11585_v11 = vmax.f32 %v11583_v4, %v11584_v20  ;;  %v11601_v25 = vmax.f32 %v11599_v36, %v11600_v61  ;;  %v11606_v58 = vmax.f32 %v11604_v57, %v11605_v38 }
 0x4fe   :  { %v11592_v10 = vmax.f32 %v11590_v49, %v11591_v63  ;;  %v11638_v6 = vrot.slane %v19869_v37, 1  ;;  %v11646_v52 = vmax.f32 %v19895_v30, %v11645_v5  ;;  %v11654_v39 = vrot.slane %v19925_v44, 2  ;;  %v14082_v30 = vld [vmem:[#allocation15] ss:$0 sm:$0xff] }
 0x4ff   :  { %v11602_v51 = vrot.slane %v11601_v25, 1  ;;  %v11607_v3 = vrot.slane %v11606_v58, 4  ;;  %v11662_v31 = vmax.f32 %v19953_v22, %v11661_v7  ;;  %v11671_v33 = vmax.f32 %v11669_v26, %v11670_v27 }
 0x500   :  { %v11593_v23 = vrot.slane %v11592_v10, 1  ;;  %v11639_v9 = vmax.f32 %v19869_v37, %v11638_v6  ;;  %v11647_v28 = vrot.slane %v11646_v52, 1  ;;  %v11655_v29 = vmax.f32 %v19925_v44, %v11654_v39 }
 0x501   :  { %v11603_v21 = vmax.f32 %v11601_v25, %v11602_v51  ;;  %v11608_v60 = vmax.f32 %v11606_v58, %v11607_v3  ;;  %v11663_v35 = vrot.slane %v11662_v31, 2  ;;  %v11672_v1 = vrot.slane %v11671_v33, 2 }
 0x502   :  { %v11594_v40 = vmax.f32 %v11592_v10, %v11593_v23  ;;  %v11648_v5 = vmax.f32 %v11646_v52, %v11647_v28  ;;  %v11656_v50 = vrot.slane %v11655_v29, 1  ;;  %v11676_v17 = vsel %vm4984_vm2, %v11459_v16, -inf  ;;  %v15064_v23 = vld [vmem:[#allocation16 + $0x8] ss:$0 sps:$4 sm:$0xff]  }
 0x503   :  { %v11677_v41 = vsel %vm11541_vm3, %v11507_v55, -inf  ;;  %v11609_v62 = vrot.slane %v11608_v60, 2  ;;  %v11664_v22 = vmax.f32 %v11662_v31, %v11663_v35  ;;  %v11673_v7 = vmax.f32 %v11671_v33, %v11672_v1 }
 0x504   :  { %v11678_v26 = vmax.f32 %v11676_v17, %v11677_v41  ;;  %v11657_v32 = vmax.f32 %v11655_v29, %v11656_v50  ;;  %v11692_v37 = vadd.f32 %v14082_v30, %v19980_v15  ;;  %v11693_v44 = vadd.f32 %v14082_v30, %v19987_v45 }
 0x505   :  { %v11694_v42 = vadd.f32 %v14082_v30, %v11567_v53  ;;  %v11610_v59 = vmax.f32 %v11608_v60, %v11609_v62  ;;  %v11665_v0 = vrot.slane %v11664_v22, 1  ;;  %v11674_v34 = vrot.slane %v11673_v7, 1 }
 0x506   :  { %v11679_v27 = vrot.slane %v11678_v26, 4  ;;  %v11695_v12 = vadd.f32 %v14082_v30, %v11576_v19  ;;  %v11696_v56 = vadd.f32 %v14082_v30, %v11585_v11  ;;  %v11697_v8 = vadd.f32 %v14082_v30, %v11594_v40 }
 0x507   :  { %v11698_v43 = vadd.f32 %v14082_v30, %v11603_v21  ;;  %v11611_v46 = vrot.slane %v11610_v59, 1  ;;  %v11666_v48 = vmax.f32 %v11664_v22, %v11665_v0  ;;  %v11675_v49 = vmax.f32 %v11673_v7, %v11674_v34  ;;  %v11708_v7 = vld [vmem:[#allocation7] sm:$0xff]  ;;  %v20052_v0 = vld [vmem:[#allocation19] sm:$0xff]  }
 0x508   :  { %v11680_v54 = vmax.f32 %v11678_v26, %v11679_v27  ;;  %v11700_v13 = vadd.f32 %v14082_v30, %v11621_v14  ;;  %v11701_v4 = vadd.f32 %v14082_v30, %v11630_v24  ;;  %v11702_v36 = vadd.f32 %v14082_v30, %v11639_v9  ;;  %v11709_v26 = vld [vmem:[#allocation7 + $0x8] sm:$0xff]  ;;  %v20055_v27 = vld [vmem:[#allocation19 + $0x8] sm:$0xff]  }
 0x509   :  { %v11703_v16 = vadd.f32 %v14082_v30, %v11648_v5  ;;  %v11612_v15 = vmax.f32 %v11610_v59, %v11611_v46  ;;  %v11704_v45 = vadd.f32 %v14082_v30, %v11657_v32  ;;  %v11705_v53 = vadd.f32 %v14082_v30, %v11666_v48 }
 0x50a   :  { %v11681_v63 = vrot.slane %v11680_v54, 2  ;;  %v11706_v57 = vadd.f32 %v14082_v30, %v11675_v49  ;;  %v11726_v2 = vrot.slane %v11693_v44, 7  ;;  %v11729_v47 = vrot.slane %v11694_v42, 6 }
 0x50b   :  { %v11699_v20 = vadd.f32 %v14082_v30, %v11612_v15  ;;  %v11732_v61 = vrot.slane %v11695_v12, 5  ;;  %v11735_v38 = vrot.slane %v11696_v56, 4  ;;  %v11738_v55 = vrot.slane %v11697_v8, 3  ;;  %v14083_v56 = vld [vmem:[#allocation18] ss:$0 sm:$0xff] }
 0x50c   :  { %v11682_v19 = vmax.f32 %v11680_v54, %v11681_v63  ;;  %v11728_v10 = vsel %vm11727_vm4, %v11726_v2, %v11692_v37  ;;  %v11741_v25 = vrot.slane %v11698_v43, 2  ;;  %v11747_v39 = vrot.slane %v11701_v4, 7 }
 0x50d   :  { %v11731_v24 = vsel %vm11730_vm5, %v11729_v47, %v11728_v10  ;;  %v11744_v58 = vrot.slane %v11699_v20, 1  ;;  %v11749_v3 = vrot.slane %v11702_v36, 6  ;;  %v11751_v31 = vrot.slane %v11703_v16, 5 }
 0x50e   :  { %v11683_v14 = vrot.slane %v11682_v19, 1  ;;  %v11734_v11 = vsel %vm11733_vm6, %v11732_v61, %v11731_v24  ;;  %v11753_v33 = vrot.slane %v11704_v45, 4  ;;  %v11748_v28 = vsel %vm11727_vm4, %v11747_v39, %v11700_v13 }
 0x50f   :  { %v11737_v52 = vsel %vm11736_vm7, %v11735_v38, %v11734_v11  ;;  %v11755_v29 = vrot.slane %v11705_v53, 3  ;;  %v11750_v60 = vsel %vm11730_vm5, %v11749_v3, %v11748_v28  ;;  %v11757_v35 = vrot.slane %v11706_v57, 2 }
 0x510   :  { %v11684_v6 = vmax.f32 %v11682_v19, %v11683_v14  ;;  %v11740_v51 = vsel %vm11739_vm8, %v11738_v55, %v11737_v52  ;;  %v11795_v1 = vsel %vm5030_vm1, %v15064_v23, 0  ;;  %v11752_v5 = vsel %vm11733_vm6, %v11751_v31, %v11750_v60 }
 0x511   :  { %v11743_v9 = vsel %vm11742_vm9, %v11741_v25, %v11740_v51  ;;  %14601 = vmatpush3.bf16.msra.mxu1 %v11795_v1  ;;  %v11754_v17 = vsel %vm11736_vm7, %v11753_v33, %v11752_v5  ;;  %v15729_v12 = vmov 0   ;;  %v21501_v49 = vlaneseq }
 0x512   :  { %v11707_v40 = vadd.f32 %v14082_v30, %v11684_v6  ;;  %v11746_v21 = vsel %vm11745_vm10, %v11744_v58, %v11743_v9  ;;  %14606 = vmatprep.subr.bf16.mxu1 %v20947_v18  ;;  %v11756_v30 = vsel %vm11739_vm8, %v11755_v29, %v11754_v17  ;;  %vm12803_vm8 = vcmask 1041408  }
 0x513   :  { %v11758_v41 = vsel %vm11742_vm9, %v11757_v35, %v11756_v30  ;;  %v20070_v54 = vand.u32 127, %v21501_v49  ;;  %vm12810_vm9 = vcmask 1045504  }
 0x514   :  { %v11759_v50 = vrot.slane %v11707_v40, 1 }
 0x515   :  { %v11850_v36 = vand.u32 31, %v20070_v54 }
 0x516   :  { %v11760_v62 = vsel %vm11745_vm10, %v11759_v50, %v11758_v41 }
 0x517   :  { %v15021_v22 = vpack.i.bf16 %v11760_v62, %v11746_v21  ;;  %vm20073_vm13 = vcmp.lt.s32.totalorder %v11850_v36, 16 }
 0x519   :  { %15022 = vrot.lane.b32.xlu0 %v15021_v22, %s15728_s12 }
 0x58b   :  { %v15023_v32 = vpop.permute.xlu0 %15022 }
 0x58c   :  { %v15025_v37 = vunpack.i.h.bf16 %v15023_v32  ;;  %v15024_v44 = vunpack.i.l.bf16 %v15023_v32 }
 0x58e   :  { %v11769_v42 = vsel %vm11767_vm11, %v11709_v26, %v15025_v37  ;;  %v11768_v59 = vsel %vm11767_vm11, %v11708_v7, %v15024_v44 }
 0x58f   :  { %v11770_v34 = vpack.c.bf16 %v11769_v42, %v11768_v59 }
 0x591   :  { %14603 = vmatmul.mubr.msk.bf16.vlgmr.msra.gmra.mrb[60].mxu1 %vm11790_vm12, %v11770_v34 }
 0x592   :  { %14607 = vmatpush3.bf16.msra.mxu1 %v20052_v0  ;;  %14610 = vmatprep.mubr.msk.bf16.mxu1 %vm15726_vm0, %v20947_v18 }
 0x593   :  { %14608 = vmatprep.subr.bf16.mxu1 %v20947_v18 }
 0x596   :  { %14609 = vmatpush3.bf16.msra.mxu1 %v20055_v27 }
 0x597   :  { %14614 = vmatprep.subr.bf16.mxu1 %v20947_v18 }
 0x599   :  { %14611 = vmatmul.mubr.bf16.vlgmr.msra.gmra.mrb[64].mxu1 %v15729_v12 }
 0x59a   :  { %14615 = vmatpush3.bf16.msra.mxu1 %v20052_v0  ;;  %14618 = vmatprep.mubr.msk.bf16.mxu1 %vm15726_vm0, %v20947_v18 }
 0x59b   :  { %14616 = vmatprep.subr.bf16.mxu1 %v20947_v18 }
 0x59e   :  { %14617 = vmatpush3.bf16.msra.mxu1 %v20055_v27 }
 0x59f   :  { %14622 = vmatprep.subr.bf16.mxu1 %v20947_v18 }
 0x664   :  { %v11831_v8 = vpop.f32.mrb[60].mxu1 }
 0x665   :  { %v11832_v43 = vadd.f32 %v14083_v56, %v11831_v8  ;;  %v14604_v46 = vpop.f32.mrb[61].mxu1 }
 0x666   :  { %v11834_v48 = vpop.f32.mrb[62].mxu1 }
 0x667   :  { %11838 = vst [vmem:[#allocation2] sm:$0xff] %v11832_v43  ;;  %v11835_v13 = vadd.f32 %v14083_v56, %v11834_v48  ;;  %v14605_v4 = vpop.f32.mrb[63].mxu1 }
 0x669   :  { %11839 = vst [vmem:[#allocation2 + $0x8] sm:$0xff] %v11835_v13 }
 0x66c   :  { %v11912_v16 = vpop.f32.mrb[64].mxu1 }
 0x66d   :  { %v14612_v15 = vpop.f32.mrb[65].mxu1 }
 0x66e   :  { %v11915_v45 = vpop.f32.mrb[66].mxu1  ;;  %v11859_v57 = vld [vmem:[#allocation2] sm:$0x3]  ;;  %v11953_v31 = vld [vmem:[#allocation2 + $0x2] sm:$0x3] }
 0x66f   :  { %v14613_v53 = vpop.f32.mrb[67].mxu1  ;;  %v12037_v59 = vld [vmem:[#allocation2 + $0x4] sm:$0x3] }
 0x670   :  { %v11860_v2 = vld [vmem:[#allocation2 + $0xe] sm:$0x3]  ;;  %v11954_v3 = vld [vmem:[#allocation2 + $0xc] sm:$0x3]  ;;  %v12038_v42 = vld [vmem:[#allocation2 + $0xa] sm:$0x3] }
 0x671   :  { %v11861_v47 = vsel %vm20073_vm13, %v11859_v57, %v11860_v2  ;;  %v11955_v33 = vsel %vm20073_vm13, %v11953_v31, %v11954_v3  ;;  %v12039_v34 = vsel %vm20073_vm13, %v12037_v59, %v12038_v42 }
 0x672   :  { %v11918_v19 = vadd.f32 %v11912_v16, %v11861_v47 }
 0x674   :  { %15077 = vtanh.f32 %v11918_v19  ;;  %v14089_v61 = vmul.f32 -1.442695, %v11918_v19 }
 0x676   :  { %15079 = vpow2.f32 %v14089_v61 }
 0x67e   :  { %v15078_v20 = vpop.eup %15077 }
 0x67f   :  { %11928 = vrot.lane.b32.xlu0 %v15078_v20, %s15706_s30 }
 0x680   :  { %v15080_v10 = vpop.eup %15079 }
 0x681   :  { %v11922_v38 = vadd.f32 1.0, %v15080_v10 }
 0x683   :  { %15081 = vrcp.f32 %v11922_v38  ;;  %v12122_v38 = vld [vmem:[#allocation2 + $0x8] sm:$0x3] }
 0x68d   :  { %v15082_v14 = vpop.eup %15081 }
 0x68e   :  { %v11926_v11 = vmul.f32 0.0, %v15082_v14 }
 0x6f1   :  { %v11929_v24 = vpop.permute.xlu0 %11928 }
 0x6f2   :  { %v11931_v55 = vmul.f32 %v15082_v14, %v11929_v24 }
 0x6f4   :  { %11933 = vrot.lane.b32.xlu1 %v11931_v55, %s15730_s1 }
 0x766   :  { %v11934_v25 = vpop.permute.xlu1 %11933 }
 0x767   :  { %v11936_v58 = vadd.f32 %v11934_v25, %v11926_v11 }
 0x769   :  { %15083 = vtanh.f32 %v11936_v58 }
 0x773   :  { %v15084_v23 = vpop.eup %15083 }
 0x774   :  { %11939 = vrot.lane.b32.xlu1 %v15084_v23, %s15706_s30 }
 0x7e6   :  { %v11940_v6 = vpop.permute.xlu1 %11939 }
 0x7e7   :  { %v20082_v52 = vmul.f32 %v15082_v14, %v11940_v6  ;;  %v12121_v14 = vld [vmem:[#allocation2 + $0x6] sm:$0x3] }
 0x7e8   :  { %v12123_v24 = vsel %vm20073_vm13, %v12121_v14, %v12122_v38 }
 0x7e9   :  { %v11956_v39 = vpack.c.bf16 %v20082_v52, %v20082_v52 }
 0x7eb   :  { %11958 = vrot.lane.b32.xlu0 %v11956_v39, %s15730_s1 }
 0x85d   :  { %v11959_v51 = vpop.permute.xlu0 %11958 }
 0x85e   :  { %14619 = vmatmul.mubr.msk.bf16.vlgmr.msra.gmra.mrb[68].mxu1 %vm11874_vm14, %v11959_v51 }
 0x85f   :  { %14623 = vmatpush3.bf16.msra.mxu1 %v20052_v0  ;;  %14626 = vmatprep.mubr.msk.bf16.mxu1 %vm15726_vm0, %v20947_v18 }
 0x860   :  { %14624 = vmatprep.subr.bf16.mxu1 %v20947_v18 }
 0x863   :  { %14625 = vmatpush3.bf16.msra.mxu1 %v20055_v27 }
 0x864   :  { %14630 = vmatprep.subr.bf16.mxu1 %v20947_v18 }
 0x931   :  { %v11997_v40 = vpop.f32.mrb[68].mxu1 }
 0x932   :  { %v12003_v9 = vadd.f32 %v11997_v40, %v11955_v33  ;;  %v14620_v28 = vpop.f32.mrb[69].mxu1 }
 0x933   :  { %v12000_v29 = vpop.f32.mrb[70].mxu1 }
 0x934   :  { %15085 = vtanh.f32 %v12003_v9  ;;  %v14621_v21 = vpop.f32.mrb[71].mxu1  ;;  %v14091_v35 = vmul.f32 -1.442695, %v12003_v9 }
 0x936   :  { %15087 = vpow2.f32 %v14091_v35 }
 0x93e   :  { %v15086_v60 = vpop.eup %15085 }
 0x93f   :  { %12013 = vrot.lane.b32.xlu1 %v15086_v60, %s15706_s30 }
 0x940   :  { %v15088_v1 = vpop.eup %15087 }
 0x941   :  { %v12007_v5 = vadd.f32 1.0, %v15088_v1 }
 0x943   :  { %15089 = vrcp.f32 %v12007_v5 }
 0x94d   :  { %v15090_v50 = vpop.eup %15089 }
 0x94e   :  { %v12011_v41 = vmul.f32 %v15090_v50, %v11936_v58 }
 0x9b1   :  { %v12014_v17 = vpop.permute.xlu1 %12013 }
 0x9b2   :  { %v12016_v30 = vmul.f32 %v15090_v50, %v12014_v17  ;;  %v12206_v17 = vld [vmem:[#allocation2 + $0x6] sm:$0x3] }
 0x9b4   :  { %12018 = vrot.lane.b32.xlu0 %v12016_v30, %s15730_s1 }
 0xa26   :  { %v12019_v62 = vpop.permute.xlu0 %12018 }
 0xa27   :  { %v12021_v22 = vadd.f32 %v12019_v62, %v12011_v41 }
 0xa29   :  { %15091 = vtanh.f32 %v12021_v22 }
 0xa33   :  { %v15092_v7 = vpop.eup %15091 }
 0xa34   :  { %12024 = vrot.lane.b32.xlu1 %v15092_v7, %s15706_s30 }
 0xaa6   :  { %v12025_v26 = vpop.permute.xlu1 %12024 }
 0xaa7   :  { %v20099_v32 = vmul.f32 %v15090_v50, %v12025_v26  ;;  %v12205_v50 = vld [vmem:[#allocation2 + $0x8] sm:$0x3] }
 0xaa8   :  { %v12207_v30 = vsel %vm20073_vm13, %v12205_v50, %v12206_v17 }
 0xaa9   :  { %v12040_v37 = vpack.c.bf16 %v20099_v32, %v20099_v32 }
 0xaab   :  { %12042 = vrot.lane.b32.xlu0 %v12040_v37, %s15730_s1 }
 0xb1d   :  { %v12043_v44 = vpop.permute.xlu0 %12042 }
 0xb1e   :  { %14627 = vmatmul.mubr.msk.bf16.vlgmr.msra.gmra.mrb[72].mxu1 %vm11874_vm14, %v12043_v44 }
 0xb1f   :  { %14631 = vmatpush3.bf16.msra.mxu1 %v20052_v0  ;;  %14634 = vmatprep.mubr.msk.bf16.mxu1 %vm15726_vm0, %v20947_v18 }
 0xb20   :  { %14632 = vmatprep.subr.bf16.mxu1 %v20947_v18 }
 0xb23   :  { %14633 = vmatpush3.bf16.msra.mxu1 %v20055_v27 }
 0xb24   :  { %14638 = vmatprep.subr.bf16.mxu1 %v20947_v18 }
 0xbf1   :  { %v12081_v56 = vpop.f32.mrb[72].mxu1 }
 0xbf2   :  { %v12087_v8 = vadd.f32 %v12081_v56, %v12039_v34  ;;  %v14628_v43 = vpop.f32.mrb[73].mxu1 }
 0xbf3   :  { %v12084_v46 = vpop.f32.mrb[74].mxu1 }
 0xbf4   :  { %15093 = vtanh.f32 %v12087_v8  ;;  %v14629_v48 = vpop.f32.mrb[75].mxu1  ;;  %v14093_v13 = vmul.f32 -1.442695, %v12087_v8 }
 0xbf6   :  { %15095 = vpow2.f32 %v14093_v13 }
 0xbfe   :  { %v15094_v49 = vpop.eup %15093 }
 0xbff   :  { %12097 = vrot.lane.b32.xlu1 %v15094_v49, %s15706_s30 }
 0xc00   :  { %v15096_v4 = vpop.eup %15095 }
 0xc01   :  { %v12091_v36 = vadd.f32 1.0, %v15096_v4 }
 0xc03   :  { %15097 = vrcp.f32 %v12091_v36 }
 0xc0d   :  { %v15098_v16 = vpop.eup %15097 }
 0xc0e   :  { %v12095_v53 = vmul.f32 %v15098_v16, %v12021_v22 }
 0xc71   :  { %v12098_v15 = vpop.permute.xlu1 %12097 }
 0xc72   :  { %v12100_v45 = vmul.f32 %v15098_v16, %v12098_v15  ;;  %v12289_v15 = vld [vmem:[#allocation2 + $0xa] sm:$0x3] }
 0xc74   :  { %12102 = vrot.lane.b32.xlu0 %v12100_v45, %s15730_s1  ;;  %v12290_v45 = vld [vmem:[#allocation2 + $0x4] sm:$0x3] }
 0xce6   :  { %v12103_v57 = vpop.permute.xlu0 %12102 }
 0xce7   :  { %v12105_v2 = vadd.f32 %v12103_v57, %v12095_v53  ;;  %v12291_v53 = vsel %vm20073_vm13, %v12289_v15, %v12290_v45 }
 0xce9   :  { %15099 = vtanh.f32 %v12105_v2 }
 0xcf3   :  { %v15100_v47 = vpop.eup %15099 }
 0xcf4   :  { %12108 = vrot.lane.b32.xlu1 %v15100_v47, %s15706_s30 }
 0xd66   :  { %v12109_v19 = vpop.permute.xlu1 %12108 }
 0xd67   :  { %v20116_v20 = vmul.f32 %v15098_v16, %v12109_v19 }
 0xd69   :  { %v12124_v61 = vpack.c.bf16 %v20116_v20, %v20116_v20 }
 0xd6b   :  { %12126 = vrot.lane.b32.xlu0 %v12124_v61, %s15730_s1 }
 0xddd   :  { %v12127_v10 = vpop.permute.xlu0 %12126 }
 0xdde   :  { %14635 = vmatmul.mubr.msk.bf16.vlgmr.msra.gmra.mrb[76].mxu1 %vm11874_vm14, %v12127_v10 }
 0xddf   :  { %14639 = vmatpush3.bf16.msra.mxu1 %v20052_v0  ;;  %14642 = vmatprep.mubr.msk.bf16.mxu1 %vm15726_vm0, %v20947_v18 }
 0xde0   :  { %14640 = vmatprep.subr.bf16.mxu1 %v20947_v18 }
 0xde3   :  { %14641 = vmatpush3.bf16.msra.mxu1 %v20055_v27 }
 0xde4   :  { %14646 = vmatprep.subr.bf16.mxu1 %v20947_v18 }
 0xeb1   :  { %v12165_v55 = vpop.f32.mrb[76].mxu1 }
 0xeb2   :  { %v12171_v11 = vadd.f32 %v12165_v55, %v12123_v24  ;;  %v14636_v25 = vpop.f32.mrb[77].mxu1 }
 0xeb3   :  { %v12168_v58 = vpop.f32.mrb[78].mxu1 }
 0xeb4   :  { %15101 = vtanh.f32 %v12171_v11  ;;  %v14637_v23 = vpop.f32.mrb[79].mxu1  ;;  %v14095_v39 = vmul.f32 -1.442695, %v12171_v11 }
 0xeb6   :  { %15103 = vpow2.f32 %v14095_v39 }
 0xebe   :  { %v15102_v6 = vpop.eup %15101 }
 0xebf   :  { %12181 = vrot.lane.b32.xlu1 %v15102_v6, %s15706_s30 }
 0xec0   :  { %v15104_v51 = vpop.eup %15103 }
 0xec1   :  { %v12175_v3 = vadd.f32 1.0, %v15104_v51 }
 0xec3   :  { %15105 = vrcp.f32 %v12175_v3 }
 0xecd   :  { %v15106_v31 = vpop.eup %15105 }
 0xece   :  { %v12179_v9 = vmul.f32 %v15106_v31, %v12105_v2 }
 0xf31   :  { %v12182_v33 = vpop.permute.xlu1 %12181 }
 0xf32   :  { %v12184_v40 = vmul.f32 %v15106_v31, %v12182_v33 }
 0xf34   :  { %12186 = vrot.lane.b32.xlu0 %v12184_v40, %s15730_s1  ;;  %v12373_v40 = vld [vmem:[#allocation2 + $0xc] sm:$0x3] }
 0xfa6   :  { %v12187_v28 = vpop.permute.xlu0 %12186 }
 0xfa7   :  { %v12189_v29 = vadd.f32 %v12187_v28, %v12179_v9  ;;  %v12374_v9 = vld [vmem:[#allocation2 + $0x2] sm:$0x3] }
 0xfa8   :  { %v12375_v28 = vsel %vm20073_vm13, %v12373_v40, %v12374_v9 }
 0xfa9   :  { %15107 = vtanh.f32 %v12189_v29 }
 0xfb3   :  { %v15108_v21 = vpop.eup %15107 }
 0xfb4   :  { %12192 = vrot.lane.b32.xlu1 %v15108_v21, %s15706_s30 }
0x1026   :  { %v12193_v60 = vpop.permute.xlu1 %12192 }
0x1027   :  { %v20133_v35 = vmul.f32 %v15106_v31, %v12193_v60 }
0x1029   :  { %v12208_v1 = vpack.c.bf16 %v20133_v35, %v20133_v35 }
0x102b   :  { %12210 = vrot.lane.b32.xlu0 %v12208_v1, %s15730_s1 }
0x109d   :  { %v12211_v5 = vpop.permute.xlu0 %12210 }
0x109e   :  { %14643 = vmatmul.mubr.msk.bf16.vlgmr.msra.gmra.mrb[80].mxu1 %vm11874_vm14, %v12211_v5 }
0x109f   :  { %14647 = vmatpush3.bf16.msra.mxu1 %v20052_v0  ;;  %14650 = vmatprep.mubr.msk.bf16.mxu1 %vm15726_vm0, %v20947_v18 }
0x10a0   :  { %14648 = vmatprep.subr.bf16.mxu1 %v20947_v18 }
0x10a3   :  { %14649 = vmatpush3.bf16.msra.mxu1 %v20055_v27 }
0x10a4   :  { %14654 = vmatprep.subr.bf16.mxu1 %v20947_v18 }
0x1171   :  { %v12249_v41 = vpop.f32.mrb[80].mxu1 }
0x1172   :  { %v12255_v62 = vadd.f32 %v12249_v41, %v12207_v30  ;;  %v14644_v22 = vpop.f32.mrb[81].mxu1 }
0x1173   :  { %v12252_v7 = vpop.f32.mrb[82].mxu1 }
0x1174   :  { %15109 = vtanh.f32 %v12255_v62  ;;  %v14645_v26 = vpop.f32.mrb[83].mxu1  ;;  %v14097_v44 = vmul.f32 -1.442695, %v12255_v62 }
0x1176   :  { %15111 = vpow2.f32 %v14097_v44 }
0x117e   :  { %v15110_v37 = vpop.eup %15109 }
0x117f   :  { %12265 = vrot.lane.b32.xlu1 %v15110_v37, %s15706_s30 }
0x1180   :  { %v15112_v42 = vpop.eup %15111 }
0x1181   :  { %v12259_v59 = vadd.f32 1.0, %v15112_v42 }
0x1183   :  { %15113 = vrcp.f32 %v12259_v59 }
0x118d   :  { %v15114_v34 = vpop.eup %15113 }
0x118e   :  { %v12263_v43 = vmul.f32 %v15114_v34, %v12189_v29 }
0x11f1   :  { %v12266_v56 = vpop.permute.xlu1 %12265 }
0x11f2   :  { %v12268_v8 = vmul.f32 %v15114_v34, %v12266_v56  ;;  %v12457_v56 = vld [vmem:[#allocation2 + $0xe] sm:$0x3] }
0x11f4   :  { %12270 = vrot.lane.b32.xlu0 %v12268_v8, %s15730_s1  ;;  %v12458_v8 = vld [vmem:[#allocation2] sm:$0x3] }
0x1266   :  { %v12271_v46 = vpop.permute.xlu0 %12270 }
0x1267   :  { %v12273_v48 = vadd.f32 %v12271_v46, %v12263_v43  ;;  %v12459_v43 = vsel %vm20073_vm13, %v12457_v56, %v12458_v8  ;;  %vm13870_vm13 = vcmask 7168  }
0x1269   :  { %15115 = vtanh.f32 %v12273_v48 }
0x1273   :  { %v15116_v49 = vpop.eup %15115 }
0x1274   :  { %12276 = vrot.lane.b32.xlu1 %v15116_v49, %s15706_s30 }
0x12e6   :  { %v12277_v13 = vpop.permute.xlu1 %12276 }
0x12e7   :  { %v20150_v4 = vmul.f32 %v15114_v34, %v12277_v13 }
0x12e9   :  { %v12292_v36 = vpack.c.bf16 %v20150_v4, %v20150_v4 }
0x12eb   :  { %12294 = vrot.lane.b32.xlu0 %v12292_v36, %s15730_s1 }
0x135d   :  { %v12295_v16 = vpop.permute.xlu0 %12294 }
0x135e   :  { %14651 = vmatmul.mubr.msk.bf16.vlgmr.msra.gmra.mrb[84].mxu1 %vm11874_vm14, %v12295_v16 }
0x135f   :  { %14655 = vmatpush3.bf16.msra.mxu1 %v20052_v0  ;;  %14658 = vmatprep.mubr.msk.bf16.mxu1 %vm15726_vm0, %v20947_v18 }
0x1360   :  { %14656 = vmatprep.subr.bf16.mxu1 %v20947_v18 }
0x1363   :  { %14657 = vmatpush3.bf16.msra.mxu1 %v20055_v27 }
0x1364   :  { %14662 = vmatprep.subr.bf16.mxu1 %v20947_v18 }
0x1431   :  { %v12333_v57 = vpop.f32.mrb[84].mxu1 }
0x1432   :  { %v12339_v2 = vadd.f32 %v12333_v57, %v12291_v53  ;;  %v14652_v47 = vpop.f32.mrb[85].mxu1 }
0x1433   :  { %v12336_v19 = vpop.f32.mrb[86].mxu1 }
0x1434   :  { %15117 = vtanh.f32 %v12339_v2  ;;  %v14653_v61 = vpop.f32.mrb[87].mxu1  ;;  %v14099_v38 = vmul.f32 -1.442695, %v12339_v2 }
0x1436   :  { %15119 = vpow2.f32 %v14099_v38 }
0x143e   :  { %v15118_v10 = vpop.eup %15117 }
0x143f   :  { %12349 = vrot.lane.b32.xlu1 %v15118_v10, %s15706_s30 }
0x1440   :  { %v15120_v14 = vpop.eup %15119 }
0x1441   :  { %v12343_v24 = vadd.f32 1.0, %v15120_v14 }
0x1443   :  { %15121 = vrcp.f32 %v12343_v24 }
0x144d   :  { %v15122_v55 = vpop.eup %15121 }
0x144e   :  { %v12347_v58 = vmul.f32 %v15122_v55, %v12273_v48 }
0x14b1   :  { %v12350_v11 = vpop.permute.xlu1 %12349 }
0x14b2   :  { %v12352_v25 = vmul.f32 %v15122_v55, %v12350_v11 }
0x14b4   :  { %12354 = vrot.lane.b32.xlu0 %v12352_v25, %s15730_s1 }
0x1526   :  { %v12355_v23 = vpop.permute.xlu0 %12354 }
0x1527   :  { %v12357_v6 = vadd.f32 %v12355_v23, %v12347_v58 }
0x1529   :  { %15123 = vtanh.f32 %v12357_v6 }
0x1533   :  { %v15124_v39 = vpop.eup %15123 }
0x1534   :  { %12360 = vrot.lane.b32.xlu1 %v15124_v39, %s15706_s30 }
0x15a6   :  { %v12361_v51 = vpop.permute.xlu1 %12360 }
0x15a7   :  { %v20167_v3 = vmul.f32 %v15122_v55, %v12361_v51 }
0x15a9   :  { %v12376_v31 = vpack.c.bf16 %v20167_v3, %v20167_v3 }
0x15ab   :  { %12378 = vrot.lane.b32.xlu0 %v12376_v31, %s15730_s1 }
0x161d   :  { %v12379_v33 = vpop.permute.xlu0 %12378 }
0x161e   :  { %14659 = vmatmul.mubr.msk.bf16.vlgmr.msra.gmra.mrb[88].mxu1 %vm11874_vm14, %v12379_v33 }
0x161f   :  { %14663 = vmatpush3.bf16.msra.mxu1 %v20052_v0  ;;  %14666 = vmatprep.mubr.msk.bf16.mxu1 %vm15726_vm0, %v20947_v18 }
0x1620   :  { %14664 = vmatprep.subr.bf16.mxu1 %v20947_v18 }
0x1623   :  { %14665 = vmatpush3.bf16.msra.mxu1 %v20055_v27 }
0x1624   :  { %14670 = vmatprep.subr.bf16.mxu1 %v20947_v18 }
0x16f1   :  { %v12417_v29 = vpop.f32.mrb[88].mxu1 }
0x16f2   :  { %v12423_v21 = vadd.f32 %v12417_v29, %v12375_v28  ;;  %v14660_v60 = vpop.f32.mrb[89].mxu1 }
0x16f3   :  { %v12420_v1 = vpop.f32.mrb[90].mxu1 }
0x16f4   :  { %15125 = vtanh.f32 %v12423_v21  ;;  %v14661_v0 = vpop.f32.mrb[91].mxu1  ;;  %v14101_v50 = vmul.f32 -1.442695, %v12423_v21 }
0x16f6   :  { %15127 = vpow2.f32 %v14101_v50 }
0x16fe   :  { %v15126_v5 = vpop.eup %15125 }
0x16ff   :  { %12433 = vrot.lane.b32.xlu1 %v15126_v5, %s15706_s30 }
0x1700   :  { %v15128_v17 = vpop.eup %15127 }
0x1701   :  { %v12427_v27 = vadd.f32 1.0, %v15128_v17 }
0x1703   :  { %15129 = vrcp.f32 %v12427_v27 }
0x170d   :  { %v15130_v30 = vpop.eup %15129 }
0x170e   :  { %v12431_v22 = vmul.f32 %v15130_v30, %v12357_v6  ;;  %v15067_v6 = vld [vmem:[#allocation21] sm:$0xff]  }
0x1771   :  { %v12434_v41 = vpop.permute.xlu1 %12433 }
0x1772   :  { %v12436_v62 = vmul.f32 %v15130_v30, %v12434_v41 }
0x1774   :  { %12438 = vrot.lane.b32.xlu0 %v12436_v62, %s15730_s1 }
0x17e6   :  { %v12439_v7 = vpop.permute.xlu0 %12438 }
0x17e7   :  { %v12441_v26 = vadd.f32 %v12439_v7, %v12431_v22 }
0x17e9   :  { %15131 = vtanh.f32 %v12441_v26 }
0x17f3   :  { %v15132_v37 = vpop.eup %15131 }
0x17f4   :  { %12444 = vrot.lane.b32.xlu1 %v15132_v37, %s15706_s30 }
0x1866   :  { %v12445_v44 = vpop.permute.xlu1 %12444 }
0x1867   :  { %v12447_v42 = vmul.f32 %v15130_v30, %v12445_v44  ;;  %v12710_v44 = vld [vmem:[#allocation12] sm:$0x1] }
0x1868   :  { %vm12711_vm2 = vcmp.ne.s32.totalorder %v12710_v44, 0 }
0x1869   :  { %v12460_v59 = vpack.c.bf16 %v12447_v42, %v12447_v42 }
0x186b   :  { %12462 = vrot.lane.b32.xlu0 %v12460_v59, %s15730_s1 }
0x18dd   :  { %v12463_v34 = vpop.permute.xlu0 %12462 }
0x18de   :  { %14667 = vmatmul.mubr.msk.bf16.vlgmr.msra.gmra.mrb[92].mxu1 %vm11874_vm14, %v12463_v34  ;;  %v12712_v34 = vsel %vm12711_vm2, 1, %v15729_v12 }
0x18df   :  { %14674 = vmatprep.mubr.msk.bf16.mxu1 %vm15726_vm0, %v20947_v18  ;;  %14671 = vmatpush3.bf16.msra.mxu1 %v15067_v6 }
0x18e0   :  { %14672 = vmatprep.subr.bf16.mxu1 %v20947_v18 }
0x19b1   :  { %v12501_v46 = vpop.f32.mrb[92].mxu1 }
0x19b2   :  { %v12507_v48 = vadd.f32 %v12501_v46, %v12459_v43  ;;  %v14668_v49 = vpop.f32.mrb[93].mxu1  ;;  %v12700_v43 = vand.u32 1, %v20070_v54 }
0x19b3   :  { %v12504_v13 = vpop.f32.mrb[94].mxu1 }
0x19b4   :  { %15133 = vtanh.f32 %v12507_v48  ;;  %v14669_v36 = vpop.f32.mrb[95].mxu1  ;;  %v14103_v15 = vmul.f32 -1.442695, %v12507_v48 }
0x19b6   :  { %15135 = vpow2.f32 %v14103_v15 }
0x19be   :  { %v15134_v16 = vpop.eup %15133 }
0x19bf   :  { %12517 = vrot.lane.b32.xlu1 %v15134_v16, %s15706_s30 }
0x19c0   :  { %v15136_v45 = vpop.eup %15135 }
0x19c1   :  { %v12511_v53 = vadd.f32 1.0, %v15136_v45 }
0x19c3   :  { %15137 = vrcp.f32 %v12511_v53 }
0x19cd   :  { %v15138_v57 = vpop.eup %15137 }
0x19ce   :  { %v12515_v63 = vmul.f32 %v15138_v57, %v12441_v26 }
0x1a31   :  { %v12518_v2 = vpop.permute.xlu1 %12517 }
0x1a32   :  { %v12520_v47 = vmul.f32 %v15138_v57, %v12518_v2 }
0x1a34   :  { %12522 = vrot.lane.b32.xlu0 %v12520_v47, %s15730_s1 }
0x1a38   :  { %11949 = vrot.lane.b32.xlu0 %v20082_v52, %s15728_s12 }
0x1a3c   :  { %12117 = vrot.lane.b32.xlu0 %v20116_v20, %s15728_s12 }
0x1a40   :  { %12285 = vrot.lane.b32.xlu0 %v20150_v4, %s15728_s12 }
0x1a44   :  { %12453 = vrot.lane.b32.xlu0 %v12447_v42, %s15728_s12 }
0x1a48   :  { %11944 = vrot.lane.b32.xlu0 %v20082_v52, %s15730_s1 }
0x1a4c   :  { %12113 = vrot.lane.b32.xlu0 %v20116_v20, %s15730_s1 }
0x1a50   :  { %12281 = vrot.lane.b32.xlu0 %v20150_v4, %s15730_s1 }
0x1a54   :  { %12449 = vrot.lane.b32.xlu0 %v12447_v42, %s15730_s1  ;;  %v21504_v42 = vld [vmem:[#allocation49_spill] sm:$0xff] }
0x1a55   :  { %v12715_v59 = vsub.s32 0, %v21504_v42  ;;  %v12671_v56 = vadd.s32 8, %v21504_v42  ;;  %v12676_v8 = vand.u32 1, %v21504_v42 }
0x1a57   :  { %v12716_v46 = vrot.slane %v12712_v34, %v12715_v59  ;;  %v12683_v48 = vand.u32 1, %v12671_v56  ;;  %vm12708_vm3 = vcmp.eq.s32.totalorder %v12676_v8, %v12700_v43 }
0x1a59   :  { %vm12717_vm4 = vcmp.eq.s32.totalorder %v12716_v46, 1  ;;  %vm12709_vm5 = vcmp.eq.s32.totalorder %v12683_v48, %v12700_v43 }
0x1a5a   :  { %vm12718_vm6 = vmand %vm12708_vm3, %vm12717_vm4 }
0x1a5b   :  { %vm12719_vm7 = vmand %vm12709_vm5, %vm12717_vm4 }
0x1aa6   :  { %v12523_v19 = vpop.permute.xlu0 %12522 }
0x1aa7   :  { %v12525_v61 = vadd.f32 %v12523_v19, %v12515_v63 }
0x1aa9   :  { %15139 = vtanh.f32 %v12525_v61 }
0x1aaa   :  { %v11950_v10 = vpop.permute.xlu0 %11949 }
0x1aab   :  { %11952 = vst.msk [vmem:[#allocation4 + $0xe] sm:$0x3] %vm11947_vm15, %v11950_v10 }
0x1aae   :  { %v12118_v38 = vpop.permute.xlu0 %12117 }
0x1aaf   :  { %12120 = vst.msk [vmem:[#allocation4 + $0xa] sm:$0x3] %vm11947_vm15, %v12118_v38 }
0x1ab2   :  { %v12286_v52 = vpop.permute.xlu0 %12285 }
0x1ab3   :  { %v15140_v14 = vpop.eup %15139  ;;  %12288 = vst.msk [vmem:[#allocation4 + $0x6] sm:$0x3] %vm11947_vm15, %v12286_v52 }
0x1ab4   :  { %12528 = vrot.lane.b32.xlu1 %v15140_v14, %s15706_s30 }
0x1ab6   :  { %v12454_v20 = vpop.permute.xlu0 %12453 }
0x1ab7   :  { %12456 = vst.msk [vmem:[#allocation4 + $0x2] sm:$0x3] %vm11947_vm15, %v12454_v20 }
0x1ab8   :  { %12033 = vrot.lane.b32.xlu1 %v20099_v32, %s15728_s12 }
0x1aba   :  { %v11945_v4 = vpop.permute.xlu0 %11944 }
0x1abb   :  { %11948 = vst.msk [vmem:[#allocation3] sm:$0x3] %vm11947_vm15, %v11945_v4 }
0x1abc   :  { %12201 = vrot.lane.b32.xlu1 %v20133_v35, %s15728_s12 }
0x1abe   :  { %v12114_v24 = vpop.permute.xlu0 %12113 }
0x1abf   :  { %12116 = vst.msk [vmem:[#allocation3 + $0x4] sm:$0x3] %vm11947_vm15, %v12114_v24 }
0x1ac0   :  { %12369 = vrot.lane.b32.xlu1 %v20167_v3, %s15728_s12 }
0x1ac2   :  { %v12282_v55 = vpop.permute.xlu0 %12281 }
0x1ac3   :  { %12284 = vst.msk [vmem:[#allocation3 + $0x8] sm:$0x3] %vm11947_vm15, %v12282_v55 }
0x1ac6   :  { %v12450_v11 = vpop.permute.xlu0 %12449 }
0x1ac7   :  { %12452 = vst.msk [vmem:[#allocation3 + $0xc] sm:$0x3] %vm11947_vm15, %v12450_v11 }
0x1b26   :  { %v12529_v25 = vpop.permute.xlu1 %12528 }
0x1b27   :  { %v12531_v58 = vmul.f32 %v15138_v57, %v12529_v25 }
0x1b29   :  { %12537 = vrot.lane.b32.xlu1 %v12531_v58, %s15728_s12 }
0x1b2a   :  { %v12034_v23 = vpop.permute.xlu1 %12033 }
0x1b2b   :  { %12036 = vst.msk [vmem:[#allocation4 + $0xc] sm:$0x3] %vm11947_vm15, %v12034_v23 }
0x1b2d   :  { %12029 = vrot.lane.b32.xlu1 %v20099_v32, %s15730_s1  ;;  %v15068_v32 = vld [vmem:[#allocation21 + $0x8] sm:$0xff]  }
0x1b2e   :  { %v12202_v39 = vpop.permute.xlu1 %12201  ;;  %14673 = vmatpush3.bf16.msra.mxu1 %v15068_v32  ;;  %v15070_v32 = vld [vmem:[#allocation27 + $0x8] sm:$0xff]  }
0x1b2f   :  { %12204 = vst.msk [vmem:[#allocation4 + $0x8] sm:$0x3] %vm11947_vm15, %v12202_v39  ;;  %14678 = vmatprep.subr.bf16.mxu1 %v20947_v18 }
0x1b31   :  { %12197 = vrot.lane.b32.xlu1 %v20133_v35, %s15730_s1 }
0x1b32   :  { %v12370_v51 = vpop.permute.xlu1 %12369 }
0x1b33   :  { %12372 = vst.msk [vmem:[#allocation4 + $0x4] sm:$0x3] %vm11947_vm15, %v12370_v51 }
0x1b35   :  { %12365 = vrot.lane.b32.xlu1 %v20167_v3, %s15730_s1 }
0x1b36   :  { %v12544_v9 = vld [vmem:[#allocation4 + $0x8] sm:$0xff] }
0x1b39   :  { %12533 = vrot.lane.b32.xlu1 %v12531_v58, %s15730_s1 }
0x1b9b   :  { %v12538_v31 = vpop.permute.xlu1 %12537 }
0x1b9c   :  { %12540 = vst.msk [vmem:[#allocation4] sm:$0x3] %vm11947_vm15, %v12538_v31  ;;  %v15069_v31 = vld [vmem:[#allocation27] sm:$0xff]  }
0x1b9f   :  { %v12030_v33 = vpop.permute.xlu1 %12029 }
0x1ba0   :  { %12032 = vst.msk [vmem:[#allocation3 + $0x2] sm:$0x3] %vm11947_vm15, %v12030_v33  ;;  %v20269_v33 = vld [vmem:[#allocation22] sm:$0xff] }
0x1ba3   :  { %v12198_v40 = vpop.permute.xlu1 %12197  ;;  %v12543_v35 = vld [vmem:[#allocation4] sm:$0xff] }
0x1ba4   :  { %12200 = vst.msk [vmem:[#allocation3 + $0x6] sm:$0x3] %vm11947_vm15, %v12198_v40  ;;  %v15026_v28 = vpack.i.bf16 %v12544_v9, %v12543_v35  ;;  %v20271_v40 = vld [vmem:[#allocation24] sm:$0xff]  ;;  %v12819_v9 = vsub.s32 1, %v21504_v42 }
0x1ba5   :  { %v12794_v35 = vadd.f32 %v20271_v40, %v20269_v33 }
0x1ba6   :  { %15027 = vrot.lane.b32.xlu0 %v15026_v28, %s15728_s12 }
0x1ba7   :  { %v12366_v3 = vpop.permute.xlu1 %12365  ;;  %v12798_v28 = vrot.slane %v12794_v35, %v12715_v59  ;;  %v12911_v35 = vsub.s32 6, %v21504_v42 }
0x1ba8   :  { %12368 = vst.msk [vmem:[#allocation3 + $0xa] sm:$0x3] %vm11947_vm15, %v12366_v3 }
0x1bab   :  { %v12534_v29 = vpop.permute.xlu1 %12533  ;;  %v12541_v0 = vld [vmem:[#allocation3] sm:$0xff] }
0x1bac   :  { %12536 = vst.msk [vmem:[#allocation3 + $0xe] sm:$0x3] %vm11947_vm15, %v12534_v29  ;;  %v12820_v29 = vrot.slane %v20269_v33, %v12819_v9 }
0x1bb3   :  { %v12542_v5 = vld [vmem:[#allocation3 + $0x8] sm:$0xff] }
0x1c18   :  { %v15028_v21 = vpop.permute.xlu0 %15027 }
0x1c19   :  { %v15030_v60 = vunpack.i.h.bf16 %v15028_v21  ;;  %v15029_v1 = vunpack.i.l.bf16 %v15028_v21 }
0x1c1b   :  { %v12553_v50 = vsel %vm11767_vm11, %v12541_v0, %v15029_v1  ;;  %v12554_v17 = vsel %vm11767_vm11, %v12542_v5, %v15030_v60  ;;  %v12843_v0 = vsub.s32 2, %v21504_v42 }
0x1c1c   :  { %v12555_v27 = vpack.c.bf16 %v12554_v17, %v12553_v50 }
0x1c1d   :  { %v12844_v59 = vrot.slane %v20269_v33, %v12843_v0 }
0x1c1e   :  { %14675 = vmatmul.mubr.msk.bf16.vlgmr.msra.gmra.mrb[96].mxu1 %vm11874_vm14, %v12555_v27 }
0x1c1f   :  { %14680 = vmatprep.mubr.msk.bf16.mxu1 %vm15726_vm0, %v20947_v18 }
0x1cf1   :  { %v12609_v30 = vpop.f32.mrb[96].mxu1 }
0x1cf2   :  { %v14676_v41 = vpop.f32.mrb[97].mxu1 }
0x1cf3   :  { %v12612_v62 = vpop.f32.mrb[98].mxu1 }
0x1cf4   :  { %v12616_v22 = vpack.c.bf16 %v12612_v62, %v12609_v30  ;;  %v14677_v7 = vpop.f32.mrb[99].mxu1  ;;  %v12828_v62 = vrot.slane %v20271_v40, %v12819_v9 }
0x1cf5   :  { %v12863_v7 = vsub.s32 3, %v21504_v42 }
0x1cf6   :  { %12618 = vrot.lane.b32.xlu1 %v12616_v22, %s15731_s19 }
0x1d68   :  { %v12619_v26 = vpop.permute.xlu1 %12618 }
0x1d69   :  { %v12624_v37 = vsel %vm11874_vm14, %v12619_v26, 0 }
0x1d6a   :  { %14679 = vmatpush3.bf16.xpose.msra.mxu1 %v12624_v37 }
0x1d6b   :  { %14684 = vmatprep.subr.bf16.mxu1 %v20947_v18 }
0x1d71   :  { %14681 = vmatmul.mubr.msk.bf16.vlgmr.msra.gmra.mrb[100].mxu1 %vm11874_vm14, %v12616_v22 }
0x1d72   :  { %14686 = vmatprep.mubr.msk.bf16.mxu1 %vm15726_vm0, %v20947_v18 }
0x1e44   :  { %v12660_v49 = vpop.f32.mrb[100].mxu1 }
0x1e45   :  { %v12667_v13 = vmul.f32 0.17677669, %v12660_v49  ;;  %v14682_v36 = vpop.f32.mrb[101].mxu1 }
0x1e46   :  { %v12663_v16 = vpop.f32.mrb[102].mxu1  ;;  %v12852_v36 = vrot.slane %v20271_v40, %v12843_v0 }
0x1e47   :  { %v12668_v15 = vmul.f32 0.17677669, %v12663_v16  ;;  %v14683_v45 = vpop.f32.mrb[103].mxu1  ;;  %v12720_v53 = vsel %vm12718_vm6, %v12667_v13, -1e+30  ;;  %v12864_v16 = vrot.slane %v20269_v33, %v12863_v7 }
0x1e48   :  { %v12722_v57 = vsel %vm11767_vm11, %v12720_v53, -inf }
0x1e49   :  { %12723 = vmax.xlane.f32.xlu0 %v12722_v57  ;;  %v12721_v2 = vsel %vm12719_vm7, %v12668_v15, -1e+30  ;;  %v12879_v15 = vsub.s32 4, %v21504_v42 }
0x1e4a   :  { %v12725_v47 = vsel %vm11767_vm11, %v12721_v2, -inf }
0x1e4b   :  { %12726 = vmax.xlane.f32.xlu1 %v12725_v47 }
0x1e5c   :  { %12745 = vrot.lane.b32.xlu1 %v12616_v22, %s15706_s30 }
0x1ed6   :  { %v12724_v63 = vpop.xlane.xlu0 %12723 }
0x1ed7   :  { %v12728_v19 = vsub.f32 %v12720_v53, %v12724_v63 }
0x1ed8   :  { %v12727_v61 = vpop.xlane.xlu1 %12726 }
0x1ed9   :  { %v12730_v10 = vmul.f32 1.442695, %v12728_v19  ;;  %v12729_v38 = vsub.f32 %v12721_v2, %v12727_v61  ;;  %v12872_v19 = vrot.slane %v20271_v40, %v12863_v7 }
0x1edb   :  { %15141 = vpow2.f32 %v12730_v10  ;;  %v12732_v52 = vmul.f32 1.442695, %v12729_v38 }
0x1edc   :  { %v12746_v14 = vpop.permute.xlu1 %12745 }
0x1edd   :  { %15143 = vpow2.f32 %v12732_v52  ;;  %14685 = vmatpush3.bf16.msra.mxu1 %v12746_v14  ;;  %v12880_v14 = vrot.slane %v20269_v33, %v12879_v15 }
0x1ede   :  { %14690 = vmatprep.subr.bf16.mxu1 %v20947_v18 }
0x1ee5   :  { %v15142_v20 = vpop.eup %15141 }
0x1ee6   :  { %v12734_v4 = vsel %vm11767_vm11, %v15142_v20, 0.0 }
0x1ee7   :  { %v15144_v24 = vpop.eup %15143  ;;  %12735 = vadd.xlane.f32.xlu0 %v12734_v4 }
0x1ee8   :  { %v12737_v55 = vsel %vm11767_vm11, %v15144_v24, 0.0 }
0x1eeb   :  { %12738 = vadd.xlane.f32.xlu0 %v12737_v55 }
0x1f74   :  { %v12736_v11 = vpop.xlane.xlu0 %12735 }
0x1f75   :  { %15145 = vrcp.f32 %v12736_v11 }
0x1f78   :  { %v12739_v25 = vpop.xlane.xlu0 %12738 }
0x1f79   :  { %15147 = vrcp.f32 %v12739_v25  ;;  %v12881_v25 = vmul.f32 0.0, %v12880_v14 }
0x1f7f   :  { %v15146_v58 = vpop.eup %15145 }
0x1f80   :  { %v12742_v6 = vmul.f32 %v15146_v58, %v15142_v20  ;;  %v12895_v20 = vsub.s32 5, %v21504_v42 }
0x1f83   :  { %v15148_v23 = vpop.eup %15147 }
0x1f84   :  { %v12743_v39 = vmul.f32 %v15148_v23, %v15144_v24  ;;  %v12888_v23 = vrot.slane %v20271_v40, %v12879_v15 }
0x1f86   :  { %v12744_v51 = vpack.c.bf16 %v12743_v39, %v12742_v6 }
0x1f88   :  { %14687 = vmatmul.mubr.msk.bf16.vlgmr.msra.gmra.mrb[104].mxu1 %vm11767_vm11, %v12744_v51 }
0x1f89   :  { %14694 = vmatprep.mubr.msk.bf16.mxu1 %vm15726_vm0, %v20947_v18  ;;  %14691 = vmatpush3.bf16.msra.mxu1 %v15069_v31 }
0x1f8a   :  { %14692 = vmatprep.subr.bf16.mxu1 %v20947_v18 }
0x1f8d   :  { %14693 = vmatpush3.bf16.msra.mxu1 %v15070_v32  ;;  %v12896_v32 = vrot.slane %v20269_v33, %v12895_v20 }
0x1f8e   :  { %14698 = vmatprep.subr.bf16.mxu1 %v20947_v18 }
0x205b   :  { %v20278_v3 = vpop.f32.mrb[104].mxu1 }
0x205c   :  { %v12799_v21 = vmul.f32 %v12798_v28, %v20278_v3  ;;  %v12804_v60 = vrot.slane %v20278_v3, 6  ;;  %v14688_v1 = vpop.f32.mrb[105].mxu1  ;;  %v12833_v17 = vrot.slane %v20278_v3, 4  ;;  %v12811_v22 = vrot.slane %v20278_v3, 2 }
0x205d   :  { %v20284_v5 = vpop.f32.mrb[106].mxu1  ;;  %v12904_v1 = vrot.slane %v20271_v40, %v12895_v20  ;;  %v12882_v0 = vmul.f32 %v12880_v14, %v20278_v3 }
0x205e   :  { %v20287_v50 = vsel %vm12803_vm8, 0.0, %v12804_v60  ;;  %v12800_v27 = vmul.f32 %v12798_v28, %v20284_v5  ;;  %v14689_v30 = vpop.f32.mrb[107].mxu1  ;;  %v12805_v26 = vrot.slane %v20284_v5, 6  ;;  %v12812_v37 = vrot.slane %v20284_v5, 2 }
0x205f   :  { %v12821_v41 = vmul.f32 %v12820_v29, %v20287_v50  ;;  %v12834_v34 = vrot.slane %v20284_v5, 4  ;;  %v20300_v56 = vsel %vm5030_vm1, 0.0, %v12833_v17  ;;  %v12858_v47 = vsel %vm12810_vm9, 0.0, %v12811_v22 }
0x2060   :  { %v12806_v8 = vsel %vm12803_vm8, %v12804_v60, %v12805_v26  ;;  %v12813_v43 = vsel %vm12810_vm9, %v12811_v22, %v12812_v37  ;;  %v12816_v46 = vsel %vm12810_vm9, %v12812_v37, 0.0  ;;  %v12845_v45 = vmul.f32 %v12844_v59, %v20300_v56 }
0x2061   :  { %v12823_v44 = vadd.f32 %v12821_v41, %v12799_v21  ;;  %v12822_v48 = vmul.f32 %v12820_v29, %v12806_v8  ;;  %v12829_v49 = vmul.f32 %v12828_v62, %v12813_v43  ;;  %v12835_v13 = vsel %vm5030_vm1, %v12833_v17, %v12834_v34 }
0x2062   :  { %v12830_v57 = vmul.f32 %v12828_v62, %v12816_v46  ;;  %v12840_v63 = vsel %vm5030_vm1, %v12834_v34, 0.0  ;;  %v12846_v10 = vmul.f32 %v12844_v59, %v12835_v13  ;;  %v12853_v52 = vmul.f32 %v12852_v36, %v12835_v13 }
0x2063   :  { %v12824_v53 = vadd.f32 %v12822_v48, %v12800_v27  ;;  %v12831_v2 = vadd.f32 %v12829_v49, %v12823_v44  ;;  %v12865_v4 = vmul.f32 %v12864_v16, %v12858_v47  ;;  %v12854_v55 = vmul.f32 %v12852_v36, %v12840_v63 }
0x2064   :  { %v12860_v58 = vsel %vm12803_vm8, %v12805_v26, 0.0  ;;  %v12866_v39 = vmul.f32 %v12864_v16, %v12813_v43  ;;  %v12873_v31 = vmul.f32 %v12872_v19, %v12806_v8  ;;  %v12890_v21 = vmul.f32 0.0, %v12888_v23 }
0x2065   :  { %v12832_v61 = vadd.f32 %v12830_v57, %v12824_v53  ;;  %v12847_v38 = vadd.f32 %v12845_v45, %v12831_v2  ;;  %v12874_v28 = vmul.f32 %v12872_v19, %v12860_v58  ;;  %v12897_v60 = vmul.f32 0.0, %v12896_v32 }
0x2066   :  { %v12889_v30 = vmul.f32 %v12888_v23, %v20284_v5  ;;  %v12912_v41 = vrot.slane %v20269_v33, %v12911_v35  ;;  %v12927_v62 = vsub.s32 7, %v21504_v42  ;;  %v12906_v37 = vmul.f32 0.0, %v12904_v1 }
0x2067   :  { %v12848_v24 = vadd.f32 %v12846_v10, %v12832_v61  ;;  %v12855_v11 = vadd.f32 %v12853_v52, %v12847_v38  ;;  %v12920_v44 = vrot.slane %v20271_v40, %v12911_v35  ;;  %v12898_v59 = vmul.f32 %v12896_v32, %v20287_v50  ;;  %v14109_v61 = vld [vmem:[#allocation25] ss:$0 sm:$0xff] }
0x2068   :  { %v12913_v26 = vmul.f32 0.0, %v12912_v41  ;;  %v12905_v43 = vmul.f32 %v12904_v1, %v12816_v46  ;;  %v12928_v48 = vrot.slane %v20269_v33, %v12927_v62  ;;  %v12936_v15 = vrot.slane %v20271_v40, %v12927_v62  ;;  %v14110_v1 = vld [vmem:[#allocation28] ss:$0 sm:$0xff] }
0x2069   :  { %v12856_v6 = vadd.f32 %v12854_v55, %v12848_v24  ;;  %v12867_v51 = vadd.f32 %v12865_v4, %v12855_v11  ;;  %v12922_v16 = vmul.f32 0.0, %v12920_v44  ;;  %v12914_v42 = vmul.f32 %v12912_v41, %v20300_v56 }
0x206a   :  { %v12929_v36 = vmul.f32 0.0, %v12928_v48  ;;  %v12921_v57 = vmul.f32 %v12920_v44, %v12840_v63  ;;  %v12938_v50 = vmul.f32 0.0, %v12936_v15  ;;  %v12930_v10 = vmul.f32 %v12928_v48, %v12858_v47 }
0x206b   :  { %v12868_v9 = vadd.f32 %v12866_v39, %v12856_v6  ;;  %v12875_v29 = vadd.f32 %v12873_v31, %v12867_v51  ;;  %v12937_v52 = vmul.f32 %v12936_v15, %v12860_v58  ;;  %v12948_v33 = vmul.f32 %v14109_v61, %v20278_v3 }
0x206c   :  { %v12949_v40 = vmul.f32 %v14109_v61, %v20284_v5 }
0x206d   :  { %v12876_v17 = vadd.f32 %v12874_v28, %v12868_v9  ;;  %v12883_v27 = vadd.f32 %v12881_v25, %v12875_v29 }
0x206f   :  { %v12884_v22 = vadd.f32 %v12882_v0, %v12876_v17  ;;  %v12891_v7 = vadd.f32 %v12889_v30, %v12883_v27 }
0x2071   :  { %v12892_v34 = vadd.f32 %v12890_v21, %v12884_v22  ;;  %v12899_v8 = vadd.f32 %v12897_v60, %v12891_v7  ;;  %v15071_v60 = vld [vmem:[#allocation30] sm:$0xff]  }
0x2073   :  { %v12900_v49 = vadd.f32 %v12898_v59, %v12892_v34  ;;  %v12907_v13 = vadd.f32 %v12905_v43, %v12899_v8  ;;  %v15072_v34 = vld [vmem:[#allocation30 + $0x8] sm:$0xff]  }
0x2075   :  { %v12908_v45 = vadd.f32 %v12906_v37, %v12900_v49  ;;  %v12915_v53 = vadd.f32 %v12913_v26, %v12907_v13 }
0x2077   :  { %v12916_v2 = vadd.f32 %v12914_v42, %v12908_v45  ;;  %v12923_v19 = vadd.f32 %v12921_v57, %v12915_v53  ;;  %v20342_v42 = vld [vmem:[#allocation31 + $0x8] sm:$0xff]   ;;  %v14116_v45 = vld [vmem:[#allocation33] ss:$0 sm:$0xff] }
0x2079   :  { %v12924_v38 = vadd.f32 %v12922_v16, %v12916_v2  ;;  %v12931_v46 = vadd.f32 %v12929_v36, %v12923_v19  ;;  %v20338_v16 = vld [vmem:[#allocation31] sm:$0xff]  }
0x207b   :  { %v12932_v14 = vadd.f32 %v12930_v10, %v12924_v38  ;;  %v12939_v20 = vadd.f32 %v12937_v52, %v12931_v46 }
0x207d   :  { %v12940_v4 = vadd.f32 %v12938_v50, %v12932_v14  ;;  %v12950_v24 = vadd.f32 %v12948_v33, %v12939_v20 }
0x207f   :  { %v12951_v56 = vadd.f32 %v12949_v40, %v12940_v4  ;;  %v12952_v55 = vmul.f32 %v12950_v24, %v12950_v24 }
0x2081   :  { %v12953_v11 = vmul.f32 %v12951_v56, %v12951_v56  ;;  %v12954_v63 = vmul.f32 %v12952_v55, %v12950_v24 }
0x2083   :  { %v12955_v25 = vmul.f32 %v12953_v11, %v12951_v56  ;;  %v12956_v23 = vmul.f32 0.044715, %v12954_v63 }
0x2085   :  { %v12957_v6 = vmul.f32 0.044715, %v12955_v25  ;;  %v12958_v39 = vadd.f32 %v12956_v23, %v12950_v24 }
0x2087   :  { %v12959_v47 = vadd.f32 %v12957_v6, %v12951_v56  ;;  %v12960_v51 = vmul.f32 0.7978846, %v12958_v39 }
0x2089   :  { %v12961_v31 = vmul.f32 0.7978846, %v12959_v47  ;;  %15149 = vtanh.f32 %v12960_v51 }
0x208b   :  { %15151 = vtanh.f32 %v12961_v31 }
0x2093   :  { %v15150_v3 = vpop.eup %15149 }
0x2094   :  { %v12964_v58 = vadd.f32 1.0, %v15150_v3 }
0x2095   :  { %v15152_v32 = vpop.eup %15151 }
0x2096   :  { %v12965_v35 = vadd.f32 1.0, %v15152_v32  ;;  %v12966_v9 = vmul.f32 0.5, %v12964_v58 }
0x2098   :  { %v12967_v5 = vmul.f32 0.5, %v12965_v35  ;;  %v12968_v28 = vmul.f32 %v12966_v9, %v12950_v24 }
0x209a   :  { %v12969_v29 = vmul.f32 %v12967_v5, %v12951_v56 }
0x209c   :  { %v12970_v21 = vpack.c.bf16 %v12969_v29, %v12968_v28 }
0x209e   :  { %14695 = vmatmul.mubr.msk.bf16.vlgmr.msra.gmra.mrb[108].mxu1 %vm11874_vm14, %v12970_v21 }
0x209f   :  { %14702 = vmatprep.mubr.msk.bf16.mxu1 %vm15726_vm0, %v20947_v18  ;;  %14699 = vmatpush3.bf16.msra.mxu1 %v15071_v60 }
0x20a0   :  { %14700 = vmatprep.subr.bf16.mxu1 %v20947_v18 }
0x20a3   :  { %14701 = vmatpush3.bf16.msra.mxu1 %v15072_v34 }
0x20a4   :  { %14706 = vmatprep.subr.bf16.mxu1 %v20947_v18 }
0x2171   :  { %v13031_v0 = vpop.f32.mrb[108].mxu1 }
0x2172   :  { %v13032_v17 = vadd.f32 %v14110_v1, %v13031_v0  ;;  %v14696_v27 = vpop.f32.mrb[109].mxu1 }
0x2173   :  { %v13034_v30 = vpop.f32.mrb[110].mxu1 }
0x2174   :  { %v14114_v41 = vmul.f32 -1.442695, %v13032_v17  ;;  %v13035_v62 = vadd.f32 %v14110_v1, %v13034_v30  ;;  %v14697_v22 = vpop.f32.mrb[111].mxu1 }
0x2176   :  { %15153 = vpow2.f32 %v14114_v41  ;;  %v14115_v7 = vmul.f32 -1.442695, %v13035_v62 }
0x2178   :  { %15155 = vpow2.f32 %v14115_v7 }
0x2180   :  { %v15154_v26 = vpop.eup %15153 }
0x2181   :  { %v13044_v37 = vadd.f32 1.0, %v15154_v26 }
0x2182   :  { %v15156_v44 = vpop.eup %15155 }
0x2183   :  { %15157 = vrcp.f32 %v13044_v37  ;;  %v13045_v59 = vadd.f32 1.0, %v15156_v44 }
0x2185   :  { %15159 = vrcp.f32 %v13045_v59 }
0x218d   :  { %v15158_v8 = vpop.eup %15157 }
0x218e   :  { %13052 = vrot.lane.b32.xlu0 %v15158_v8, %s15731_s19 }
0x218f   :  { %v15160_v43 = vpop.eup %15159 }
0x2190   :  { %13054 = vrot.lane.b32.xlu1 %v15160_v43, %s15731_s19 }
0x2200   :  { %v13053_v48 = vpop.permute.xlu0 %13052 }
0x2201   :  { %v13058_v13 = vmul.f32 %v13053_v48, %v13032_v17 }
0x2202   :  { %v13055_v49 = vpop.permute.xlu1 %13054 }
0x2203   :  { %v13059_v36 = vmul.f32 %v13055_v49, %v13035_v62 }
0x2205   :  { %v13060_v15 = vpack.c.bf16 %v13059_v36, %v13058_v13 }
0x2207   :  { %14703 = vmatmul.mubr.msk.bf16.vlgmr.msra.gmra.mrb[112].mxu1 %vm11874_vm14, %v13060_v15 }
0x2208   :  { %14707 = vmatpush3.bf16.msra.mxu1 %v20338_v16  ;;  %14710 = vmatprep.mubr.msk.bf16.mxu1 %vm15726_vm0, %v20947_v18 }
0x2209   :  { %14708 = vmatprep.subr.bf16.mxu1 %v20947_v18 }
0x220c   :  { %14709 = vmatpush3.bf16.msra.mxu1 %v20342_v42 }
0x220d   :  { %14714 = vmatprep.subr.bf16.mxu1 %v20947_v18 }
0x220f   :  { %14711 = vmatmul.mubr.bf16.vlgmr.msra.gmra.mrb[116].mxu1 %v15729_v12 }
0x2210   :  { %14715 = vmatpush3.bf16.msra.mxu1 %v20338_v16  ;;  %14718 = vmatprep.mubr.msk.bf16.mxu1 %vm15726_vm0, %v20947_v18 }
0x2211   :  { %14716 = vmatprep.subr.bf16.mxu1 %v20947_v18 }
0x2214   :  { %14717 = vmatpush3.bf16.msra.mxu1 %v20342_v42 }
0x2215   :  { %14722 = vmatprep.subr.bf16.mxu1 %v20947_v18 }
0x22da   :  { %v13121_v53 = vpop.f32.mrb[112].mxu1 }
0x22db   :  { %v13122_v57 = vadd.f32 %v14116_v45, %v13121_v53  ;;  %v14704_v2 = vpop.f32.mrb[113].mxu1 }
0x22dc   :  { %v13124_v19 = vpop.f32.mrb[114].mxu1 }
0x22dd   :  { %13128 = vst [vmem:[#allocation5] sm:$0xff] %v13122_v57  ;;  %v13125_v61 = vadd.f32 %v14116_v45, %v13124_v19  ;;  %v14705_v50 = vpop.f32.mrb[115].mxu1 }
0x22df   :  { %13129 = vst [vmem:[#allocation5 + $0x8] sm:$0xff] %v13125_v61 }
0x22e2   :  { %v13181_v12 = vpop.f32.mrb[116].mxu1 }
0x22e3   :  { %v14712_v10 = vpop.f32.mrb[117].mxu1 }
0x22e4   :  { %v13134_v38 = vld [vmem:[#allocation5] sm:$0x3]  ;;  %v13184_v46 = vpop.f32.mrb[118].mxu1  ;;  %v13218_v31 = vld [vmem:[#allocation5 + $0x2] sm:$0x3] }
0x22e5   :  { %v13187_v52 = vadd.f32 %v13181_v12, %v13134_v38  ;;  %v14713_v33 = vpop.f32.mrb[119].mxu1  ;;  %v13296_v37 = vld [vmem:[#allocation5 + $0x4] sm:$0x3]  ;;  %v13374_v46 = vld [vmem:[#allocation5 + $0x6] sm:$0x3] }
0x22e7   :  { %15161 = vtanh.f32 %v13187_v52  ;;  %v14122_v20 = vmul.f32 -1.442695, %v13187_v52 }
0x22e9   :  { %15163 = vpow2.f32 %v14122_v20 }
0x22f1   :  { %v15162_v14 = vpop.eup %15161 }
0x22f2   :  { %13197 = vrot.lane.b32.xlu1 %v15162_v14, %s15706_s30 }
0x22f3   :  { %v15164_v4 = vpop.eup %15163 }
0x22f4   :  { %v13191_v40 = vadd.f32 1.0, %v15164_v4 }
0x22f6   :  { %15165 = vrcp.f32 %v13191_v40 }
0x2300   :  { %v15166_v24 = vpop.eup %15165 }
0x2301   :  { %v13195_v11 = vmul.f32 0.0, %v15166_v24 }
0x2364   :  { %v13198_v56 = vpop.permute.xlu1 %13197 }
0x2365   :  { %v13200_v55 = vmul.f32 %v15166_v24, %v13198_v56 }
0x2367   :  { %13202 = vrot.lane.b32.xlu0 %v13200_v55, %s15730_s1 }
0x23d9   :  { %v13203_v63 = vpop.permute.xlu0 %13202 }
0x23da   :  { %v13205_v25 = vadd.f32 %v13203_v63, %v13195_v11 }
0x23dc   :  { %15167 = vtanh.f32 %v13205_v25 }
0x23e6   :  { %v15168_v23 = vpop.eup %15167 }
0x23e7   :  { %13208 = vrot.lane.b32.xlu1 %v15168_v23, %s15706_s30 }
0x2459   :  { %v13209_v6 = vpop.permute.xlu1 %13208 }
0x245a   :  { %v20359_v39 = vmul.f32 %v15166_v24, %v13209_v6 }
0x245c   :  { %v13219_v47 = vpack.c.bf16 %v20359_v39, %v20359_v39 }
0x245e   :  { %13221 = vrot.lane.b32.xlu0 %v13219_v47, %s15730_s1 }
0x24d0   :  { %v13222_v51 = vpop.permute.xlu0 %13221 }
0x24d1   :  { %14719 = vmatmul.mubr.msk.bf16.vlgmr.msra.gmra.mrb[120].mxu1 %vm11874_vm14, %v13222_v51 }
0x24d2   :  { %14723 = vmatpush3.bf16.msra.mxu1 %v20338_v16  ;;  %14726 = vmatprep.mubr.msk.bf16.mxu1 %vm15726_vm0, %v20947_v18 }
0x24d3   :  { %14724 = vmatprep.subr.bf16.mxu1 %v20947_v18 }
0x24d6   :  { %14725 = vmatpush3.bf16.msra.mxu1 %v20342_v42 }
0x24d7   :  { %14730 = vmatprep.subr.bf16.mxu1 %v20947_v18 }
0x25a4   :  { %v13260_v3 = vpop.f32.mrb[120].mxu1 }
0x25a5   :  { %v13266_v58 = vadd.f32 %v13260_v3, %v13218_v31  ;;  %v14720_v32 = vpop.f32.mrb[121].mxu1 }
0x25a6   :  { %v13263_v35 = vpop.f32.mrb[122].mxu1 }
0x25a7   :  { %15169 = vtanh.f32 %v13266_v58  ;;  %v14721_v9 = vpop.f32.mrb[123].mxu1  ;;  %v14124_v28 = vmul.f32 -1.442695, %v13266_v58  ;;  %v13452_v35 = vld [vmem:[#allocation5 + $0x8] sm:$0x3] }
0x25a9   :  { %15171 = vpow2.f32 %v14124_v28 }
0x25b1   :  { %v15170_v5 = vpop.eup %15169 }
0x25b2   :  { %13276 = vrot.lane.b32.xlu1 %v15170_v5, %s15706_s30 }
0x25b3   :  { %v15172_v29 = vpop.eup %15171 }
0x25b4   :  { %v13270_v21 = vadd.f32 1.0, %v15172_v29 }
0x25b6   :  { %15173 = vrcp.f32 %v13270_v21 }
0x25c0   :  { %v15174_v60 = vpop.eup %15173 }
0x25c1   :  { %v13274_v17 = vmul.f32 %v15174_v60, %v13205_v25 }
0x2624   :  { %v13277_v1 = vpop.permute.xlu1 %13276 }
0x2625   :  { %v13279_v0 = vmul.f32 %v15174_v60, %v13277_v1 }
0x2627   :  { %13281 = vrot.lane.b32.xlu0 %v13279_v0, %s15730_s1 }
0x2699   :  { %v13282_v27 = vpop.permute.xlu0 %13281 }
0x269a   :  { %v13284_v30 = vadd.f32 %v13282_v27, %v13274_v17 }
0x269c   :  { %15175 = vtanh.f32 %v13284_v30 }
0x26a6   :  { %v15176_v41 = vpop.eup %15175 }
0x26a7   :  { %13287 = vrot.lane.b32.xlu1 %v15176_v41, %s15706_s30 }
0x2719   :  { %v13288_v62 = vpop.permute.xlu1 %13287 }
0x271a   :  { %v20374_v22 = vmul.f32 %v15174_v60, %v13288_v62 }
0x271c   :  { %v13297_v7 = vpack.c.bf16 %v20374_v22, %v20374_v22 }
0x271e   :  { %13299 = vrot.lane.b32.xlu0 %v13297_v7, %s15730_s1 }
0x2790   :  { %v13300_v26 = vpop.permute.xlu0 %13299 }
0x2791   :  { %14727 = vmatmul.mubr.msk.bf16.vlgmr.msra.gmra.mrb[124].mxu1 %vm11874_vm14, %v13300_v26 }
0x2792   :  { %14731 = vmatpush3.bf16.msra.mxu1 %v20338_v16  ;;  %14734 = vmatprep.mubr.msk.bf16.mxu1 %vm15726_vm0, %v20947_v18 }
0x2793   :  { %14732 = vmatprep.subr.bf16.mxu1 %v20947_v18 }
0x2796   :  { %14733 = vmatpush3.bf16.msra.mxu1 %v20342_v42 }
0x2797   :  { %14738 = vmatprep.subr.bf16.mxu1 %v20947_v18 }
0x2864   :  { %v13338_v44 = vpop.f32.mrb[124].mxu1 }
0x2865   :  { %v13344_v59 = vadd.f32 %v13338_v44, %v13296_v37  ;;  %v14728_v34 = vpop.f32.mrb[125].mxu1 }
0x2866   :  { %v13341_v8 = vpop.f32.mrb[126].mxu1 }
0x2867   :  { %15177 = vtanh.f32 %v13344_v59  ;;  %v14729_v43 = vpop.f32.mrb[127].mxu1  ;;  %v14126_v49 = vmul.f32 -1.442695, %v13344_v59 }
0x2868   :  { %v13530_v43 = vld [vmem:[#allocation5 + $0xa] sm:$0x3] }
0x2869   :  { %15179 = vpow2.f32 %v14126_v49 }
0x2871   :  { %v15178_v48 = vpop.eup %15177 }
0x2872   :  { %13354 = vrot.lane.b32.xlu1 %v15178_v48, %s15706_s30 }
0x2873   :  { %v15180_v13 = vpop.eup %15179 }
0x2874   :  { %v13348_v36 = vadd.f32 1.0, %v15180_v13 }
0x2876   :  { %15181 = vrcp.f32 %v13348_v36 }
0x2880   :  { %v15182_v15 = vpop.eup %15181 }
0x2881   :  { %v13352_v57 = vmul.f32 %v15182_v15, %v13284_v30 }
0x28e4   :  { %v13355_v45 = vpop.permute.xlu1 %13354 }
0x28e5   :  { %v13357_v53 = vmul.f32 %v15182_v15, %v13355_v45 }
0x28e7   :  { %13359 = vrot.lane.b32.xlu0 %v13357_v53, %s15730_s1 }
0x2959   :  { %v13360_v2 = vpop.permute.xlu0 %13359 }
0x295a   :  { %v13362_v19 = vadd.f32 %v13360_v2, %v13352_v57 }
0x295c   :  { %15183 = vtanh.f32 %v13362_v19 }
0x2966   :  { %v15184_v61 = vpop.eup %15183 }
0x2967   :  { %13365 = vrot.lane.b32.xlu1 %v15184_v61, %s15706_s30 }
0x29d9   :  { %v13366_v50 = vpop.permute.xlu1 %13365 }
0x29da   :  { %v20389_v12 = vmul.f32 %v15182_v15, %v13366_v50 }
0x29dc   :  { %v13375_v10 = vpack.c.bf16 %v20389_v12, %v20389_v12 }
0x29de   :  { %13377 = vrot.lane.b32.xlu0 %v13375_v10, %s15730_s1 }
0x2a50   :  { %v13378_v38 = vpop.permute.xlu0 %13377 }
0x2a51   :  { %14735 = vmatmul.mubr.msk.bf16.vlgmr.msra.gmra.mrb[128].mxu1 %vm11874_vm14, %v13378_v38 }
0x2a52   :  { %14739 = vmatpush3.bf16.msra.mxu1 %v20338_v16  ;;  %14742 = vmatprep.mubr.msk.bf16.mxu1 %vm15726_vm0, %v20947_v18 }
0x2a53   :  { %14740 = vmatprep.subr.bf16.mxu1 %v20947_v18 }
0x2a56   :  { %14741 = vmatpush3.bf16.msra.mxu1 %v20342_v42 }
0x2a57   :  { %14746 = vmatprep.subr.bf16.mxu1 %v20947_v18 }
0x2b24   :  { %v13416_v52 = vpop.f32.mrb[128].mxu1 }
0x2b25   :  { %v13422_v33 = vadd.f32 %v13416_v52, %v13374_v46  ;;  %v14736_v14 = vpop.f32.mrb[129].mxu1 }
0x2b26   :  { %v13419_v20 = vpop.f32.mrb[130].mxu1 }
0x2b27   :  { %15185 = vtanh.f32 %v13422_v33  ;;  %v14737_v4 = vpop.f32.mrb[131].mxu1  ;;  %v14128_v24 = vmul.f32 -1.442695, %v13422_v33 }
0x2b29   :  { %15187 = vpow2.f32 %v14128_v24 }
0x2b31   :  { %v15186_v40 = vpop.eup %15185 }
0x2b32   :  { %13432 = vrot.lane.b32.xlu1 %v15186_v40, %s15706_s30  ;;  %v13608_v40 = vld [vmem:[#allocation5 + $0xc] sm:$0x3] }
0x2b33   :  { %v15188_v56 = vpop.eup %15187 }
0x2b34   :  { %v13426_v55 = vadd.f32 1.0, %v15188_v56 }
0x2b36   :  { %15189 = vrcp.f32 %v13426_v55 }
0x2b40   :  { %v15190_v11 = vpop.eup %15189 }
0x2b41   :  { %v13430_v23 = vmul.f32 %v15190_v11, %v13362_v19 }
0x2ba4   :  { %v13433_v63 = vpop.permute.xlu1 %13432 }
0x2ba5   :  { %v13435_v25 = vmul.f32 %v15190_v11, %v13433_v63 }
0x2ba7   :  { %13437 = vrot.lane.b32.xlu0 %v13435_v25, %s15730_s1 }
0x2c19   :  { %v13438_v6 = vpop.permute.xlu0 %13437 }
0x2c1a   :  { %v13440_v47 = vadd.f32 %v13438_v6, %v13430_v23 }
0x2c1c   :  { %15191 = vtanh.f32 %v13440_v47 }
0x2c26   :  { %v15192_v51 = vpop.eup %15191 }
0x2c27   :  { %13443 = vrot.lane.b32.xlu1 %v15192_v51, %s15706_s30 }
0x2c99   :  { %v13444_v31 = vpop.permute.xlu1 %13443 }
0x2c9a   :  { %v20404_v3 = vmul.f32 %v15190_v11, %v13444_v31 }
0x2c9c   :  { %v13453_v58 = vpack.c.bf16 %v20404_v3, %v20404_v3 }
0x2c9e   :  { %13455 = vrot.lane.b32.xlu0 %v13453_v58, %s15730_s1 }
0x2d10   :  { %v13456_v32 = vpop.permute.xlu0 %13455 }
0x2d11   :  { %14743 = vmatmul.mubr.msk.bf16.vlgmr.msra.gmra.mrb[132].mxu1 %vm11874_vm14, %v13456_v32 }
0x2d12   :  { %14747 = vmatpush3.bf16.msra.mxu1 %v20338_v16  ;;  %14750 = vmatprep.mubr.msk.bf16.mxu1 %vm15726_vm0, %v20947_v18 }
0x2d13   :  { %14748 = vmatprep.subr.bf16.mxu1 %v20947_v18 }
0x2d16   :  { %14749 = vmatpush3.bf16.msra.mxu1 %v20342_v42 }
0x2d17   :  { %14754 = vmatprep.subr.bf16.mxu1 %v20947_v18 }
0x2de4   :  { %v13494_v9 = vpop.f32.mrb[132].mxu1 }
0x2de5   :  { %v13500_v5 = vadd.f32 %v13494_v9, %v13452_v35  ;;  %v14744_v28 = vpop.f32.mrb[133].mxu1 }
0x2de6   :  { %v13497_v29 = vpop.f32.mrb[134].mxu1 }
0x2de7   :  { %15193 = vtanh.f32 %v13500_v5  ;;  %v14745_v21 = vpop.f32.mrb[135].mxu1  ;;  %v14130_v1 = vmul.f32 -1.442695, %v13500_v5 }
0x2de8   :  { %v13686_v21 = vld [vmem:[#allocation5 + $0xe] sm:$0x3] }
0x2de9   :  { %15195 = vpow2.f32 %v14130_v1 }
0x2df1   :  { %v15194_v60 = vpop.eup %15193 }
0x2df2   :  { %13510 = vrot.lane.b32.xlu1 %v15194_v60, %s15706_s30 }
0x2df3   :  { %v15196_v0 = vpop.eup %15195 }
0x2df4   :  { %v13504_v17 = vadd.f32 1.0, %v15196_v0 }
0x2df6   :  { %15197 = vrcp.f32 %v13504_v17 }
0x2e00   :  { %v15198_v27 = vpop.eup %15197 }
0x2e01   :  { %v13508_v62 = vmul.f32 %v15198_v27, %v13440_v47 }
0x2e64   :  { %v13511_v30 = vpop.permute.xlu1 %13510 }
0x2e65   :  { %v13513_v41 = vmul.f32 %v15198_v27, %v13511_v30 }
0x2e67   :  { %13515 = vrot.lane.b32.xlu0 %v13513_v41, %s15730_s1 }
0x2ed9   :  { %v13516_v7 = vpop.permute.xlu0 %13515 }
0x2eda   :  { %v13518_v26 = vadd.f32 %v13516_v7, %v13508_v62 }
0x2edc   :  { %15199 = vtanh.f32 %v13518_v26 }
0x2ee6   :  { %v15200_v37 = vpop.eup %15199 }
0x2ee7   :  { %13521 = vrot.lane.b32.xlu1 %v15200_v37, %s15706_s30 }
0x2f59   :  { %v13522_v44 = vpop.permute.xlu1 %13521 }
0x2f5a   :  { %v20419_v59 = vmul.f32 %v15198_v27, %v13522_v44 }
0x2f5c   :  { %v13531_v34 = vpack.c.bf16 %v20419_v59, %v20419_v59 }
0x2f5e   :  { %13533 = vrot.lane.b32.xlu0 %v13531_v34, %s15730_s1 }
0x2fd0   :  { %v13534_v8 = vpop.permute.xlu0 %13533 }
0x2fd1   :  { %14751 = vmatmul.mubr.msk.bf16.vlgmr.msra.gmra.mrb[136].mxu1 %vm11874_vm14, %v13534_v8 }
0x2fd2   :  { %14755 = vmatpush3.bf16.msra.mxu1 %v20338_v16  ;;  %14758 = vmatprep.mubr.msk.bf16.mxu1 %vm15726_vm0, %v20947_v18 }
0x2fd3   :  { %14756 = vmatprep.subr.bf16.mxu1 %v20947_v18 }
0x2fd6   :  { %14757 = vmatpush3.bf16.msra.mxu1 %v20342_v42 }
0x2fd7   :  { %14762 = vmatprep.subr.bf16.mxu1 %v20947_v18 }
0x30a4   :  { %v13572_v48 = vpop.f32.mrb[136].mxu1 }
0x30a5   :  { %v13578_v49 = vadd.f32 %v13572_v48, %v13530_v43  ;;  %v14752_v13 = vpop.f32.mrb[137].mxu1 }
0x30a6   :  { %v13575_v36 = vpop.f32.mrb[138].mxu1 }
0x30a7   :  { %15201 = vtanh.f32 %v13578_v49  ;;  %v14753_v15 = vpop.f32.mrb[139].mxu1  ;;  %v14132_v53 = vmul.f32 -1.442695, %v13578_v49  ;;  %v15076_v36 = vld [vmem:[#allocation34 + $0x8] sm:$0xff]  }
0x30a9   :  { %15203 = vpow2.f32 %v14132_v53 }
0x30b1   :  { %v15202_v45 = vpop.eup %15201 }
0x30b2   :  { %13588 = vrot.lane.b32.xlu1 %v15202_v45, %s15706_s30 }
0x30b3   :  { %v15204_v57 = vpop.eup %15203 }
0x30b4   :  { %v13582_v2 = vadd.f32 1.0, %v15204_v57 }
0x30b6   :  { %15205 = vrcp.f32 %v13582_v2 }
0x30c0   :  { %v15206_v19 = vpop.eup %15205 }
0x30c1   :  { %v13586_v10 = vmul.f32 %v15206_v19, %v13518_v26 }
0x3124   :  { %v13589_v61 = vpop.permute.xlu1 %13588 }
0x3125   :  { %v13591_v50 = vmul.f32 %v15206_v19, %v13589_v61  ;;  %v14137_v61 = vld [vmem:[#allocation36] ss:$0 sm:$0xff] }
0x3127   :  { %13593 = vrot.lane.b32.xlu0 %v13591_v50, %s15730_s1 }
0x3199   :  { %v13594_v38 = vpop.permute.xlu0 %13593 }
0x319a   :  { %v13596_v46 = vadd.f32 %v13594_v38, %v13586_v10 }
0x319c   :  { %15207 = vtanh.f32 %v13596_v46 }
0x31a6   :  { %v15208_v52 = vpop.eup %15207 }
0x31a7   :  { %13599 = vrot.lane.b32.xlu1 %v15208_v52, %s15706_s30 }
0x3219   :  { %v13600_v33 = vpop.permute.xlu1 %13599 }
0x321a   :  { %v20434_v14 = vmul.f32 %v15206_v19, %v13600_v33 }
0x321c   :  { %v13609_v20 = vpack.c.bf16 %v20434_v14, %v20434_v14 }
0x321e   :  { %13611 = vrot.lane.b32.xlu0 %v13609_v20, %s15730_s1 }
0x3290   :  { %v13612_v4 = vpop.permute.xlu0 %13611 }
0x3291   :  { %14759 = vmatmul.mubr.msk.bf16.vlgmr.msra.gmra.mrb[140].mxu1 %vm11874_vm14, %v13612_v4 }
0x3292   :  { %14763 = vmatpush3.bf16.msra.mxu1 %v20338_v16  ;;  %14766 = vmatprep.mubr.msk.bf16.mxu1 %vm15726_vm0, %v20947_v18 }
0x3293   :  { %14764 = vmatprep.subr.bf16.mxu1 %v20947_v18 }
0x3296   :  { %14765 = vmatpush3.bf16.msra.mxu1 %v20342_v42 }
0x3297   :  { %14770 = vmatprep.subr.bf16.mxu1 %v20947_v18 }
0x3364   :  { %v13650_v24 = vpop.f32.mrb[140].mxu1 }
0x3365   :  { %v13656_v56 = vadd.f32 %v13650_v24, %v13608_v40  ;;  %v14760_v55 = vpop.f32.mrb[141].mxu1 }
0x3366   :  { %v13653_v11 = vpop.f32.mrb[142].mxu1 }
0x3367   :  { %15209 = vtanh.f32 %v13656_v56  ;;  %v14761_v63 = vpop.f32.mrb[143].mxu1  ;;  %v14134_v16 = vmul.f32 -1.442695, %v13656_v56 }
0x3369   :  { %15211 = vpow2.f32 %v14134_v16 }
0x3371   :  { %v15210_v25 = vpop.eup %15209 }
0x3372   :  { %13666 = vrot.lane.b32.xlu1 %v15210_v25, %s15706_s30 }
0x3373   :  { %v15212_v23 = vpop.eup %15211 }
0x3374   :  { %v13660_v6 = vadd.f32 1.0, %v15212_v23 }
0x3376   :  { %15213 = vrcp.f32 %v13660_v6 }
0x3380   :  { %v15214_v47 = vpop.eup %15213 }
0x3381   :  { %v13664_v31 = vmul.f32 %v15214_v47, %v13596_v46 }
0x33e4   :  { %v13667_v51 = vpop.permute.xlu1 %13666 }
0x33e5   :  { %v13669_v42 = vmul.f32 %v15214_v47, %v13667_v51 }
0x33e7   :  { %13671 = vrot.lane.b32.xlu0 %v13669_v42, %s15730_s1 }
0x3459   :  { %v13672_v58 = vpop.permute.xlu0 %13671 }
0x345a   :  { %v13674_v32 = vadd.f32 %v13672_v58, %v13664_v31 }
0x345c   :  { %15215 = vtanh.f32 %v13674_v32 }
0x3466   :  { %v15216_v35 = vpop.eup %15215 }
0x3467   :  { %13677 = vrot.lane.b32.xlu1 %v15216_v35, %s15706_s30 }
0x34d9   :  { %v13678_v9 = vpop.permute.xlu1 %13677 }
0x34da   :  { %v13680_v5 = vmul.f32 %v15214_v47, %v13678_v9 }
0x34dc   :  { %v13687_v28 = vpack.c.bf16 %v13680_v5, %v13680_v5 }
0x34de   :  { %13689 = vrot.lane.b32.xlu0 %v13687_v28, %s15730_s1 }
0x3550   :  { %v13690_v29 = vpop.permute.xlu0 %13689 }
0x3551   :  { %14767 = vmatmul.mubr.msk.bf16.vlgmr.msra.gmra.mrb[144].mxu1 %vm11874_vm14, %v13690_v29 }
0x3552   :  { %14774 = vmatprep.mubr.msk.bf16.mxu1 %vm15726_vm0, %v20947_v18  ;;  %vm13216_vm0 = vcmask 254976  }
0x3624   :  { %v13728_v60 = vpop.f32.mrb[144].mxu1 }
0x3625   :  { %v13734_v1 = vadd.f32 %v13728_v60, %v13686_v21  ;;  %v14768_v0 = vpop.f32.mrb[145].mxu1 }
0x3626   :  { %v13731_v17 = vpop.f32.mrb[146].mxu1 }
0x3627   :  { %15217 = vtanh.f32 %v13734_v1  ;;  %v14769_v27 = vpop.f32.mrb[147].mxu1  ;;  %v14136_v41 = vmul.f32 -1.442695, %v13734_v1 }
0x3629   :  { %15219 = vpow2.f32 %v14136_v41 }
0x3631   :  { %v15218_v30 = vpop.eup %15217 }
0x3632   :  { %13744 = vrot.lane.b32.xlu1 %v15218_v30, %s15706_s30 }
0x3633   :  { %v15220_v62 = vpop.eup %15219 }
0x3634   :  { %v13738_v7 = vadd.f32 1.0, %v15220_v62 }
0x3636   :  { %15221 = vrcp.f32 %v13738_v7 }
0x3640   :  { %v15222_v26 = vpop.eup %15221 }
0x3641   :  { %v13742_v34 = vmul.f32 %v15222_v26, %v13674_v32 }
0x36a4   :  { %v13745_v37 = vpop.permute.xlu1 %13744 }
0x36a5   :  { %v13747_v44 = vmul.f32 %v15222_v26, %v13745_v37 }
0x36a7   :  { %13749 = vrot.lane.b32.xlu0 %v13747_v44, %s15730_s1 }
0x36ab   :  { %13213 = vrot.lane.b32.xlu0 %v20359_v39, %s15730_s1 }
0x36af   :  { %13370 = vrot.lane.b32.xlu0 %v20389_v12, %s15730_s1 }
0x36b3   :  { %13526 = vrot.lane.b32.xlu0 %v20419_v59, %s15730_s1  ;;  %v15075_v59 = vld [vmem:[#allocation34] sm:$0xff]  }
0x36b4   :  { %14771 = vmatpush3.bf16.msra.mxu1 %v15075_v59 }
0x36b5   :  { %14772 = vmatprep.subr.bf16.mxu1 %v20947_v18 }
0x36b7   :  { %13682 = vrot.lane.b32.xlu0 %v13680_v5, %s15730_s1 }
0x36b8   :  { %14773 = vmatpush3.bf16.msra.mxu1 %v15076_v36 }
0x3719   :  { %v13750_v8 = vpop.permute.xlu0 %13749 }
0x371a   :  { %v13752_v43 = vadd.f32 %v13750_v8, %v13742_v34 }
0x371c   :  { %15223 = vtanh.f32 %v13752_v43 }
0x371d   :  { %v13214_v48 = vpop.permute.xlu0 %13213 }
0x371e   :  { %13217 = vst.msk [vmem:[#allocation6] sm:$0x3] %vm13216_vm0, %v13214_v48 }
0x3721   :  { %v13371_v49 = vpop.permute.xlu0 %13370 }
0x3722   :  { %13373 = vst.msk [vmem:[#allocation6 + $0x4] sm:$0x3] %vm13216_vm0, %v13371_v49 }
0x3725   :  { %v13527_v39 = vpop.permute.xlu0 %13526 }
0x3726   :  { %v15224_v13 = vpop.eup %15223  ;;  %13529 = vst.msk [vmem:[#allocation6 + $0x8] sm:$0x3] %vm13216_vm0, %v13527_v39 }
0x3727   :  { %13755 = vrot.lane.b32.xlu1 %v15224_v13, %s15706_s30  ;;  %s15732_s30 = smov [#allocation37]  }
0x3728   :  { %s13878_s28 = sshll.u32 %s15732_s30, 4  ;;  %s13879_s28 = int_to_ptr.vmem [resolvable:$true] %s13878_s28 }
0x3729   :  { %v13683_v12 = vpop.permute.xlu0 %13682  ;;  %s15658_s18 = scalar_lea.vmem %s13879_s28, 256  ;;  %p15663_p13 = scmp.lt.s32.totalorder %s13879_s28, %s13879_s28 }
0x372a   :  { %13685 = vst.msk [vmem:[#allocation6 + $0xc] sm:$0x3] %vm13216_vm0, %v13683_v12  ;;  %p15659_p12 = scmp.ne.s32.totalorder %s13879_s28, %s15658_s18  ;;  %p15664_p0 = scmp.lt.s32.totalorder %s15658_s18, %s15658_s18 }
0x372b   :  { %13292 = vrot.lane.b32.xlu1 %v20374_v22, %s15730_s1 }
0x372c   :  { %p15665_p1 = por %p15664_p0, %p15663_p13 }
0x372e   :  { %p15666_p2 = pnand %p15665_p1, %p15659_p12 }
0x372f   :  { %13448 = vrot.lane.b32.xlu1 %v20404_v3, %s15730_s1 }
0x3733   :  { %13604 = vrot.lane.b32.xlu1 %v20434_v14, %s15730_s1 }
0x3799   :  { %v13756_v15 = vpop.permute.xlu1 %13755 }
0x379a   :  { %v13758_v45 = vmul.f32 %v15222_v26, %v13756_v15 }
0x379c   :  { %13760 = vrot.lane.b32.xlu1 %v13758_v45, %s15730_s1 }
0x379d   :  { %v13293_v53 = vpop.permute.xlu1 %13292 }
0x379e   :  { %13295 = vst.msk [vmem:[#allocation6 + $0x2] sm:$0x3] %vm13216_vm0, %v13293_v53 }
0x37a1   :  { %v13449_v22 = vpop.permute.xlu1 %13448 }
0x37a2   :  { %13451 = vst.msk [vmem:[#allocation6 + $0x6] sm:$0x3] %vm13216_vm0, %v13449_v22 }
0x37a5   :  { %v13605_v3 = vpop.permute.xlu1 %13604 }
0x37a6   :  { %13607 = vst.msk [vmem:[#allocation6 + $0xa] sm:$0x3] %vm13216_vm0, %v13605_v3 }
0x37a9   :  { %v13764_v2 = vld [vmem:[#allocation6] sm:$0xff] }
0x380e   :  { %v13761_v57 = vpop.permute.xlu1 %13760 }
0x380f   :  { %13763 = vst.msk [vmem:[#allocation6 + $0xe] sm:$0x3] %vm13216_vm0, %v13761_v57 }
0x3816   :  { %v13765_v19 = vld [vmem:[#allocation6 + $0x8] sm:$0xff] }
0x3817   :  { %v13766_v18 = vpack.c.bf16 %v13765_v19, %v13764_v2 }
0x3819   :  { %14775 = vmatmul.mubr.msk.bf16.vlgmr.msra.gmra.mrb[148].mxu1 %vm11874_vm14, %v13766_v18 }
0x38ec   :  { %v13827_v50 = vpop.f32.mrb[148].mxu1 }
0x38ed   :  { %v13828_v10 = vadd.f32 %v14137_v61, %v13827_v50  ;;  %v14776_v38 = vpop.f32.mrb[149].mxu1 }
0x38ee   :  { %v13830_v46 = vpop.f32.mrb[150].mxu1 }
0x38ef   :  { %v13831_v52 = vadd.f32 %v14137_v61, %v13830_v46  ;;  %13834 = vmax.xlane.f32.xlu0 %v13828_v10  ;;  %v14777_v33 = vpop.f32.mrb[151].mxu1 }
0x38f1   :  { %13836 = vmax.xlane.f32.xlu1 %v13831_v52 }
0x397c   :  { %v13835_v14 = vpop.xlane.xlu0 %13834 }
0x397d   :  { %vm13838_vm1 = vcmp.eq.f32.partialorder %v13828_v10, %v13835_v14 }
0x397e   :  { %v13840_v20 = vsel %vm13838_vm1, %v20070_v54, 128  ;;  %v13837_v4 = vpop.xlane.xlu1 %13836 }
0x397f   :  { %v13843_v40 = vshra.s32 %v13840_v20, 16  ;;  %vm13839_vm10 = vcmp.eq.f32.partialorder %v13831_v52, %v13837_v4  ;;  %v13842_v63 = vand.u32 65535, %v13840_v20 }
0x3980   :  { %v13841_v24 = vsel %vm13839_vm10, %v20070_v54, 128 }
0x3981   :  { %v13845_v56 = vcvt.s32.f32 %v13843_v40  ;;  %v13857_v55 = vshra.s32 %v13841_v24, 16  ;;  %v13844_v25 = vcvt.s32.f32 %v13842_v63  ;;  %v13856_v16 = vand.u32 65535, %v13841_v24 }
0x3983   :  { %13846 = vmin.xlane.f32.xlu0 %v13845_v56  ;;  %v13859_v11 = vcvt.s32.f32 %v13857_v55  ;;  %v13858_v47 = vcvt.s32.f32 %v13856_v16 }
0x3987   :  { %13860 = vmin.xlane.f32.xlu0 %v13859_v11 }
0x3a10   :  { %v13847_v23 = vpop.xlane.xlu0 %13846 }
0x3a11   :  { %vm13848_vm11 = vcmp.eq.f32.partialorder %v13845_v56, %v13847_v23  ;;  %v13853_v31 = vcvt.f32.s32 %v13847_v23 }
0x3a12   :  { %v13849_v6 = vsel %vm13848_vm11, %v13844_v25, inf }
0x3a13   :  { %13850 = vmin.xlane.f32.xlu1 %v13849_v6  ;;  %v13854_v54 = vshll.u32 %v13853_v31, 16 }
0x3a14   :  { %v13861_v51 = vpop.xlane.xlu0 %13860 }
0x3a15   :  { %vm13862_vm12 = vcmp.eq.f32.partialorder %v13859_v11, %v13861_v51  ;;  %v13867_v32 = vcvt.f32.s32 %v13861_v51 }
0x3a16   :  { %v13863_v42 = vsel %vm13862_vm12, %v13858_v47, inf }
0x3a17   :  { %13864 = vmin.xlane.f32.xlu0 %v13863_v42  ;;  %v13868_v28 = vshll.u32 %v13867_v32, 16 }
0x3aa0   :  { %v13851_v58 = vpop.xlane.xlu1 %13850 }
0x3aa1   :  { %v13852_v35 = vcvt.f32.s32 %v13851_v58 }
0x3aa3   :  { %v13855_v9 = vadd.s32 %v13854_v54, %v13852_v35 }
0x3aa4   :  { %v13865_v5 = vpop.xlane.xlu0 %13864 }
0x3aa5   :  { %v13866_v29 = vcvt.f32.s32 %v13865_v5  ;;  %13871 = vst.msk [vmem:[#allocation37] sm:$0xff] %vm13870_vm13, %v13855_v9 }
0x3aa7   :  { %v13869_v21 = vadd.s32 %v13868_v28, %v13866_v29 }
0x3aa9   :  { %13872 = vst.msk [vmem:[#allocation37 + $0x8] sm:$0xff] %vm13870_vm13, %v13869_v21 }
0x3aaa   :  { %15669 = shalt.err (!%p15666_p2)
}
0x3aab   :  { %s21505_s0 = sld [smem:[#allocation266_spill]] }
0x3ab1   :  { %s15670_s7 = scalar_lea.hbm %s21505_s0, 256 }
0x3ab2   :  { %p15671_p3 = scmp.ne.s32.totalorder %s21505_s0, %s15670_s7  ;;  %p15674_p4 = scmp.lt.u32.totalorder %s15670_s7, %s21505_s0 }
0x3ab4   :  { %p15676_p5 = pnand %p15674_p4, %p15671_p3 }
0x3ab6   :  { %15679 = shalt.err (!%p15676_p5)
}
0x3ab7   :  { %13884 = dma.vmem_to_hbm [thread:$0]  %s13879_s28, 256, %s21505_s0, [#allocation9], %s20917_s5, %s20917_s5, %s20916_s17  }
0x3ab8   :  { %15700 = dma.done.wait [#allocation9], 256  }
0x3ab9   :  { %15701 = vsyncadd [#allocation9], 4294967040 }
0x3aba   :  { %13888 = vsyncpa [#allocation8], 1 }
0x3abb   :  { %13889 = vsyncpa [#allocation11], 1 }
0x3abc   :  { %13890 = vsyncpa [#allocation14], 1 }
0x3abd   :  { %13891 = vsyncpa [#allocation17], 1 }
0x3abe   :  { %13892 = vsyncpa [#allocation20], 1 }
0x3abf   :  { %13893 = vsyncpa [#allocation23], 1 }
0x3ac0   :  { %13894 = vsyncpa [#allocation26], 1 }
0x3ac1   :  { %13895 = vsyncpa [#allocation29], 1 }
0x3ac2   :  { %13896 = vsyncpa [#allocation32], 1 }
0x3ac3   :  { %13897 = vsyncpa [#allocation35], 1 }
0x3ac4   :  { %13898 = vsyncpa [#allocation9], 1 }

</bundles_post_ra>
